<compile_context>
chip_gen: v5e
topology: v5e:2x2
jax: 0.10.0
libtpu: 0.0.40
codegen_flags: <defaults>
</compile_context>

<pallas_src>
import jax
import jax.numpy as jnp
from jax import lax
from jax.experimental import pallas as pl
from jax.experimental.pallas import tpu as pltpu

_SQRT1_2 = 0.7071067811865476


def _gelu(t):
    # exact (erf-based) GELU, matching torch.nn.functional.gelu's default
    return 0.5 * t * (1.0 + lax.erf(t * _SQRT1_2))


def _cdiv(a, b):
    return (a + b - 1) // b


def _round_up(a, b):
    return _cdiv(a, b) * b


def hyperffn_kernel(p_ref, x_ref, w1_ref, b1_ref, w2_ref, b2_ref, pb_ref, o_ref):
    w1 = w1_ref[...]                       # (dim_p, hid_p)  bf16 (wrapper-cast)
    w2 = w2_ref[...]                       # (hid_p, dim_p)  bf16
    b1 = b1_ref[...].astype(jnp.float32)   # (1, hid_p)
    b2 = b2_ref[...].astype(jnp.float32)   # (1, dim_p)
    pb = pb_ref[...].astype(jnp.float32)   # (8, dim_p) per-feature gate biases

    def ffn(t):
        # t: (tm, dim_p) f32 -> (tm, dim_p) f32; bf16 MXU inputs, f32 accumulation
        h = _gelu(jnp.dot(t.astype(w1.dtype), w1,
                          preferred_element_type=jnp.float32) + b1)
        return jnp.dot(h.astype(w2.dtype), w2,
                       preferred_element_type=jnp.float32) + b2

    def aff(t, k):
        # scalar gate read straight from SMEM + per-feature bias row from VMEM
        return t * p_ref[k] + pb[k:k + 1, :]

    x = ffn(x_ref[...].astype(jnp.float32))
    y = _gelu(aff(x, 0))
    z = _gelu(aff(x, 1))
    y = ffn(y)                              # separate calls: no concat/slice copies
    z = ffn(z)
    u = _gelu(aff(y, 2) + aff(z, 3))
    v = _gelu(aff(y, 4) + aff(z, 5))
    u = ffn(u)
    v = ffn(v)
    w = _gelu(aff(u, 6) + aff(v, 7))
    o_ref[...] = ffn(w).astype(o_ref.dtype)


def _tpu_defaults():
    """Returns (feature_align, vmem_limit_bytes, default_tm) per TPU generation."""
    kind = ""
    try:
        kind = jax.devices()[0].device_kind.lower()
    except Exception:
        pass
    if ("v5e" in kind) or ("v5 lite" in kind) or ("v5litepod" in kind):
        # 4x128x128 MXU, 128 MiB VMEM, single vst slot -> smaller row tile
        return 128, 96 * 1024 * 1024, 128
    if "v6" in kind:
        # 2x256x256 MXU, 128 MiB VMEM -> bigger row tile, 256-aligned features
        return 256, 96 * 1024 * 1024, 512
    # v7x (64 MiB physical VMEM) or unknown: conservative VMEM budget
    return 256, 48 * 1024 * 1024, 256


def hyperffn(x2d, w1, b1, w2, b2, params, pbias, *, tm=None, feature_align=None,
             vmem_limit_bytes=None, compute_dtype=jnp.bfloat16):
    """x2d: (M, dim); w1: (dim, hidden); b1: (hidden,); w2: (hidden, dim);
    b2: (dim,); params: (8,) scalar gates; pbias: (8, dim) gate biases."""
    M, dim = x2d.shape
    hidden = w1.shape[1]
    f32 = jnp.float32

    d_align, d_vmem, d_tm = _tpu_defaults()
    feature_align = d_align if feature_align is None else feature_align
    vmem_limit_bytes = d_vmem if vmem_limit_bytes is None else vmem_limit_bytes
    tm = d_tm if tm is None else tm

    # MXU/lane-align the feature dims (exact: zeros stay zeros, see header).
    dim_p = _round_up(dim, feature_align)
    hid_p = _round_up(hidden, feature_align)

    # Row tiling: pick the tile COUNT first (>=2 when M>8 so v7x's two
    # TensorCores both get work), then size the tile -> padding waste <= 7 rows.
    n_tiles = max(_cdiv(M, tm), 2 if M > 8 else 1)
    tm_eff = _round_up(_cdiv(M, n_tiles), 8)
    m_p = _round_up(M, tm_eff)
    grid = (m_p // tm_eff,)

    x_p = jnp.pad(x2d, ((0, m_p - M), (0, dim_p - dim)))
    w1_p = jnp.pad(w1, ((0, dim_p - dim), (0, hid_p - hidden))).astype(compute_dtype)
    w2_p = jnp.pad(w2, ((0, hid_p - hidden), (0, dim_p - dim))).astype(compute_dtype)
    b1_p = jnp.pad(b1.reshape(1, hidden), ((0, 0), (0, hid_p - hidden))).astype(f32)
    b2_p = jnp.pad(b2.reshape(1, dim), ((0, 0), (0, dim_p - dim))).astype(f32)
    pb_p = jnp.pad(pbias, ((0, 0), (0, dim_p - dim))).astype(f32)
    p_p = params.astype(f32)

    # Advisory cost hint: 6 shared-FFN applications = 12 matmuls, 11 GELUs.
    flops = 6 * 4 * m_p * dim_p * hid_p
    transcendentals = m_p * (6 * hid_p + 5 * dim_p)
    weight_bytes = (2 * dim_p * hid_p) * jnp.dtype(compute_dtype).itemsize \
        + (hid_p + dim_p + 8 * dim_p) * 4
    bytes_accessed = 2 * m_p * dim_p * jnp.dtype(x2d.dtype).itemsize + weight_bytes
    cost = pl.CostEstimate(flops=int(flops), transcendentals=int(transcendentals),
                           bytes_accessed=int(bytes_accessed))

    def _call(single_buffer_weights):
        # Weight blocks have a constant index_map -> no need to double-buffer them.
        wkw = {"pipeline_mode": pl.Buffered(1)} if single_buffer_weights else {}
        in_specs = [
            pl.BlockSpec((tm_eff, dim_p), lambda i, p: (i, 0)),          # x tile
            pl.BlockSpec((dim_p, hid_p), lambda i, p: (0, 0), **wkw),    # W1 (bf16)
            pl.BlockSpec((1, hid_p), lambda i, p: (0, 0), **wkw),        # b1
            pl.BlockSpec((hid_p, dim_p), lambda i, p: (0, 0), **wkw),    # W2 (bf16)
            pl.BlockSpec((1, dim_p), lambda i, p: (0, 0), **wkw),        # b2
            pl.BlockSpec((8, dim_p), lambda i, p: (0, 0), **wkw),        # gate biases
        ]
        return pl.pallas_call(
            hyperffn_kernel,
            out_shape=jax.ShapeDtypeStruct((m_p, dim_p), x2d.dtype),
            grid_spec=pltpu.PrefetchScalarGridSpec(
                num_scalar_prefetch=1,                 # 8 scalar gates -> SMEM
                grid=grid,
                in_specs=in_specs,
                out_specs=pl.BlockSpec((tm_eff, dim_p), lambda i, p: (i, 0)),
            ),
            compiler_params=pltpu.CompilerParams(
                dimension_semantics=("parallel",),
                vmem_limit_bytes=vmem_limit_bytes,
            ),
            cost_estimate=cost,
        )(p_p, x_p, w1_p, b1_p, w2_p, b2_p, pb_p)

    try:
        out_p = _call(True)
    except Exception:
        # Fallback if this JAX build rejects single-buffered pipeline_mode.
        out_p = _call(False)
    return out_p[:M, :dim]


def ref_forward(x2d, w1, b1, w2, b2, params, pbias):
    """Pure-JAX f32 reference of the same forward (exact-erf GELU)."""
    def ffn(t):
        return _gelu(t @ w1 + b1) @ w2 + b2

    def aff(t, k):
        return t * params[k] + pbias[k]

    x = ffn(x2d)
    y = _gelu(aff(x, 0))
    z = _gelu(aff(x, 1))
    y, z = ffn(y), ffn(z)
    u = _gelu(aff(y, 2) + aff(z, 3))
    v = _gelu(aff(y, 4) + aff(z, 5))
    u, v = ffn(u), ffn(v)
    w = _gelu(aff(u, 6) + aff(v, 7))
    return ffn(w)


if __name__ == "__main__":
    dim, hidden_dim = 16, 32
    batch, seq = 2, 8

    key = jax.random.PRNGKey(0)
    kx, kp, kpb, kw1, kw2 = jax.random.split(key, 5)

    # input: (batch, seq, dim)
    x = jax.random.normal(kx, (batch, seq, dim), dtype=jnp.float32)

    # module parameters: 8 scalar gates ~ N(0,1); the module inits its 8 dim-sized
    # biases to zero, but small random values exercise that path too.
    params = jax.random.normal(kp, (8,), dtype=jnp.float32)
    pbias = 0.1 * jax.random.normal(kpb, (8, dim), dtype=jnp.float32)

    # shared FFN weights (deterministic synthetic init)
    w1 = 0.1 * jax.random.normal(kw1, (dim, hidden_dim), dtype=jnp.float32)
    b1 = jnp.zeros((hidden_dim,), dtype=jnp.float32)
    w2 = 0.1 * jax.random.normal(kw2, (hidden_dim, dim), dtype=jnp.float32)
    b2 = jnp.zeros((dim,), dtype=jnp.float32)

    x2d = x.reshape(batch * seq, dim)
    out2d = hyperffn(x2d, w1, b1, w2, b2, params, pbias)
    out = out2d.reshape(batch, seq, dim)
    jax.block_until_ready(out)

    ref = ref_forward(x2d, w1, b1, w2, b2, params, pbias).reshape(batch, seq, dim)
    # tolerance loosened vs an all-f32 path because the MXU inputs are bf16
    # (f32 accumulation); cascading 6 FFN stages stays well under 1e-2 here.
    # Re-validate (or set compute_dtype=jnp.float32) at production dim/hidden.
    assert jnp.allclose(out, ref, atol=2e-2, rtol=2e-2), "mismatch vs JAX reference"

    print("KERNEL_OK")
</pallas_src>

<mosaic_0001>
module attributes {stable_mosaic.version = 11 : i64} {
  func.func @hyperffn_kernel(%arg0: i32, %arg1: memref<8xf32, #tpu.memory_space<smem>>, %arg2: memref<8x256xf32, #tpu.memory_space<vmem>>, %arg3: memref<256x256xbf16, #tpu.memory_space<vmem>>, %arg4: memref<1x256xf32, #tpu.memory_space<vmem>>, %arg5: memref<256x256xbf16, #tpu.memory_space<vmem>>, %arg6: memref<1x256xf32, #tpu.memory_space<vmem>>, %arg7: memref<8x256xf32, #tpu.memory_space<vmem>>, %arg8: memref<8x256xf32, #tpu.memory_space<vmem>>) attributes {dimension_semantics = [#tpu.dimension_semantics<parallel>], iteration_bounds = array<i64: 2>, scalar_prefetch = 1 : i64, scratch_operands = 0 : i64, tpu.core_type = #tpu.core_type<tc>, window_params = [{transform_indices = @transform_0, window_bounds = array<i64: 8, 256>}, {pipeline_mode = #tpu.pipeline_mode<synchronous>, transform_indices = @transform_1, window_bounds = array<i64: 256, 256>}, {pipeline_mode = #tpu.pipeline_mode<synchronous>, transform_indices = @transform_2, window_bounds = array<i64: 1, 256>}, {pipeline_mode = #tpu.pipeline_mode<synchronous>, transform_indices = @transform_3, window_bounds = array<i64: 256, 256>}, {pipeline_mode = #tpu.pipeline_mode<synchronous>, transform_indices = @transform_4, window_bounds = array<i64: 1, 256>}, {pipeline_mode = #tpu.pipeline_mode<synchronous>, transform_indices = @transform_5, window_bounds = array<i64: 8, 256>}, {transform_indices = @transform_6, window_bounds = array<i64: 8, 256>}]} {
    %c0 = arith.constant 0 : index
    %c0_0 = arith.constant 0 : index
    %0 = vector.load %arg3[%c0, %c0_0] : memref<256x256xbf16, #tpu.memory_space<vmem>>, vector<256x256xbf16>
    %c0_1 = arith.constant 0 : index
    %c0_2 = arith.constant 0 : index
    %1 = vector.load %arg5[%c0_1, %c0_2] : memref<256x256xbf16, #tpu.memory_space<vmem>>, vector<256x256xbf16>
    %c0_3 = arith.constant 0 : index
    %c0_4 = arith.constant 0 : index
    %2 = vector.load %arg4[%c0_3, %c0_4] : memref<1x256xf32, #tpu.memory_space<vmem>>, vector<1x256xf32>
    %c0_5 = arith.constant 0 : index
    %c0_6 = arith.constant 0 : index
    %3 = vector.load %arg6[%c0_5, %c0_6] : memref<1x256xf32, #tpu.memory_space<vmem>>, vector<1x256xf32>
    %c0_7 = arith.constant 0 : index
    %c0_8 = arith.constant 0 : index
    %4 = vector.load %arg7[%c0_7, %c0_8] : memref<8x256xf32, #tpu.memory_space<vmem>>, vector<8x256xf32>
    %c0_9 = arith.constant 0 : index
    %c0_10 = arith.constant 0 : index
    %5 = vector.load %arg2[%c0_9, %c0_10] : memref<8x256xf32, #tpu.memory_space<vmem>>, vector<8x256xf32>
    %6 = arith.truncf %5 : vector<8x256xf32> to vector<8x256xbf16>
    %cst = arith.constant dense<0.000000e+00> : vector<8x256xf32>
    %7 = tpu.matmul %6, %0, %cst {dimension_numbers = #tpu.dot_dimension_numbers<[1], [0], [0], [1], [0, 0, 1, 1], [], []>} : vector<8x256xbf16>, vector<256x256xbf16>, vector<8x256xf32> -> vector<8x256xf32>
    %8 = vector.broadcast %2 : vector<1x256xf32> to vector<8x256xf32>
    %9 = arith.addf %7, %8 : vector<8x256xf32>
    %cst_11 = arith.constant 5.000000e-01 : f32
    %10 = vector.broadcast %cst_11 : f32 to vector<8x256xf32>
    %11 = arith.mulf %10, %9 : vector<8x256xf32>
    %cst_12 = arith.constant 0.707106769 : f32
    %12 = vector.broadcast %cst_12 : f32 to vector<8x256xf32>
    %13 = arith.mulf %9, %12 : vector<8x256xf32>
    %14 = math.erf %13 : vector<8x256xf32>
    %cst_13 = arith.constant 1.000000e+00 : f32
    %15 = vector.broadcast %cst_13 : f32 to vector<8x256xf32>
    %16 = arith.addf %15, %14 : vector<8x256xf32>
    %17 = arith.mulf %11, %16 : vector<8x256xf32>
    %18 = arith.truncf %17 : vector<8x256xf32> to vector<8x256xbf16>
    %cst_14 = arith.constant dense<0.000000e+00> : vector<8x256xf32>
    %19 = tpu.matmul %18, %1, %cst_14 {dimension_numbers = #tpu.dot_dimension_numbers<[1], [0], [0], [1], [0, 0, 1, 1], [], []>} : vector<8x256xbf16>, vector<256x256xbf16>, vector<8x256xf32> -> vector<8x256xf32>
    %20 = vector.broadcast %3 : vector<1x256xf32> to vector<8x256xf32>
    %21 = arith.addf %19, %20 : vector<8x256xf32>
    %c0_15 = arith.constant 0 : index
    %22 = memref.load %arg1[%c0_15] : memref<8xf32, #tpu.memory_space<smem>>
    %23 = vector.broadcast %22 : f32 to vector<8x256xf32>
    %24 = arith.mulf %21, %23 : vector<8x256xf32>
    %25 = vector.extract_strided_slice %4 {offsets = [0, 0], sizes = [1, 256], strides = [1, 1]} : vector<8x256xf32> to vector<1x256xf32>
    %26 = vector.broadcast %25 : vector<1x256xf32> to vector<8x256xf32>
    %27 = arith.addf %24, %26 : vector<8x256xf32>
    %cst_16 = arith.constant 5.000000e-01 : f32
    %28 = vector.broadcast %cst_16 : f32 to vector<8x256xf32>
    %29 = arith.mulf %28, %27 : vector<8x256xf32>
    %cst_17 = arith.constant 0.707106769 : f32
    %30 = vector.broadcast %cst_17 : f32 to vector<8x256xf32>
    %31 = arith.mulf %27, %30 : vector<8x256xf32>
    %32 = math.erf %31 : vector<8x256xf32>
    %cst_18 = arith.constant 1.000000e+00 : f32
    %33 = vector.broadcast %cst_18 : f32 to vector<8x256xf32>
    %34 = arith.addf %33, %32 : vector<8x256xf32>
    %35 = arith.mulf %29, %34 : vector<8x256xf32>
    %c1 = arith.constant 1 : index
    %36 = memref.load %arg1[%c1] : memref<8xf32, #tpu.memory_space<smem>>
    %37 = vector.broadcast %36 : f32 to vector<8x256xf32>
    %38 = arith.mulf %21, %37 : vector<8x256xf32>
    %39 = vector.extract_strided_slice %4 {offsets = [1, 0], sizes = [1, 256], strides = [1, 1]} : vector<8x256xf32> to vector<1x256xf32>
    %40 = vector.broadcast %39 : vector<1x256xf32> to vector<8x256xf32>
    %41 = arith.addf %38, %40 : vector<8x256xf32>
    %cst_19 = arith.constant 5.000000e-01 : f32
    %42 = vector.broadcast %cst_19 : f32 to vector<8x256xf32>
    %43 = arith.mulf %42, %41 : vector<8x256xf32>
    %cst_20 = arith.constant 0.707106769 : f32
    %44 = vector.broadcast %cst_20 : f32 to vector<8x256xf32>
    %45 = arith.mulf %41, %44 : vector<8x256xf32>
    %46 = math.erf %45 : vector<8x256xf32>
    %cst_21 = arith.constant 1.000000e+00 : f32
    %47 = vector.broadcast %cst_21 : f32 to vector<8x256xf32>
    %48 = arith.addf %47, %46 : vector<8x256xf32>
    %49 = arith.mulf %43, %48 : vector<8x256xf32>
    %50 = arith.truncf %35 : vector<8x256xf32> to vector<8x256xbf16>
    %cst_22 = arith.constant dense<0.000000e+00> : vector<8x256xf32>
    %51 = tpu.matmul %50, %0, %cst_22 {dimension_numbers = #tpu.dot_dimension_numbers<[1], [0], [0], [1], [0, 0, 1, 1], [], []>} : vector<8x256xbf16>, vector<256x256xbf16>, vector<8x256xf32> -> vector<8x256xf32>
    %52 = vector.broadcast %2 : vector<1x256xf32> to vector<8x256xf32>
    %53 = arith.addf %51, %52 : vector<8x256xf32>
    %cst_23 = arith.constant 5.000000e-01 : f32
    %54 = vector.broadcast %cst_23 : f32 to vector<8x256xf32>
    %55 = arith.mulf %54, %53 : vector<8x256xf32>
    %cst_24 = arith.constant 0.707106769 : f32
    %56 = vector.broadcast %cst_24 : f32 to vector<8x256xf32>
    %57 = arith.mulf %53, %56 : vector<8x256xf32>
    %58 = math.erf %57 : vector<8x256xf32>
    %cst_25 = arith.constant 1.000000e+00 : f32
    %59 = vector.broadcast %cst_25 : f32 to vector<8x256xf32>
    %60 = arith.addf %59, %58 : vector<8x256xf32>
    %61 = arith.mulf %55, %60 : vector<8x256xf32>
    %62 = arith.truncf %61 : vector<8x256xf32> to vector<8x256xbf16>
    %cst_26 = arith.constant dense<0.000000e+00> : vector<8x256xf32>
    %63 = tpu.matmul %62, %1, %cst_26 {dimension_numbers = #tpu.dot_dimension_numbers<[1], [0], [0], [1], [0, 0, 1, 1], [], []>} : vector<8x256xbf16>, vector<256x256xbf16>, vector<8x256xf32> -> vector<8x256xf32>
    %64 = vector.broadcast %3 : vector<1x256xf32> to vector<8x256xf32>
    %65 = arith.addf %63, %64 : vector<8x256xf32>
    %66 = arith.truncf %49 : vector<8x256xf32> to vector<8x256xbf16>
    %cst_27 = arith.constant dense<0.000000e+00> : vector<8x256xf32>
    %67 = tpu.matmul %66, %0, %cst_27 {dimension_numbers = #tpu.dot_dimension_numbers<[1], [0], [0], [1], [0, 0, 1, 1], [], []>} : vector<8x256xbf16>, vector<256x256xbf16>, vector<8x256xf32> -> vector<8x256xf32>
    %68 = vector.broadcast %2 : vector<1x256xf32> to vector<8x256xf32>
    %69 = arith.addf %67, %68 : vector<8x256xf32>
    %cst_28 = arith.constant 5.000000e-01 : f32
    %70 = vector.broadcast %cst_28 : f32 to vector<8x256xf32>
    %71 = arith.mulf %70, %69 : vector<8x256xf32>
    %cst_29 = arith.constant 0.707106769 : f32
    %72 = vector.broadcast %cst_29 : f32 to vector<8x256xf32>
    %73 = arith.mulf %69, %72 : vector<8x256xf32>
    %74 = math.erf %73 : vector<8x256xf32>
    %cst_30 = arith.constant 1.000000e+00 : f32
    %75 = vector.broadcast %cst_30 : f32 to vector<8x256xf32>
    %76 = arith.addf %75, %74 : vector<8x256xf32>
    %77 = arith.mulf %71, %76 : vector<8x256xf32>
    %78 = arith.truncf %77 : vector<8x256xf32> to vector<8x256xbf16>
    %cst_31 = arith.constant dense<0.000000e+00> : vector<8x256xf32>
    %79 = tpu.matmul %78, %1, %cst_31 {dimension_numbers = #tpu.dot_dimension_numbers<[1], [0], [0], [1], [0, 0, 1, 1], [], []>} : vector<8x256xbf16>, vector<256x256xbf16>, vector<8x256xf32> -> vector<8x256xf32>
    %80 = vector.broadcast %3 : vector<1x256xf32> to vector<8x256xf32>
    %81 = arith.addf %79, %80 : vector<8x256xf32>
    %c2 = arith.constant 2 : index
    %82 = memref.load %arg1[%c2] : memref<8xf32, #tpu.memory_space<smem>>
    %83 = vector.broadcast %82 : f32 to vector<8x256xf32>
    %84 = arith.mulf %65, %83 : vector<8x256xf32>
    %85 = vector.extract_strided_slice %4 {offsets = [2, 0], sizes = [1, 256], strides = [1, 1]} : vector<8x256xf32> to vector<1x256xf32>
    %86 = vector.broadcast %85 : vector<1x256xf32> to vector<8x256xf32>
    %87 = arith.addf %84, %86 : vector<8x256xf32>
    %c3 = arith.constant 3 : index
    %88 = memref.load %arg1[%c3] : memref<8xf32, #tpu.memory_space<smem>>
    %89 = vector.broadcast %88 : f32 to vector<8x256xf32>
    %90 = arith.mulf %81, %89 : vector<8x256xf32>
    %91 = vector.extract_strided_slice %4 {offsets = [3, 0], sizes = [1, 256], strides = [1, 1]} : vector<8x256xf32> to vector<1x256xf32>
    %92 = vector.broadcast %91 : vector<1x256xf32> to vector<8x256xf32>
    %93 = arith.addf %90, %92 : vector<8x256xf32>
    %94 = arith.addf %87, %93 : vector<8x256xf32>
    %cst_32 = arith.constant 5.000000e-01 : f32
    %95 = vector.broadcast %cst_32 : f32 to vector<8x256xf32>
    %96 = arith.mulf %95, %94 : vector<8x256xf32>
    %cst_33 = arith.constant 0.707106769 : f32
    %97 = vector.broadcast %cst_33 : f32 to vector<8x256xf32>
    %98 = arith.mulf %94, %97 : vector<8x256xf32>
    %99 = math.erf %98 : vector<8x256xf32>
    %cst_34 = arith.constant 1.000000e+00 : f32
    %100 = vector.broadcast %cst_34 : f32 to vector<8x256xf32>
    %101 = arith.addf %100, %99 : vector<8x256xf32>
    %102 = arith.mulf %96, %101 : vector<8x256xf32>
    %c4 = arith.constant 4 : index
    %103 = memref.load %arg1[%c4] : memref<8xf32, #tpu.memory_space<smem>>
    %104 = vector.broadcast %103 : f32 to vector<8x256xf32>
    %105 = arith.mulf %65, %104 : vector<8x256xf32>
    %106 = vector.extract_strided_slice %4 {offsets = [4, 0], sizes = [1, 256], strides = [1, 1]} : vector<8x256xf32> to vector<1x256xf32>
    %107 = vector.broadcast %106 : vector<1x256xf32> to vector<8x256xf32>
    %108 = arith.addf %105, %107 : vector<8x256xf32>
    %c5 = arith.constant 5 : index
    %109 = memref.load %arg1[%c5] : memref<8xf32, #tpu.memory_space<smem>>
    %110 = vector.broadcast %109 : f32 to vector<8x256xf32>
    %111 = arith.mulf %81, %110 : vector<8x256xf32>
    %112 = vector.extract_strided_slice %4 {offsets = [5, 0], sizes = [1, 256], strides = [1, 1]} : vector<8x256xf32> to vector<1x256xf32>
    %113 = vector.broadcast %112 : vector<1x256xf32> to vector<8x256xf32>
    %114 = arith.addf %111, %113 : vector<8x256xf32>
    %115 = arith.addf %108, %114 : vector<8x256xf32>
    %cst_35 = arith.constant 5.000000e-01 : f32
    %116 = vector.broadcast %cst_35 : f32 to vector<8x256xf32>
    %117 = arith.mulf %116, %115 : vector<8x256xf32>
    %cst_36 = arith.constant 0.707106769 : f32
    %118 = vector.broadcast %cst_36 : f32 to vector<8x256xf32>
    %119 = arith.mulf %115, %118 : vector<8x256xf32>
    %120 = math.erf %119 : vector<8x256xf32>
    %cst_37 = arith.constant 1.000000e+00 : f32
    %121 = vector.broadcast %cst_37 : f32 to vector<8x256xf32>
    %122 = arith.addf %121, %120 : vector<8x256xf32>
    %123 = arith.mulf %117, %122 : vector<8x256xf32>
    %124 = arith.truncf %102 : vector<8x256xf32> to vector<8x256xbf16>
    %cst_38 = arith.constant dense<0.000000e+00> : vector<8x256xf32>
    %125 = tpu.matmul %124, %0, %cst_38 {dimension_numbers = #tpu.dot_dimension_numbers<[1], [0], [0], [1], [0, 0, 1, 1], [], []>} : vector<8x256xbf16>, vector<256x256xbf16>, vector<8x256xf32> -> vector<8x256xf32>
    %126 = vector.broadcast %2 : vector<1x256xf32> to vector<8x256xf32>
    %127 = arith.addf %125, %126 : vector<8x256xf32>
    %cst_39 = arith.constant 5.000000e-01 : f32
    %128 = vector.broadcast %cst_39 : f32 to vector<8x256xf32>
    %129 = arith.mulf %128, %127 : vector<8x256xf32>
    %cst_40 = arith.constant 0.707106769 : f32
    %130 = vector.broadcast %cst_40 : f32 to vector<8x256xf32>
    %131 = arith.mulf %127, %130 : vector<8x256xf32>
    %132 = math.erf %131 : vector<8x256xf32>
    %cst_41 = arith.constant 1.000000e+00 : f32
    %133 = vector.broadcast %cst_41 : f32 to vector<8x256xf32>
    %134 = arith.addf %133, %132 : vector<8x256xf32>
    %135 = arith.mulf %129, %134 : vector<8x256xf32>
    %136 = arith.truncf %135 : vector<8x256xf32> to vector<8x256xbf16>
    %cst_42 = arith.constant dense<0.000000e+00> : vector<8x256xf32>
    %137 = tpu.matmul %136, %1, %cst_42 {dimension_numbers = #tpu.dot_dimension_numbers<[1], [0], [0], [1], [0, 0, 1, 1], [], []>} : vector<8x256xbf16>, vector<256x256xbf16>, vector<8x256xf32> -> vector<8x256xf32>
    %138 = vector.broadcast %3 : vector<1x256xf32> to vector<8x256xf32>
    %139 = arith.addf %137, %138 : vector<8x256xf32>
    %140 = arith.truncf %123 : vector<8x256xf32> to vector<8x256xbf16>
    %cst_43 = arith.constant dense<0.000000e+00> : vector<8x256xf32>
    %141 = tpu.matmul %140, %0, %cst_43 {dimension_numbers = #tpu.dot_dimension_numbers<[1], [0], [0], [1], [0, 0, 1, 1], [], []>} : vector<8x256xbf16>, vector<256x256xbf16>, vector<8x256xf32> -> vector<8x256xf32>
    %142 = vector.broadcast %2 : vector<1x256xf32> to vector<8x256xf32>
    %143 = arith.addf %141, %142 : vector<8x256xf32>
    %cst_44 = arith.constant 5.000000e-01 : f32
    %144 = vector.broadcast %cst_44 : f32 to vector<8x256xf32>
    %145 = arith.mulf %144, %143 : vector<8x256xf32>
    %cst_45 = arith.constant 0.707106769 : f32
    %146 = vector.broadcast %cst_45 : f32 to vector<8x256xf32>
    %147 = arith.mulf %143, %146 : vector<8x256xf32>
    %148 = math.erf %147 : vector<8x256xf32>
    %cst_46 = arith.constant 1.000000e+00 : f32
    %149 = vector.broadcast %cst_46 : f32 to vector<8x256xf32>
    %150 = arith.addf %149, %148 : vector<8x256xf32>
    %151 = arith.mulf %145, %150 : vector<8x256xf32>
    %152 = arith.truncf %151 : vector<8x256xf32> to vector<8x256xbf16>
    %cst_47 = arith.constant dense<0.000000e+00> : vector<8x256xf32>
    %153 = tpu.matmul %152, %1, %cst_47 {dimension_numbers = #tpu.dot_dimension_numbers<[1], [0], [0], [1], [0, 0, 1, 1], [], []>} : vector<8x256xbf16>, vector<256x256xbf16>, vector<8x256xf32> -> vector<8x256xf32>
    %154 = vector.broadcast %3 : vector<1x256xf32> to vector<8x256xf32>
    %155 = arith.addf %153, %154 : vector<8x256xf32>
    %c6 = arith.constant 6 : index
    %156 = memref.load %arg1[%c6] : memref<8xf32, #tpu.memory_space<smem>>
    %157 = vector.broadcast %156 : f32 to vector<8x256xf32>
    %158 = arith.mulf %139, %157 : vector<8x256xf32>
    %159 = vector.extract_strided_slice %4 {offsets = [6, 0], sizes = [1, 256], strides = [1, 1]} : vector<8x256xf32> to vector<1x256xf32>
    %160 = vector.broadcast %159 : vector<1x256xf32> to vector<8x256xf32>
    %161 = arith.addf %158, %160 : vector<8x256xf32>
    %c7 = arith.constant 7 : index
    %162 = memref.load %arg1[%c7] : memref<8xf32, #tpu.memory_space<smem>>
    %163 = vector.broadcast %162 : f32 to vector<8x256xf32>
    %164 = arith.mulf %155, %163 : vector<8x256xf32>
    %165 = vector.extract_strided_slice %4 {offsets = [7, 0], sizes = [1, 256], strides = [1, 1]} : vector<8x256xf32> to vector<1x256xf32>
    %166 = vector.broadcast %165 : vector<1x256xf32> to vector<8x256xf32>
    %167 = arith.addf %164, %166 : vector<8x256xf32>
    %168 = arith.addf %161, %167 : vector<8x256xf32>
    %cst_48 = arith.constant 5.000000e-01 : f32
    %169 = vector.broadcast %cst_48 : f32 to vector<8x256xf32>
    %170 = arith.mulf %169, %168 : vector<8x256xf32>
    %cst_49 = arith.constant 0.707106769 : f32
    %171 = vector.broadcast %cst_49 : f32 to vector<8x256xf32>
    %172 = arith.mulf %168, %171 : vector<8x256xf32>
    %173 = math.erf %172 : vector<8x256xf32>
    %cst_50 = arith.constant 1.000000e+00 : f32
    %174 = vector.broadcast %cst_50 : f32 to vector<8x256xf32>
    %175 = arith.addf %174, %173 : vector<8x256xf32>
    %176 = arith.mulf %170, %175 : vector<8x256xf32>
    %177 = arith.truncf %176 : vector<8x256xf32> to vector<8x256xbf16>
    %cst_51 = arith.constant dense<0.000000e+00> : vector<8x256xf32>
    %178 = tpu.matmul %177, %0, %cst_51 {dimension_numbers = #tpu.dot_dimension_numbers<[1], [0], [0], [1], [0, 0, 1, 1], [], []>} : vector<8x256xbf16>, vector<256x256xbf16>, vector<8x256xf32> -> vector<8x256xf32>
    %179 = vector.broadcast %2 : vector<1x256xf32> to vector<8x256xf32>
    %180 = arith.addf %178, %179 : vector<8x256xf32>
    %cst_52 = arith.constant 5.000000e-01 : f32
    %181 = vector.broadcast %cst_52 : f32 to vector<8x256xf32>
    %182 = arith.mulf %181, %180 : vector<8x256xf32>
    %cst_53 = arith.constant 0.707106769 : f32
    %183 = vector.broadcast %cst_53 : f32 to vector<8x256xf32>
    %184 = arith.mulf %180, %183 : vector<8x256xf32>
    %185 = math.erf %184 : vector<8x256xf32>
    %cst_54 = arith.constant 1.000000e+00 : f32
    %186 = vector.broadcast %cst_54 : f32 to vector<8x256xf32>
    %187 = arith.addf %186, %185 : vector<8x256xf32>
    %188 = arith.mulf %182, %187 : vector<8x256xf32>
    %189 = arith.truncf %188 : vector<8x256xf32> to vector<8x256xbf16>
    %cst_55 = arith.constant dense<0.000000e+00> : vector<8x256xf32>
    %190 = tpu.matmul %189, %1, %cst_55 {dimension_numbers = #tpu.dot_dimension_numbers<[1], [0], [0], [1], [0, 0, 1, 1], [], []>} : vector<8x256xbf16>, vector<256x256xbf16>, vector<8x256xf32> -> vector<8x256xf32>
    %191 = vector.broadcast %3 : vector<1x256xf32> to vector<8x256xf32>
    %192 = arith.addf %190, %191 : vector<8x256xf32>
    %c0_56 = arith.constant 0 : index
    %c0_57 = arith.constant 0 : index
    %193 = vector.load %arg8[%c0_56, %c0_57] : memref<8x256xf32, #tpu.memory_space<vmem>>, vector<8x256xf32>
    tpu.vector_store %arg8[%c0_56, %c0_57], %192 {strides = array<i32>} : memref<8x256xf32, #tpu.memory_space<vmem>>, vector<8x256xf32>,
    return
  }
  func.func @transform_0(%arg0: i32, %arg1: memref<8xf32, #tpu.memory_space<smem>>) -> (i32, i32) {
    %c0_i32 = arith.constant 0 : i32
    %c0_i32_0 = arith.constant 0 : i32
    return %arg0, %c0_i32 : i32, i32
  }
  func.func @transform_1(%arg0: i32, %arg1: memref<8xf32, #tpu.memory_space<smem>>) -> (i32, i32) {
    %c0_i32 = arith.constant 0 : i32
    %c0_i32_0 = arith.constant 0 : i32
    %c0_i32_1 = arith.constant 0 : i32
    return %c0_i32, %c0_i32_0 : i32, i32
  }
  func.func @transform_2(%arg0: i32, %arg1: memref<8xf32, #tpu.memory_space<smem>>) -> (i32, i32) {
    %c0_i32 = arith.constant 0 : i32
    %c0_i32_0 = arith.constant 0 : i32
    %c0_i32_1 = arith.constant 0 : i32
    return %c0_i32, %c0_i32_0 : i32, i32
  }
  func.func @transform_3(%arg0: i32, %arg1: memref<8xf32, #tpu.memory_space<smem>>) -> (i32, i32) {
    %c0_i32 = arith.constant 0 : i32
    %c0_i32_0 = arith.constant 0 : i32
    %c0_i32_1 = arith.constant 0 : i32
    return %c0_i32, %c0_i32_0 : i32, i32
  }
  func.func @transform_4(%arg0: i32, %arg1: memref<8xf32, #tpu.memory_space<smem>>) -> (i32, i32) {
    %c0_i32 = arith.constant 0 : i32
    %c0_i32_0 = arith.constant 0 : i32
    %c0_i32_1 = arith.constant 0 : i32
    return %c0_i32, %c0_i32_0 : i32, i32
  }
  func.func @transform_5(%arg0: i32, %arg1: memref<8xf32, #tpu.memory_space<smem>>) -> (i32, i32) {
    %c0_i32 = arith.constant 0 : i32
    %c0_i32_0 = arith.constant 0 : i32
    %c0_i32_1 = arith.constant 0 : i32
    return %c0_i32, %c0_i32_0 : i32, i32
  }
  func.func @transform_6(%arg0: i32, %arg1: memref<8xf32, #tpu.memory_space<smem>>) -> (i32, i32) {
    %c0_i32 = arith.constant 0 : i32
    %c0_i32_0 = arith.constant 0 : i32
    return %arg0, %c0_i32 : i32, i32
  }
}

module attributes {stable_mosaic.version = 11 : i64} {
  func.func @hyperffn_kernel(%arg0: i32, %arg1: memref<8xf32, #tpu.memory_space<smem>>, %arg2: memref<8x256xf32, #tpu.memory_space<vmem>>, %arg3: memref<256x256xbf16, #tpu.memory_space<vmem>>, %arg4: memref<1x256xf32, #tpu.memory_space<vmem>>, %arg5: memref<256x256xbf16, #tpu.memory_space<vmem>>, %arg6: memref<1x256xf32, #tpu.memory_space<vmem>>, %arg7: memref<8x256xf32, #tpu.memory_space<vmem>>, %arg8: memref<8x256xf32, #tpu.memory_space<vmem>>) attributes {dimension_semantics = [#tpu.dimension_semantics<parallel>], iteration_bounds = array<i64: 2>, scalar_prefetch = 1 : i64, scratch_operands = 0 : i64, tpu.core_type = #tpu.core_type<tc>, window_params = [{transform_indices = @transform_0, window_bounds = array<i64: 8, 256>}, {pipeline_mode = #tpu.pipeline_mode<synchronous>, transform_indices = @transform_1, window_bounds = array<i64: 256, 256>}, {pipeline_mode = #tpu.pipeline_mode<synchronous>, transform_indices = @transform_2, window_bounds = array<i64: 1, 256>}, {pipeline_mode = #tpu.pipeline_mode<synchronous>, transform_indices = @transform_3, window_bounds = array<i64: 256, 256>}, {pipeline_mode = #tpu.pipeline_mode<synchronous>, transform_indices = @transform_4, window_bounds = array<i64: 1, 256>}, {pipeline_mode = #tpu.pipeline_mode<synchronous>, transform_indices = @transform_5, window_bounds = array<i64: 8, 256>}, {transform_indices = @transform_6, window_bounds = array<i64: 8, 256>}]} {
    %c0 = arith.constant 0 : index
    %c0_0 = arith.constant 0 : index
    %0 = vector.load %arg3[%c0, %c0_0] : memref<256x256xbf16, #tpu.memory_space<vmem>>, vector<256x256xbf16>
    %c0_1 = arith.constant 0 : index
    %c0_2 = arith.constant 0 : index
    %1 = vector.load %arg5[%c0_1, %c0_2] : memref<256x256xbf16, #tpu.memory_space<vmem>>, vector<256x256xbf16>
    %c0_3 = arith.constant 0 : index
    %c0_4 = arith.constant 0 : index
    %2 = vector.load %arg4[%c0_3, %c0_4] : memref<1x256xf32, #tpu.memory_space<vmem>>, vector<1x256xf32>
    %c0_5 = arith.constant 0 : index
    %c0_6 = arith.constant 0 : index
    %3 = vector.load %arg6[%c0_5, %c0_6] : memref<1x256xf32, #tpu.memory_space<vmem>>, vector<1x256xf32>
    %c0_7 = arith.constant 0 : index
    %c0_8 = arith.constant 0 : index
    %4 = vector.load %arg7[%c0_7, %c0_8] : memref<8x256xf32, #tpu.memory_space<vmem>>, vector<8x256xf32>
    %c0_9 = arith.constant 0 : index
    %c0_10 = arith.constant 0 : index
    %5 = vector.load %arg2[%c0_9, %c0_10] : memref<8x256xf32, #tpu.memory_space<vmem>>, vector<8x256xf32>
    %6 = arith.truncf %5 : vector<8x256xf32> to vector<8x256xbf16>
    %cst = arith.constant dense<0.000000e+00> : vector<8x256xf32>
    %7 = tpu.matmul %6, %0, %cst {dimension_numbers = #tpu.dot_dimension_numbers<[1], [0], [0], [1], [0, 0, 1, 1], [], []>} : vector<8x256xbf16>, vector<256x256xbf16>, vector<8x256xf32> -> vector<8x256xf32>
    %8 = vector.broadcast %2 : vector<1x256xf32> to vector<8x256xf32>
    %9 = arith.addf %7, %8 : vector<8x256xf32>
    %cst_11 = arith.constant 5.000000e-01 : f32
    %10 = vector.broadcast %cst_11 : f32 to vector<8x256xf32>
    %11 = arith.mulf %10, %9 : vector<8x256xf32>
    %cst_12 = arith.constant 0.707106769 : f32
    %12 = vector.broadcast %cst_12 : f32 to vector<8x256xf32>
    %13 = arith.mulf %9, %12 : vector<8x256xf32>
    %14 = math.erf %13 : vector<8x256xf32>
    %cst_13 = arith.constant 1.000000e+00 : f32
    %15 = vector.broadcast %cst_13 : f32 to vector<8x256xf32>
    %16 = arith.addf %15, %14 : vector<8x256xf32>
    %17 = arith.mulf %11, %16 : vector<8x256xf32>
    %18 = arith.truncf %17 : vector<8x256xf32> to vector<8x256xbf16>
    %cst_14 = arith.constant dense<0.000000e+00> : vector<8x256xf32>
    %19 = tpu.matmul %18, %1, %cst_14 {dimension_numbers = #tpu.dot_dimension_numbers<[1], [0], [0], [1], [0, 0, 1, 1], [], []>} : vector<8x256xbf16>, vector<256x256xbf16>, vector<8x256xf32> -> vector<8x256xf32>
    %20 = vector.broadcast %3 : vector<1x256xf32> to vector<8x256xf32>
    %21 = arith.addf %19, %20 : vector<8x256xf32>
    %c0_15 = arith.constant 0 : index
    %22 = memref.load %arg1[%c0_15] : memref<8xf32, #tpu.memory_space<smem>>
    %23 = vector.broadcast %22 : f32 to vector<8x256xf32>
    %24 = arith.mulf %21, %23 : vector<8x256xf32>
    %25 = vector.extract_strided_slice %4 {offsets = [0, 0], sizes = [1, 256], strides = [1, 1]} : vector<8x256xf32> to vector<1x256xf32>
    %26 = vector.broadcast %25 : vector<1x256xf32> to vector<8x256xf32>
    %27 = arith.addf %24, %26 : vector<8x256xf32>
    %cst_16 = arith.constant 5.000000e-01 : f32
    %28 = vector.broadcast %cst_16 : f32 to vector<8x256xf32>
    %29 = arith.mulf %28, %27 : vector<8x256xf32>
    %cst_17 = arith.constant 0.707106769 : f32
    %30 = vector.broadcast %cst_17 : f32 to vector<8x256xf32>
    %31 = arith.mulf %27, %30 : vector<8x256xf32>
    %32 = math.erf %31 : vector<8x256xf32>
    %cst_18 = arith.constant 1.000000e+00 : f32
    %33 = vector.broadcast %cst_18 : f32 to vector<8x256xf32>
    %34 = arith.addf %33, %32 : vector<8x256xf32>
    %35 = arith.mulf %29, %34 : vector<8x256xf32>
    %c1 = arith.constant 1 : index
    %36 = memref.load %arg1[%c1] : memref<8xf32, #tpu.memory_space<smem>>
    %37 = vector.broadcast %36 : f32 to vector<8x256xf32>
    %38 = arith.mulf %21, %37 : vector<8x256xf32>
    %39 = vector.extract_strided_slice %4 {offsets = [1, 0], sizes = [1, 256], strides = [1, 1]} : vector<8x256xf32> to vector<1x256xf32>
    %40 = vector.broadcast %39 : vector<1x256xf32> to vector<8x256xf32>
    %41 = arith.addf %38, %40 : vector<8x256xf32>
    %cst_19 = arith.constant 5.000000e-01 : f32
    %42 = vector.broadcast %cst_19 : f32 to vector<8x256xf32>
    %43 = arith.mulf %42, %41 : vector<8x256xf32>
    %cst_20 = arith.constant 0.707106769 : f32
    %44 = vector.broadcast %cst_20 : f32 to vector<8x256xf32>
    %45 = arith.mulf %41, %44 : vector<8x256xf32>
    %46 = math.erf %45 : vector<8x256xf32>
    %cst_21 = arith.constant 1.000000e+00 : f32
    %47 = vector.broadcast %cst_21 : f32 to vector<8x256xf32>
    %48 = arith.addf %47, %46 : vector<8x256xf32>
    %49 = arith.mulf %43, %48 : vector<8x256xf32>
    %50 = arith.truncf %35 : vector<8x256xf32> to vector<8x256xbf16>
    %cst_22 = arith.constant dense<0.000000e+00> : vector<8x256xf32>
    %51 = tpu.matmul %50, %0, %cst_22 {dimension_numbers = #tpu.dot_dimension_numbers<[1], [0], [0], [1], [0, 0, 1, 1], [], []>} : vector<8x256xbf16>, vector<256x256xbf16>, vector<8x256xf32> -> vector<8x256xf32>
    %52 = vector.broadcast %2 : vector<1x256xf32> to vector<8x256xf32>
    %53 = arith.addf %51, %52 : vector<8x256xf32>
    %cst_23 = arith.constant 5.000000e-01 : f32
    %54 = vector.broadcast %cst_23 : f32 to vector<8x256xf32>
    %55 = arith.mulf %54, %53 : vector<8x256xf32>
    %cst_24 = arith.constant 0.707106769 : f32
    %56 = vector.broadcast %cst_24 : f32 to vector<8x256xf32>
    %57 = arith.mulf %53, %56 : vector<8x256xf32>
    %58 = math.erf %57 : vector<8x256xf32>
    %cst_25 = arith.constant 1.000000e+00 : f32
    %59 = vector.broadcast %cst_25 : f32 to vector<8x256xf32>
    %60 = arith.addf %59, %58 : vector<8x256xf32>
    %61 = arith.mulf %55, %60 : vector<8x256xf32>
    %62 = arith.truncf %61 : vector<8x256xf32> to vector<8x256xbf16>
    %cst_26 = arith.constant dense<0.000000e+00> : vector<8x256xf32>
    %63 = tpu.matmul %62, %1, %cst_26 {dimension_numbers = #tpu.dot_dimension_numbers<[1], [0], [0], [1], [0, 0, 1, 1], [], []>} : vector<8x256xbf16>, vector<256x256xbf16>, vector<8x256xf32> -> vector<8x256xf32>
    %64 = vector.broadcast %3 : vector<1x256xf32> to vector<8x256xf32>
    %65 = arith.addf %63, %64 : vector<8x256xf32>
    %66 = arith.truncf %49 : vector<8x256xf32> to vector<8x256xbf16>
    %cst_27 = arith.constant dense<0.000000e+00> : vector<8x256xf32>
    %67 = tpu.matmul %66, %0, %cst_27 {dimension_numbers = #tpu.dot_dimension_numbers<[1], [0], [0], [1], [0, 0, 1, 1], [], []>} : vector<8x256xbf16>, vector<256x256xbf16>, vector<8x256xf32> -> vector<8x256xf32>
    %68 = vector.broadcast %2 : vector<1x256xf32> to vector<8x256xf32>
    %69 = arith.addf %67, %68 : vector<8x256xf32>
    %cst_28 = arith.constant 5.000000e-01 : f32
    %70 = vector.broadcast %cst_28 : f32 to vector<8x256xf32>
    %71 = arith.mulf %70, %69 : vector<8x256xf32>
    %cst_29 = arith.constant 0.707106769 : f32
    %72 = vector.broadcast %cst_29 : f32 to vector<8x256xf32>
    %73 = arith.mulf %69, %72 : vector<8x256xf32>
    %74 = math.erf %73 : vector<8x256xf32>
    %cst_30 = arith.constant 1.000000e+00 : f32
    %75 = vector.broadcast %cst_30 : f32 to vector<8x256xf32>
    %76 = arith.addf %75, %74 : vector<8x256xf32>
    %77 = arith.mulf %71, %76 : vector<8x256xf32>
    %78 = arith.truncf %77 : vector<8x256xf32> to vector<8x256xbf16>
    %cst_31 = arith.constant dense<0.000000e+00> : vector<8x256xf32>
    %79 = tpu.matmul %78, %1, %cst_31 {dimension_numbers = #tpu.dot_dimension_numbers<[1], [0], [0], [1], [0, 0, 1, 1], [], []>} : vector<8x256xbf16>, vector<256x256xbf16>, vector<8x256xf32> -> vector<8x256xf32>
    %80 = vector.broadcast %3 : vector<1x256xf32> to vector<8x256xf32>
    %81 = arith.addf %79, %80 : vector<8x256xf32>
    %c2 = arith.constant 2 : index
    %82 = memref.load %arg1[%c2] : memref<8xf32, #tpu.memory_space<smem>>
    %83 = vector.broadcast %82 : f32 to vector<8x256xf32>
    %84 = arith.mulf %65, %83 : vector<8x256xf32>
    %85 = vector.extract_strided_slice %4 {offsets = [2, 0], sizes = [1, 256], strides = [1, 1]} : vector<8x256xf32> to vector<1x256xf32>
    %86 = vector.broadcast %85 : vector<1x256xf32> to vector<8x256xf32>
    %87 = arith.addf %84, %86 : vector<8x256xf32>
    %c3 = arith.constant 3 : index
    %88 = memref.load %arg1[%c3] : memref<8xf32, #tpu.memory_space<smem>>
    %89 = vector.broadcast %88 : f32 to vector<8x256xf32>
    %90 = arith.mulf %81, %89 : vector<8x256xf32>
    %91 = vector.extract_strided_slice %4 {offsets = [3, 0], sizes = [1, 256], strides = [1, 1]} : vector<8x256xf32> to vector<1x256xf32>
    %92 = vector.broadcast %91 : vector<1x256xf32> to vector<8x256xf32>
    %93 = arith.addf %90, %92 : vector<8x256xf32>
    %94 = arith.addf %87, %93 : vector<8x256xf32>
    %cst_32 = arith.constant 5.000000e-01 : f32
    %95 = vector.broadcast %cst_32 : f32 to vector<8x256xf32>
    %96 = arith.mulf %95, %94 : vector<8x256xf32>
    %cst_33 = arith.constant 0.707106769 : f32
    %97 = vector.broadcast %cst_33 : f32 to vector<8x256xf32>
    %98 = arith.mulf %94, %97 : vector<8x256xf32>
    %99 = math.erf %98 : vector<8x256xf32>
    %cst_34 = arith.constant 1.000000e+00 : f32
    %100 = vector.broadcast %cst_34 : f32 to vector<8x256xf32>
    %101 = arith.addf %100, %99 : vector<8x256xf32>
    %102 = arith.mulf %96, %101 : vector<8x256xf32>
    %c4 = arith.constant 4 : index
    %103 = memref.load %arg1[%c4] : memref<8xf32, #tpu.memory_space<smem>>
    %104 = vector.broadcast %103 : f32 to vector<8x256xf32>
    %105 = arith.mulf %65, %104 : vector<8x256xf32>
    %106 = vector.extract_strided_slice %4 {offsets = [4, 0], sizes = [1, 256], strides = [1, 1]} : vector<8x256xf32> to vector<1x256xf32>
    %107 = vector.broadcast %106 : vector<1x256xf32> to vector<8x256xf32>
    %108 = arith.addf %105, %107 : vector<8x256xf32>
    %c5 = arith.constant 5 : index
    %109 = memref.load %arg1[%c5] : memref<8xf32, #tpu.memory_space<smem>>
    %110 = vector.broadcast %109 : f32 to vector<8x256xf32>
    %111 = arith.mulf %81, %110 : vector<8x256xf32>
    %112 = vector.extract_strided_slice %4 {offsets = [5, 0], sizes = [1, 256], strides = [1, 1]} : vector<8x256xf32> to vector<1x256xf32>
    %113 = vector.broadcast %112 : vector<1x256xf32> to vector<8x256xf32>
    %114 = arith.addf %111, %113 : vector<8x256xf32>
    %115 = arith.addf %108, %114 : vector<8x256xf32>
    %cst_35 = arith.constant 5.000000e-01 : f32
    %116 = vector.broadcast %cst_35 : f32 to vector<8x256xf32>
    %117 = arith.mulf %116, %115 : vector<8x256xf32>
    %cst_36 = arith.constant 0.707106769 : f32
    %118 = vector.broadcast %cst_36 : f32 to vector<8x256xf32>
    %119 = arith.mulf %115, %118 : vector<8x256xf32>
    %120 = math.erf %119 : vector<8x256xf32>
    %cst_37 = arith.constant 1.000000e+00 : f32
    %121 = vector.broadcast %cst_37 : f32 to vector<8x256xf32>
    %122 = arith.addf %121, %120 : vector<8x256xf32>
    %123 = arith.mulf %117, %122 : vector<8x256xf32>
    %124 = arith.truncf %102 : vector<8x256xf32> to vector<8x256xbf16>
    %cst_38 = arith.constant dense<0.000000e+00> : vector<8x256xf32>
    %125 = tpu.matmul %124, %0, %cst_38 {dimension_numbers = #tpu.dot_dimension_numbers<[1], [0], [0], [1], [0, 0, 1, 1], [], []>} : vector<8x256xbf16>, vector<256x256xbf16>, vector<8x256xf32> -> vector<8x256xf32>
    %126 = vector.broadcast %2 : vector<1x256xf32> to vector<8x256xf32>
    %127 = arith.addf %125, %126 : vector<8x256xf32>
    %cst_39 = arith.constant 5.000000e-01 : f32
    %128 = vector.broadcast %cst_39 : f32 to vector<8x256xf32>
    %129 = arith.mulf %128, %127 : vector<8x256xf32>
    %cst_40 = arith.constant 0.707106769 : f32
    %130 = vector.broadcast %cst_40 : f32 to vector<8x256xf32>
    %131 = arith.mulf %127, %130 : vector<8x256xf32>
    %132 = math.erf %131 : vector<8x256xf32>
    %cst_41 = arith.constant 1.000000e+00 : f32
    %133 = vector.broadcast %cst_41 : f32 to vector<8x256xf32>
    %134 = arith.addf %133, %132 : vector<8x256xf32>
    %135 = arith.mulf %129, %134 : vector<8x256xf32>
    %136 = arith.truncf %135 : vector<8x256xf32> to vector<8x256xbf16>
    %cst_42 = arith.constant dense<0.000000e+00> : vector<8x256xf32>
    %137 = tpu.matmul %136, %1, %cst_42 {dimension_numbers = #tpu.dot_dimension_numbers<[1], [0], [0], [1], [0, 0, 1, 1], [], []>} : vector<8x256xbf16>, vector<256x256xbf16>, vector<8x256xf32> -> vector<8x256xf32>
    %138 = vector.broadcast %3 : vector<1x256xf32> to vector<8x256xf32>
    %139 = arith.addf %137, %138 : vector<8x256xf32>
    %140 = arith.truncf %123 : vector<8x256xf32> to vector<8x256xbf16>
    %cst_43 = arith.constant dense<0.000000e+00> : vector<8x256xf32>
    %141 = tpu.matmul %140, %0, %cst_43 {dimension_numbers = #tpu.dot_dimension_numbers<[1], [0], [0], [1], [0, 0, 1, 1], [], []>} : vector<8x256xbf16>, vector<256x256xbf16>, vector<8x256xf32> -> vector<8x256xf32>
    %142 = vector.broadcast %2 : vector<1x256xf32> to vector<8x256xf32>
    %143 = arith.addf %141, %142 : vector<8x256xf32>
    %cst_44 = arith.constant 5.000000e-01 : f32
    %144 = vector.broadcast %cst_44 : f32 to vector<8x256xf32>
    %145 = arith.mulf %144, %143 : vector<8x256xf32>
    %cst_45 = arith.constant 0.707106769 : f32
    %146 = vector.broadcast %cst_45 : f32 to vector<8x256xf32>
    %147 = arith.mulf %143, %146 : vector<8x256xf32>
    %148 = math.erf %147 : vector<8x256xf32>
    %cst_46 = arith.constant 1.000000e+00 : f32
    %149 = vector.broadcast %cst_46 : f32 to vector<8x256xf32>
    %150 = arith.addf %149, %148 : vector<8x256xf32>
    %151 = arith.mulf %145, %150 : vector<8x256xf32>
    %152 = arith.truncf %151 : vector<8x256xf32> to vector<8x256xbf16>
    %cst_47 = arith.constant dense<0.000000e+00> : vector<8x256xf32>
    %153 = tpu.matmul %152, %1, %cst_47 {dimension_numbers = #tpu.dot_dimension_numbers<[1], [0], [0], [1], [0, 0, 1, 1], [], []>} : vector<8x256xbf16>, vector<256x256xbf16>, vector<8x256xf32> -> vector<8x256xf32>
    %154 = vector.broadcast %3 : vector<1x256xf32> to vector<8x256xf32>
    %155 = arith.addf %153, %154 : vector<8x256xf32>
    %c6 = arith.constant 6 : index
    %156 = memref.load %arg1[%c6] : memref<8xf32, #tpu.memory_space<smem>>
    %157 = vector.broadcast %156 : f32 to vector<8x256xf32>
    %158 = arith.mulf %139, %157 : vector<8x256xf32>
    %159 = vector.extract_strided_slice %4 {offsets = [6, 0], sizes = [1, 256], strides = [1, 1]} : vector<8x256xf32> to vector<1x256xf32>
    %160 = vector.broadcast %159 : vector<1x256xf32> to vector<8x256xf32>
    %161 = arith.addf %158, %160 : vector<8x256xf32>
    %c7 = arith.constant 7 : index
    %162 = memref.load %arg1[%c7] : memref<8xf32, #tpu.memory_space<smem>>
    %163 = vector.broadcast %162 : f32 to vector<8x256xf32>
    %164 = arith.mulf %155, %163 : vector<8x256xf32>
    %165 = vector.extract_strided_slice %4 {offsets = [7, 0], sizes = [1, 256], strides = [1, 1]} : vector<8x256xf32> to vector<1x256xf32>
    %166 = vector.broadcast %165 : vector<1x256xf32> to vector<8x256xf32>
    %167 = arith.addf %164, %166 : vector<8x256xf32>
    %168 = arith.addf %161, %167 : vector<8x256xf32>
    %cst_48 = arith.constant 5.000000e-01 : f32
    %169 = vector.broadcast %cst_48 : f32 to vector<8x256xf32>
    %170 = arith.mulf %169, %168 : vector<8x256xf32>
    %cst_49 = arith.constant 0.707106769 : f32
    %171 = vector.broadcast %cst_49 : f32 to vector<8x256xf32>
    %172 = arith.mulf %168, %171 : vector<8x256xf32>
    %173 = math.erf %172 : vector<8x256xf32>
    %cst_50 = arith.constant 1.000000e+00 : f32
    %174 = vector.broadcast %cst_50 : f32 to vector<8x256xf32>
    %175 = arith.addf %174, %173 : vector<8x256xf32>
    %176 = arith.mulf %170, %175 : vector<8x256xf32>
    %177 = arith.truncf %176 : vector<8x256xf32> to vector<8x256xbf16>
    %cst_51 = arith.constant dense<0.000000e+00> : vector<8x256xf32>
    %178 = tpu.matmul %177, %0, %cst_51 {dimension_numbers = #tpu.dot_dimension_numbers<[1], [0], [0], [1], [0, 0, 1, 1], [], []>} : vector<8x256xbf16>, vector<256x256xbf16>, vector<8x256xf32> -> vector<8x256xf32>
    %179 = vector.broadcast %2 : vector<1x256xf32> to vector<8x256xf32>
    %180 = arith.addf %178, %179 : vector<8x256xf32>
    %cst_52 = arith.constant 5.000000e-01 : f32
    %181 = vector.broadcast %cst_52 : f32 to vector<8x256xf32>
    %182 = arith.mulf %181, %180 : vector<8x256xf32>
    %cst_53 = arith.constant 0.707106769 : f32
    %183 = vector.broadcast %cst_53 : f32 to vector<8x256xf32>
    %184 = arith.mulf %180, %183 : vector<8x256xf32>
    %185 = math.erf %184 : vector<8x256xf32>
    %cst_54 = arith.constant 1.000000e+00 : f32
    %186 = vector.broadcast %cst_54 : f32 to vector<8x256xf32>
    %187 = arith.addf %186, %185 : vector<8x256xf32>
    %188 = arith.mulf %182, %187 : vector<8x256xf32>
    %189 = arith.truncf %188 : vector<8x256xf32> to vector<8x256xbf16>
    %cst_55 = arith.constant dense<0.000000e+00> : vector<8x256xf32>
    %190 = tpu.matmul %189, %1, %cst_55 {dimension_numbers = #tpu.dot_dimension_numbers<[1], [0], [0], [1], [0, 0, 1, 1], [], []>} : vector<8x256xbf16>, vector<256x256xbf16>, vector<8x256xf32> -> vector<8x256xf32>
    %191 = vector.broadcast %3 : vector<1x256xf32> to vector<8x256xf32>
    %192 = arith.addf %190, %191 : vector<8x256xf32>
    %c0_56 = arith.constant 0 : index
    %c0_57 = arith.constant 0 : index
    %193 = vector.load %arg8[%c0_56, %c0_57] : memref<8x256xf32, #tpu.memory_space<vmem>>, vector<8x256xf32>
    tpu.vector_store %arg8[%c0_56, %c0_57], %192 {strides = array<i32>} : memref<8x256xf32, #tpu.memory_space<vmem>>, vector<8x256xf32>,
    return
  }
  func.func @transform_0(%arg0: i32, %arg1: memref<8xf32, #tpu.memory_space<smem>>) -> (i32, i32) {
    %c0_i32 = arith.constant 0 : i32
    %c0_i32_0 = arith.constant 0 : i32
    return %arg0, %c0_i32 : i32, i32
  }
  func.func @transform_1(%arg0: i32, %arg1: memref<8xf32, #tpu.memory_space<smem>>) -> (i32, i32) {
    %c0_i32 = arith.constant 0 : i32
    %c0_i32_0 = arith.constant 0 : i32
    %c0_i32_1 = arith.constant 0 : i32
    return %c0_i32, %c0_i32_0 : i32, i32
  }
  func.func @transform_2(%arg0: i32, %arg1: memref<8xf32, #tpu.memory_space<smem>>) -> (i32, i32) {
    %c0_i32 = arith.constant 0 : i32
    %c0_i32_0 = arith.constant 0 : i32
    %c0_i32_1 = arith.constant 0 : i32
    return %c0_i32, %c0_i32_0 : i32, i32
  }
  func.func @transform_3(%arg0: i32, %arg1: memref<8xf32, #tpu.memory_space<smem>>) -> (i32, i32) {
    %c0_i32 = arith.constant 0 : i32
    %c0_i32_0 = arith.constant 0 : i32
    %c0_i32_1 = arith.constant 0 : i32
    return %c0_i32, %c0_i32_0 : i32, i32
  }
  func.func @transform_4(%arg0: i32, %arg1: memref<8xf32, #tpu.memory_space<smem>>) -> (i32, i32) {
    %c0_i32 = arith.constant 0 : i32
    %c0_i32_0 = arith.constant 0 : i32
    %c0_i32_1 = arith.constant 0 : i32
    return %c0_i32, %c0_i32_0 : i32, i32
  }
  func.func @transform_5(%arg0: i32, %arg1: memref<8xf32, #tpu.memory_space<smem>>) -> (i32, i32) {
    %c0_i32 = arith.constant 0 : i32
    %c0_i32_0 = arith.constant 0 : i32
    %c0_i32_1 = arith.constant 0 : i32
    return %c0_i32, %c0_i32_0 : i32, i32
  }
  func.func @transform_6(%arg0: i32, %arg1: memref<8xf32, #tpu.memory_space<smem>>) -> (i32, i32) {
    %c0_i32 = arith.constant 0 : i32
    %c0_i32_0 = arith.constant 0 : i32
    return %arg0, %c0_i32 : i32, i32
  }
}

</mosaic_0001>

<bundles_post_ra>
// kernel: tpu_custom_call.1
= control target key start
LH: loop header
LB: loop body
LE: loop exit
PB: predicated region body
PF: predicated region fallthrough
CT: control target
= control target key end

     0   :  { %s3240_s27 = smov [#allocation3]   ;;  %s4453_s0 = inlined_call_operand.hbm [shape: f32[8], index: 0, kind: input, shape index: {}]   ;;  %s4454_s1 = inlined_call_operand.hbm [shape: f32[16,256], index: 1, kind: input, shape index: {}]   ;;  %s4455_s2 = inlined_call_operand.hbm [shape: bf16[256,256], index: 2, kind: input, shape index: {}]   ;;  %s4456_s3 = inlined_call_operand.vmem [shape: f32[1,256], index: 3, kind: input, shape index: {}]   ;;  %s4457_s4 = inlined_call_operand.hbm [shape: bf16[256,256], index: 4, kind: input, shape index: {}]   ;;  %s4458_s5 = inlined_call_operand.vmem [shape: f32[1,256], index: 5, kind: input, shape index: {}]   ;;  %s4459_s6 = inlined_call_operand.hbm [shape: f32[8,256], index: 6, kind: input, shape index: {}]   ;;  %s4460_s7 = inlined_call_operand.hbm [shape: f32[16,256], index: 7, kind: output, shape index: {}]  }
   0x1   :  { %s13_s26 = sshll.u32 %s4453_s0, 4  ;;  %s14_s26 = int_to_ptr.hbm [resolvable:$true] %s13_s26 }
   0x2   :  { %16 = dma.hbm_to_smem %s14_s26, 16, %s3240_s27, [#allocation2] }
   0x3   :  { %3206 = dma.done.wait [#allocation2], 16 }
   0x4   :  { %3207 = vsyncadd [#allocation2], 4294967280 }
   0x5   :  { %19 = sfence }
   0x6   :  { %20 = vsyncpa [#allocation5], 0 }
   0x7   :  { %22 = vsyncpa [#allocation5 + $0x1], 0 }
   0x8   :  { %23 = vsyncpa [#allocation8], 0 }
   0x9   :  { %24 = vsyncpa [#allocation11], 0 }
   0xa   :  { %25 = vsyncpa [#allocation6], 0 }
   0xb   :  { %27 = vsyncpa [#allocation6 + $0x1], 0  ;;  %s3289_s28 = smov 0   ;;  %s3291_s29 = smov 0  }
   0xc   :  { %s3293_s30 = smov 0   ;;  %s3295_s8 = smov 0  }
   0xd LB: > { %s206_s10 = sshll.u32 %s4455_s2, 4  ;;  %s3313_s11 = sadd.s32 4294967295, %s3238_s8   ;;  %s3238_s8 = sphi %s3295_s8, %s4834_s8   ;;  %s3234_s30 = sphi %s3293_s30, %s4833_s30   ;;  %s3230_s29 = sphi %s3291_s29, %s4832_s29   ;;  %s3226_s28 = sphi %s3289_s28, %s4831_s28   ;;  %s207_s10 = int_to_ptr.hbm [resolvable:$true] %s206_s10 }
   0xe   : > { %p2532_p0 = scmp.ge.s32.totalorder %s3238_s8, 1  ;;  %p54_p1 = scmp.eq.s32.totalorder %s3313_s11, 0 }
   0xf   : > { %p195_p2 = scmp.lt.s32.totalorder %s3238_s8, 3  ;;  %s3241_s13 = smov [#allocation7]  }
  0x10   : > { %s208_s14 = sshll.u32 %s3241_s13, 4  ;;  %s223_s17 = sshll.u32 %s4457_s4, 4  ;;  %s209_s14 = int_to_ptr.vmem [resolvable:$true] %s208_s14  ;;  %s224_s17 = int_to_ptr.hbm [resolvable:$true] %s223_s17 }
  0x11   : > { %p3318_p3 = pnand %p2532_p0, %p195_p2  ;;  %s241_s21 = sshll.u32 %s4459_s6, 4  ;;  %s242_s21 = int_to_ptr.hbm [resolvable:$true] %s241_s21 }
  0x12   : > { %s3242_s22 = smov [#allocation9]   ;;  %s3243_s24 = smov 128  }
  0x13   : > { %p2918_p4 = pneg %p3318_p3  ;;  %s225_s23 = sshll.u32 %s3242_s22, 4  ;;  %s226_s23 = int_to_ptr.vmem [resolvable:$true] %s225_s23 }
  0x14   : > { %s3244_s25 = smov 8   ;;  %s3245_s26 = smov [#allocation10]  }
  0x15   : > { %p3330_p6 = pnand %p2918_p4, %p54_p1  ;;  %s243_s27 = sshll.u32 %s3245_s26, 4  ;;  %s244_s27 = int_to_ptr.vmem [resolvable:$true] %s243_s27 }
  0x16   : > { %s2531_s0 = sadd.s32 4294967294, %s3238_s8   ;;  %s3345_s9 = sadd.s32 1, %s3238_s8  }
  0x17   : > { %2921 = dma.hbm_to_vmem [thread:$0]  (!%p3330_p6), %s207_s10, 4096, %s209_s14, [#allocation8], %s3243_s24, %s3243_s24, %s3244_s25  }
  0x18   : > { %2924 = dma.hbm_to_vmem [thread:$0]  (!%p3330_p6), %s224_s17, 4096, %s226_s23, [#allocation8], %s3243_s24, %s3243_s24, %s3244_s25  }
  0x19   : > { %2927 = dma.hbm_to_vmem [thread:$0]  (!%p3330_p6), %s242_s21, 256, %s244_s27, [#allocation11]  }
  0x1a   : > { %s40_s13 = sadd.s32 1, %s3234_s30  ;;  %s37_s10 = ssub.s32 %s3238_s8, %s3345_s9 }
  0x1b   : > { %p47_p7 = scmp.ne.s32.totalorder %s3234_s30, %s3230_s29  ;;  %p38_p8 = scmp.eq.s32.totalorder %s37_s10, 0 }
  0x1c   : > { %p48_p9 = scmp.eq.s32.totalorder %s3238_s8, 0  ;;  %p53_p10 = scmp.ne.s32.totalorder %s3230_s29, %s3226_s28 }
  0x1d   : > { %p182_p11 = scmp.eq.s32.totalorder %s3313_s11, 1  ;;  %p188_p0 = scmp.eq.s32.totalorder %s2531_s0, 1 }
  0x1e   : > { %s3357_s14 = scalar_select %p38_p8, %s3234_s30, %s40_s13  }
  0x1f   : > { %p3361_p12 = por %p54_p1, %p53_p10  ;;  %p3365_p13 = por %p182_p11, %p47_p7 }
  0x20   : > { %p49_p2 = por %p48_p9, %p47_p7  ;;  %s254_s17 = sand.u32 1, %s3234_s30  }
  0x21   : > { %p3370_p4 = por %p188_p0, %p53_p10  ;;  %p2939_p6 = scmp.lt.s32.totalorder %s3238_s8, 2 }
  0x22   : > { %s2537_s19 = sshll.u32 %s254_s17, 4  ;;  %s2836_s20 = sshll.u32 %s3238_s8, 4 }
  0x23   : > { %s263_s23 = scalar_lea.hbm %s4454_s1, %s2836_s20  ;;  %s258_s25 = scalar_lea.vmem [#allocation4], %s2537_s19 }
  0x24   : > { %s265_s24 = sshll.u32 %s263_s23, 4  ;;  %s267_s26 = sshll.u32 %s258_s25, 4  ;;  %s266_s24 = int_to_ptr.hbm [resolvable:$true] %s265_s24  ;;  %s268_s26 = int_to_ptr.vmem [resolvable:$true] %s267_s26 }
  0x25   : > { %p3379_p8 = pnand %p2939_p6, %p49_p2  ;;  %s255_s0 = scalar_lea.sflag [#allocation5], %s254_s17 }
  0x26   : > { %s3132_s13 = sshra.s32 %s266_s24, 4  ;;  %s3139_s19 = scalar_lea.hbm %s4454_s1, 32  ;;  %s3133_s13 = int_to_ptr.hbm [resolvable:$true] %s3132_s13 }
  0x27   : > { %s3134_s10 = scalar_lea.hbm %s3133_s13, 16  ;;  %p3136_p9 = pneg %p3379_p8 }
  0x28   : > { %p3135_p7 = scmp.ne.s32.totalorder %s3133_s13, %s3134_s10  ;;  %p3140_p0 = scmp.lt.s32.totalorder %s3133_s13, %s4454_s1 }
  0x29   : > { %p3141_p2 = scmp.lt.s32.totalorder %s3139_s19, %s3134_s10 }
  0x2a   : > { %p3137_p10 = pnand %p3136_p9, %p3135_p7 }
  0x2b   : > { %p3142_p6 = por %p3141_p2, %p3140_p0 }
  0x2c   : > { %p3138_p11 = pneg %p3137_p10 }
  0x2e   : > { %p3143_p5 = pnand %p3142_p6, %p3138_p11 }
  0x30   : > { %3146 = shalt.err (!%p3143_p5)
}
  0x31   : > { %2931 = dma.hbm_to_vmem [thread:$0]  (!%p3379_p8), %s266_s24, 256, %s268_s26, %s255_s0  }
  0x32   : > { %276 = sbr.rel (%p3318_p3) target bundleno = 1980 (0x7bc), region = 44 }
  0x37   : > { %s3396_s17 = sand.u32 1, %s3230_s29  }
  0x38   : > { %s2541_s25 = sshll.u32 %s3396_s17, 4  ;;  %s279_s20 = scalar_lea.sflag [#allocation5], %s3396_s17 }
  0x39   : > { %s3402_s13 = scalar_lea.vmem [#allocation4], %s2541_s25 }
  0x3a   : > { %3209 = dma.done.wait (%p3361_p12), %s279_s20, 256  }
  0x3b   : > { %3211 = vsyncadd (%p3361_p12), %s279_s20, 4294967040 }
  0x3c   : > { %3213 = dma.done.wait (%p54_p1), [#allocation8], 8192  }
  0x3d   : > { %3215 = vsyncadd (%p54_p1), [#allocation8], 4294959104 }
  0x3e   : > { %3217 = dma.done.wait (%p54_p1), [#allocation11], 256  }
  0x3f   : > { %3219 = vsyncadd (%p54_p1), [#allocation11], 4294967040  ;;  %v2604_v0 = vld [vmem:[#allocation7 + $0x70] sm:$0xf]  ;;  %v2852_v1 = vld [vmem:[#allocation7 + $0x74] sm:$0xf0] }
  0x40   : > { %v2668_v2 = vld [vmem:[#allocation7 + $0xf0] sm:$0xf]  ;;  %v3416_v3 = vor.u32 %v2852_v1, %v2604_v0  ;;  %v2868_v4 = vld [vmem:[#allocation7 + $0xf4] sm:$0xf0]  ;;  %v2851_v5 = vld [vmem:[#allocation7 + $0x74] sm:$0xf] }
  0x41   : > { %v2606_v6 = vld [vmem:[#allocation7 + $0x78] sm:$0xf0]  ;;  %v3418_v7 = vor.u32 %v2868_v4, %v2668_v2  ;;  %v2867_v9 = vld [vmem:[#allocation7 + $0xf4] sm:$0xf]  ;;  %v2596_v11 = vld [vmem:[#allocation7 + $0x60] sm:$0xf] }
  0x42   : > { %4611 = vst [vmem:[#allocation18_spill] sm:$0xff] %v3416_v3  ;;  %v3420_v8 = vor.u32 %v2851_v5, %v2606_v6  ;;  %v2670_v10 = vld [vmem:[#allocation7 + $0xf8] sm:$0xf0]  ;;  %564 = vmatpush.bf16.msra.mxu0 %v3416_v3  ;;  %v2850_v13 = vld [vmem:[#allocation7 + $0x64] sm:$0xf0]  ;;  %s923_s27 = sld [smem:[#allocation3]] }
  0x43   : > { %4612 = vst [vmem:[#allocation19_spill] sm:$0xff] %v3418_v7  ;;  %v3423_v12 = vor.u32 %v2867_v9, %v2670_v10  ;;  %v2660_v14 = vld [vmem:[#allocation7 + $0xe0] sm:$0xf]  ;;  %v2866_v15 = vld [vmem:[#allocation7 + $0xe4] sm:$0xf0]  ;;  %577 = vmatpush.bf16.msra.mxu1 %v3418_v7  ;;  %v3427_v16 = vor.u32 %v2850_v13, %v2596_v11  ;;  %s2806_s0 = sld [smem:[#allocation3 + $0x1]] }
  0x44   : > { %4613 = vst [vmem:[#allocation20_spill] sm:$0xff] %v3420_v8  ;;  %590 = vmatpush.bf16.msra.mxu2 %v3420_v8  ;;  %v3429_v17 = vor.u32 %v2866_v15, %v2660_v14  ;;  %v2849_v18 = vld [vmem:[#allocation7 + $0x64] sm:$0xf]  ;;  %v2598_v19 = vld [vmem:[#allocation7 + $0x68] sm:$0xf0]  ;;  %s4053_s10 = sld [smem:[#allocation3 + $0x2]] }
  0x45   : > { %4614 = vst [vmem:[#allocation21_spill] sm:$0xff] %v3423_v12  ;;  %v2865_v20 = vld [vmem:[#allocation7 + $0xe4] sm:$0xf]  ;;  %603 = vmatpush.bf16.msra.mxu3 %v3423_v12  ;;  %v3432_v21 = vor.u32 %v2849_v18, %v2598_v19  ;;  %v2662_v22 = vld [vmem:[#allocation7 + $0xe8] sm:$0xf0]  ;;  %s4055_s21 = sld [smem:[#allocation3 + $0x4]] }
  0x46   : > { %4615 = vst [vmem:[#allocation22_spill] sm:$0xff] %v3427_v16  ;;  %v2588_v23 = vld [vmem:[#allocation7 + $0x50] sm:$0xf]  ;;  %v2848_v24 = vld [vmem:[#allocation7 + $0x54] sm:$0xf0]  ;;  %v3434_v25 = vor.u32 %v2865_v20, %v2662_v22  ;;  %565 = vmatpush.bf16.msra.mxu0 %v3427_v16  ;;  %s4057_s19 = sld [smem:[#allocation3 + $0x3]] }
  0x47   : > { %4616 = vst [vmem:[#allocation23_spill] sm:$0xff] %v3429_v17  ;;  %v2652_v26 = vld [vmem:[#allocation7 + $0xd0] sm:$0xf]  ;;  %v2864_v27 = vld [vmem:[#allocation7 + $0xd4] sm:$0xf0]  ;;  %v3437_v29 = vor.u32 %v2848_v24, %v2588_v23  ;;  %578 = vmatpush.bf16.msra.mxu1 %v3429_v17  ;;  %s4059_s22 = sld [smem:[#allocation3 + $0x5]] }
  0x48   : > { %4617 = vst [vmem:[#allocation24_spill] sm:$0xff] %v3432_v21  ;;  %v2847_v28 = vld [vmem:[#allocation7 + $0x54] sm:$0xf]  ;;  %v2590_v30 = vld [vmem:[#allocation7 + $0x58] sm:$0xf0]  ;;  %591 = vmatpush.bf16.msra.mxu2 %v3432_v21  ;;  %v3441_v33 = vor.u32 %v2864_v27, %v2652_v26  ;;  %s2825_s23 = sld [smem:[#allocation3 + $0x6]] }
  0x49   : > { %4618 = vst [vmem:[#allocation25_spill] sm:$0xff] %v3434_v25  ;;  %v2863_v31 = vld [vmem:[#allocation7 + $0xd4] sm:$0xf]  ;;  %v2654_v32 = vld [vmem:[#allocation7 + $0xd8] sm:$0xf0]  ;;  %v3443_v34 = vor.u32 %v2847_v28, %v2590_v30  ;;  %604 = vmatpush.bf16.msra.mxu3 %v3434_v25  ;;  %s2826_s20 = sld [smem:[#allocation3 + $0x7]] }
  0x4a   : > { %4619 = vst [vmem:[#allocation26_spill] sm:$0xff] %v3437_v29  ;;  %v2580_v35 = vld [vmem:[#allocation7 + $0x40] sm:$0xf]  ;;  %v2846_v36 = vld [vmem:[#allocation7 + $0x44] sm:$0xf0]  ;;  %v3446_v38 = vor.u32 %v2863_v31, %v2654_v32  ;;  %566 = vmatpush.bf16.msra.mxu0 %v3437_v29  ;;  %s326_s26 = scalar_lea.vmem [#allocation12], %s2541_s25 }
  0x4b   : > { %4620 = vst [vmem:[#allocation27_spill] sm:$0xff] %v3441_v33  ;;  %v2644_v37 = vld [vmem:[#allocation7 + $0xc0] sm:$0xf]  ;;  %v2862_v39 = vld [vmem:[#allocation7 + $0xc4] sm:$0xf0]  ;;  %v3449_v44 = vor.u32 %v2846_v36, %v2580_v35  ;;  %579 = vmatpush.bf16.msra.mxu1 %v3441_v33 }
  0x4c   : > { %4621 = vst [vmem:[#allocation28_spill] sm:$0xff] %v3443_v34  ;;  %v2845_v40 = vld [vmem:[#allocation7 + $0x44] sm:$0xf]  ;;  %v2582_v41 = vld [vmem:[#allocation7 + $0x48] sm:$0xf0]  ;;  %592 = vmatpush.bf16.msra.mxu2 %v3443_v34  ;;  %v3453_v45 = vor.u32 %v2862_v39, %v2644_v37 }
  0x4d   : > { %4622 = vst [vmem:[#allocation29_spill] sm:$0xff] %v3446_v38  ;;  %v2861_v42 = vld [vmem:[#allocation7 + $0xc4] sm:$0xf]  ;;  %v2646_v43 = vld [vmem:[#allocation7 + $0xc8] sm:$0xf0]  ;;  %v3455_v46 = vor.u32 %v2845_v40, %v2582_v41  ;;  %605 = vmatpush.bf16.msra.mxu3 %v3446_v38 }
  0x4e   : > { %4623 = vst [vmem:[#allocation30_spill] sm:$0xff] %v3449_v44  ;;  %v2572_v47 = vld [vmem:[#allocation7 + $0x30] sm:$0xf]  ;;  %v2844_v48 = vld [vmem:[#allocation7 + $0x34] sm:$0xf0]  ;;  %v3458_v50 = vor.u32 %v2861_v42, %v2646_v43  ;;  %567 = vmatpush.bf16.msra.mxu0 %v3449_v44 }
  0x4f   : > { %4624 = vst [vmem:[#allocation31_spill] sm:$0xff] %v3453_v45  ;;  %v2636_v49 = vld [vmem:[#allocation7 + $0xb0] sm:$0xf]  ;;  %v2860_v51 = vld [vmem:[#allocation7 + $0xb4] sm:$0xf0]  ;;  %v3461_v56 = vor.u32 %v2844_v48, %v2572_v47  ;;  %580 = vmatpush.bf16.msra.mxu1 %v3453_v45 }
  0x50   : > { %4625 = vst [vmem:[#allocation32_spill] sm:$0xff] %v3455_v46  ;;  %v2843_v52 = vld [vmem:[#allocation7 + $0x34] sm:$0xf]  ;;  %v2574_v53 = vld [vmem:[#allocation7 + $0x38] sm:$0xf0]  ;;  %593 = vmatpush.bf16.msra.mxu2 %v3455_v46  ;;  %v3465_v57 = vor.u32 %v2860_v51, %v2636_v49 }
  0x51   : > { %4626 = vst [vmem:[#allocation33_spill] sm:$0xff] %v3458_v50  ;;  %v2859_v54 = vld [vmem:[#allocation7 + $0xb4] sm:$0xf]  ;;  %v2638_v55 = vld [vmem:[#allocation7 + $0xb8] sm:$0xf0]  ;;  %v3467_v58 = vor.u32 %v2843_v52, %v2574_v53  ;;  %606 = vmatpush.bf16.msra.mxu3 %v3458_v50 }
  0x52   : > { %4627 = vst [vmem:[#allocation34_spill] sm:$0xff] %v3461_v56  ;;  %v2564_v59 = vld [vmem:[#allocation7 + $0x20] sm:$0xf]  ;;  %v2842_v60 = vld [vmem:[#allocation7 + $0x24] sm:$0xf0]  ;;  %v3470_v62 = vor.u32 %v2859_v54, %v2638_v55  ;;  %568 = vmatpush.bf16.msra.mxu0 %v3461_v56 }
  0x53   : > { %4628 = vst [vmem:[#allocation35_spill] sm:$0xff] %v3465_v57  ;;  %v2628_v61 = vld [vmem:[#allocation7 + $0xa0] sm:$0xf]  ;;  %v2858_v63 = vld [vmem:[#allocation7 + $0xa4] sm:$0xf0]  ;;  %v3473_v5 = vor.u32 %v2842_v60, %v2564_v59  ;;  %581 = vmatpush.bf16.msra.mxu1 %v3465_v57 }
  0x54   : > { %4629 = vst [vmem:[#allocation36_spill] sm:$0xff] %v3467_v58  ;;  %v2841_v0 = vld [vmem:[#allocation7 + $0x24] sm:$0xf]  ;;  %v2566_v1 = vld [vmem:[#allocation7 + $0x28] sm:$0xf0]  ;;  %594 = vmatpush.bf16.msra.mxu2 %v3467_v58  ;;  %v3477_v6 = vor.u32 %v2858_v63, %v2628_v61 }
  0x55   : > { %4630 = vst [vmem:[#allocation37_spill] sm:$0xff] %v3470_v62  ;;  %v2857_v2 = vld [vmem:[#allocation7 + $0xa4] sm:$0xf]  ;;  %v2630_v4 = vld [vmem:[#allocation7 + $0xa8] sm:$0xf0]  ;;  %v3479_v9 = vor.u32 %v2841_v0, %v2566_v1  ;;  %607 = vmatpush.bf16.msra.mxu3 %v3470_v62 }
  0x56   : > { %4631 = vst [vmem:[#allocation38_spill] sm:$0xff] %v3473_v5  ;;  %v2556_v10 = vld [vmem:[#allocation7 + $0x10] sm:$0xf]  ;;  %v2840_v11 = vld [vmem:[#allocation7 + $0x14] sm:$0xf0]  ;;  %v3482_v14 = vor.u32 %v2857_v2, %v2630_v4  ;;  %569 = vmatpush.bf16.msra.mxu0 %v3473_v5 }
  0x57   : > { %4632 = vst [vmem:[#allocation39_spill] sm:$0xff] %v3477_v6  ;;  %v2620_v13 = vld [vmem:[#allocation7 + $0x90] sm:$0xf]  ;;  %v2856_v15 = vld [vmem:[#allocation7 + $0x94] sm:$0xf0]  ;;  %v3485_v23 = vor.u32 %v2840_v11, %v2556_v10  ;;  %582 = vmatpush.bf16.msra.mxu1 %v3477_v6 }
  0x58   : > { %4633 = vst [vmem:[#allocation40_spill] sm:$0xff] %v3479_v9  ;;  %v2839_v18 = vld [vmem:[#allocation7 + $0x14] sm:$0xf]  ;;  %v2558_v19 = vld [vmem:[#allocation7 + $0x18] sm:$0xf0]  ;;  %595 = vmatpush.bf16.msra.mxu2 %v3479_v9  ;;  %v3489_v24 = vor.u32 %v2856_v15, %v2620_v13 }
  0x59   : > { %4634 = vst [vmem:[#allocation41_spill] sm:$0xff] %v3482_v14  ;;  %v2855_v20 = vld [vmem:[#allocation7 + $0x94] sm:$0xf]  ;;  %v2622_v22 = vld [vmem:[#allocation7 + $0x98] sm:$0xf0]  ;;  %v3491_v26 = vor.u32 %v2839_v18, %v2558_v19  ;;  %608 = vmatpush.bf16.msra.mxu3 %v3482_v14 }
  0x5a   : > { %4635 = vst [vmem:[#allocation42_spill] sm:$0xff] %v3485_v23  ;;  %v2548_v27 = vld [vmem:[#allocation7] sm:$0xf]  ;;  %v2838_v28 = vld [vmem:[#allocation7 + $0x4] sm:$0xf0]  ;;  %v3494_v31 = vor.u32 %v2855_v20, %v2622_v22  ;;  %570 = vmatpush.bf16.msra.mxu0 %v3485_v23 }
  0x5b   : > { %4636 = vst [vmem:[#allocation43_spill] sm:$0xff] %v3489_v24  ;;  %v2612_v30 = vld [vmem:[#allocation7 + $0x80] sm:$0xf]  ;;  %v2854_v32 = vld [vmem:[#allocation7 + $0x84] sm:$0xf0]  ;;  %v3497_v40 = vor.u32 %v2838_v28, %v2548_v27  ;;  %583 = vmatpush.bf16.msra.mxu1 %v3489_v24 }
  0x5c   : > { %4637 = vst [vmem:[#allocation44_spill] sm:$0xff] %v3491_v26  ;;  %v2837_v35 = vld [vmem:[#allocation7 + $0x4] sm:$0xf]  ;;  %v2550_v36 = vld [vmem:[#allocation7 + $0x8] sm:$0xf0]  ;;  %596 = vmatpush.bf16.msra.mxu2 %v3491_v26  ;;  %v3502_v42 = vor.u32 %v2854_v32, %v2612_v30 }
  0x5d   : > { %4638 = vst [vmem:[#allocation45_spill] sm:$0xff] %v3494_v31  ;;  %v2853_v37 = vld [vmem:[#allocation7 + $0x84] sm:$0xf]  ;;  %v2614_v39 = vld [vmem:[#allocation7 + $0x88] sm:$0xf0]  ;;  %v3504_v43 = vor.u32 %v2837_v35, %v2550_v36  ;;  %609 = vmatpush.bf16.msra.mxu3 %v3494_v31 }
  0x5e   : > { %4639 = vst [vmem:[#allocation46_spill] sm:$0xff] %v3497_v40  ;;  %v395_v41 = vld [vmem:[%s3402_s13] sm:$0xff]  ;;  %v396_v47 = vld [vmem:[%s3402_s13 + $0x8] sm:$0xff]  ;;  %v3508_v48 = vor.u32 %v2853_v37, %v2614_v39  ;;  %571 = vmatpush.bf16.msra.mxu0 %v3497_v40  ;;  %s2901_s13 = sshll.u32 %s3313_s11, 4  ;;  %s2416_s11 = scalar_lea.sflag [#allocation6], %s3396_s17 }
  0x5f   : > { %4640 = vst [vmem:[#allocation47_spill] sm:$0xff] %v3502_v42  ;;  %v397_v49 = vpack.c.bf16 %v395_v41, %v395_v41  ;;  %v398_v51 = vpack.c.bf16 %v396_v47, %v396_v47  ;;  %584 = vmatpush.bf16.msra.mxu1 %v3502_v42  ;;  %v391_v52 = vld [vmem:[%s4456_s3] sm:$0x3]  ;;  %v2734_v53 = vld [vmem:[#allocation9 + $0x70] sm:$0xf]  ;;  %s2427_s24 = scalar_lea.hbm %s4460_s7, %s2901_s13 }
  0x60   : > { %4641 = vst [vmem:[#allocation48_spill] sm:$0xff] %v3504_v43  ;;  %597 = vmatpush.bf16.msra.mxu2 %v3504_v43  ;;  %v2884_v54 = vld [vmem:[#allocation9 + $0x74] sm:$0xf0]  ;;  %v2883_v55 = vld [vmem:[#allocation9 + $0x74] sm:$0xf]  ;;  %v3521_v63 = vperm.slane %v391_v52, 0 }
  0x61   : > { %4642 = vst [vmem:[#allocation49_spill] sm:$0xff] %v3508_v48  ;;  %610 = vmatpush.bf16.msra.mxu3 %v3508_v48  ;;  %572 = vmatmul.bf16.vlgmr.msra.gmra.mxu0 %v397_v49  ;;  %v3517_v59 = vor.u32 %v2884_v54, %v2734_v53  ;;  %v2736_v60 = vld [vmem:[#allocation9 + $0x78] sm:$0xf0]  ;;  %v2726_v0 = vld [vmem:[#allocation9 + $0x60] sm:$0xf]  ;;  %v3538_v39 = vperm.slane %v391_v52, 1 }
  0x62   : > { %585 = vmatmul.bf16.vlgmr.msra.gmra.mxu1 %v398_v51  ;;  %v3519_v61 = vor.u32 %v2883_v55, %v2736_v60  ;;  %4643 = vst [vmem:[#allocation50_spill] sm:$0xff] %v3521_v63  ;;  %v2882_v1 = vld [vmem:[#allocation9 + $0x64] sm:$0xf0]  ;;  %v2881_v2 = vld [vmem:[#allocation9 + $0x64] sm:$0xf] }
  0x63   : > { %598 = vmatmul.bf16.vlgmr.msra.gmra.mxu2 %v397_v49  ;;  %871 = vmatpush.bf16.msrb.mxu0 %v3517_v59  ;;  %v3525_v4 = vor.u32 %v2882_v1, %v2726_v0  ;;  %v2728_v10 = vld [vmem:[#allocation9 + $0x68] sm:$0xf0]  ;;  %v2798_v15 = vld [vmem:[#allocation9 + $0xf0] sm:$0xf]  ;;  %v2900_v18 = vld [vmem:[#allocation9 + $0xf4] sm:$0xf0] }
  0x64   : > { %611 = vmatmul.bf16.vlgmr.msra.gmra.mxu3 %v398_v51  ;;  %897 = vmatpush.bf16.msrb.mxu2 %v3519_v61  ;;  %v3527_v13 = vor.u32 %v2881_v2, %v2728_v10  ;;  %v2899_v19 = vld [vmem:[#allocation9 + $0xf4] sm:$0xf]  ;;  %v3531_v27 = vor.u32 %v2900_v18, %v2798_v15  ;;  %v2800_v28 = vld [vmem:[#allocation9 + $0xf8] sm:$0xf0]  ;;  %v2718_v32 = vld [vmem:[#allocation9 + $0x50] sm:$0xf] }
  0x65   : > { %4644 = vst [vmem:[#allocation51_spill] sm:$0xff] %v3525_v4  ;;  %v3534_v30 = vor.u32 %v2899_v19, %v2800_v28  ;;  %v2880_v35 = vld [vmem:[#allocation9 + $0x54] sm:$0xf0]  ;;  %v2879_v36 = vld [vmem:[#allocation9 + $0x54] sm:$0xf] }
  0x66   : > { %4645 = vst [vmem:[#allocation52_spill] sm:$0xff] %v3527_v13  ;;  %884 = vmatpush.bf16.msrb.mxu1 %v3531_v27  ;;  %v3541_v41 = vor.u32 %v2880_v35, %v2718_v32  ;;  %v2720_v47 = vld [vmem:[#allocation9 + $0x58] sm:$0xf0]  ;;  %v2790_v51 = vld [vmem:[#allocation9 + $0xe0] sm:$0xf] }
  0x67   : > { %872 = vmatpush.bf16.msrb.mxu0 %v3525_v4  ;;  %4646 = vst [vmem:[#allocation53_spill] sm:$0xff] %v3531_v27  ;;  %910 = vmatpush.bf16.msrb.mxu3 %v3534_v30  ;;  %v3544_v49 = vor.u32 %v2879_v36, %v2720_v47  ;;  %v2898_v53 = vld [vmem:[#allocation9 + $0xe4] sm:$0xf0]  ;;  %v2897_v54 = vld [vmem:[#allocation9 + $0xe4] sm:$0xf] }
  0x68   : > { %898 = vmatpush.bf16.msrb.mxu2 %v3527_v13  ;;  %4647 = vst [vmem:[#allocation54_spill] sm:$0xff] %v3534_v30  ;;  %v3550_v60 = vor.u32 %v2898_v53, %v2790_v51  ;;  %v2792_v52 = vld [vmem:[#allocation9 + $0xe8] sm:$0xf0]  ;;  %v2710_v1 = vld [vmem:[#allocation9 + $0x40] sm:$0xf] }
  0x69   : > { %4648 = vst [vmem:[#allocation55_spill] sm:$0xff] %v3538_v39  ;;  %v3553_v0 = vor.u32 %v2897_v54, %v2792_v52  ;;  %v2878_v2 = vld [vmem:[#allocation9 + $0x44] sm:$0xf0]  ;;  %v2877_v10 = vld [vmem:[#allocation9 + $0x44] sm:$0xf] }
  0x6a   : > { %4649 = vst [vmem:[#allocation56_spill] sm:$0xff] %v3541_v41  ;;  %885 = vmatpush.bf16.msrb.mxu1 %v3550_v60  ;;  %v3558_v18 = vor.u32 %v2878_v2, %v2710_v1  ;;  %v2712_v19 = vld [vmem:[#allocation9 + $0x48] sm:$0xf0]  ;;  %v2782_v35 = vld [vmem:[#allocation9 + $0xd0] sm:$0xf] }
  0x6b   : > { %4650 = vst [vmem:[#allocation57_spill] sm:$0xff] %v3544_v49  ;;  %873 = vmatpush.bf16.msrb.mxu0 %v3541_v41  ;;  %911 = vmatpush.bf16.msrb.mxu3 %v3553_v0  ;;  %v3562_v32 = vor.u32 %v2877_v10, %v2712_v19  ;;  %v2896_v36 = vld [vmem:[#allocation9 + $0xd4] sm:$0xf0]  ;;  %v2895_v47 = vld [vmem:[#allocation9 + $0xd4] sm:$0xf] }
  0x6c   : > { %4651 = vst [vmem:[#allocation58_spill] sm:$0xff] %v3550_v60  ;;  %899 = vmatpush.bf16.msrb.mxu2 %v3544_v49  ;;  %v3567_v54 = vor.u32 %v2896_v36, %v2782_v35  ;;  %v2784_v52 = vld [vmem:[#allocation9 + $0xd8] sm:$0xf0]  ;;  %v2876_v10 = vld [vmem:[#allocation9 + $0x34] sm:$0xf0] }
  0x6d   : > { %4652 = vst [vmem:[#allocation59_spill] sm:$0xff] %v3553_v0  ;;  %v3572_v2 = vor.u32 %v2895_v47, %v2784_v52  ;;  %v2875_v19 = vld [vmem:[#allocation9 + $0x34] sm:$0xf]  ;;  %v2704_v35 = vld [vmem:[#allocation9 + $0x38] sm:$0xf0] }
  0x6e   : > { %4653 = vst [vmem:[#allocation60_spill] sm:$0xff] %v3558_v18  ;;  %886 = vmatpush.bf16.msrb.mxu1 %v3567_v54  ;;  %v2892_v49 = vld [vmem:[#allocation9 + $0xb4] sm:$0xf0] }
  0x6f   : > { %4654 = vst [vmem:[#allocation61_spill] sm:$0xff] %v3562_v32  ;;  %874 = vmatpush.bf16.msrb.mxu0 %v3558_v18  ;;  %912 = vmatpush.bf16.msrb.mxu3 %v3572_v2  ;;  %v2696_v18 = vld [vmem:[#allocation9 + $0x28] sm:$0xf0] }
  0x70   : > { %4655 = vst [vmem:[#allocation62_spill] sm:$0xff] %v3567_v54  ;;  %900 = vmatpush.bf16.msrb.mxu2 %v3562_v32  ;;  %v2776_v54 = vld [vmem:[#allocation9 + $0xc8] sm:$0xf0]  ;;  %v2694_v32 = vld [vmem:[#allocation9 + $0x20] sm:$0xf] }
  0x71   : > { %4656 = vst [vmem:[#allocation63_spill] sm:$0xff] %v3572_v2 }
  0xde   : > { %v573_v11 = vpop.f32.mrf.mxu0 }
  0xdf   : > { %v574_v20 = vadd.f32 %v573_v11, %v3521_v63  ;;  %v586_v22 = vpop.f32.mrf.mxu1 }
  0xe1   : > { %v3536_v37 = vadd.f32 %v586_v22, %v574_v20 }
  0xe3   : > { %v3547_v55 = vmul.f32 0.70710677, %v3536_v37 }
  0xe5   : > { %v620_v11 = vmul.f32 %v3547_v55, %v3547_v55 }
  0xe6   : > { %v599_v15 = vpop.f32.mrf.mxu2  ;;  %v575_v28 = vpop.f32.mrf.mxu0 }
  0xe7   : > { %v600_v20 = vadd.f32 %v599_v15, %v3538_v39  ;;  %v612_v22 = vpop.f32.mrf.mxu3  ;;  %v3564_v51 = vmin.f32 %v620_v11, 16.0  ;;  %v588_v53 = vpop.f32.mrf.mxu1  ;;  %v2702_v15 = vld [vmem:[#allocation9 + $0x30] sm:$0xf]  ;;  %v2894_v39 = vld [vmem:[#allocation9 + $0xc4] sm:$0xf0] }
  0xe8   : > { %v3577_v53 = vor.u32 %v2876_v10, %v2702_v15  ;;  %v2893_v10 = vld [vmem:[#allocation9 + $0xc4] sm:$0xf] }
  0xe9   : > { %v3569_v1 = vadd.f32 %v612_v22, %v600_v20  ;;  %v622_v28 = vmul.f32 2.1237322e-06, %v3564_v51  ;;  %v633_v11 = vmul.f32 3.8918573e-05, %v3564_v51  ;;  %v3583_v20 = vor.u32 %v2875_v19, %v2704_v35  ;;  %v2774_v22 = vld [vmem:[#allocation9 + $0xc0] sm:$0xf] }
  0xea   : > { %4657 = vst [vmem:[#allocation64_spill] sm:$0xff] %v3577_v53  ;;  %875 = vmatpush.bf16.msrb.mxu0 %v3577_v53  ;;  %v3589_v15 = vor.u32 %v2894_v39, %v2774_v22  ;;  %v2873_v53 = vld [vmem:[#allocation9 + $0x24] sm:$0xf] }
  0xeb   : > { %v3580_v36 = vmul.f32 0.70710677, %v3569_v1  ;;  %4658 = vst [vmem:[#allocation65_spill] sm:$0xff] %v3583_v20  ;;  %v623_v47 = vadd.f32 0.00028619796, %v622_v28  ;;  %901 = vmatpush.bf16.msrb.mxu2 %v3583_v20  ;;  %v3593_v28 = vor.u32 %v2893_v10, %v2776_v54  ;;  %v3600_v22 = vor.u32 %v2873_v53, %v2696_v18 }
  0xec   : > { %v634_v52 = vadd.f32 0.001143296, %v633_v11  ;;  %4659 = vst [vmem:[#allocation66_spill] sm:$0xff] %v3589_v15  ;;  %v2874_v11 = vld [vmem:[#allocation9 + $0x24] sm:$0xf0]  ;;  %887 = vmatpush.bf16.msrb.mxu1 %v3589_v15 }
  0xed   : > { %v660_v63 = vmul.f32 %v3580_v36, %v3580_v36  ;;  %v624_v2 = vmul.f32 %v623_v47, %v3564_v51  ;;  %4660 = vst [vmem:[#allocation67_spill] sm:$0xff] %v3593_v28  ;;  %v3598_v39 = vor.u32 %v2874_v11, %v2694_v32  ;;  %v2766_v20 = vld [vmem:[#allocation9 + $0xb0] sm:$0xf]  ;;  %913 = vmatpush.bf16.msrb.mxu3 %v3593_v28  ;;  %v2872_v53 = vld [vmem:[#allocation9 + $0x14] sm:$0xf0] }
  0xee   : > { %v635_v19 = vmul.f32 %v634_v52, %v3564_v51  ;;  %v601_v35 = vpop.f32.mrf.mxu2  ;;  %4662 = vst [vmem:[#allocation69_spill] sm:$0xff] %v3600_v22  ;;  %v3603_v54 = vor.u32 %v2892_v49, %v2766_v20  ;;  %v2891_v52 = vld [vmem:[#allocation9 + $0xb4] sm:$0xf]  ;;  %v2688_v28 = vld [vmem:[#allocation9 + $0x18] sm:$0xf0] }
  0xef   : > { %v3595_v0 = vmin.f32 %v660_v63, 16.0  ;;  %v614_v60 = vpop.f32.mrf.mxu3  ;;  %4661 = vst [vmem:[#allocation68_spill] sm:$0xff] %v3598_v39  ;;  %v625_v47 = vadd.f32 0.0036580483, %v624_v2  ;;  %876 = vmatpush.bf16.msrb.mxu0 %v3598_v39  ;;  %902 = vmatpush.bf16.msrb.mxu2 %v3600_v22  ;;  %v2686_v2 = vld [vmem:[#allocation9 + $0x10] sm:$0xf] }
  0xf0   : > { %v636_v41 = vadd.f32 0.014752088, %v635_v19  ;;  %4663 = vst [vmem:[#allocation70_spill] sm:$0xff] %v3603_v54  ;;  %v2768_v60 = vld [vmem:[#allocation9 + $0xb8] sm:$0xf0]  ;;  %888 = vmatpush.bf16.msrb.mxu1 %v3603_v54  ;;  %v3614_v11 = vor.u32 %v2872_v53, %v2686_v2 }
  0xf1   : > { %v662_v10 = vmul.f32 2.1237322e-06, %v3595_v0  ;;  %v673_v63 = vmul.f32 3.8918573e-05, %v3595_v0  ;;  %v3610_v32 = vor.u32 %v2891_v52, %v2768_v60  ;;  %v2871_v19 = vld [vmem:[#allocation9 + $0x14] sm:$0xf]  ;;  %v626_v49 = vmul.f32 %v625_v47, %v3564_v51 }
  0xf2   : > { %v637_v18 = vmul.f32 %v636_v41, %v3564_v51  ;;  %4665 = vst [vmem:[#allocation72_spill] sm:$0xff] %v3614_v11  ;;  %v3617_v22 = vor.u32 %v2871_v19, %v2688_v28  ;;  %v2758_v41 = vld [vmem:[#allocation9 + $0xa0] sm:$0xf]  ;;  %v2890_v47 = vld [vmem:[#allocation9 + $0xa4] sm:$0xf0] }
  0xf3   : > { %4664 = vst [vmem:[#allocation71_spill] sm:$0xff] %v3610_v32  ;;  %v663_v20 = vadd.f32 0.00028619796, %v662_v10  ;;  %v674_v35 = vadd.f32 0.001143296, %v673_v63  ;;  %914 = vmatpush.bf16.msrb.mxu3 %v3610_v32  ;;  %877 = vmatpush.bf16.msrb.mxu0 %v3614_v11  ;;  %v3624_v2 = vor.u32 %v2890_v47, %v2758_v41 }
  0xf4   : > { %v638_v39 = vadd.f32 0.112945676, %v637_v18  ;;  %4666 = vst [vmem:[#allocation73_spill] sm:$0xff] %v3617_v22  ;;  %v2889_v10 = vld [vmem:[#allocation9 + $0xa4] sm:$0xf]  ;;  %903 = vmatpush.bf16.msrb.mxu2 %v3617_v22 }
  0xf5   : > { %v664_v52 = vmul.f32 %v663_v20, %v3595_v0  ;;  %v675_v60 = vmul.f32 %v674_v35, %v3595_v0  ;;  %v2760_v63 = vld [vmem:[#allocation9 + $0xa8] sm:$0xf0]  ;;  %4667 = vst [vmem:[#allocation74_spill] sm:$0xff] %v3624_v2  ;;  %v2678_v28 = vld [vmem:[#allocation9] sm:$0xf]  ;;  %889 = vmatpush.bf16.msrb.mxu1 %v3624_v2 }
  0xf6   : > { %v639_v54 = vmul.f32 %v638_v39, %v3564_v51  ;;  %v3626_v18 = vor.u32 %v2889_v10, %v2760_v63  ;;  %v2870_v53 = vld [vmem:[#allocation9 + $0x4] sm:$0xf0]  ;;  %v2869_v19 = vld [vmem:[#allocation9 + $0x4] sm:$0xf]  ;;  %v627_v32 = vadd.f32 0.05243302, %v626_v49 }
  0xf7   : > { %v676_v20 = vadd.f32 0.014752088, %v675_v60  ;;  %v3628_v15 = vor.u32 %v2870_v53, %v2678_v28  ;;  %v2680_v35 = vld [vmem:[#allocation9 + $0x8] sm:$0xf0]  ;;  %v665_v30 = vadd.f32 0.0036580483, %v664_v52 }
  0xf8   : > { %4668 = vst [vmem:[#allocation75_spill] sm:$0xff] %v3626_v18  ;;  %v640_v11 = vadd.f32 0.4994258, %v639_v54  ;;  %915 = vmatpush.bf16.msrb.mxu3 %v3626_v18  ;;  %v3632_v39 = vor.u32 %v2869_v19, %v2680_v35  ;;  %v2750_v41 = vld [vmem:[#allocation9 + $0x90] sm:$0xf] }
  0xf9   : > { %4669 = vst [vmem:[#allocation76_spill] sm:$0xff] %v3628_v15  ;;  %v677_v47 = vmul.f32 %v676_v20, %v3595_v0  ;;  %878 = vmatpush.bf16.msrb.mxu0 %v3628_v15  ;;  %v2888_v10 = vld [vmem:[#allocation9 + $0x94] sm:$0xf0]  ;;  %v2887_v63 = vld [vmem:[#allocation9 + $0x94] sm:$0xf]  ;;  %v666_v15 = vmul.f32 %v665_v30, %v3595_v0 }
  0xfa   : > { %4670 = vst [vmem:[#allocation77_spill] sm:$0xff] %v3632_v39  ;;  %v2752_v49 = vld [vmem:[#allocation9 + $0x98] sm:$0xf0]  ;;  %v641_v60 = vmul.f32 %v640_v11, %v3564_v51  ;;  %904 = vmatpush.bf16.msrb.mxu2 %v3632_v39  ;;  %v3638_v54 = vor.u32 %v2888_v10, %v2750_v41  ;;  %v2742_v28 = vld [vmem:[#allocation9 + $0x80] sm:$0xf]  ;;  %v628_v10 = vmul.f32 %v627_v32, %v3564_v51 }
  0xfb   : > { %v3640_v52 = vor.u32 %v2887_v63, %v2752_v49  ;;  %v2886_v53 = vld [vmem:[#allocation9 + $0x84] sm:$0xf0]  ;;  %v2885_v19 = vld [vmem:[#allocation9 + $0x84] sm:$0xf]  ;;  %v678_v35 = vadd.f32 0.112945676, %v677_v47 }
  0xfc   : > { %4671 = vst [vmem:[#allocation78_spill] sm:$0xff] %v3638_v54  ;;  %v2744_v18 = vld [vmem:[#allocation9 + $0x88] sm:$0xf0]  ;;  %v642_v20 = vadd.f32 1.0, %v641_v60  ;;  %890 = vmatpush.bf16.msrb.mxu1 %v3638_v54  ;;  %v3647_v11 = vor.u32 %v2886_v53, %v2742_v28  ;;  %v667_v49 = vadd.f32 0.05243302, %v666_v15 }
  0xfd   : > { %4672 = vst [vmem:[#allocation79_spill] sm:$0xff] %v3640_v52  ;;  %1117 = vmatpush.bf16.msra.mxu0 %v3416_v3  ;;  %916 = vmatpush.bf16.msrb.mxu3 %v3640_v52  ;;  %v3649_v41 = vor.u32 %v2885_v19, %v2744_v18  ;;  %v679_v47 = vmul.f32 %v678_v35, %v3595_v0  ;;  %v629_v30 = vadd.f32 0.18741608, %v628_v10 }
  0xfe   : > { %1143 = vmatpush.bf16.msra.mxu2 %v3420_v8  ;;  %4673 = vst [vmem:[#allocation80_spill] sm:$0xff] %v3647_v11  ;;  %2982 = vrcp.f32 %v642_v20  ;;  %v668_v28 = vmul.f32 %v667_v49, %v3595_v0  ;;  %v654_v35 = vand.u32 2147483648, %v642_v20  ;;  %vm648_vm1 = vweird.f32 %v642_v20 }
  0xff   : > { %4674 = vst [vmem:[#allocation81_spill] sm:$0xff] %v3649_v41  ;;  %v680_v63 = vadd.f32 0.4994258, %v679_v47  ;;  %v630_v15 = vmul.f32 %v629_v30, %v3564_v51 }
 0x100   : > { %891 = vmatpush.bf16.msrb.mxu1 %v3647_v11  ;;  %v669_v10 = vadd.f32 0.18741608, %v668_v28  ;;  %v655_v30 = vor.u32 1.1754944e-38, %v654_v35 }
 0x101   : > { %1118 = vmatpush.bf16.msra.mxu0 %v3427_v16  ;;  %917 = vmatpush.bf16.msrb.mxu3 %v3649_v41  ;;  %v681_v60 = vmul.f32 %v680_v63, %v3595_v0  ;;  %v631_v47 = vadd.f32 1.1283791, %v630_v15 }
 0x102   : > { %1144 = vmatpush.bf16.msra.mxu2 %v3432_v21 }
 0x103   : > { %v682_v32 = vadd.f32 1.0, %v681_v60  ;;  %v652_v60 = vand.u32 2147483647, %v642_v20  ;;  %v632_v15 = vmul.f32 %v631_v47, %v3547_v55 }
 0x104   : > { %1130 = vmatpush.bf16.msra.mxu1 %v3418_v7  ;;  %v2983_v18 = vpop.eup %2982 }
 0x105   : > { %1156 = vmatpush.bf16.msra.mxu3 %v3423_v12  ;;  %1119 = vmatpush.bf16.msra.mxu0 %v3437_v29  ;;  %v644_v53 = vmul.f32 %v2983_v18, %v642_v20  ;;  %2984 = vrcp.f32 %v682_v32  ;;  %vm649_vm0 = vweird.f32 %v2983_v18  ;;  %vm653_vm3 = vcmp.eq.f32.partialorder %v652_v60, 8.507059e+37 }
 0x106   : > { %1145 = vmatpush.bf16.msra.mxu2 %v3443_v34  ;;  %vm650_vm2 = vmor %vm648_vm1, %vm649_vm0  ;;  %vm688_vm5 = vweird.f32 %v682_v32 }
 0x107   : > { %v645_v19 = vsub.f32 1.0, %v644_v53  ;;  %v670_v53 = vmul.f32 %v669_v10, %v3595_v0  ;;  %v692_v0 = vand.u32 2147483647, %v682_v32 }
 0x108   : > { %1131 = vmatpush.bf16.msra.mxu1 %v3429_v17 }
 0x109   : > { %1157 = vmatpush.bf16.msra.mxu3 %v3434_v25  ;;  %1120 = vmatpush.bf16.msra.mxu0 %v3449_v44  ;;  %v646_v63 = vmul.f32 %v2983_v18, %v645_v19  ;;  %v671_v35 = vadd.f32 1.1283791, %v670_v53  ;;  %vm693_vm7 = vcmp.eq.f32.partialorder %v692_v0, 8.507059e+37  ;;  %v4681_v0 = vld [vmem:[#allocation61_spill] sm:$0xff] }
 0x10a   : > { %1146 = vmatpush.bf16.msra.mxu2 %v3455_v46 }
 0x10b   : > { %v2985_v51 = vpop.eup %2984  ;;  %v647_v49 = vadd.f32 %v2983_v18, %v646_v63  ;;  %v672_v60 = vmul.f32 %v671_v35, %v3580_v36  ;;  %v4680_v35 = vld [vmem:[#allocation60_spill] sm:$0xff] }
 0x10c   : > { %1132 = vmatpush.bf16.msra.mxu1 %v3441_v33  ;;  %v684_v28 = vmul.f32 %v2985_v51, %v682_v32  ;;  %v694_v33 = vand.u32 2147483648, %v682_v32  ;;  %vm689_vm4 = vweird.f32 %v2985_v51 }
 0x10d   : > { %1158 = vmatpush.bf16.msra.mxu3 %v3446_v38  ;;  %1121 = vmatpush.bf16.msra.mxu0 %v3461_v56  ;;  %v651_v19 = vsel %vm650_vm2, %v2983_v18, %v647_v49  ;;  %v616_v18 = vmul.f32 0.5, %v3536_v37  ;;  %vm690_vm6 = vmor %vm688_vm5, %vm689_vm4  ;;  %v617_v37 = vmul.f32 0.5, %v3569_v1  ;;  %v4675_v1 = vld [vmem:[#allocation54_spill] sm:$0xff] }
 0x10e   : > { %1147 = vmatpush.bf16.msra.mxu2 %v3467_v58  ;;  %v656_v38 = vsel %vm653_vm3, %v655_v30, %v651_v19  ;;  %v685_v63 = vsub.f32 1.0, %v684_v28  ;;  %v4677_v19 = vld [vmem:[#allocation57_spill] sm:$0xff] }
 0x10f   : > { %v657_v20 = vmul.f32 %v656_v38, %v632_v15  ;;  %v695_v38 = vor.u32 1.1754944e-38, %v694_v33  ;;  %v4676_v15 = vld [vmem:[#allocation56_spill] sm:$0xff] }
 0x110   : > { %1133 = vmatpush.bf16.msra.mxu1 %v3453_v45  ;;  %v686_v58 = vmul.f32 %v2985_v51, %v685_v63  ;;  %v4678_v63 = vld [vmem:[#allocation58_spill] sm:$0xff] }
 0x111   : > { %1159 = vmatpush.bf16.msra.mxu3 %v3458_v50  ;;  %1122 = vmatpush.bf16.msra.mxu0 %v3473_v5  ;;  %v2674_v10 = vclamps-f32 %v657_v20, 1.0  ;;  %v4679_v20 = vld [vmem:[#allocation59_spill] sm:$0xff] }
 0x112   : > { %1148 = vmatpush.bf16.msra.mxu2 %v3479_v9  ;;  %v687_v55 = vadd.f32 %v2985_v51, %v686_v58 }
 0x113   : > { %v700_v47 = vadd.f32 1.0, %v2674_v10  ;;  %v4682_v10 = vld [vmem:[#allocation62_spill] sm:$0xff] }
 0x114   : > { %1134 = vmatpush.bf16.msra.mxu1 %v3465_v57  ;;  %v691_v49 = vsel %vm690_vm6, %v2985_v51, %v687_v55  ;;  %v4683_v55 = vld [vmem:[#allocation63_spill] sm:$0xff] }
 0x115   : > { %1160 = vmatpush.bf16.msra.mxu3 %v3470_v62  ;;  %1123 = vmatpush.bf16.msra.mxu0 %v3485_v23  ;;  %v696_v30 = vsel %vm693_vm7, %v695_v38, %v691_v49  ;;  %v702_v53 = vmul.f32 %v700_v47, %v616_v18  ;;  %v4684_v18 = vld [vmem:[#allocation64_spill] sm:$0xff]  ;;  %v4685_v38 = vld [vmem:[#allocation65_spill] sm:$0xff]  ;;  %v4686_v47 = vld [vmem:[#allocation66_spill] sm:$0xff] }
 0x116   : > { %1149 = vmatpush.bf16.msra.mxu2 %v3491_v26  ;;  %v697_v58 = vmul.f32 %v696_v30, %v672_v60  ;;  %v4687_v60 = vld [vmem:[#allocation67_spill] sm:$0xff]  ;;  %v4688_v49 = vld [vmem:[#allocation68_spill] sm:$0xff]  ;;  %v4689_v30 = vld [vmem:[#allocation69_spill] sm:$0xff] }
 0x117   : > { %v704_v32 = vpack.c.bf16 %v702_v53, %v702_v53  ;;  %v4690_v53 = vld [vmem:[#allocation70_spill] sm:$0xff] }
 0x118   : > { %1135 = vmatpush.bf16.msra.mxu1 %v3477_v6  ;;  %v2675_v33 = vclamps-f32 %v697_v58, 1.0  ;;  %v4691_v58 = vld [vmem:[#allocation71_spill] sm:$0xff] }
 0x119   : > { %1161 = vmatpush.bf16.msra.mxu3 %v3482_v14  ;;  %1124 = vmatpush.bf16.msra.mxu0 %v3497_v40 }
 0x11a   : > { %1150 = vmatpush.bf16.msra.mxu2 %v3504_v43  ;;  %879 = vmatmul.bf16.vlgmr.msrb.gmra.mxu0 %v704_v32  ;;  %v701_v36 = vadd.f32 1.0, %v2675_v33  ;;  %v4693_v33 = vld [vmem:[#allocation75_spill] sm:$0xff] }
 0x11b   : > { %905 = vmatmul.bf16.vlgmr.msrb.gmra.mxu2 %v704_v32  ;;  %v4692_v32 = vld [vmem:[#allocation72_spill] sm:$0xff] }
 0x11c   : > { %1136 = vmatpush.bf16.msra.mxu1 %v3489_v24  ;;  %v703_v51 = vmul.f32 %v701_v36, %v617_v37  ;;  %v4694_v37 = vld [vmem:[#allocation76_spill] sm:$0xff]  ;;  %v392_v36 = vld [vmem:[%s4458_s5] sm:$0x3] }
 0x11d   : > { %1162 = vmatpush.bf16.msra.mxu3 %v3494_v31  ;;  %1259 = vmatpush.bf16.msrb.mxu0 %v3517_v59 }
 0x11e   : > { %1285 = vmatpush.bf16.msrb.mxu2 %v3519_v61  ;;  %v705_v28 = vpack.c.bf16 %v703_v51, %v703_v51 }
 0x120   : > { %1137 = vmatpush.bf16.msra.mxu1 %v3502_v42  ;;  %918 = vmatmul.bf16.vlgmr.msrb.gmra.mxu3 %v705_v28 }
 0x121   : > { %1163 = vmatpush.bf16.msra.mxu3 %v3508_v48  ;;  %1260 = vmatpush.bf16.msrb.mxu0 %v3525_v4 }
 0x122   : > { %1286 = vmatpush.bf16.msrb.mxu2 %v3527_v13  ;;  %892 = vmatmul.bf16.vlgmr.msrb.gmra.mxu1 %v705_v28  ;;  %v3728_v28 = vperm.slane %v392_v36, 0 }
 0x124   : > { %1272 = vmatpush.bf16.msrb.mxu1 %v3531_v27  ;;  %4695 = vst [vmem:[#allocation82_spill] sm:$0xff] %v3728_v28 }
 0x125   : > { %1298 = vmatpush.bf16.msrb.mxu3 %v4675_v1  ;;  %1261 = vmatpush.bf16.msrb.mxu0 %v4676_v15 }
 0x126   : > { %1287 = vmatpush.bf16.msrb.mxu2 %v4677_v19 }
 0x128   : > { %1273 = vmatpush.bf16.msrb.mxu1 %v4678_v63 }
 0x129   : > { %1299 = vmatpush.bf16.msrb.mxu3 %v4679_v20  ;;  %1262 = vmatpush.bf16.msrb.mxu0 %v4680_v35 }
 0x12a   : > { %1288 = vmatpush.bf16.msrb.mxu2 %v4681_v0 }
 0x12c   : > { %1274 = vmatpush.bf16.msrb.mxu1 %v4682_v10 }
 0x12d   : > { %1300 = vmatpush.bf16.msrb.mxu3 %v4683_v55  ;;  %1263 = vmatpush.bf16.msrb.mxu0 %v4684_v18 }
 0x12e   : > { %1289 = vmatpush.bf16.msrb.mxu2 %v4685_v38 }
 0x130   : > { %1275 = vmatpush.bf16.msrb.mxu1 %v4686_v47 }
 0x131   : > { %1301 = vmatpush.bf16.msrb.mxu3 %v4687_v60  ;;  %1264 = vmatpush.bf16.msrb.mxu0 %v4688_v49 }
 0x132   : > { %1290 = vmatpush.bf16.msrb.mxu2 %v4689_v30 }
 0x134   : > { %1276 = vmatpush.bf16.msrb.mxu1 %v4690_v53  ;;  %v3741_v53 = vld [vmem:[#allocation10 + $0x8] sm:$0xff] }
 0x135   : > { %1302 = vmatpush.bf16.msrb.mxu3 %v4691_v58  ;;  %1265 = vmatpush.bf16.msrb.mxu0 %v4692_v32 }
 0x136   : > { %1291 = vmatpush.bf16.msrb.mxu2 %v3617_v22  ;;  %v3736_v22 = vperm.slane %v392_v36, 1 }
 0x138   : > { %1277 = vmatpush.bf16.msrb.mxu1 %v3624_v2  ;;  %v924_v2 = vstv %s923_s27  ;;  %4696 = vst [vmem:[#allocation83_spill] sm:$0xff] %v3736_v22  ;;  %s2429_s27 = sshll.u32 %s326_s26, 4  ;;  %s2430_s27 = int_to_ptr.vmem [resolvable:$true] %s2429_s27 }
 0x139   : > { %1303 = vmatpush.bf16.msrb.mxu3 %v4693_v33  ;;  %1266 = vmatpush.bf16.msrb.mxu0 %v4694_v37  ;;  %v3730_v33 = vld [vmem:[#allocation10] sm:$0xff] }
 0x13a   : > { %1292 = vmatpush.bf16.msrb.mxu2 %v3632_v39 }
 0x13c   : > { %1278 = vmatpush.bf16.msrb.mxu1 %v3638_v54 }
 0x13d   : > { %1304 = vmatpush.bf16.msrb.mxu3 %v3640_v52 }
 0x140   : > { %1279 = vmatpush.bf16.msrb.mxu1 %v3647_v11  ;;  %v927_v11 = vperm.slane %v3730_v33, 0 }
 0x141   : > { %1305 = vmatpush.bf16.msrb.mxu3 %v3649_v41 }
 0x197   : > { %v880_v51 = vpop.f32.mrf.mxu0 }
 0x198   : > { %v881_v39 = vadd.f32 %v880_v51, %v3728_v28 }
 0x19e   : > { %v906_v37 = vpop.f32.mrf.mxu2 }
 0x19f   : > { %v893_v54 = vpop.f32.mrf.mxu1  ;;  %v882_v41 = vpop.f32.mrf.mxu0  ;;  %v907_v30 = vadd.f32 %v906_v37, %v3736_v22 }
 0x1a0   : > { %v3733_v52 = vadd.f32 %v893_v54, %v881_v39  ;;  %v928_v54 = vperm.slane %v3741_v53, 0 }
 0x1a2   : > { %v925_v32 = vmul.f32 %v924_v2, %v3733_v52 }
 0x1a3   : > { %v919_v49 = vpop.f32.mrf.mxu3 }
 0x1a4   : > { %v3739_v58 = vadd.f32 %v927_v11, %v925_v32  ;;  %v3747_v39 = vadd.f32 %v919_v49, %v907_v30 }
 0x1a6   : > { %v3745_v51 = vmul.f32 0.70710677, %v3739_v58  ;;  %v908_v28 = vpop.f32.mrf.mxu2  ;;  %v926_v11 = vmul.f32 %v924_v2, %v3747_v39 }
 0x1a7   : > { %v895_v41 = vpop.f32.mrf.mxu1 }
 0x1a8   : > { %v935_v36 = vmul.f32 %v3745_v51, %v3745_v51  ;;  %v3753_v60 = vadd.f32 %v928_v54, %v926_v11 }
 0x1aa   : > { %v936_v32 = vmin.f32 %v935_v36, 16.0  ;;  %v3756_v22 = vmul.f32 0.70710677, %v3753_v60 }
 0x1ab   : > { %v921_v38 = vpop.f32.mrf.mxu3 }
 0x1ac   : > { %v937_v47 = vmul.f32 2.1237322e-06, %v936_v32  ;;  %v948_v37 = vmul.f32 3.8918573e-05, %v936_v32  ;;  %v975_v30 = vmul.f32 %v3756_v22, %v3756_v22 }
 0x1ae   : > { %v938_v28 = vadd.f32 0.00028619796, %v937_v47  ;;  %v949_v49 = vadd.f32 0.001143296, %v948_v37  ;;  %v976_v55 = vmin.f32 %v975_v30, 16.0 }
 0x1b0   : > { %v939_v41 = vmul.f32 %v938_v28, %v936_v32  ;;  %v950_v18 = vmul.f32 %v949_v49, %v936_v32  ;;  %v977_v2 = vmul.f32 2.1237322e-06, %v976_v55  ;;  %v988_v36 = vmul.f32 3.8918573e-05, %v976_v55 }
 0x1b2   : > { %v940_v10 = vadd.f32 0.0036580483, %v939_v41  ;;  %v951_v0 = vadd.f32 0.014752088, %v950_v18  ;;  %v978_v11 = vadd.f32 0.00028619796, %v977_v2 }
 0x1b3   : > { %v989_v35 = vadd.f32 0.001143296, %v988_v36 }
 0x1b4   : > { %v952_v54 = vmul.f32 %v951_v0, %v936_v32  ;;  %v941_v20 = vmul.f32 %v940_v10, %v936_v32  ;;  %v979_v19 = vmul.f32 %v978_v11, %v976_v55 }
 0x1b5   : > { %v990_v15 = vmul.f32 %v989_v35, %v976_v55 }
 0x1b6   : > { %v953_v63 = vadd.f32 0.112945676, %v952_v54  ;;  %v942_v37 = vadd.f32 0.05243302, %v941_v20  ;;  %v980_v27 = vadd.f32 0.0036580483, %v979_v19 }
 0x1b7   : > { %v991_v47 = vadd.f32 0.014752088, %v990_v15 }
 0x1b8   : > { %v954_v38 = vmul.f32 %v953_v63, %v936_v32  ;;  %v943_v30 = vmul.f32 %v942_v37, %v936_v32  ;;  %v981_v18 = vmul.f32 %v980_v27, %v976_v55 }
 0x1b9   : > { %v992_v13 = vmul.f32 %v991_v47, %v976_v55 }
 0x1ba   : > { %v955_v1 = vadd.f32 0.4994258, %v954_v38  ;;  %v944_v0 = vadd.f32 0.18741608, %v943_v30  ;;  %v982_v2 = vadd.f32 0.05243302, %v981_v18 }
 0x1bb   : > { %v993_v49 = vadd.f32 0.112945676, %v992_v13 }
 0x1bc   : > { %v956_v28 = vmul.f32 %v955_v1, %v936_v32  ;;  %v945_v11 = vmul.f32 %v944_v0, %v936_v32  ;;  %v983_v63 = vmul.f32 %v982_v2, %v976_v55 }
 0x1bd   : > { %v994_v4 = vmul.f32 %v993_v49, %v976_v55 }
 0x1be   : > { %v957_v41 = vadd.f32 1.0, %v956_v28  ;;  %v946_v19 = vadd.f32 1.1283791, %v945_v11  ;;  %v984_v47 = vadd.f32 0.18741608, %v983_v63 }
 0x1bf   : > { %v995_v36 = vadd.f32 0.4994258, %v994_v4 }
 0x1c0   : > { %2986 = vrcp.f32 %v957_v41  ;;  %v969_v38 = vand.u32 2147483648, %v957_v41  ;;  %v967_v13 = vand.u32 2147483647, %v957_v41  ;;  %vm963_vm9 = vweird.f32 %v957_v41 }
 0x1c1   : > { %v996_v10 = vmul.f32 %v995_v36, %v976_v55  ;;  %v947_v4 = vmul.f32 %v946_v19, %v3745_v51  ;;  %v985_v32 = vmul.f32 %v984_v47, %v976_v55 }
 0x1c2   : > { %v970_v37 = vor.u32 1.1754944e-38, %v969_v38  ;;  %vm968_vm11 = vcmp.eq.f32.partialorder %v967_v13, 8.507059e+37 }
 0x1c3   : > { %v997_v15 = vadd.f32 1.0, %v996_v10  ;;  %v986_v36 = vadd.f32 1.1283791, %v985_v32 }
 0x1c5   : > { %2988 = vrcp.f32 %v997_v15  ;;  %v1009_v10 = vand.u32 2147483648, %v997_v15  ;;  %vm1003_vm13 = vweird.f32 %v997_v15 }
 0x1c6   : > { %v2987_v54 = vpop.eup %2986 }
 0x1c7   : > { %v959_v35 = vmul.f32 %v2987_v54, %v957_v41  ;;  %vm964_vm8 = vweird.f32 %v2987_v54  ;;  %v931_v41 = vmul.f32 0.5, %v3739_v58  ;;  %v1010_v51 = vor.u32 1.1754944e-38, %v1009_v10 }
 0x1c8   : > { %vm965_vm10 = vmor %vm963_vm9, %vm964_vm8  ;;  %v932_v58 = vmul.f32 0.5, %v3753_v60  ;;  %v4697_v60 = vld [vmem:[#allocation27_spill] sm:$0xff] }
 0x1c9   : > { %v960_v20 = vsub.f32 1.0, %v959_v35  ;;  %v1007_v35 = vand.u32 2147483647, %v997_v15 }
 0x1cb   : > { %v961_v1 = vmul.f32 %v2987_v54, %v960_v20  ;;  %v2989_v28 = vpop.eup %2988  ;;  %vm1008_vm15 = vcmp.eq.f32.partialorder %v1007_v35, 8.507059e+37 }
 0x1cc   : > { %v999_v18 = vmul.f32 %v2989_v28, %v997_v15  ;;  %vm1004_vm12 = vweird.f32 %v2989_v28 }
 0x1cd   : > { %v962_v27 = vadd.f32 %v2987_v54, %v961_v1  ;;  %vm1005_vm14 = vmor %vm1003_vm13, %vm1004_vm12 }
 0x1ce   : > { %v1000_v2 = vsub.f32 1.0, %v999_v18 }
 0x1cf   : > { %v966_v49 = vsel %vm965_vm10, %v2987_v54, %v962_v27  ;;  %v987_v54 = vmul.f32 %v986_v36, %v3756_v22 }
 0x1d0   : > { %v971_v30 = vsel %vm968_vm11, %v970_v37, %v966_v49  ;;  %v1001_v11 = vmul.f32 %v2989_v28, %v1000_v2  ;;  %v1020_v49 = vstv %s2806_s0  ;;  %v1024_v2 = vperm.slane %v3741_v53, 1  ;;  %s2431_s0 = sshll.u32 %s2427_s24, 4  ;;  %s2432_s0 = int_to_ptr.hbm [resolvable:$true] %s2431_s0 }
 0x1d1   : > { %v972_v0 = vmul.f32 %v971_v30, %v947_v4  ;;  %v4699_v4 = vld [vmem:[#allocation36_spill] sm:$0xff]  ;;  %v1021_v32 = vmul.f32 %v1020_v49, %v3733_v52  ;;  %v1023_v30 = vperm.slane %v3730_v33, 1 }
 0x1d2   : > { %v1002_v20 = vadd.f32 %v2989_v28, %v1001_v11 }
 0x1d3   : > { %v2804_v63 = vclamps-f32 %v972_v0, 1.0  ;;  %v3798_v18 = vadd.f32 %v1023_v30, %v1021_v32  ;;  %v1022_v0 = vmul.f32 %v1020_v49, %v3747_v39 }
 0x1d4   : > { %v1006_v55 = vsel %vm1005_vm14, %v2989_v28, %v1002_v20  ;;  %v4698_v28 = vld [vmem:[#allocation29_spill] sm:$0xff] }
 0x1d5   : > { %v1015_v38 = vadd.f32 1.0, %v2804_v63  ;;  %v1011_v1 = vsel %vm1008_vm15, %v1010_v51, %v1006_v55  ;;  %v3803_v36 = vmul.f32 0.70710677, %v3798_v18  ;;  %v3805_v10 = vadd.f32 %v1024_v2, %v1022_v0  ;;  %v4701_v2 = vld [vmem:[#allocation55_spill] sm:$0xff] }
 0x1d6   : > { %v1012_v13 = vmul.f32 %v1011_v1, %v987_v54 }
 0x1d7   : > { %v1017_v19 = vmul.f32 %v1015_v38, %v931_v41  ;;  %v1031_v11 = vmul.f32 %v3803_v36, %v3803_v36  ;;  %v3810_v35 = vmul.f32 0.70710677, %v3805_v10 }
 0x1d8   : > { %v2805_v27 = vclamps-f32 %v1012_v13, 1.0 }
 0x1d9   : > { %v1115_v47 = vpack.c.bf16 %v1017_v19, %v1017_v19  ;;  %v3812_v52 = vmin.f32 %v1031_v11, 16.0  ;;  %v1071_v33 = vmul.f32 %v3810_v35, %v3810_v35 }
 0x1da   : > { %v1016_v15 = vadd.f32 1.0, %v2805_v27 }
 0x1db   : > { %1125 = vmatmul.bf16.vlgmr.msra.gmra.mxu0 %v1115_v47  ;;  %1151 = vmatmul.bf16.vlgmr.msra.gmra.mxu2 %v1115_v47  ;;  %v1044_v39 = vmul.f32 3.8918573e-05, %v3812_v52  ;;  %v3817_v63 = vmin.f32 %v1071_v33, 16.0  ;;  %v4700_v47 = vld [vmem:[#allocation50_spill] sm:$0xff] }
 0x1dc   : > { %1313 = vmatpush.bf16.msra.mxu0 %v3416_v3  ;;  %1339 = vmatpush.bf16.msra.mxu2 %v3420_v8  ;;  %v1018_v37 = vmul.f32 %v1016_v15, %v932_v58 }
 0x1dd   : > { %v1045_v53 = vadd.f32 0.001143296, %v1044_v39  ;;  %v1084_v41 = vmul.f32 3.8918573e-05, %v3817_v63 }
 0x1de   : > { %v1116_v22 = vpack.c.bf16 %v1018_v37, %v1018_v37 }
 0x1df   : > { %v1046_v20 = vmul.f32 %v1045_v53, %v3812_v52  ;;  %v1085_v38 = vadd.f32 0.001143296, %v1084_v41 }
 0x1e0   : > { %1314 = vmatpush.bf16.msra.mxu0 %v3427_v16  ;;  %1340 = vmatpush.bf16.msra.mxu2 %v3432_v21 }
 0x1e1   : > { %1138 = vmatmul.bf16.vlgmr.msra.gmra.mxu1 %v1116_v22  ;;  %1164 = vmatmul.bf16.vlgmr.msra.gmra.mxu3 %v1116_v22  ;;  %v1047_v54 = vadd.f32 0.014752088, %v1046_v20  ;;  %v1086_v55 = vmul.f32 %v1085_v38, %v3817_v63  ;;  %v1033_v38 = vmul.f32 2.1237322e-06, %v3812_v52 }
 0x1e2   : > { %1326 = vmatpush.bf16.msra.mxu1 %v3418_v7  ;;  %1352 = vmatpush.bf16.msra.mxu3 %v3423_v12 }
 0x1e3   : > { %v1048_v19 = vmul.f32 %v1047_v54, %v3812_v52  ;;  %v1087_v13 = vadd.f32 0.014752088, %v1086_v55 }
 0x1e4   : > { %1315 = vmatpush.bf16.msra.mxu0 %v3437_v29  ;;  %1341 = vmatpush.bf16.msra.mxu2 %v3443_v34 }
 0x1e5   : > { %v1049_v37 = vadd.f32 0.112945676, %v1048_v19  ;;  %v1088_v49 = vmul.f32 %v1087_v13, %v3817_v63 }
 0x1e6   : > { %1327 = vmatpush.bf16.msra.mxu1 %v3429_v17  ;;  %1353 = vmatpush.bf16.msra.mxu3 %v3434_v25 }
 0x1e7   : > { %v1050_v30 = vmul.f32 %v1049_v37, %v3812_v52  ;;  %v1089_v53 = vadd.f32 0.112945676, %v1088_v49  ;;  %v1034_v37 = vadd.f32 0.00028619796, %v1033_v38  ;;  %v1073_v38 = vmul.f32 2.1237322e-06, %v3817_v63 }
 0x1e8   : > { %1316 = vmatpush.bf16.msra.mxu0 %v3449_v44  ;;  %1342 = vmatpush.bf16.msra.mxu2 %v3455_v46 }
 0x1e9   : > { %v1051_v54 = vadd.f32 0.4994258, %v1050_v30 }
 0x1ea   : > { %1328 = vmatpush.bf16.msra.mxu1 %v4697_v60  ;;  %1354 = vmatpush.bf16.msra.mxu3 %v4698_v28 }
 0x1eb   : > { %v1052_v49 = vmul.f32 %v1051_v54, %v3812_v52 }
 0x1ec   : > { %1317 = vmatpush.bf16.msra.mxu0 %v3461_v56  ;;  %1343 = vmatpush.bf16.msra.mxu2 %v4699_v4 }
 0x1ee   : > { %1329 = vmatpush.bf16.msra.mxu1 %v3453_v45  ;;  %1355 = vmatpush.bf16.msra.mxu3 %v3458_v50 }
 0x1f0   : > { %1318 = vmatpush.bf16.msra.mxu0 %v3473_v5  ;;  %1344 = vmatpush.bf16.msra.mxu2 %v3479_v9 }
 0x1f2   : > { %1330 = vmatpush.bf16.msra.mxu1 %v3465_v57  ;;  %1356 = vmatpush.bf16.msra.mxu3 %v3470_v62 }
 0x1f4   : > { %1319 = vmatpush.bf16.msra.mxu0 %v3485_v23  ;;  %1345 = vmatpush.bf16.msra.mxu2 %v3491_v26 }
 0x1f6   : > { %1331 = vmatpush.bf16.msra.mxu1 %v3477_v6  ;;  %1357 = vmatpush.bf16.msra.mxu3 %v3482_v14 }
 0x1f8   : > { %1320 = vmatpush.bf16.msra.mxu0 %v3497_v40  ;;  %1346 = vmatpush.bf16.msra.mxu2 %v3504_v43 }
 0x1fa   : > { %1332 = vmatpush.bf16.msra.mxu1 %v3489_v24  ;;  %1358 = vmatpush.bf16.msra.mxu3 %v3494_v31 }
 0x1fe   : > { %1333 = vmatpush.bf16.msra.mxu1 %v3502_v42  ;;  %1359 = vmatpush.bf16.msra.mxu3 %v3508_v48 }
 0x258   : > { %v1126_v51 = vpop.f32.mrf.mxu0 }
 0x259   : > { %v1127_v27 = vadd.f32 %v1126_v51, %v4700_v47  ;;  %v3855_v47 = vadd.f32 1.0, %v1052_v49 }
 0x25b   : > { %2990 = vrcp.f32 %v3855_v47  ;;  %vm1059_vm3 = vweird.f32 %v3855_v47 }
 0x25e   : > { %v1152_v1 = vpop.f32.mrf.mxu2  ;;  %v1139_v58 = vpop.f32.mrf.mxu1 }
 0x25f   : > { %v3824_v22 = vadd.f32 %v1139_v58, %v1127_v27  ;;  %v1153_v11 = vadd.f32 %v1152_v1, %v4701_v2  ;;  %v1090_v1 = vmul.f32 %v1089_v53, %v3817_v63 }
 0x260   : > { %v1128_v15 = vpop.f32.mrf.mxu0 }
 0x261   : > { %v3828_v32 = vmul.f32 0.70710677, %v3824_v22 }
 0x263   : > { %v1173_v0 = vmul.f32 %v3828_v32, %v3828_v32 }
 0x264   : > { %v1165_v33 = vpop.f32.mrf.mxu3 }
 0x265   : > { %v3834_v41 = vmin.f32 %v1173_v0, 16.0  ;;  %v3836_v20 = vadd.f32 %v1165_v33, %v1153_v11 }
 0x266   : > { %v1154_v39 = vpop.f32.mrf.mxu2  ;;  %v1141_v51 = vpop.f32.mrf.mxu1 }
 0x267   : > { %v1175_v55 = vmul.f32 2.1237322e-06, %v3834_v41  ;;  %v1186_v19 = vmul.f32 3.8918573e-05, %v3834_v41  ;;  %v3842_v13 = vmul.f32 0.70710677, %v3836_v20 }
 0x268   : > { %v1091_v39 = vadd.f32 0.4994258, %v1090_v1 }
 0x269   : > { %v1176_v27 = vadd.f32 0.00028619796, %v1175_v55  ;;  %v1187_v58 = vadd.f32 0.001143296, %v1186_v19  ;;  %v1213_v15 = vmul.f32 %v3842_v13, %v3842_v13  ;;  %v1035_v19 = vmul.f32 %v1034_v37, %v3812_v52 }
 0x26a   : > { %v1074_v37 = vadd.f32 0.00028619796, %v1073_v38 }
 0x26b   : > { %v1177_v0 = vmul.f32 %v1176_v27, %v3834_v41  ;;  %v1188_v30 = vmul.f32 %v1187_v58, %v3834_v41  ;;  %v3850_v11 = vmin.f32 %v1213_v15, 16.0  ;;  %v1036_v48 = vadd.f32 0.0036580483, %v1035_v19 }
 0x26c   : > { %v1167_v33 = vpop.f32.mrf.mxu3 }
 0x26d   : > { %v1189_v51 = vadd.f32 0.014752088, %v1188_v30  ;;  %v1178_v2 = vadd.f32 0.0036580483, %v1177_v0  ;;  %v1215_v53 = vmul.f32 2.1237322e-06, %v3850_v11  ;;  %v1092_v33 = vmul.f32 %v1091_v39, %v3817_v63 }
 0x26e   : > { %v1226_v55 = vmul.f32 3.8918573e-05, %v3850_v11 }
 0x26f   : > { %v1190_v54 = vmul.f32 %v1189_v51, %v3834_v41  ;;  %v1216_v27 = vadd.f32 0.00028619796, %v1215_v53  ;;  %v1179_v1 = vmul.f32 %v1178_v2, %v3834_v41  ;;  %v3865_v53 = vadd.f32 1.0, %v1092_v33 }
 0x270   : > { %v1227_v58 = vadd.f32 0.001143296, %v1226_v55  ;;  %v1037_v2 = vmul.f32 %v1036_v48, %v3812_v52 }
 0x271   : > { %v1191_v15 = vadd.f32 0.112945676, %v1190_v54  ;;  %v1217_v0 = vmul.f32 %v1216_v27, %v3850_v11  ;;  %v1180_v55 = vadd.f32 0.05243302, %v1179_v1  ;;  %v1075_v54 = vmul.f32 %v1074_v37, %v3817_v63 }
 0x272   : > { %v1228_v30 = vmul.f32 %v1227_v58, %v3850_v11  ;;  %v3871_v58 = vpop.eup %2990  ;;  %2992 = vrcp.f32 %v3865_v53  ;;  %vm1099_vm13 = vweird.f32 %v3865_v53 }
 0x273   : > { %v1192_v49 = vmul.f32 %v1191_v15, %v3834_v41  ;;  %v1218_v51 = vadd.f32 0.0036580483, %v1217_v0  ;;  %v1181_v33 = vmul.f32 %v1180_v55, %v3834_v41  ;;  %v1038_v0 = vadd.f32 0.05243302, %v1037_v2 }
 0x274   : > { %v1229_v42 = vadd.f32 0.014752088, %v1228_v30  ;;  %v1055_v48 = vmul.f32 %v3871_v58, %v3855_v47  ;;  %vm1060_vm1 = vweird.f32 %v3871_v58 }
 0x275   : > { %v1193_v31 = vadd.f32 0.4994258, %v1192_v49  ;;  %v1219_v15 = vmul.f32 %v1218_v51, %v3850_v11  ;;  %v1182_v37 = vadd.f32 0.18741608, %v1181_v33  ;;  %vm3904_vm6 = vmor %vm1059_vm3, %vm1060_vm1 }
 0x276   : > { %v1230_v39 = vmul.f32 %v1229_v42, %v3850_v11  ;;  %v1076_v42 = vadd.f32 0.0036580483, %v1075_v54  ;;  %v1056_v55 = vsub.f32 1.0, %v1055_v48 }
 0x277   : > { %v1194_v27 = vmul.f32 %v1193_v31, %v3834_v41  ;;  %v1220_v31 = vadd.f32 0.05243302, %v1219_v15 }
 0x278   : > { %v1231_v19 = vadd.f32 0.112945676, %v1230_v39  ;;  %v1039_v39 = vmul.f32 %v1038_v0, %v3812_v52  ;;  %v1077_v51 = vmul.f32 %v1076_v42, %v3817_v63 }
 0x279   : > { %v1195_v38 = vadd.f32 1.0, %v1194_v27  ;;  %v3882_v27 = vpop.eup %2992  ;;  %v1221_v54 = vmul.f32 %v1220_v31, %v3850_v11 }
 0x27a   : > { %v1232_v1 = vmul.f32 %v1231_v19, %v3850_v11  ;;  %v1183_v19 = vmul.f32 %v1182_v37, %v3834_v41  ;;  %v1040_v15 = vadd.f32 0.18741608, %v1039_v39  ;;  %v1078_v33 = vadd.f32 0.05243302, %v1077_v51 }
 0x27b   : > { %2994 = vrcp.f32 %v1195_v38  ;;  %v1095_v0 = vmul.f32 %v3882_v27, %v3865_v53  ;;  %v1222_v48 = vadd.f32 0.18741608, %v1221_v54  ;;  %v1205_v14 = vand.u32 2147483647, %v1195_v38 }
 0x27c   : > { %v1233_v30 = vadd.f32 0.4994258, %v1232_v1  ;;  %v1057_v1 = vmul.f32 %v3871_v58, %v1056_v55  ;;  %v1041_v31 = vmul.f32 %v1040_v15, %v3812_v52  ;;  %v1065_v41 = vand.u32 2147483648, %v3855_v47 }
 0x27d   : > { %v1079_v37 = vmul.f32 %v1078_v33, %v3817_v63  ;;  %v1096_v55 = vsub.f32 1.0, %v1095_v0  ;;  %vm1201_vm2 = vweird.f32 %v1195_v38  ;;  %v1223_v54 = vmul.f32 %v1222_v48, %v3850_v11 }
 0x27e   : > { %v1234_v49 = vmul.f32 %v1233_v30, %v3850_v11  ;;  %v1207_v30 = vand.u32 2147483648, %v1195_v38  ;;  %v1058_v51 = vadd.f32 %v3871_v58, %v1057_v1  ;;  %vm1206_vm5 = vcmp.eq.f32.partialorder %v1205_v14, 8.507059e+37 }
 0x27f   : > { %v1224_v14 = vadd.f32 1.1283791, %v1223_v54  ;;  %v1042_v48 = vadd.f32 1.1283791, %v1041_v31  ;;  %vm1100_vm10 = vweird.f32 %v3882_v27 }
 0x280   : > { %v3884_v24 = vadd.f32 1.0, %v1234_v49  ;;  %v1184_v49 = vadd.f32 1.1283791, %v1183_v19  ;;  %v1063_v19 = vand.u32 2147483647, %v3855_v47  ;;  %v1062_v11 = vsel %vm3904_vm6, %v3871_v58, %v1058_v51  ;;  %vm1101_vm14 = vmor %vm1099_vm13, %vm1100_vm10 }
 0x281   : > { %v2995_v2 = vpop.eup %2994  ;;  %v1097_v47 = vmul.f32 %v3882_v27, %v1096_v55  ;;  %v1169_v58 = vmul.f32 0.5, %v3824_v22 }
 0x282   : > { %v1197_v43 = vmul.f32 %v2995_v2, %v1195_v38  ;;  %2996 = vrcp.f32 %v3884_v24  ;;  %vm1202_vm0 = vweird.f32 %v2995_v2  ;;  %v1185_v15 = vmul.f32 %v1184_v49, %v3828_v32 }
 0x283   : > { %vm1203_vm4 = vmor %vm1201_vm2, %vm1202_vm0  ;;  %v1080_v38 = vadd.f32 0.18741608, %v1079_v37  ;;  %vm1064_vm8 = vcmp.eq.f32.partialorder %v1063_v19, 8.507059e+37  ;;  %vm1241_vm9 = vweird.f32 %v3884_v24  ;;  %v1098_v54 = vadd.f32 %v3882_v27, %v1097_v47 }
 0x284   : > { %v1198_v42 = vsub.f32 1.0, %v1197_v43  ;;  %v1208_v43 = vor.u32 1.1754944e-38, %v1207_v30  ;;  %v1043_v19 = vmul.f32 %v1042_v48, %v3803_v36  ;;  %v1170_v36 = vmul.f32 0.5, %v3836_v20  ;;  %v4706_v48 = vld [vmem:[#allocation53_spill] sm:$0xff] }
 0x285   : > { %v1081_v37 = vmul.f32 %v1080_v38, %v3817_v63  ;;  %v1105_v63 = vand.u32 2147483648, %v3865_v53  ;;  %v1027_v20 = vmul.f32 0.5, %v3798_v18 }
 0x286   : > { %v1199_v40 = vmul.f32 %v2995_v2, %v1198_v42 }
 0x287   : > { %v1082_v38 = vadd.f32 1.1283791, %v1081_v37  ;;  %v4708_v37 = vld [vmem:[#allocation56_spill] sm:$0xff] }
 0x288   : > { %v2997_v39 = vpop.eup %2996  ;;  %v1200_v6 = vadd.f32 %v2995_v2, %v1199_v40  ;;  %v1066_v40 = vor.u32 1.1754944e-38, %v1065_v41 }
 0x289   : > { %v1237_v52 = vmul.f32 %v2997_v39, %v3884_v24  ;;  %vm1242_vm7 = vweird.f32 %v2997_v39  ;;  %v1083_v47 = vmul.f32 %v1082_v38, %v3810_v35  ;;  %v4709_v35 = vld [vmem:[#allocation57_spill] sm:$0xff]  ;;  %v4720_v38 = vld [vmem:[#allocation68_spill] sm:$0xff] }
 0x28a   : > { %v1204_v42 = vsel %vm1203_vm4, %v2995_v2, %v1200_v6  ;;  %v1247_v6 = vand.u32 2147483648, %v3884_v24  ;;  %v1245_v2 = vand.u32 2147483647, %v3884_v24  ;;  %v1067_v41 = vsel %vm1064_vm8, %v1066_v40, %v1062_v11  ;;  %vm1243_vm11 = vmor %vm1241_vm9, %vm1242_vm7 }
 0x28b   : > { %v1209_v1 = vsel %vm1206_vm5, %v1208_v43, %v1204_v42  ;;  %v1238_v0 = vsub.f32 1.0, %v1237_v52  ;;  %v1225_v52 = vmul.f32 %v1224_v14, %v3842_v13  ;;  %v1103_v24 = vand.u32 2147483647, %v3865_v53 }
 0x28c   : > { %v1210_v30 = vmul.f32 %v1209_v1, %v1185_v15  ;;  %v1248_v55 = vor.u32 1.1754944e-38, %v1247_v6  ;;  %vm1246_vm12 = vcmp.eq.f32.partialorder %v1245_v2, 8.507059e+37  ;;  %v1068_v33 = vmul.f32 %v1067_v41, %v1043_v19 }
 0x28d   : > { %v1239_v32 = vmul.f32 %v2997_v39, %v1238_v0  ;;  %v1102_v13 = vsel %vm1101_vm14, %v3882_v27, %v1098_v54  ;;  %v1106_v1 = vor.u32 1.1754944e-38, %v1105_v63  ;;  %vm1104_vm15 = vcmp.eq.f32.partialorder %v1103_v24, 8.507059e+37  ;;  %v4704_v27 = vld [vmem:[#allocation51_spill] sm:$0xff]  ;;  %v4712_v54 = vld [vmem:[#allocation60_spill] sm:$0xff]  ;;  %v4714_v63 = vld [vmem:[#allocation62_spill] sm:$0xff] }
 0x28e   : > { %v2809_v49 = vclamps-f32 %v1210_v30, 1.0  ;;  %v2807_v11 = vclamps-f32 %v1068_v33, 1.0  ;;  %v4717_v24 = vld [vmem:[#allocation65_spill] sm:$0xff]  ;;  %v4718_v33 = vld [vmem:[#allocation66_spill] sm:$0xff] }
 0x28f   : > { %v1240_v43 = vadd.f32 %v2997_v39, %v1239_v32  ;;  %v1107_v53 = vsel %vm1104_vm15, %v1106_v1, %v1102_v13  ;;  %v4705_v32 = vld [vmem:[#allocation52_spill] sm:$0xff]  ;;  %v4721_v13 = vld [vmem:[#allocation69_spill] sm:$0xff] }
 0x290   : > { %v1253_v51 = vadd.f32 1.0, %v2809_v49  ;;  %v1108_v6 = vmul.f32 %v1107_v53, %v1083_v47  ;;  %v1111_v2 = vadd.f32 1.0, %v2807_v11  ;;  %v4707_v49 = vld [vmem:[#allocation54_spill] sm:$0xff]  ;;  %v4724_v1 = vld [vmem:[#allocation72_spill] sm:$0xff]  ;;  %v4727_v53 = vld [vmem:[#allocation75_spill] sm:$0xff] }
 0x291   : > { %v1244_v31 = vsel %vm1243_vm11, %v2997_v39, %v1240_v43  ;;  %v4728_v11 = vld [vmem:[#allocation76_spill] sm:$0xff]  ;;  %v4729_v47 = vld [vmem:[#allocation77_spill] sm:$0xff] }
 0x292   : > { %v1255_v15 = vmul.f32 %v1253_v51, %v1169_v58  ;;  %v1249_v42 = vsel %vm1246_vm12, %v1248_v55, %v1244_v31  ;;  %v2808_v41 = vclamps-f32 %v1108_v6, 1.0  ;;  %v1113_v43 = vmul.f32 %v1111_v2, %v1027_v20  ;;  %v4710_v58 = vld [vmem:[#allocation58_spill] sm:$0xff]  ;;  %v4711_v51 = vld [vmem:[#allocation59_spill] sm:$0xff]  ;;  %v4733_v2 = vld [vmem:[#allocation81_spill] sm:$0xff] }
 0x293   : > { %v1250_v22 = vmul.f32 %v1249_v42, %v1225_v52  ;;  %v4713_v52 = vld [vmem:[#allocation61_spill] sm:$0xff]  ;;  %v1028_v31 = vmul.f32 0.5, %v3805_v10  ;;  %v4716_v42 = vld [vmem:[#allocation64_spill] sm:$0xff]  ;;  %v4722_v10 = vld [vmem:[#allocation70_spill] sm:$0xff] }
 0x294   : > { %v1257_v40 = vpack.c.bf16 %v1255_v15, %v1255_v15  ;;  %v1112_v55 = vadd.f32 1.0, %v2808_v41  ;;  %v1311_v18 = vpack.c.bf16 %v1113_v43, %v1113_v43  ;;  %v4715_v15 = vld [vmem:[#allocation63_spill] sm:$0xff]  ;;  %v4735_v41 = vld [vmem:[#allocation41_spill] sm:$0xff]  ;;  %v4736_v43 = vld [vmem:[#allocation46_spill] sm:$0xff] }
 0x295   : > { %v2810_v39 = vclamps-f32 %v1250_v22, 1.0  ;;  %v4731_v6 = vld [vmem:[#allocation79_spill] sm:$0xff] }
 0x296   : > { %1267 = vmatmul.bf16.vlgmr.msrb.gmra.mxu0 %v1257_v40  ;;  %1293 = vmatmul.bf16.vlgmr.msrb.gmra.mxu2 %v1257_v40  ;;  %v1114_v19 = vmul.f32 %v1112_v55, %v1028_v31  ;;  %v4719_v40 = vld [vmem:[#allocation67_spill] sm:$0xff]  ;;  %v4737_v55 = vld [vmem:[#allocation48_spill] sm:$0xff]  ;;  %v4739_v31 = vld [vmem:[#allocation45_spill] sm:$0xff] }
 0x297   : > { %v1254_v0 = vadd.f32 1.0, %v2810_v39  ;;  %1455 = vmatpush.bf16.msrb.mxu0 %v3517_v59  ;;  %1481 = vmatpush.bf16.msrb.mxu2 %v3519_v61  ;;  %v4723_v39 = vld [vmem:[#allocation71_spill] sm:$0xff] }
 0x298   : > { %v1312_v22 = vpack.c.bf16 %v1114_v19, %v1114_v19  ;;  %v4734_v20 = vld [vmem:[#allocation39_spill] sm:$0xff] }
 0x299   : > { %v1256_v30 = vmul.f32 %v1254_v0, %v1170_v36  ;;  %v4725_v36 = vld [vmem:[#allocation73_spill] sm:$0xff]  ;;  %v4726_v0 = vld [vmem:[#allocation74_spill] sm:$0xff]  ;;  %v4740_v19 = vld [vmem:[#allocation47_spill] sm:$0xff] }
 0x29b   : > { %v1258_v14 = vpack.c.bf16 %v1256_v30, %v1256_v30  ;;  %1456 = vmatpush.bf16.msrb.mxu0 %v4704_v27  ;;  %1482 = vmatpush.bf16.msrb.mxu2 %v4705_v32  ;;  %v4730_v30 = vld [vmem:[#allocation78_spill] sm:$0xff] }
 0x29d   : > { %1280 = vmatmul.bf16.vlgmr.msrb.gmra.mxu1 %v1258_v14  ;;  %1306 = vmatmul.bf16.vlgmr.msrb.gmra.mxu3 %v1258_v14  ;;  %v4732_v14 = vld [vmem:[#allocation80_spill] sm:$0xff] }
 0x29e   : > { %1468 = vmatpush.bf16.msrb.mxu1 %v4706_v48  ;;  %1494 = vmatpush.bf16.msrb.mxu3 %v4707_v49 }
 0x29f   : > { %1457 = vmatpush.bf16.msrb.mxu0 %v4708_v37  ;;  %1483 = vmatpush.bf16.msrb.mxu2 %v4709_v35 }
 0x2a2   : > { %1469 = vmatpush.bf16.msrb.mxu1 %v4710_v58  ;;  %1495 = vmatpush.bf16.msrb.mxu3 %v4711_v51 }
 0x2a3   : > { %1458 = vmatpush.bf16.msrb.mxu0 %v4712_v54  ;;  %1484 = vmatpush.bf16.msrb.mxu2 %v4713_v52 }
 0x2a6   : > { %1321 = vmatmul.bf16.vlgmr.msra.gmra.mxu0 %v1311_v18  ;;  %1347 = vmatmul.bf16.vlgmr.msra.gmra.mxu2 %v1311_v18  ;;  %v4738_v18 = vld [vmem:[#allocation43_spill] sm:$0xff] }
 0x2a7   : > { %1470 = vmatpush.bf16.msrb.mxu1 %v4714_v63  ;;  %1496 = vmatpush.bf16.msrb.mxu3 %v4715_v15 }
 0x2a8   : > { %1459 = vmatpush.bf16.msrb.mxu0 %v4716_v42  ;;  %1485 = vmatpush.bf16.msrb.mxu2 %v4717_v24 }
 0x2ab   : > { %1471 = vmatpush.bf16.msrb.mxu1 %v4718_v33  ;;  %1497 = vmatpush.bf16.msrb.mxu3 %v4719_v40 }
 0x2ac   : > { %1460 = vmatpush.bf16.msrb.mxu0 %v4720_v38  ;;  %1486 = vmatpush.bf16.msrb.mxu2 %v4721_v13 }
 0x2ad   : > { %1334 = vmatmul.bf16.vlgmr.msra.gmra.mxu1 %v1312_v22  ;;  %1360 = vmatmul.bf16.vlgmr.msra.gmra.mxu3 %v1312_v22  ;;  %v4741_v22 = vld [vmem:[#allocation49_spill] sm:$0xff] }
 0x2af   : > { %1472 = vmatpush.bf16.msrb.mxu1 %v4722_v10  ;;  %1498 = vmatpush.bf16.msrb.mxu3 %v4723_v39 }
 0x2b0   : > { %1461 = vmatpush.bf16.msrb.mxu0 %v4724_v1  ;;  %1487 = vmatpush.bf16.msrb.mxu2 %v4725_v36 }
 0x2b3   : > { %1473 = vmatpush.bf16.msrb.mxu1 %v4726_v0  ;;  %1499 = vmatpush.bf16.msrb.mxu3 %v4727_v53 }
 0x2b4   : > { %1462 = vmatpush.bf16.msrb.mxu0 %v4728_v11  ;;  %1488 = vmatpush.bf16.msrb.mxu2 %v4729_v47 }
 0x2b7   : > { %1474 = vmatpush.bf16.msrb.mxu1 %v4730_v30  ;;  %1500 = vmatpush.bf16.msrb.mxu3 %v4731_v6 }
 0x2b8   : > { %1721 = vmatpush.bf16.msra.mxu0 %v3416_v3  ;;  %1747 = vmatpush.bf16.msra.mxu2 %v3420_v8 }
 0x2bb   : > { %1475 = vmatpush.bf16.msrb.mxu1 %v4732_v14  ;;  %1501 = vmatpush.bf16.msrb.mxu3 %v4733_v2 }
 0x2bc   : > { %1722 = vmatpush.bf16.msra.mxu0 %v3427_v16  ;;  %1748 = vmatpush.bf16.msra.mxu2 %v3432_v21 }
 0x2bf   : > { %1734 = vmatpush.bf16.msra.mxu1 %v3418_v7  ;;  %1760 = vmatpush.bf16.msra.mxu3 %v3423_v12 }
 0x2c0   : > { %1723 = vmatpush.bf16.msra.mxu0 %v3437_v29  ;;  %1749 = vmatpush.bf16.msra.mxu2 %v3443_v34 }
 0x2c3   : > { %1735 = vmatpush.bf16.msra.mxu1 %v3429_v17  ;;  %1761 = vmatpush.bf16.msra.mxu3 %v3434_v25 }
 0x2c4   : > { %1724 = vmatpush.bf16.msra.mxu0 %v3449_v44  ;;  %1750 = vmatpush.bf16.msra.mxu2 %v3455_v46 }
 0x2c7   : > { %1736 = vmatpush.bf16.msra.mxu1 %v4697_v60  ;;  %1762 = vmatpush.bf16.msra.mxu3 %v4698_v28 }
 0x2c8   : > { %1725 = vmatpush.bf16.msra.mxu0 %v3461_v56  ;;  %1751 = vmatpush.bf16.msra.mxu2 %v4699_v4 }
 0x2cb   : > { %1737 = vmatpush.bf16.msra.mxu1 %v3453_v45  ;;  %1763 = vmatpush.bf16.msra.mxu3 %v3458_v50 }
 0x2cc   : > { %1726 = vmatpush.bf16.msra.mxu0 %v3473_v5  ;;  %1752 = vmatpush.bf16.msra.mxu2 %v3479_v9  ;;  %v4743_v5 = vld [vmem:[#allocation83_spill] sm:$0xff] }
 0x2cf   : > { %1738 = vmatpush.bf16.msra.mxu1 %v3465_v57  ;;  %1764 = vmatpush.bf16.msra.mxu3 %v3470_v62 }
 0x2d0   : > { %1727 = vmatpush.bf16.msra.mxu0 %v3485_v23  ;;  %1753 = vmatpush.bf16.msra.mxu2 %v3491_v26  ;;  %v4742_v23 = vld [vmem:[#allocation82_spill] sm:$0xff] }
 0x2d3   : > { %1739 = vmatpush.bf16.msra.mxu1 %v4734_v20  ;;  %1765 = vmatpush.bf16.msra.mxu3 %v4735_v41 }
 0x2d4   : > { %1728 = vmatpush.bf16.msra.mxu0 %v4736_v43  ;;  %1754 = vmatpush.bf16.msra.mxu2 %v4737_v55 }
 0x2d7   : > { %1740 = vmatpush.bf16.msra.mxu1 %v4738_v18  ;;  %1766 = vmatpush.bf16.msra.mxu3 %v4739_v31 }
 0x2db   : > { %1741 = vmatpush.bf16.msra.mxu1 %v4740_v19  ;;  %1767 = vmatpush.bf16.msra.mxu3 %v4741_v22  ;;  %v4745_v19 = vld [vmem:[#allocation50_spill] sm:$0xff] }
 0x313   : > { %v1268_v62 = vpop.f32.mrf.mxu0 }
 0x314   : > { %v1269_v57 = vadd.f32 %v1268_v62, %v4742_v23 }
 0x319   : > { %v1294_v26 = vpop.f32.mrf.mxu2 }
 0x31a   : > { %v1281_v9 = vpop.f32.mrf.mxu1  ;;  %v1295_v43 = vadd.f32 %v1294_v26, %v4743_v5  ;;  %v4746_v26 = vld [vmem:[#allocation55_spill] sm:$0xff] }
 0x31b   : > { %v3996_v20 = vadd.f32 %v1281_v9, %v1269_v57  ;;  %v1270_v41 = vpop.f32.mrf.mxu0 }
 0x320   : > { %v1307_v50 = vpop.f32.mrf.mxu3 }
 0x321   : > { %v3999_v55 = vadd.f32 %v1307_v50, %v1295_v43  ;;  %v1296_v18 = vpop.f32.mrf.mxu2 }
 0x322   : > { %v1283_v45 = vpop.f32.mrf.mxu1 }
 0x323   : > { %4744 = vst [vmem:[#allocation51_spill] sm:$0xff] %v3999_v55  ;;  %v1322_v31 = vpop.f32.mrf.mxu0 }
 0x324   : > { %v1323_v56 = vadd.f32 %v1322_v31, %v4745_v19 }
 0x328   : > { %v1309_v4 = vpop.f32.mrf.mxu3 }
 0x329   : > { %v1348_v22 = vpop.f32.mrf.mxu2 }
 0x32a   : > { %v1335_v28 = vpop.f32.mrf.mxu1  ;;  %v1349_v50 = vadd.f32 %v1348_v22, %v4746_v26 }
 0x32b   : > { %v4002_v60 = vadd.f32 %v1335_v28, %v1323_v56  ;;  %v1324_v62 = vpop.f32.mrf.mxu0 }
 0x32d   : > { %v4005_v57 = vmul.f32 0.70710677, %v4002_v60 }
 0x32f   : > { %v1369_v9 = vmul.f32 %v4005_v57, %v4005_v57 }
 0x330   : > { %v1361_v41 = vpop.f32.mrf.mxu3 }
 0x331   : > { %v1370_v43 = vmin.f32 %v1369_v9, 16.0  ;;  %v4010_v45 = vadd.f32 %v1361_v41, %v1349_v50  ;;  %v1350_v4 = vpop.f32.mrf.mxu2 }
 0x332   : > { %v1337_v18 = vpop.f32.mrf.mxu1 }
 0x333   : > { %v1371_v31 = vmul.f32 2.1237322e-06, %v1370_v43  ;;  %v1382_v19 = vmul.f32 3.8918573e-05, %v1370_v43  ;;  %v4013_v56 = vmul.f32 0.70710677, %v4010_v45 }
 0x335   : > { %v1372_v28 = vadd.f32 0.00028619796, %v1371_v31  ;;  %v1383_v62 = vadd.f32 0.001143296, %v1382_v19  ;;  %v1409_v46 = vmul.f32 %v4013_v56, %v4013_v56 }
 0x337   : > { %v1373_v44 = vmul.f32 %v1372_v28, %v1370_v43  ;;  %v1384_v25 = vmul.f32 %v1383_v62, %v1370_v43  ;;  %v1410_v17 = vmin.f32 %v1409_v46, 16.0 }
 0x338   : > { %v1363_v22 = vpop.f32.mrf.mxu3 }
 0x339   : > { %v1385_v26 = vadd.f32 0.014752088, %v1384_v25  ;;  %v1374_v9 = vadd.f32 0.0036580483, %v1373_v44  ;;  %v1411_v50 = vmul.f32 2.1237322e-06, %v1410_v17 }
 0x33a   : > { %v1422_v41 = vmul.f32 3.8918573e-05, %v1410_v17 }
 0x33b   : > { %v1386_v4 = vmul.f32 %v1385_v26, %v1370_v43  ;;  %v1412_v18 = vadd.f32 0.00028619796, %v1411_v50  ;;  %v1375_v12 = vmul.f32 %v1374_v9, %v1370_v43 }
 0x33c   : > { %v1423_v34 = vadd.f32 0.001143296, %v1422_v41 }
 0x33d   : > { %v1387_v29 = vadd.f32 0.112945676, %v1386_v4  ;;  %v1413_v7 = vmul.f32 %v1412_v18, %v1410_v17  ;;  %v1376_v3 = vadd.f32 0.05243302, %v1375_v12 }
 0x33e   : > { %v1424_v21 = vmul.f32 %v1423_v34, %v1410_v17 }
 0x33f   : > { %v1388_v31 = vmul.f32 %v1387_v29, %v1370_v43  ;;  %v1414_v8 = vadd.f32 0.0036580483, %v1413_v7  ;;  %v1377_v44 = vmul.f32 %v1376_v3, %v1370_v43 }
 0x340   : > { %v1425_v19 = vadd.f32 0.014752088, %v1424_v21 }
 0x341   : > { %v1389_v16 = vadd.f32 0.4994258, %v1388_v31  ;;  %v1415_v25 = vmul.f32 %v1414_v8, %v1410_v17  ;;  %v1378_v41 = vadd.f32 0.18741608, %v1377_v44 }
 0x342   : > { %v1426_v28 = vmul.f32 %v1425_v19, %v1410_v17 }
 0x343   : > { %v1390_v62 = vmul.f32 %v1389_v16, %v1370_v43  ;;  %v1416_v50 = vadd.f32 0.05243302, %v1415_v25  ;;  %v1379_v29 = vmul.f32 %v1378_v41, %v1370_v43 }
 0x344   : > { %v1427_v46 = vadd.f32 0.112945676, %v1426_v28 }
 0x345   : > { %v1391_v22 = vadd.f32 1.0, %v1390_v62  ;;  %v1417_v34 = vmul.f32 %v1416_v50, %v1410_v17  ;;  %v1380_v16 = vadd.f32 1.1283791, %v1379_v29 }
 0x346   : > { %v1428_v55 = vmul.f32 %v1427_v46, %v1410_v17 }
 0x347   : > { %2998 = vrcp.f32 %v1391_v22  ;;  %v1403_v12 = vand.u32 2147483648, %v1391_v22  ;;  %v1418_v31 = vadd.f32 0.18741608, %v1417_v34  ;;  %v1401_v8 = vand.u32 2147483647, %v1391_v22 }
 0x348   : > { %v1429_v26 = vadd.f32 0.4994258, %v1428_v55  ;;  %vm1397_vm1 = vweird.f32 %v1391_v22  ;;  %v1381_v25 = vmul.f32 %v1380_v16, %v4005_v57 }
 0x349   : > { %v1404_v55 = vor.u32 1.1754944e-38, %v1403_v12  ;;  %v1419_v62 = vmul.f32 %v1418_v31, %v1410_v17  ;;  %vm1402_vm3 = vcmp.eq.f32.partialorder %v1401_v8, 8.507059e+37 }
 0x34a   : > { %v1430_v4 = vmul.f32 %v1429_v26, %v1410_v17 }
 0x34c   : > { %v1431_v9 = vadd.f32 1.0, %v1430_v4  ;;  %v1420_v4 = vadd.f32 1.1283791, %v1419_v62 }
 0x34d   : > { %v2999_v18 = vpop.eup %2998 }
 0x34e   : > { %v1393_v21 = vmul.f32 %v2999_v18, %v1391_v22  ;;  %3000 = vrcp.f32 %v1431_v9  ;;  %vm1398_vm0 = vweird.f32 %v2999_v18  ;;  %v1443_v41 = vand.u32 2147483648, %v1431_v9 }
 0x34f   : > { %vm1399_vm2 = vmor %vm1397_vm1, %vm1398_vm0  ;;  %v1441_v29 = vand.u32 2147483647, %v1431_v9  ;;  %vm1437_vm5 = vweird.f32 %v1431_v9  ;;  %v1365_v22 = vmul.f32 0.5, %v4002_v60  ;;  %v1421_v57 = vmul.f32 %v1420_v4, %v4013_v56 }
 0x350   : > { %v1394_v7 = vsub.f32 1.0, %v1393_v21  ;;  %v1444_v17 = vor.u32 1.1754944e-38, %v1443_v41  ;;  %v1508_v56 = vstv %s4053_s10  ;;  %v1516_v4 = vstv %s4057_s19  ;;  %s3176_s10 = sshra.s32 %s2432_s0, 4  ;;  %s3177_s10 = int_to_ptr.hbm [resolvable:$true] %s3176_s10 }
 0x351   : > { %vm1442_vm7 = vcmp.eq.f32.partialorder %v1441_v29, 8.507059e+37  ;;  %p3183_p12 = scmp.lt.s32.totalorder %s3177_s10, %s4460_s7 }
 0x352   : > { %v1395_v19 = vmul.f32 %v2999_v18, %v1394_v7 }
 0x354   : > { %v3001_v3 = vpop.eup %3000  ;;  %v1396_v28 = vadd.f32 %v2999_v18, %v1395_v19 }
 0x355   : > { %v1433_v46 = vmul.f32 %v3001_v3, %v1431_v9  ;;  %vm1438_vm4 = vweird.f32 %v3001_v3 }
 0x356   : > { %v1400_v44 = vsel %vm1399_vm2, %v2999_v18, %v1396_v28  ;;  %vm1439_vm6 = vmor %vm1437_vm5, %vm1438_vm4 }
 0x357   : > { %v1405_v43 = vsel %vm1402_vm3, %v1404_v55, %v1400_v44  ;;  %v1434_v26 = vsub.f32 1.0, %v1433_v46  ;;  %v1366_v55 = vmul.f32 0.5, %v4010_v45  ;;  %v3026_v46 = vld [vmem:[#allocation10] sm:$0xff] }
 0x358   : > { %v1406_v50 = vmul.f32 %v1405_v43, %v1381_v25  ;;  %v1511_v25 = vperm.slane %v3026_v46, 2 }
 0x359   : > { %v1435_v34 = vmul.f32 %v3001_v3, %v1434_v26  ;;  %v1509_v26 = vmul.f32 %v1508_v56, %v3996_v20 }
 0x35a   : > { %v2811_v21 = vclamps-f32 %v1406_v50, 1.0  ;;  %v1617_v50 = vperm.slane %v3026_v46, 4 }
 0x35b   : > { %v1436_v7 = vadd.f32 %v3001_v3, %v1435_v34  ;;  %v1622_v34 = vstv %s4059_s22  ;;  %s3182_s22 = scalar_lea.hbm %s4460_s7, 32 }
 0x35c   : > { %v1449_v12 = vadd.f32 1.0, %v2811_v21 }
 0x35d   : > { %v1440_v18 = vsel %vm1439_vm6, %v3001_v3, %v1436_v7  ;;  %v1614_v3 = vstv %s4055_s21  ;;  %v1519_v7 = vperm.slane %v3026_v46, 3  ;;  %s3178_s21 = scalar_lea.hbm %s3177_s10, 16 }
 0x35e   : > { %v1451_v31 = vmul.f32 %v1449_v12, %v1365_v22  ;;  %v1445_v16 = vsel %vm1442_vm7, %v1444_v17, %v1440_v18  ;;  %v1615_v29 = vmul.f32 %v1614_v3, %v3996_v20  ;;  %v1625_v22 = vperm.slane %v3026_v46, 5  ;;  %v4747_v46 = vld [vmem:[#allocation51_spill] sm:$0xff]  ;;  %p3179_p1 = scmp.ne.s32.totalorder %s3177_s10, %s3178_s21  ;;  %p3184_p8 = scmp.lt.s32.totalorder %s3182_s22, %s3178_s21 }
 0x35f   : > { %v1446_v19 = vmul.f32 %v1445_v16, %v1421_v57  ;;  %v1513_v18 = vadd.f32 %v1511_v25, %v1509_v26 }
 0x360   : > { %v1453_v8 = vpack.c.bf16 %v1451_v31, %v1451_v31  ;;  %v1619_v31 = vadd.f32 %v1617_v50, %v1615_v29  ;;  %p3180_p3 = pnand %p3179_p1, %p3365_p13  ;;  %p3185_p7 = por %p3184_p8, %p3183_p12 }
 0x361   : > { %v2812_v28 = vclamps-f32 %v1446_v19, 1.0 }
 0x362   : > { %1463 = vmatmul.bf16.vlgmr.msrb.gmra.mxu0 %v1453_v8  ;;  %1489 = vmatmul.bf16.vlgmr.msrb.gmra.mxu2 %v1453_v8  ;;  %p3181_p5 = pneg %p3180_p3 }
 0x363   : > { %v1450_v62 = vadd.f32 1.0, %v2812_v28  ;;  %1863 = vmatpush.bf16.msrb.mxu0 %v3517_v59  ;;  %1889 = vmatpush.bf16.msrb.mxu2 %v3519_v61  ;;  %v3027_v28 = vld [vmem:[#allocation10 + $0x8] sm:$0xff] }
 0x364   : > { %v1520_v25 = vperm.slane %v3027_v28, 3  ;;  %v1626_v26 = vperm.slane %v3027_v28, 5  ;;  %p3186_p9 = pnand %p3185_p7, %p3181_p5 }
 0x365   : > { %v1452_v60 = vmul.f32 %v1450_v62, %v1366_v55  ;;  %v1512_v55 = vperm.slane %v3027_v28, 2 }
 0x367   : > { %v1454_v9 = vpack.c.bf16 %v1452_v60, %v1452_v60  ;;  %1864 = vmatpush.bf16.msrb.mxu0 %v4704_v27  ;;  %1890 = vmatpush.bf16.msrb.mxu2 %v4705_v32  ;;  %v1618_v60 = vperm.slane %v3027_v28, 4 }
 0x369   : > { %1476 = vmatmul.bf16.vlgmr.msrb.gmra.mxu1 %v1454_v9  ;;  %1502 = vmatmul.bf16.vlgmr.msrb.gmra.mxu3 %v1454_v9 }
 0x36a   : > { %1876 = vmatpush.bf16.msrb.mxu1 %v4706_v48  ;;  %1902 = vmatpush.bf16.msrb.mxu3 %v4707_v49 }
 0x36b   : > { %1865 = vmatpush.bf16.msrb.mxu0 %v4708_v37  ;;  %1891 = vmatpush.bf16.msrb.mxu2 %v4709_v35 }
 0x36e   : > { %1877 = vmatpush.bf16.msrb.mxu1 %v4710_v58  ;;  %1903 = vmatpush.bf16.msrb.mxu3 %v4711_v51 }
 0x36f   : > { %1866 = vmatpush.bf16.msrb.mxu0 %v4712_v54  ;;  %1892 = vmatpush.bf16.msrb.mxu2 %v4713_v52 }
 0x372   : > { %1878 = vmatpush.bf16.msrb.mxu1 %v4714_v63  ;;  %1904 = vmatpush.bf16.msrb.mxu3 %v4715_v15 }
 0x373   : > { %1867 = vmatpush.bf16.msrb.mxu0 %v4716_v42  ;;  %1893 = vmatpush.bf16.msrb.mxu2 %v4717_v24 }
 0x376   : > { %1879 = vmatpush.bf16.msrb.mxu1 %v4718_v33  ;;  %1905 = vmatpush.bf16.msrb.mxu3 %v4719_v40 }
 0x377   : > { %1868 = vmatpush.bf16.msrb.mxu0 %v4720_v38  ;;  %1894 = vmatpush.bf16.msrb.mxu2 %v4721_v13 }
 0x37a   : > { %1880 = vmatpush.bf16.msrb.mxu1 %v4722_v10  ;;  %1906 = vmatpush.bf16.msrb.mxu3 %v4723_v39 }
 0x37b   : > { %1869 = vmatpush.bf16.msrb.mxu0 %v4724_v1  ;;  %1895 = vmatpush.bf16.msrb.mxu2 %v4725_v36 }
 0x37e   : > { %1881 = vmatpush.bf16.msrb.mxu1 %v4726_v0  ;;  %1907 = vmatpush.bf16.msrb.mxu3 %v4727_v53 }
 0x37f   : > { %1870 = vmatpush.bf16.msrb.mxu0 %v4728_v11  ;;  %1896 = vmatpush.bf16.msrb.mxu2 %v4729_v47 }
 0x382   : > { %1882 = vmatpush.bf16.msrb.mxu1 %v4730_v30  ;;  %1908 = vmatpush.bf16.msrb.mxu3 %v4731_v6 }
 0x386   : > { %1883 = vmatpush.bf16.msrb.mxu1 %v4732_v14  ;;  %1909 = vmatpush.bf16.msrb.mxu3 %v4733_v2 }
 0x3df   : > { %v1464_v45 = vpop.f32.mrf.mxu0 }
 0x3e0   : > { %v1465_v44 = vadd.f32 %v1464_v45, %v4742_v23  ;;  %v4777_v23 = vld [vmem:[#allocation45_spill] sm:$0xff] }
 0x3e5   : > { %v1490_v43 = vpop.f32.mrf.mxu2 }
 0x3e6   : > { %v1477_v41 = vpop.f32.mrf.mxu1  ;;  %v1491_v8 = vadd.f32 %v1490_v43, %v4743_v5 }
 0x3e7   : > { %v1478_v21 = vadd.f32 %v1477_v41, %v1465_v44  ;;  %v1466_v12 = vpop.f32.mrf.mxu0  ;;  %v1510_v41 = vmul.f32 %v1508_v56, %v4747_v46 }
 0x3e9   : > { %v1517_v17 = vmul.f32 %v1516_v4, %v1478_v21  ;;  %v1623_v57 = vmul.f32 %v1622_v34, %v1478_v21  ;;  %v1616_v21 = vmul.f32 %v1614_v3, %v4747_v46  ;;  %v1514_v12 = vadd.f32 %v1512_v55, %v1510_v41 }
 0x3eb   : > { %v1521_v16 = vadd.f32 %v1519_v7, %v1517_v17  ;;  %v1627_v19 = vadd.f32 %v1625_v22, %v1623_v57  ;;  %v1620_v17 = vadd.f32 %v1618_v60, %v1616_v21 }
 0x3ec   : > { %v1503_v62 = vpop.f32.mrf.mxu3 }
 0x3ed   : > { %v4069_v9 = vadd.f32 %v1521_v16, %v1513_v18  ;;  %v4071_v45 = vadd.f32 %v1627_v19, %v1619_v31  ;;  %v1504_v20 = vadd.f32 %v1503_v62, %v1491_v8  ;;  %v1492_v44 = vpop.f32.mrf.mxu2 }
 0x3ee   : > { %v1479_v50 = vpop.f32.mrf.mxu1 }
 0x3ef   : > { %v4076_v29 = vmul.f32 0.70710677, %v4069_v9  ;;  %v1518_v43 = vmul.f32 %v1516_v4, %v1504_v20  ;;  %v1624_v7 = vmul.f32 %v1622_v34, %v1504_v20 }
 0x3f1   : > { %v1529_v22 = vmul.f32 %v4076_v29, %v4076_v29  ;;  %v1522_v57 = vadd.f32 %v1520_v25, %v1518_v43  ;;  %v1628_v18 = vadd.f32 %v1626_v26, %v1624_v7 }
 0x3f3   : > { %v1530_v31 = vmin.f32 %v1529_v22, 16.0  ;;  %v4080_v16 = vadd.f32 %v1522_v57, %v1514_v12  ;;  %v4082_v56 = vadd.f32 %v1628_v18, %v1620_v17 }
 0x3f4   : > { %v1505_v3 = vpop.f32.mrf.mxu3 }
 0x3f5   : > { %v1531_v19 = vmul.f32 2.1237322e-06, %v1530_v31  ;;  %v1542_v8 = vmul.f32 3.8918573e-05, %v1530_v31  ;;  %v4085_v28 = vmul.f32 0.70710677, %v4080_v16 }
 0x3f7   : > { %v1532_v4 = vadd.f32 0.00028619796, %v1531_v19  ;;  %v1543_v34 = vadd.f32 0.001143296, %v1542_v8  ;;  %v1569_v62 = vmul.f32 %v4085_v28, %v4085_v28 }
 0x3f9   : > { %v1533_v55 = vmul.f32 %v1532_v4, %v1530_v31  ;;  %v1544_v60 = vmul.f32 %v1543_v34, %v1530_v31  ;;  %v1570_v20 = vmin.f32 %v1569_v62, 16.0 }
 0x3fb   : > { %v1545_v44 = vadd.f32 0.014752088, %v1544_v60  ;;  %v1534_v46 = vadd.f32 0.0036580483, %v1533_v55  ;;  %v1571_v41 = vmul.f32 2.1237322e-06, %v1570_v20 }
 0x3fc   : > { %v1582_v21 = vmul.f32 3.8918573e-05, %v1570_v20 }
 0x3fd   : > { %v1546_v25 = vmul.f32 %v1545_v44, %v1530_v31  ;;  %v1572_v26 = vadd.f32 0.00028619796, %v1571_v41  ;;  %v1535_v7 = vmul.f32 %v1534_v46, %v1530_v31 }
 0x3fe   : > { %v1583_v50 = vadd.f32 0.001143296, %v1582_v21 }
 0x3ff   : > { %v1547_v43 = vadd.f32 0.112945676, %v1546_v25  ;;  %v1573_v22 = vmul.f32 %v1572_v26, %v1570_v20  ;;  %v1536_v19 = vadd.f32 0.05243302, %v1535_v7 }
 0x400   : > { %v1584_v12 = vmul.f32 %v1583_v50, %v1570_v20 }
 0x401   : > { %v1548_v17 = vmul.f32 %v1547_v43, %v1530_v31  ;;  %v1574_v18 = vadd.f32 0.0036580483, %v1573_v22  ;;  %v1537_v55 = vmul.f32 %v1536_v19, %v1530_v31 }
 0x402   : > { %v1585_v57 = vadd.f32 0.014752088, %v1584_v12 }
 0x403   : > { %v1549_v3 = vadd.f32 0.4994258, %v1548_v17  ;;  %v1575_v62 = vmul.f32 %v1574_v18, %v1570_v20  ;;  %v1538_v21 = vadd.f32 0.18741608, %v1537_v55 }
 0x404   : > { %v1586_v8 = vmul.f32 %v1585_v57, %v1570_v20 }
 0x405   : > { %v1550_v4 = vmul.f32 %v1549_v3, %v1530_v31  ;;  %v1576_v44 = vadd.f32 0.05243302, %v1575_v62  ;;  %v1539_v43 = vmul.f32 %v1538_v21, %v1530_v31 }
 0x406   : > { %v1587_v34 = vadd.f32 0.112945676, %v1586_v8 }
 0x407   : > { %v1551_v60 = vadd.f32 1.0, %v1550_v4  ;;  %v1577_v26 = vmul.f32 %v1576_v44, %v1570_v20  ;;  %v1540_v57 = vadd.f32 1.1283791, %v1539_v43 }
 0x408   : > { %v1588_v5 = vmul.f32 %v1587_v34, %v1570_v20 }
 0x409   : > { %3002 = vrcp.f32 %v1551_v60  ;;  %v1578_v7 = vadd.f32 0.18741608, %v1577_v26  ;;  %v1563_v17 = vand.u32 2147483648, %v1551_v60  ;;  %v1561_v18 = vand.u32 2147483647, %v1551_v60 }
 0x40a   : > { %v1589_v41 = vadd.f32 0.4994258, %v1588_v5  ;;  %vm1557_vm9 = vweird.f32 %v1551_v60  ;;  %v1541_v34 = vmul.f32 %v1540_v57, %v4076_v29 }
 0x40b   : > { %v1579_v4 = vmul.f32 %v1578_v7, %v1570_v20  ;;  %v1564_v5 = vor.u32 1.1754944e-38, %v1563_v17  ;;  %vm1562_vm11 = vcmp.eq.f32.partialorder %v1561_v18, 8.507059e+37 }
 0x40c   : > { %v1590_v25 = vmul.f32 %v1589_v41, %v1570_v20 }
 0x40d   : > { %v1580_v21 = vadd.f32 1.1283791, %v1579_v4  ;;  %v4748_v4 = vld [vmem:[#allocation18_spill] sm:$0xff] }
 0x40e   : > { %v1591_v50 = vadd.f32 1.0, %v1590_v25 }
 0x40f   : > { %v3003_v46 = vpop.eup %3002  ;;  %v1581_v29 = vmul.f32 %v1580_v21, %v4085_v28  ;;  %v4751_v28 = vld [vmem:[#allocation24_spill] sm:$0xff]  ;;  %v4756_v21 = vld [vmem:[#allocation23_spill] sm:$0xff] }
 0x410   : > { %v1553_v12 = vmul.f32 %v3003_v46, %v1551_v60  ;;  %3004 = vrcp.f32 %v1591_v50  ;;  %vm1558_vm8 = vweird.f32 %v3003_v46  ;;  %v1603_v25 = vand.u32 2147483648, %v1591_v50 }
 0x411   : > { %vm1559_vm10 = vmor %vm1557_vm9, %vm1558_vm8  ;;  %v1525_v60 = vmul.f32 0.5, %v4069_v9  ;;  %vm1597_vm13 = vweird.f32 %v1591_v50  ;;  %v1526_v9 = vmul.f32 0.5, %v4080_v16  ;;  %v4757_v16 = vld [vmem:[#allocation25_spill] sm:$0xff] }
 0x412   : > { %v1554_v22 = vsub.f32 1.0, %v1553_v12  ;;  %v1601_v12 = vand.u32 2147483647, %v1591_v50  ;;  %v1604_v7 = vor.u32 1.1754944e-38, %v1603_v25  ;;  %v4758_v25 = vld [vmem:[#allocation30_spill] sm:$0xff] }
 0x414   : > { %v1555_v3 = vmul.f32 %v3003_v46, %v1554_v22  ;;  %vm1602_vm15 = vcmp.eq.f32.partialorder %v1601_v12, 8.507059e+37  ;;  %v4761_v12 = vld [vmem:[#allocation29_spill] sm:$0xff] }
 0x416   : > { %v1556_v19 = vadd.f32 %v3003_v46, %v1555_v3  ;;  %v3005_v8 = vpop.eup %3004 }
 0x417   : > { %v1593_v31 = vmul.f32 %v3005_v8, %v1591_v50  ;;  %vm1598_vm12 = vweird.f32 %v3005_v8 }
 0x418   : > { %v1560_v62 = vsel %vm1559_vm10, %v3003_v46, %v1556_v19  ;;  %vm1599_vm14 = vmor %vm1597_vm13, %vm1598_vm12 }
 0x419   : > { %v1565_v55 = vsel %vm1562_vm11, %v1564_v5, %v1560_v62  ;;  %v1594_v41 = vsub.f32 1.0, %v1593_v31  ;;  %v4749_v5 = vld [vmem:[#allocation20_spill] sm:$0xff]  ;;  %v4750_v62 = vld [vmem:[#allocation22_spill] sm:$0xff]  ;;  %v4752_v31 = vld [vmem:[#allocation19_spill] sm:$0xff] }
 0x41a   : > { %v1566_v44 = vmul.f32 %v1565_v55, %v1541_v34  ;;  %v4753_v55 = vld [vmem:[#allocation21_spill] sm:$0xff] }
 0x41b   : > { %v1595_v43 = vmul.f32 %v3005_v8, %v1594_v41  ;;  %v4755_v41 = vld [vmem:[#allocation28_spill] sm:$0xff] }
 0x41c   : > { %v2815_v26 = vclamps-f32 %v1566_v44, 1.0  ;;  %v4754_v44 = vld [vmem:[#allocation26_spill] sm:$0xff] }
 0x41d   : > { %v1596_v20 = vadd.f32 %v3005_v8, %v1595_v43  ;;  %v4760_v43 = vld [vmem:[#allocation27_spill] sm:$0xff] }
 0x41e   : > { %v1609_v22 = vadd.f32 1.0, %v2815_v26  ;;  %v4759_v26 = vld [vmem:[#allocation32_spill] sm:$0xff] }
 0x41f   : > { %v1600_v17 = vsel %vm1599_vm14, %v3005_v8, %v1596_v20  ;;  %v4764_v20 = vld [vmem:[#allocation31_spill] sm:$0xff] }
 0x420   : > { %v1611_v46 = vmul.f32 %v1609_v22, %v1525_v60  ;;  %v1605_v57 = vsel %vm1602_vm15, %v1604_v7, %v1600_v17  ;;  %v4762_v60 = vld [vmem:[#allocation34_spill] sm:$0xff]  ;;  %v4763_v22 = vld [vmem:[#allocation36_spill] sm:$0xff]  ;;  %v4765_v7 = vld [vmem:[#allocation33_spill] sm:$0xff] }
 0x421   : > { %v1606_v18 = vmul.f32 %v1605_v57, %v1581_v29  ;;  %v4766_v29 = vld [vmem:[#allocation38_spill] sm:$0xff]  ;;  %v4768_v17 = vld [vmem:[#allocation35_spill] sm:$0xff]  ;;  %v4769_v57 = vld [vmem:[#allocation37_spill] sm:$0xff] }
 0x422   : > { %v1719_v3 = vpack.c.bf16 %v1611_v46, %v1611_v46  ;;  %v4767_v46 = vld [vmem:[#allocation40_spill] sm:$0xff] }
 0x423   : > { %v2816_v19 = vclamps-f32 %v1606_v18, 1.0  ;;  %v4771_v18 = vld [vmem:[#allocation44_spill] sm:$0xff] }
 0x424   : > { %1729 = vmatmul.bf16.vlgmr.msra.gmra.mxu0 %v1719_v3  ;;  %1755 = vmatmul.bf16.vlgmr.msra.gmra.mxu2 %v1719_v3  ;;  %v4770_v3 = vld [vmem:[#allocation42_spill] sm:$0xff] }
 0x425   : > { %1917 = vmatpush.bf16.msra.mxu0 %v4748_v4  ;;  %1943 = vmatpush.bf16.msra.mxu2 %v4749_v5  ;;  %v1610_v50 = vadd.f32 1.0, %v2816_v19  ;;  %v4772_v19 = vld [vmem:[#allocation39_spill] sm:$0xff] }
 0x427   : > { %v1612_v34 = vmul.f32 %v1610_v50, %v1526_v9  ;;  %v4773_v9 = vld [vmem:[#allocation41_spill] sm:$0xff]  ;;  %v4774_v50 = vld [vmem:[#allocation46_spill] sm:$0xff] }
 0x429   : > { %1918 = vmatpush.bf16.msra.mxu0 %v4750_v62  ;;  %1944 = vmatpush.bf16.msra.mxu2 %v4751_v28  ;;  %v1720_v8 = vpack.c.bf16 %v1612_v34, %v1612_v34  ;;  %v4775_v34 = vld [vmem:[#allocation48_spill] sm:$0xff] }
 0x42b   : > { %1742 = vmatmul.bf16.vlgmr.msra.gmra.mxu1 %v1720_v8  ;;  %1768 = vmatmul.bf16.vlgmr.msra.gmra.mxu3 %v1720_v8  ;;  %v4776_v8 = vld [vmem:[#allocation43_spill] sm:$0xff] }
 0x42c   : > { %1930 = vmatpush.bf16.msra.mxu1 %v4752_v31  ;;  %1956 = vmatpush.bf16.msra.mxu3 %v4753_v55 }
 0x42d   : > { %1919 = vmatpush.bf16.msra.mxu0 %v4754_v44  ;;  %1945 = vmatpush.bf16.msra.mxu2 %v4755_v41 }
 0x430   : > { %1931 = vmatpush.bf16.msra.mxu1 %v4756_v21  ;;  %1957 = vmatpush.bf16.msra.mxu3 %v4757_v16 }
 0x431   : > { %1920 = vmatpush.bf16.msra.mxu0 %v4758_v25  ;;  %1946 = vmatpush.bf16.msra.mxu2 %v4759_v26 }
 0x434   : > { %1932 = vmatpush.bf16.msra.mxu1 %v4760_v43  ;;  %1958 = vmatpush.bf16.msra.mxu3 %v4761_v12 }
 0x435   : > { %1921 = vmatpush.bf16.msra.mxu0 %v4762_v60  ;;  %1947 = vmatpush.bf16.msra.mxu2 %v4763_v22  ;;  %v4780_v60 = vld [vmem:[#allocation50_spill] sm:$0xff] }
 0x438   : > { %1933 = vmatpush.bf16.msra.mxu1 %v4764_v20  ;;  %1959 = vmatpush.bf16.msra.mxu3 %v4765_v7 }
 0x439   : > { %1922 = vmatpush.bf16.msra.mxu0 %v4766_v29  ;;  %1948 = vmatpush.bf16.msra.mxu2 %v4767_v46  ;;  %v4778_v46 = vld [vmem:[#allocation47_spill] sm:$0xff] }
 0x43c   : > { %1934 = vmatpush.bf16.msra.mxu1 %v4768_v17  ;;  %1960 = vmatpush.bf16.msra.mxu3 %v4769_v57  ;;  %v4779_v17 = vld [vmem:[#allocation49_spill] sm:$0xff] }
 0x43d   : > { %1923 = vmatpush.bf16.msra.mxu0 %v4770_v3  ;;  %1949 = vmatpush.bf16.msra.mxu2 %v4771_v18  ;;  %v4126_v3 = vmul.f32 0.70710677, %v4071_v45 }
 0x440   : > { %1935 = vmatpush.bf16.msra.mxu1 %v4772_v19  ;;  %1961 = vmatpush.bf16.msra.mxu3 %v4773_v9  ;;  %v1635_v19 = vmul.f32 %v4126_v3, %v4126_v3  ;;  %v4131_v9 = vmul.f32 0.70710677, %v4082_v56 }
 0x441   : > { %1924 = vmatpush.bf16.msra.mxu0 %v4774_v50  ;;  %1950 = vmatpush.bf16.msra.mxu2 %v4775_v34 }
 0x442   : > { %v4133_v50 = vmin.f32 %v1635_v19, 16.0 }
 0x444   : > { %1936 = vmatpush.bf16.msra.mxu1 %v4776_v8  ;;  %1962 = vmatpush.bf16.msra.mxu3 %v4777_v23  ;;  %v1675_v8 = vmul.f32 %v4131_v9, %v4131_v9  ;;  %v1648_v23 = vmul.f32 3.8918573e-05, %v4133_v50 }
 0x446   : > { %v4138_v34 = vmin.f32 %v1675_v8, 16.0 }
 0x448   : > { %1937 = vmatpush.bf16.msra.mxu1 %v4778_v46  ;;  %1963 = vmatpush.bf16.msra.mxu3 %v4779_v17  ;;  %v1649_v46 = vadd.f32 0.001143296, %v1648_v23  ;;  %v1688_v17 = vmul.f32 3.8918573e-05, %v4138_v34 }
 0x44a   : > { %v1650_v18 = vmul.f32 %v1649_v46, %v4133_v50  ;;  %v1689_v57 = vadd.f32 0.001143296, %v1688_v17 }
 0x44c   : > { %v1651_v7 = vadd.f32 0.014752088, %v1650_v18  ;;  %v1690_v20 = vmul.f32 %v1689_v57, %v4138_v34  ;;  %v4781_v57 = vld [vmem:[#allocation55_spill] sm:$0xff] }
 0x44e   : > { %v1652_v19 = vmul.f32 %v1651_v7, %v4133_v50  ;;  %v1691_v43 = vadd.f32 0.014752088, %v1690_v20 }
 0x450   : > { %v1653_v23 = vadd.f32 0.112945676, %v1652_v19  ;;  %v1692_v46 = vmul.f32 %v1691_v43, %v4138_v34 }
 0x452   : > { %v1654_v7 = vmul.f32 %v1653_v23, %v4133_v50 }
 0x454   : > { %v1655_v41 = vadd.f32 0.4994258, %v1654_v7 }
 0x4a1   : > { %v1730_v29 = vpop.f32.mrf.mxu0 }
 0x4a2   : > { %v1731_v12 = vadd.f32 %v1730_v29, %v4780_v60 }
 0x4a7   : > { %v1756_v22 = vpop.f32.mrf.mxu2 }
 0x4a8   : > { %v1743_v26 = vpop.f32.mrf.mxu1  ;;  %v1757_v18 = vadd.f32 %v1756_v22, %v4781_v57  ;;  %v1656_v57 = vmul.f32 %v1655_v41, %v4133_v50 }
 0x4a9   : > { %v1732_v25 = vpop.f32.mrf.mxu0  ;;  %v4145_v8 = vadd.f32 %v1743_v26, %v1731_v12  ;;  %v1693_v26 = vadd.f32 0.112945676, %v1692_v46  ;;  %v1637_v12 = vmul.f32 2.1237322e-06, %v4133_v50  ;;  %v1677_v46 = vmul.f32 2.1237322e-06, %v4138_v34 }
 0x4ab   : > { %v4148_v16 = vmul.f32 0.70710677, %v4145_v8  ;;  %v1678_v14 = vadd.f32 0.00028619796, %v1677_v46 }
 0x4ad   : > { %v1777_v17 = vmul.f32 %v4148_v16, %v4148_v16  ;;  %v1679_v6 = vmul.f32 %v1678_v14, %v4138_v34 }
 0x4ae   : > { %v1769_v21 = vpop.f32.mrf.mxu3 }
 0x4af   : > { %v1758_v29 = vpop.f32.mrf.mxu2  ;;  %v4155_v20 = vmin.f32 %v1777_v17, 16.0  ;;  %v4157_v25 = vadd.f32 %v1769_v21, %v1757_v18  ;;  %v1638_v17 = vadd.f32 0.00028619796, %v1637_v12 }
 0x4b0   : > { %v1745_v19 = vpop.f32.mrf.mxu1  ;;  %v1694_v29 = vmul.f32 %v1693_v26, %v4138_v34 }
 0x4b1   : > { %v1779_v60 = vmul.f32 2.1237322e-06, %v4155_v20  ;;  %v1790_v43 = vmul.f32 3.8918573e-05, %v4155_v20  ;;  %v4163_v44 = vmul.f32 0.70710677, %v4157_v25  ;;  %v1639_v2 = vmul.f32 %v1638_v17, %v4133_v50 }
 0x4b3   : > { %v1780_v22 = vadd.f32 0.00028619796, %v1779_v60  ;;  %v1791_v23 = vadd.f32 0.001143296, %v1790_v43  ;;  %v1817_v21 = vmul.f32 %v4163_v44, %v4163_v44  ;;  %v1695_v60 = vadd.f32 0.4994258, %v1694_v29 }
 0x4b5   : > { %v1781_v18 = vmul.f32 %v1780_v22, %v4155_v20  ;;  %v1792_v19 = vmul.f32 %v1791_v23, %v4155_v20  ;;  %v4172_v7 = vmin.f32 %v1817_v21, 16.0  ;;  %v4178_v22 = vadd.f32 1.0, %v1656_v57 }
 0x4b6   : > { %v1771_v55 = vpop.f32.mrf.mxu3 }
 0x4b7   : > { %v1793_v31 = vadd.f32 0.014752088, %v1792_v19  ;;  %v1782_v43 = vadd.f32 0.0036580483, %v1781_v18  ;;  %v1819_v26 = vmul.f32 2.1237322e-06, %v4172_v7  ;;  %v1696_v18 = vmul.f32 %v1695_v60, %v4138_v34 }
 0x4b8   : > { %v1830_v12 = vmul.f32 3.8918573e-05, %v4172_v7  ;;  %v1640_v19 = vadd.f32 0.0036580483, %v1639_v2  ;;  %3006 = vrcp.f32 %v4178_v22  ;;  %vm1663_vm4 = vweird.f32 %v4178_v22 }
 0x4b9   : > { %v1794_v28 = vmul.f32 %v1793_v31, %v4155_v20  ;;  %v1820_v23 = vadd.f32 0.00028619796, %v1819_v26  ;;  %v1783_v21 = vmul.f32 %v1782_v43, %v4155_v20  ;;  %v4188_v43 = vadd.f32 1.0, %v1696_v18 }
 0x4ba   : > { %v1831_v62 = vadd.f32 0.001143296, %v1830_v12  ;;  %v1641_v12 = vmul.f32 %v1640_v19, %v4133_v50 }
 0x4bb   : > { %v1795_v41 = vadd.f32 0.112945676, %v1794_v28  ;;  %v1821_v55 = vmul.f32 %v1820_v23, %v4172_v7  ;;  %v1784_v26 = vadd.f32 0.05243302, %v1783_v21  ;;  %3008 = vrcp.f32 %v4188_v43 }
 0x4bc   : > { %v1832_v29 = vmul.f32 %v1831_v62, %v4172_v7  ;;  %v1680_v62 = vadd.f32 0.0036580483, %v1679_v6  ;;  %v1642_v21 = vadd.f32 0.05243302, %v1641_v12  ;;  %vm1703_vm13 = vweird.f32 %v4188_v43 }
 0x4bd   : > { %v1796_v17 = vmul.f32 %v1795_v41, %v4155_v20  ;;  %v1822_v46 = vadd.f32 0.0036580483, %v1821_v55 }
 0x4be   : > { %v1833_v31 = vadd.f32 0.014752088, %v1832_v29  ;;  %v4192_v23 = vpop.eup %3006  ;;  %v1785_v29 = vmul.f32 %v1784_v26, %v4155_v20  ;;  %v1681_v18 = vmul.f32 %v1680_v62, %v4138_v34 }
 0x4bf   : > { %v1797_v57 = vadd.f32 0.4994258, %v1796_v17  ;;  %v1823_v41 = vmul.f32 %v1822_v46, %v4172_v7  ;;  %v1659_v6 = vmul.f32 %v4192_v23, %v4178_v22  ;;  %v1643_v46 = vmul.f32 %v1642_v21, %v4133_v50 }
 0x4c0   : > { %v1834_v28 = vmul.f32 %v1833_v31, %v4172_v7  ;;  %v1786_v31 = vadd.f32 0.18741608, %v1785_v29  ;;  %vm1664_vm1 = vweird.f32 %v4192_v23 }
 0x4c1   : > { %v1798_v60 = vmul.f32 %v1797_v57, %v4155_v20  ;;  %v1824_v17 = vadd.f32 0.05243302, %v1823_v41  ;;  %v4203_v26 = vpop.eup %3008  ;;  %v1644_v41 = vadd.f32 0.18741608, %v1643_v46  ;;  %vm4224_vm6 = vmor %vm1663_vm4, %vm1664_vm1 }
 0x4c2   : > { %v1835_v2 = vadd.f32 0.112945676, %v1834_v28  ;;  %v1682_v28 = vadd.f32 0.05243302, %v1681_v18  ;;  %v1699_v18 = vmul.f32 %v4203_v26, %v4188_v43  ;;  %vm1704_vm10 = vweird.f32 %v4203_v26 }
 0x4c3   : > { %v1799_v14 = vadd.f32 1.0, %v1798_v60  ;;  %v1825_v62 = vmul.f32 %v1824_v17, %v4172_v7  ;;  %vm1705_vm14 = vmor %vm1703_vm13, %vm1704_vm10 }
 0x4c4   : > { %v1836_v55 = vmul.f32 %v1835_v2, %v4172_v7  ;;  %v1660_v2 = vsub.f32 1.0, %v1659_v6  ;;  %v1683_v29 = vmul.f32 %v1682_v28, %v4138_v34  ;;  %v1700_v28 = vsub.f32 1.0, %v1699_v18 }
 0x4c5   : > { %3010 = vrcp.f32 %v1799_v14  ;;  %v1826_v5 = vadd.f32 0.18741608, %v1825_v62  ;;  %v1809_v17 = vand.u32 2147483647, %v1799_v14  ;;  %vm1805_vm2 = vweird.f32 %v1799_v14 }
 0x4c6   : > { %v1837_v19 = vadd.f32 0.4994258, %v1836_v55  ;;  %v1787_v55 = vmul.f32 %v1786_v31, %v4155_v20  ;;  %v1661_v21 = vmul.f32 %v4192_v23, %v1660_v2  ;;  %v1645_v20 = vmul.f32 %v1644_v41, %v4133_v50 }
 0x4c7   : > { %v1684_v31 = vadd.f32 0.18741608, %v1683_v29  ;;  %v1827_v11 = vmul.f32 %v1826_v5, %v4172_v7  ;;  %vm1810_vm5 = vcmp.eq.f32.partialorder %v1809_v17, 8.507059e+37  ;;  %v1669_v41 = vand.u32 2147483648, %v4178_v22 }
 0x4c8   : > { %v1838_v57 = vmul.f32 %v1837_v19, %v4172_v7  ;;  %v1788_v6 = vadd.f32 1.1283791, %v1787_v55  ;;  %v1667_v5 = vand.u32 2147483647, %v4178_v22 }
 0x4ca   : > { %v4205_v60 = vadd.f32 1.0, %v1838_v57  ;;  %v1811_v57 = vand.u32 2147483648, %v1799_v14  ;;  %v1789_v55 = vmul.f32 %v1788_v6, %v4148_v16  ;;  %v1701_v16 = vmul.f32 %v4203_v26, %v1700_v28 }
 0x4cb   : > { %v3011_v12 = vpop.eup %3010  ;;  %v1685_v6 = vmul.f32 %v1684_v31, %v4138_v34  ;;  %vm1668_vm9 = vcmp.eq.f32.partialorder %v1667_v5, 8.507059e+37  ;;  %v1774_v5 = vmul.f32 0.5, %v4157_v25  ;;  %v1631_v25 = vmul.f32 0.5, %v4071_v45 }
 0x4cc   : > { %v1801_v30 = vmul.f32 %v3011_v12, %v1799_v14  ;;  %3012 = vrcp.f32 %v4205_v60  ;;  %vm1806_vm0 = vweird.f32 %v3011_v12  ;;  %v1812_v2 = vor.u32 1.1754944e-38, %v1811_v57 }
 0x4cd   : > { %vm1807_vm3 = vmor %vm1805_vm2, %vm1806_vm0  ;;  %v1849_v18 = vand.u32 2147483647, %v4205_v60  ;;  %v1646_v57 = vadd.f32 1.1283791, %v1645_v20  ;;  %vm1845_vm8 = vweird.f32 %v4205_v60  ;;  %v1702_v34 = vadd.f32 %v4203_v26, %v1701_v16 }
 0x4ce   : > { %v1802_v19 = vsub.f32 1.0, %v1801_v30  ;;  %v1662_v30 = vadd.f32 %v4192_v23, %v1661_v21 }
 0x4cf   : > { %vm1850_vm12 = vcmp.eq.f32.partialorder %v1849_v18, 8.507059e+37  ;;  %v1647_v20 = vmul.f32 %v1646_v57, %v4126_v3  ;;  %v1706_v14 = vsel %vm1705_vm14, %v4203_v26, %v1702_v34  ;;  %v4792_v34 = vld [vmem:[#allocation80_spill] sm:$0xff] }
 0x4d0   : > { %v1803_v4 = vmul.f32 %v3011_v12, %v1802_v19  ;;  %v1851_v19 = vand.u32 2147483648, %v4205_v60 }
 0x4d2   : > { %v3013_v46 = vpop.eup %3012  ;;  %v1804_v47 = vadd.f32 %v3011_v12, %v1803_v4 }
 0x4d3   : > { %v1841_v62 = vmul.f32 %v3013_v46, %v4205_v60  ;;  %vm1846_vm7 = vweird.f32 %v3013_v46  ;;  %v1709_v60 = vand.u32 2147483648, %v4188_v43 }
 0x4d4   : > { %v1808_v50 = vsel %vm1807_vm3, %v3011_v12, %v1804_v47  ;;  %v1666_v47 = vsel %vm4224_vm6, %v4192_v23, %v1662_v30  ;;  %v1828_v12 = vadd.f32 1.1283791, %v1827_v11  ;;  %v1773_v23 = vmul.f32 0.5, %v4145_v8  ;;  %vm1847_vm11 = vmor %vm1845_vm8, %vm1846_vm7 }
 0x4d5   : > { %v1813_v29 = vsel %vm1810_vm5, %v1812_v2, %v1808_v50  ;;  %v1842_v4 = vsub.f32 1.0, %v1841_v62  ;;  %v1670_v2 = vor.u32 1.1754944e-38, %v1669_v41  ;;  %v1852_v11 = vor.u32 1.1754944e-38, %v1851_v19 }
 0x4d6   : > { %v1814_v7 = vmul.f32 %v1813_v29, %v1789_v55  ;;  %v1829_v62 = vmul.f32 %v1828_v12, %v4163_v44  ;;  %v1707_v8 = vand.u32 2147483647, %v4188_v43  ;;  %v1686_v44 = vadd.f32 1.1283791, %v1685_v6 }
 0x4d7   : > { %v1843_v21 = vmul.f32 %v3013_v46, %v1842_v4  ;;  %v1671_v28 = vsel %vm1668_vm9, %v1670_v2, %v1666_v47  ;;  %v1710_v3 = vor.u32 1.1754944e-38, %v1709_v60  ;;  %v1632_v6 = vmul.f32 0.5, %v4082_v56  ;;  %v4784_v56 = vld [vmem:[#allocation76_spill] sm:$0xff]  ;;  %v4796_v60 = vld [vmem:[#allocation26_spill] sm:$0xff] }
 0x4d8   : > { %v2821_v17 = vclamps-f32 %v1814_v7, 1.0  ;;  %v1672_v4 = vmul.f32 %v1671_v28, %v1647_v20  ;;  %vm1708_vm15 = vcmp.eq.f32.partialorder %v1707_v8, 8.507059e+37  ;;  %v1687_v47 = vmul.f32 %v1686_v44, %v4131_v9  ;;  %v4789_v28 = vld [vmem:[#allocation79_spill] sm:$0xff]  ;;  %v4793_v20 = vld [vmem:[#allocation81_spill] sm:$0xff]  ;;  %v4801_v44 = vld [vmem:[#allocation32_spill] sm:$0xff] }
 0x4d9   : > { %v1844_v22 = vadd.f32 %v3013_v46, %v1843_v21  ;;  %v1711_v19 = vsel %vm1708_vm15, %v1710_v3, %v1706_v14  ;;  %v4798_v8 = vld [vmem:[#allocation23_spill] sm:$0xff]  ;;  %v4803_v14 = vld [vmem:[#allocation29_spill] sm:$0xff]  ;;  %v4804_v3 = vld [vmem:[#allocation34_spill] sm:$0xff] }
 0x4da   : > { %v1857_v30 = vadd.f32 1.0, %v2821_v17  ;;  %v2819_v43 = vclamps-f32 %v1672_v4, 1.0  ;;  %v1712_v21 = vmul.f32 %v1711_v19, %v1687_v47  ;;  %v4800_v4 = vld [vmem:[#allocation30_spill] sm:$0xff]  ;;  %v4809_v47 = vld [vmem:[#allocation40_spill] sm:$0xff] }
 0x4db   : > { %v1848_v55 = vsel %vm1847_vm11, %v3013_v46, %v1844_v22  ;;  %v4785_v22 = vld [vmem:[#allocation77_spill] sm:$0xff]  ;;  %v4808_v19 = vld [vmem:[#allocation38_spill] sm:$0xff] }
 0x4dc   : > { %v1859_v31 = vmul.f32 %v1857_v30, %v1773_v23  ;;  %v1853_v50 = vsel %vm1850_vm12, %v1852_v11, %v1848_v55  ;;  %v1715_v26 = vadd.f32 1.0, %v2819_v43  ;;  %v2820_v18 = vclamps-f32 %v1712_v21, 1.0  ;;  %v4786_v23 = vld [vmem:[#allocation18_spill] sm:$0xff]  ;;  %v4787_v30 = vld [vmem:[#allocation20_spill] sm:$0xff]  ;;  %v4807_v43 = vld [vmem:[#allocation33_spill] sm:$0xff] }
 0x4dd   : > { %v1854_v41 = vmul.f32 %v1853_v50, %v1829_v62  ;;  %v4788_v11 = vld [vmem:[#allocation78_spill] sm:$0xff]  ;;  %v4791_v55 = vld [vmem:[#allocation24_spill] sm:$0xff]  ;;  %v4795_v50 = vld [vmem:[#allocation21_spill] sm:$0xff] }
 0x4de   : > { %v1861_v29 = vpack.c.bf16 %v1859_v31, %v1859_v31  ;;  %v1717_v9 = vmul.f32 %v1715_v26, %v1631_v25  ;;  %v1716_v57 = vadd.f32 1.0, %v2820_v18  ;;  %v4790_v62 = vld [vmem:[#allocation22_spill] sm:$0xff]  ;;  %v4794_v31 = vld [vmem:[#allocation19_spill] sm:$0xff]  ;;  %v4813_v26 = vld [vmem:[#allocation44_spill] sm:$0xff] }
 0x4df   : > { %v2822_v46 = vclamps-f32 %v1854_v41, 1.0  ;;  %v4797_v41 = vld [vmem:[#allocation28_spill] sm:$0xff]  ;;  %v4812_v21 = vld [vmem:[#allocation42_spill] sm:$0xff]  ;;  %v4814_v25 = vld [vmem:[#allocation39_spill] sm:$0xff] }
 0x4e0   : > { %1871 = vmatmul.bf16.vlgmr.msrb.gmra.mxu0 %v1861_v29  ;;  %1897 = vmatmul.bf16.vlgmr.msrb.gmra.mxu2 %v1861_v29  ;;  %v1915_v45 = vpack.c.bf16 %v1717_v9, %v1717_v9  ;;  %v1718_v17 = vmul.f32 %v1716_v57, %v1632_v6  ;;  %v4799_v29 = vld [vmem:[#allocation25_spill] sm:$0xff]  ;;  %v4816_v9 = vld [vmem:[#allocation46_spill] sm:$0xff]  ;;  %v4817_v57 = vld [vmem:[#allocation48_spill] sm:$0xff] }
 0x4e1   : > { %v1858_v7 = vadd.f32 1.0, %v2822_v46  ;;  %2059 = vmatpush.bf16.msrb.mxu0 %v3517_v59  ;;  %2085 = vmatpush.bf16.msrb.mxu2 %v3519_v61  ;;  %v4802_v46 = vld [vmem:[#allocation27_spill] sm:$0xff]  ;;  %v4815_v18 = vld [vmem:[#allocation41_spill] sm:$0xff] }
 0x4e2   : > { %v1916_v2 = vpack.c.bf16 %v1718_v17, %v1718_v17  ;;  %v4819_v6 = vld [vmem:[#allocation45_spill] sm:$0xff]  ;;  %v4820_v17 = vld [vmem:[#allocation47_spill] sm:$0xff] }
 0x4e3   : > { %v1860_v16 = vmul.f32 %v1858_v7, %v1774_v5  ;;  %v4805_v5 = vld [vmem:[#allocation36_spill] sm:$0xff]  ;;  %v4806_v7 = vld [vmem:[#allocation31_spill] sm:$0xff] }
 0x4e5   : > { %v1862_v12 = vpack.c.bf16 %v1860_v16, %v1860_v16  ;;  %2060 = vmatpush.bf16.msrb.mxu0 %v4704_v27  ;;  %2086 = vmatpush.bf16.msrb.mxu2 %v4705_v32  ;;  %v4810_v16 = vld [vmem:[#allocation35_spill] sm:$0xff] }
 0x4e7   : > { %1884 = vmatmul.bf16.vlgmr.msrb.gmra.mxu1 %v1862_v12  ;;  %1910 = vmatmul.bf16.vlgmr.msrb.gmra.mxu3 %v1862_v12  ;;  %v4811_v12 = vld [vmem:[#allocation37_spill] sm:$0xff] }
 0x4e8   : > { %2072 = vmatpush.bf16.msrb.mxu1 %v4706_v48  ;;  %2098 = vmatpush.bf16.msrb.mxu3 %v4707_v49 }
 0x4e9   : > { %2061 = vmatpush.bf16.msrb.mxu0 %v4708_v37  ;;  %2087 = vmatpush.bf16.msrb.mxu2 %v4709_v35 }
 0x4ec   : > { %2073 = vmatpush.bf16.msrb.mxu1 %v4710_v58  ;;  %2099 = vmatpush.bf16.msrb.mxu3 %v4711_v51 }
 0x4ed   : > { %2062 = vmatpush.bf16.msrb.mxu0 %v4712_v54  ;;  %2088 = vmatpush.bf16.msrb.mxu2 %v4713_v52 }
 0x4f0   : > { %1925 = vmatmul.bf16.vlgmr.msra.gmra.mxu0 %v1915_v45  ;;  %1951 = vmatmul.bf16.vlgmr.msra.gmra.mxu2 %v1915_v45  ;;  %v4818_v45 = vld [vmem:[#allocation43_spill] sm:$0xff] }
 0x4f1   : > { %2074 = vmatpush.bf16.msrb.mxu1 %v4714_v63  ;;  %2100 = vmatpush.bf16.msrb.mxu3 %v4715_v15 }
 0x4f2   : > { %2063 = vmatpush.bf16.msrb.mxu0 %v4716_v42  ;;  %2089 = vmatpush.bf16.msrb.mxu2 %v4717_v24 }
 0x4f5   : > { %2075 = vmatpush.bf16.msrb.mxu1 %v4718_v33  ;;  %2101 = vmatpush.bf16.msrb.mxu3 %v4719_v40 }
 0x4f6   : > { %2064 = vmatpush.bf16.msrb.mxu0 %v4720_v38  ;;  %2090 = vmatpush.bf16.msrb.mxu2 %v4721_v13 }
 0x4f7   : > { %1938 = vmatmul.bf16.vlgmr.msra.gmra.mxu1 %v1916_v2  ;;  %1964 = vmatmul.bf16.vlgmr.msra.gmra.mxu3 %v1916_v2  ;;  %v4821_v2 = vld [vmem:[#allocation49_spill] sm:$0xff] }
 0x4f9   : > { %2076 = vmatpush.bf16.msrb.mxu1 %v4722_v10  ;;  %2102 = vmatpush.bf16.msrb.mxu3 %v4723_v39 }
 0x4fa   : > { %2065 = vmatpush.bf16.msrb.mxu0 %v4724_v1  ;;  %2091 = vmatpush.bf16.msrb.mxu2 %v4725_v36 }
 0x4fd   : > { %2077 = vmatpush.bf16.msrb.mxu1 %v4726_v0  ;;  %2103 = vmatpush.bf16.msrb.mxu3 %v4727_v53 }
 0x4fe   : > { %2066 = vmatpush.bf16.msrb.mxu0 %v4784_v56  ;;  %2092 = vmatpush.bf16.msrb.mxu2 %v4785_v22 }
 0x501   : > { %2078 = vmatpush.bf16.msrb.mxu1 %v4788_v11  ;;  %2104 = vmatpush.bf16.msrb.mxu3 %v4789_v28 }
 0x502   : > { %2219 = vmatpush.bf16.msra.mxu0 %v4786_v23  ;;  %2245 = vmatpush.bf16.msra.mxu2 %v4787_v30  ;;  %v4822_v30 = vld [vmem:[#allocation82_spill] sm:$0xff] }
 0x505   : > { %2079 = vmatpush.bf16.msrb.mxu1 %v4792_v34  ;;  %2105 = vmatpush.bf16.msrb.mxu3 %v4793_v20 }
 0x506   : > { %2220 = vmatpush.bf16.msra.mxu0 %v4790_v62  ;;  %2246 = vmatpush.bf16.msra.mxu2 %v4791_v55 }
 0x509   : > { %2232 = vmatpush.bf16.msra.mxu1 %v4794_v31  ;;  %2258 = vmatpush.bf16.msra.mxu3 %v4795_v50 }
 0x50a   : > { %2221 = vmatpush.bf16.msra.mxu0 %v4796_v60  ;;  %2247 = vmatpush.bf16.msra.mxu2 %v4797_v41  ;;  %v4823_v41 = vld [vmem:[#allocation83_spill] sm:$0xff] }
 0x50d   : > { %2233 = vmatpush.bf16.msra.mxu1 %v4798_v8  ;;  %2259 = vmatpush.bf16.msra.mxu3 %v4799_v29 }
 0x50e   : > { %2222 = vmatpush.bf16.msra.mxu0 %v4800_v4  ;;  %2248 = vmatpush.bf16.msra.mxu2 %v4801_v44 }
 0x511   : > { %2234 = vmatpush.bf16.msra.mxu1 %v4802_v46  ;;  %2260 = vmatpush.bf16.msra.mxu3 %v4803_v14 }
 0x512   : > { %2223 = vmatpush.bf16.msra.mxu0 %v4804_v3  ;;  %2249 = vmatpush.bf16.msra.mxu2 %v4805_v5  ;;  %v4825_v5 = vld [vmem:[#allocation50_spill] sm:$0xff] }
 0x515   : > { %2235 = vmatpush.bf16.msra.mxu1 %v4806_v7  ;;  %2261 = vmatpush.bf16.msra.mxu3 %v4807_v43 }
 0x516   : > { %2224 = vmatpush.bf16.msra.mxu0 %v4808_v19  ;;  %2250 = vmatpush.bf16.msra.mxu2 %v4809_v47 }
 0x519   : > { %2236 = vmatpush.bf16.msra.mxu1 %v4810_v16  ;;  %2262 = vmatpush.bf16.msra.mxu3 %v4811_v12 }
 0x51a   : > { %2225 = vmatpush.bf16.msra.mxu0 %v4812_v21  ;;  %2251 = vmatpush.bf16.msra.mxu2 %v4813_v26  ;;  %v4826_v26 = vld [vmem:[#allocation55_spill] sm:$0xff] }
 0x51d   : > { %2237 = vmatpush.bf16.msra.mxu1 %v4814_v25  ;;  %2263 = vmatpush.bf16.msra.mxu3 %v4815_v18 }
 0x51e   : > { %2226 = vmatpush.bf16.msra.mxu0 %v4816_v9  ;;  %2252 = vmatpush.bf16.msra.mxu2 %v4817_v57 }
 0x521   : > { %2238 = vmatpush.bf16.msra.mxu1 %v4818_v45  ;;  %2264 = vmatpush.bf16.msra.mxu3 %v4819_v6 }
 0x525   : > { %2239 = vmatpush.bf16.msra.mxu1 %v4820_v17  ;;  %2265 = vmatpush.bf16.msra.mxu3 %v4821_v2 }
 0x55d   : > { %v1872_v23 = vpop.f32.mrf.mxu0 }
 0x55e   : > { %v1873_v62 = vadd.f32 %v1872_v23, %v4822_v30 }
 0x563   : > { %v1898_v55 = vpop.f32.mrf.mxu2 }
 0x564   : > { %v1885_v31 = vpop.f32.mrf.mxu1  ;;  %v1899_v8 = vadd.f32 %v1898_v55, %v4823_v41 }
 0x565   : > { %v4317_v50 = vadd.f32 %v1885_v31, %v1873_v62  ;;  %v1874_v60 = vpop.f32.mrf.mxu0 }
 0x56a   : > { %v1911_v29 = vpop.f32.mrf.mxu3 }
 0x56b   : > { %v4320_v4 = vadd.f32 %v1911_v29, %v1899_v8  ;;  %v1900_v44 = vpop.f32.mrf.mxu2 }
 0x56c   : > { %v1887_v46 = vpop.f32.mrf.mxu1 }
 0x56d   : > { %4824 = vst [vmem:[#allocation52_spill] sm:$0xff] %v4320_v4  ;;  %v1926_v14 = vpop.f32.mrf.mxu0 }
 0x56e   : > { %v1927_v7 = vadd.f32 %v1926_v14, %v4825_v5 }
 0x572   : > { %v1913_v3 = vpop.f32.mrf.mxu3 }
 0x573   : > { %v1952_v43 = vpop.f32.mrf.mxu2 }
 0x574   : > { %v1939_v19 = vpop.f32.mrf.mxu1  ;;  %v1953_v25 = vadd.f32 %v1952_v43, %v4826_v26 }
 0x575   : > { %v4323_v47 = vadd.f32 %v1939_v19, %v1927_v7  ;;  %v1928_v16 = vpop.f32.mrf.mxu0 }
 0x577   : > { %v4326_v12 = vmul.f32 0.70710677, %v4323_v47 }
 0x579   : > { %v1973_v21 = vmul.f32 %v4326_v12, %v4326_v12 }
 0x57a   : > { %v1965_v18 = vpop.f32.mrf.mxu3 }
 0x57b   : > { %v1974_v9 = vmin.f32 %v1973_v21, 16.0  ;;  %v4331_v57 = vadd.f32 %v1965_v18, %v1953_v25  ;;  %v1954_v45 = vpop.f32.mrf.mxu2 }
 0x57c   : > { %v1941_v6 = vpop.f32.mrf.mxu1 }
 0x57d   : > { %v1975_v17 = vmul.f32 2.1237322e-06, %v1974_v9  ;;  %v1986_v2 = vmul.f32 3.8918573e-05, %v1974_v9  ;;  %v4334_v23 = vmul.f32 0.70710677, %v4331_v57 }
 0x57f   : > { %v1976_v62 = vadd.f32 0.00028619796, %v1975_v17  ;;  %v1987_v55 = vadd.f32 0.001143296, %v1986_v2  ;;  %v2013_v31 = vmul.f32 %v4334_v23, %v4334_v23 }
 0x581   : > { %v1977_v60 = vmul.f32 %v1976_v62, %v1974_v9  ;;  %v1988_v8 = vmul.f32 %v1987_v55, %v1974_v9  ;;  %v2014_v29 = vmin.f32 %v2013_v31, 16.0 }
 0x582   : > { %v1967_v44 = vpop.f32.mrf.mxu3 }
 0x583   : > { %v1989_v46 = vadd.f32 0.014752088, %v1988_v8  ;;  %v1978_v14 = vadd.f32 0.0036580483, %v1977_v60  ;;  %v2015_v3 = vmul.f32 2.1237322e-06, %v2014_v29 }
 0x584   : > { %v2026_v7 = vmul.f32 3.8918573e-05, %v2014_v29 }
 0x585   : > { %v1990_v43 = vmul.f32 %v1989_v46, %v1974_v9  ;;  %v2016_v19 = vadd.f32 0.00028619796, %v2015_v3  ;;  %v1979_v25 = vmul.f32 %v1978_v14, %v1974_v9 }
 0x586   : > { %v2027_v16 = vadd.f32 0.001143296, %v2026_v7 }
 0x587   : > { %v1991_v21 = vadd.f32 0.112945676, %v1990_v43  ;;  %v2017_v18 = vmul.f32 %v2016_v19, %v2014_v29  ;;  %v1980_v5 = vadd.f32 0.05243302, %v1979_v25 }
 0x588   : > { %v2028_v45 = vmul.f32 %v2027_v16, %v2014_v29 }
 0x589   : > { %v1992_v6 = vmul.f32 %v1991_v21, %v1974_v9  ;;  %v2018_v26 = vadd.f32 0.0036580483, %v2017_v18  ;;  %v1981_v60 = vmul.f32 %v1980_v5, %v1974_v9 }
 0x58a   : > { %v2029_v17 = vadd.f32 0.014752088, %v2028_v45 }
 0x58b   : > { %v1993_v2 = vadd.f32 0.4994258, %v1992_v6  ;;  %v2019_v8 = vmul.f32 %v2018_v26, %v2014_v29  ;;  %v1982_v7 = vadd.f32 0.18741608, %v1981_v60 }
 0x58c   : > { %v2030_v62 = vmul.f32 %v2029_v17, %v2014_v29 }
 0x58d   : > { %v1994_v55 = vmul.f32 %v1993_v2, %v1974_v9  ;;  %v2020_v3 = vadd.f32 0.05243302, %v2019_v8  ;;  %v1983_v21 = vmul.f32 %v1982_v7, %v1974_v9 }
 0x58e   : > { %v2031_v31 = vadd.f32 0.112945676, %v2030_v62 }
 0x58f   : > { %v1995_v44 = vadd.f32 1.0, %v1994_v55  ;;  %v2021_v16 = vmul.f32 %v2020_v3, %v2014_v29  ;;  %v1984_v17 = vadd.f32 1.1283791, %v1983_v21 }
 0x590   : > { %v2032_v4 = vmul.f32 %v2031_v31, %v2014_v29 }
 0x591   : > { %3014 = vrcp.f32 %v1995_v44  ;;  %v2007_v25 = vand.u32 2147483648, %v1995_v44  ;;  %v2022_v6 = vadd.f32 0.18741608, %v2021_v16  ;;  %v2005_v26 = vand.u32 2147483647, %v1995_v44 }
 0x592   : > { %v2033_v46 = vadd.f32 0.4994258, %v2032_v4  ;;  %vm2001_vm1 = vweird.f32 %v1995_v44  ;;  %v1985_v8 = vmul.f32 %v1984_v17, %v4326_v12 }
 0x593   : > { %v2008_v4 = vor.u32 1.1754944e-38, %v2007_v25  ;;  %v2023_v55 = vmul.f32 %v2022_v6, %v2014_v29  ;;  %vm2006_vm3 = vcmp.eq.f32.partialorder %v2005_v26, 8.507059e+37 }
 0x594   : > { %v2034_v43 = vmul.f32 %v2033_v46, %v2014_v29 }
 0x596   : > { %v2035_v14 = vadd.f32 1.0, %v2034_v43  ;;  %v2024_v43 = vadd.f32 1.1283791, %v2023_v55 }
 0x597   : > { %v3015_v19 = vpop.eup %3014 }
 0x598   : > { %v1997_v45 = vmul.f32 %v3015_v19, %v1995_v44  ;;  %3016 = vrcp.f32 %v2035_v14  ;;  %vm2002_vm0 = vweird.f32 %v3015_v19  ;;  %v2047_v7 = vand.u32 2147483648, %v2035_v14 }
 0x599   : > { %vm2003_vm2 = vmor %vm2001_vm1, %vm2002_vm0  ;;  %v2045_v21 = vand.u32 2147483647, %v2035_v14  ;;  %vm2041_vm5 = vweird.f32 %v2035_v14  ;;  %v1969_v44 = vmul.f32 0.5, %v4323_v47  ;;  %v2025_v12 = vmul.f32 %v2024_v43, %v4334_v23 }
 0x59a   : > { %v1998_v18 = vsub.f32 1.0, %v1997_v45  ;;  %v2048_v29 = vor.u32 1.1754944e-38, %v2047_v7 }
 0x59b   : > { %vm2046_vm7 = vcmp.eq.f32.partialorder %v2045_v21, 8.507059e+37 }
 0x59c   : > { %v1999_v2 = vmul.f32 %v3015_v19, %v1998_v18 }
 0x59e   : > { %v3017_v5 = vpop.eup %3016  ;;  %v2000_v62 = vadd.f32 %v3015_v19, %v1999_v2 }
 0x59f   : > { %v2037_v31 = vmul.f32 %v3017_v5, %v2035_v14  ;;  %vm2042_vm4 = vweird.f32 %v3017_v5 }
 0x5a0   : > { %v2004_v60 = vsel %vm2003_vm2, %v3015_v19, %v2000_v62  ;;  %vm2043_vm6 = vmor %vm2041_vm5, %vm2042_vm4 }
 0x5a1   : > { %v2009_v9 = vsel %vm2006_vm3, %v2008_v4, %v2004_v60  ;;  %v2038_v46 = vsub.f32 1.0, %v2037_v31  ;;  %v1970_v4 = vmul.f32 0.5, %v4331_v57 }
 0x5a2   : > { %v2010_v3 = vmul.f32 %v2009_v9, %v1985_v8 }
 0x5a3   : > { %v2039_v16 = vmul.f32 %v3017_v5, %v2038_v46 }
 0x5a4   : > { %v2823_v45 = vclamps-f32 %v2010_v3, 1.0 }
 0x5a5   : > { %v2040_v18 = vadd.f32 %v3017_v5, %v2039_v16 }
 0x5a6   : > { %v2053_v25 = vadd.f32 1.0, %v2823_v45 }
 0x5a7   : > { %v2044_v19 = vsel %vm2043_vm6, %v3017_v5, %v2040_v18 }
 0x5a8   : > { %v2055_v6 = vmul.f32 %v2053_v25, %v1969_v44  ;;  %v2049_v17 = vsel %vm2046_vm7, %v2048_v29, %v2044_v19 }
 0x5a9   : > { %v2050_v2 = vmul.f32 %v2049_v17, %v2025_v12 }
 0x5aa   : > { %v2057_v26 = vpack.c.bf16 %v2055_v6, %v2055_v6 }
 0x5ab   : > { %v2824_v62 = vclamps-f32 %v2050_v2, 1.0 }
 0x5ac   : > { %2067 = vmatmul.bf16.vlgmr.msrb.gmra.mxu0 %v2057_v26  ;;  %2093 = vmatmul.bf16.vlgmr.msrb.gmra.mxu2 %v2057_v26 }
 0x5ad   : > { %v2054_v55 = vadd.f32 1.0, %v2824_v62  ;;  %2361 = vmatpush.bf16.msrb.mxu0 %v3517_v59  ;;  %2387 = vmatpush.bf16.msrb.mxu2 %v3519_v61  ;;  %v2112_v61 = vstv %s2825_s23 }
 0x5af   : > { %v2056_v47 = vmul.f32 %v2054_v55, %v1970_v4 }
 0x5b1   : > { %v2058_v14 = vpack.c.bf16 %v2056_v47, %v2056_v47  ;;  %2362 = vmatpush.bf16.msrb.mxu0 %v4704_v27  ;;  %2388 = vmatpush.bf16.msrb.mxu2 %v4705_v32 }
 0x5b3   : > { %2080 = vmatmul.bf16.vlgmr.msrb.gmra.mxu1 %v2058_v14  ;;  %2106 = vmatmul.bf16.vlgmr.msrb.gmra.mxu3 %v2058_v14 }
 0x5b4   : > { %2374 = vmatpush.bf16.msrb.mxu1 %v4706_v48  ;;  %2400 = vmatpush.bf16.msrb.mxu3 %v4707_v49  ;;  %v2120_v49 = vstv %s2826_s20 }
 0x5b5   : > { %2363 = vmatpush.bf16.msrb.mxu0 %v4708_v37  ;;  %2389 = vmatpush.bf16.msrb.mxu2 %v4709_v35  ;;  %v2113_v37 = vmul.f32 %v2112_v61, %v4317_v50  ;;  %v3028_v35 = vld [vmem:[#allocation10] sm:$0xff] }
 0x5b8   : > { %2375 = vmatpush.bf16.msrb.mxu1 %v4710_v58  ;;  %2401 = vmatpush.bf16.msrb.mxu3 %v4711_v51  ;;  %v2115_v58 = vperm.slane %v3028_v35, 6 }
 0x5b9   : > { %2364 = vmatpush.bf16.msrb.mxu0 %v4712_v54  ;;  %2390 = vmatpush.bf16.msrb.mxu2 %v4713_v52  ;;  %v2123_v54 = vperm.slane %v3028_v35, 7 }
 0x5bc   : > { %2376 = vmatpush.bf16.msrb.mxu1 %v4714_v63  ;;  %2402 = vmatpush.bf16.msrb.mxu3 %v4715_v15  ;;  %v2117_v15 = vadd.f32 %v2115_v58, %v2113_v37 }
 0x5bd   : > { %2365 = vmatpush.bf16.msrb.mxu0 %v4716_v42  ;;  %2391 = vmatpush.bf16.msrb.mxu2 %v4717_v24 }
 0x5c0   : > { %2377 = vmatpush.bf16.msrb.mxu1 %v4718_v33  ;;  %2403 = vmatpush.bf16.msrb.mxu3 %v4719_v40  ;;  %v3029_v33 = vld [vmem:[#allocation10 + $0x8] sm:$0xff] }
 0x5c1   : > { %2366 = vmatpush.bf16.msrb.mxu0 %v4720_v38  ;;  %2392 = vmatpush.bf16.msrb.mxu2 %v4721_v13  ;;  %v2116_v40 = vperm.slane %v3029_v33, 6  ;;  %v4827_v13 = vld [vmem:[#allocation52_spill] sm:$0xff] }
 0x5c4   : > { %2378 = vmatpush.bf16.msrb.mxu1 %v4722_v10  ;;  %2404 = vmatpush.bf16.msrb.mxu3 %v4723_v39  ;;  %v2114_v10 = vmul.f32 %v2112_v61, %v4827_v13 }
 0x5c5   : > { %2367 = vmatpush.bf16.msrb.mxu0 %v4724_v1  ;;  %2393 = vmatpush.bf16.msrb.mxu2 %v4725_v36  ;;  %v2124_v36 = vperm.slane %v3029_v33, 7 }
 0x5c8   : > { %2379 = vmatpush.bf16.msrb.mxu1 %v4726_v0  ;;  %2405 = vmatpush.bf16.msrb.mxu3 %v4727_v53 }
 0x5c9   : > { %2368 = vmatpush.bf16.msrb.mxu0 %v4784_v56  ;;  %2394 = vmatpush.bf16.msrb.mxu2 %v4785_v22 }
 0x5cc   : > { %2380 = vmatpush.bf16.msrb.mxu1 %v4788_v11  ;;  %2406 = vmatpush.bf16.msrb.mxu3 %v4789_v28  ;;  %v2118_v11 = vadd.f32 %v2116_v40, %v2114_v10 }
 0x5d0   : > { %2381 = vmatpush.bf16.msrb.mxu1 %v4792_v34  ;;  %2407 = vmatpush.bf16.msrb.mxu3 %v4793_v20 }
 0x629   : > { %v2068_v59 = vpop.f32.mrf.mxu0 }
 0x62a   : > { %v2069_v27 = vadd.f32 %v2068_v59, %v4822_v30 }
 0x62f   : > { %v2094_v32 = vpop.f32.mrf.mxu2 }
 0x630   : > { %v2081_v48 = vpop.f32.mrf.mxu1  ;;  %v2095_v24 = vadd.f32 %v2094_v32, %v4823_v41 }
 0x631   : > { %v2082_v51 = vadd.f32 %v2081_v48, %v2069_v27  ;;  %v2070_v52 = vpop.f32.mrf.mxu0 }
 0x633   : > { %v2121_v63 = vmul.f32 %v2120_v49, %v2082_v51 }
 0x635   : > { %v2125_v42 = vadd.f32 %v2123_v54, %v2121_v63 }
 0x636   : > { %v2107_v38 = vpop.f32.mrf.mxu3 }
 0x637   : > { %v4378_v39 = vadd.f32 %v2125_v42, %v2117_v15  ;;  %v2108_v1 = vadd.f32 %v2107_v38, %v2095_v24  ;;  %v2096_v0 = vpop.f32.mrf.mxu2 }
 0x638   : > { %v2083_v53 = vpop.f32.mrf.mxu1 }
 0x639   : > { %v4381_v56 = vmul.f32 0.70710677, %v4378_v39  ;;  %v2122_v22 = vmul.f32 %v2120_v49, %v2108_v1 }
 0x63b   : > { %v2133_v28 = vmul.f32 %v4381_v56, %v4381_v56  ;;  %v2126_v34 = vadd.f32 %v2124_v36, %v2122_v22 }
 0x63d   : > { %v2134_v20 = vmin.f32 %v2133_v28, 16.0  ;;  %v4385_v50 = vadd.f32 %v2126_v34, %v2118_v11 }
 0x63e   : > { %v2109_v57 = vpop.f32.mrf.mxu3 }
 0x63f   : > { %v2135_v23 = vmul.f32 2.1237322e-06, %v2134_v20  ;;  %v4388_v5 = vmul.f32 0.70710677, %v4385_v50  ;;  %v2146_v31 = vmul.f32 3.8918573e-05, %v2134_v20 }
 0x641   : > { %v2136_v8 = vadd.f32 0.00028619796, %v2135_v23  ;;  %v2173_v60 = vmul.f32 %v4388_v5, %v4388_v5  ;;  %v2147_v9 = vadd.f32 0.001143296, %v2146_v31 }
 0x643   : > { %v2137_v46 = vmul.f32 %v2136_v8, %v2134_v20  ;;  %v2174_v3 = vmin.f32 %v2173_v60, 16.0  ;;  %v2148_v7 = vmul.f32 %v2147_v9, %v2134_v20 }
 0x645   : > { %v2175_v43 = vmul.f32 2.1237322e-06, %v2174_v3  ;;  %v2186_v16 = vmul.f32 3.8918573e-05, %v2174_v3  ;;  %v2138_v21 = vadd.f32 0.0036580483, %v2137_v46 }
 0x646   : > { %v2149_v45 = vadd.f32 0.014752088, %v2148_v7 }
 0x647   : > { %v2176_v18 = vadd.f32 0.00028619796, %v2175_v43  ;;  %v2187_v44 = vadd.f32 0.001143296, %v2186_v16  ;;  %v2139_v19 = vmul.f32 %v2138_v21, %v2134_v20 }
 0x648   : > { %v2150_v25 = vmul.f32 %v2149_v45, %v2134_v20 }
 0x649   : > { %v2177_v29 = vmul.f32 %v2176_v18, %v2174_v3  ;;  %v2188_v12 = vmul.f32 %v2187_v44, %v2174_v3  ;;  %v2140_v4 = vadd.f32 0.05243302, %v2139_v19  ;;  %v2130_v44 = vmul.f32 0.5, %v4385_v50  ;;  %v4828_v19 = vld [vmem:[#allocation50_spill] sm:$0xff] }
 0x64a   : > { %v2151_v6 = vadd.f32 0.112945676, %v2150_v25 }
 0x64b   : > { %v2178_v17 = vadd.f32 0.0036580483, %v2177_v29  ;;  %v2189_v2 = vadd.f32 0.014752088, %v2188_v12  ;;  %v2141_v27 = vmul.f32 %v2140_v4, %v2134_v20  ;;  %v4829_v4 = vld [vmem:[#allocation55_spill] sm:$0xff] }
 0x64c   : > { %v2152_v26 = vmul.f32 %v2151_v6, %v2134_v20 }
 0x64d   : > { %v2190_v62 = vmul.f32 %v2189_v2, %v2174_v3  ;;  %v2179_v47 = vmul.f32 %v2178_v17, %v2174_v3  ;;  %v2142_v35 = vadd.f32 0.18741608, %v2141_v27 }
 0x64e   : > { %v2153_v55 = vadd.f32 0.4994258, %v2152_v26 }
 0x64f   : > { %v2191_v14 = vadd.f32 0.112945676, %v2190_v62  ;;  %v2180_v48 = vadd.f32 0.05243302, %v2179_v47  ;;  %v2143_v52 = vmul.f32 %v2142_v35, %v2134_v20 }
 0x650   : > { %v2154_v59 = vmul.f32 %v2153_v55, %v2134_v20 }
 0x651   : > { %v2192_v61 = vmul.f32 %v2191_v14, %v2174_v3  ;;  %v2181_v58 = vmul.f32 %v2180_v48, %v2174_v3  ;;  %v2144_v24 = vadd.f32 1.1283791, %v2143_v52 }
 0x652   : > { %v2155_v32 = vadd.f32 1.0, %v2154_v59 }
 0x653   : > { %v2193_v49 = vadd.f32 0.4994258, %v2192_v61  ;;  %v2182_v63 = vadd.f32 0.18741608, %v2181_v58  ;;  %v2145_v0 = vmul.f32 %v2144_v24, %v4381_v56 }
 0x654   : > { %3018 = vrcp.f32 %v2155_v32  ;;  %v2167_v33 = vand.u32 2147483648, %v2155_v32  ;;  %v2165_v10 = vand.u32 2147483647, %v2155_v32  ;;  %vm2161_vm9 = vweird.f32 %v2155_v32 }
 0x655   : > { %v2194_v37 = vmul.f32 %v2193_v49, %v2174_v3  ;;  %v2183_v38 = vmul.f32 %v2182_v63, %v2174_v3  ;;  %v2129_v3 = vmul.f32 0.5, %v4378_v39 }
 0x656   : > { %v2168_v53 = vor.u32 1.1754944e-38, %v2167_v33  ;;  %vm2166_vm11 = vcmp.eq.f32.partialorder %v2165_v10, 8.507059e+37 }
 0x657   : > { %v2195_v51 = vadd.f32 1.0, %v2194_v37  ;;  %v2184_v11 = vadd.f32 1.1283791, %v2183_v38 }
 0x659   : > { %3020 = vrcp.f32 %v2195_v51  ;;  %v2207_v34 = vand.u32 2147483648, %v2195_v51  ;;  %v2205_v23 = vand.u32 2147483647, %v2195_v51  ;;  %vm2201_vm13 = vweird.f32 %v2195_v51 }
 0x65a   : > { %v3019_v54 = vpop.eup %3018  ;;  %v2185_v46 = vmul.f32 %v2184_v11, %v4388_v5 }
 0x65b   : > { %v2157_v15 = vmul.f32 %v3019_v54, %v2155_v32  ;;  %vm2162_vm8 = vweird.f32 %v3019_v54  ;;  %v2208_v9 = vor.u32 1.1754944e-38, %v2207_v34  ;;  %vm2206_vm15 = vcmp.eq.f32.partialorder %v2205_v23, 8.507059e+37 }
 0x65c   : > { %vm2163_vm10 = vmor %vm2161_vm9, %vm2162_vm8 }
 0x65d   : > { %v2158_v42 = vsub.f32 1.0, %v2157_v15 }
 0x65f   : > { %v3021_v40 = vpop.eup %3020  ;;  %v2159_v13 = vmul.f32 %v3019_v54, %v2158_v42 }
 0x660   : > { %v2197_v1 = vmul.f32 %v3021_v40, %v2195_v51  ;;  %vm2202_vm12 = vweird.f32 %v3021_v40 }
 0x661   : > { %v2160_v36 = vadd.f32 %v3019_v54, %v2159_v13  ;;  %vm2203_vm14 = vmor %vm2201_vm13, %vm2202_vm12 }
 0x662   : > { %v2198_v22 = vsub.f32 1.0, %v2197_v1 }
 0x663   : > { %v2164_v28 = vsel %vm2163_vm10, %v3019_v54, %v2160_v36 }
 0x664   : > { %v2169_v20 = vsel %vm2166_vm11, %v2168_v53, %v2164_v28  ;;  %v2199_v57 = vmul.f32 %v3021_v40, %v2198_v22 }
 0x665   : > { %v2170_v31 = vmul.f32 %v2169_v20, %v2145_v0 }
 0x666   : > { %v2200_v8 = vadd.f32 %v3021_v40, %v2199_v57 }
 0x667   : > { %v2827_v60 = vclamps-f32 %v2170_v31, 1.0 }
 0x668   : > { %v2204_v56 = vsel %vm2203_vm14, %v3021_v40, %v2200_v8 }
 0x669   : > { %v2213_v7 = vadd.f32 1.0, %v2827_v60  ;;  %v2209_v43 = vsel %vm2206_vm15, %v2208_v9, %v2204_v56 }
 0x66a   : > { %v2210_v16 = vmul.f32 %v2209_v43, %v2185_v46 }
 0x66b   : > { %v2215_v21 = vmul.f32 %v2213_v7, %v2129_v3 }
 0x66c   : > { %v2828_v45 = vclamps-f32 %v2210_v16, 1.0 }
 0x66d   : > { %v2217_v18 = vpack.c.bf16 %v2215_v21, %v2215_v21 }
 0x66e   : > { %v2214_v25 = vadd.f32 1.0, %v2828_v45 }
 0x66f   : > { %2227 = vmatmul.bf16.vlgmr.msra.gmra.mxu0 %v2217_v18  ;;  %2253 = vmatmul.bf16.vlgmr.msra.gmra.mxu2 %v2217_v18 }
 0x670   : > { %v2216_v29 = vmul.f32 %v2214_v25, %v2130_v44 }
 0x672   : > { %v2218_v12 = vpack.c.bf16 %v2216_v29, %v2216_v29 }
 0x674   : > { %2240 = vmatmul.bf16.vlgmr.msra.gmra.mxu1 %v2218_v12  ;;  %2266 = vmatmul.bf16.vlgmr.msra.gmra.mxu3 %v2218_v12 }
 0x6ec   : > { %v2228_v5 = vpop.f32.mrf.mxu0 }
 0x6ed   : > { %v2229_v6 = vadd.f32 %v2228_v5, %v4828_v19 }
 0x6f1   : > { %v2241_v17 = vpop.f32.mrf.mxu1 }
 0x6f2   : > { %v4397_v39 = vadd.f32 %v2241_v17, %v2229_v6  ;;  %v2254_v2 = vpop.f32.mrf.mxu2 }
 0x6f3   : > { %v2255_v55 = vadd.f32 %v2254_v2, %v4829_v4 }
 0x6f4   : > { %v4400_v26 = vmul.f32 0.70710677, %v4397_v39  ;;  %v2230_v62 = vpop.f32.mrf.mxu0 }
 0x6f6   : > { %v2275_v50 = vmul.f32 %v4400_v26, %v4400_v26 }
 0x6f7   : > { %v2267_v47 = vpop.f32.mrf.mxu3 }
 0x6f8   : > { %v2276_v14 = vmin.f32 %v2275_v50, 16.0  ;;  %v4405_v59 = vadd.f32 %v2267_v47, %v2255_v55 }
 0x6f9   : > { %v2243_v61 = vpop.f32.mrf.mxu1 }
 0x6fa   : > { %v2277_v27 = vmul.f32 2.1237322e-06, %v2276_v14  ;;  %v2288_v32 = vmul.f32 3.8918573e-05, %v2276_v14  ;;  %v2256_v48 = vpop.f32.mrf.mxu2  ;;  %v4408_v49 = vmul.f32 0.70710677, %v4405_v59 }
 0x6fc   : > { %v2278_v37 = vadd.f32 0.00028619796, %v2277_v27  ;;  %v2289_v35 = vadd.f32 0.001143296, %v2288_v32  ;;  %v2315_v58 = vmul.f32 %v4408_v49, %v4408_v49 }
 0x6fe   : > { %v2279_v51 = vmul.f32 %v2278_v37, %v2276_v14  ;;  %v2290_v54 = vmul.f32 %v2289_v35, %v2276_v14  ;;  %v2316_v52 = vmin.f32 %v2315_v58, 16.0 }
 0x6ff   : > { %v2269_v63 = vpop.f32.mrf.mxu3 }
 0x700   : > { %v2291_v15 = vadd.f32 0.014752088, %v2290_v54  ;;  %v2280_v42 = vadd.f32 0.0036580483, %v2279_v51  ;;  %v2317_v24 = vmul.f32 2.1237322e-06, %v2316_v52 }
 0x701   : > { %v2328_v33 = vmul.f32 3.8918573e-05, %v2316_v52  ;;  %v2271_v51 = vmul.f32 0.5, %v4397_v39 }
 0x702   : > { %v2292_v40 = vmul.f32 %v2291_v15, %v2276_v14  ;;  %v2318_v38 = vadd.f32 0.00028619796, %v2317_v24  ;;  %v2281_v1 = vmul.f32 %v2280_v42, %v2276_v14 }
 0x703   : > { %v2329_v13 = vadd.f32 0.001143296, %v2328_v33 }
 0x704   : > { %v2293_v10 = vadd.f32 0.112945676, %v2292_v40  ;;  %v2319_v36 = vmul.f32 %v2318_v38, %v2316_v52  ;;  %v2282_v34 = vadd.f32 0.05243302, %v2281_v1  ;;  %v2272_v38 = vmul.f32 0.5, %v4405_v59 }
 0x705   : > { %v2330_v0 = vmul.f32 %v2329_v13, %v2316_v52 }
 0x706   : > { %v2294_v53 = vmul.f32 %v2293_v10, %v2276_v14  ;;  %v2320_v28 = vadd.f32 0.0036580483, %v2319_v36  ;;  %v2283_v60 = vmul.f32 %v2282_v34, %v2276_v14 }
 0x707   : > { %v2331_v22 = vadd.f32 0.014752088, %v2330_v0 }
 0x708   : > { %v2295_v11 = vadd.f32 0.4994258, %v2294_v53  ;;  %v2321_v8 = vmul.f32 %v2320_v28, %v2316_v52  ;;  %v2284_v3 = vadd.f32 0.18741608, %v2283_v60 }
 0x709   : > { %v2332_v20 = vmul.f32 %v2331_v22, %v2316_v52 }
 0x70a   : > { %v2296_v57 = vmul.f32 %v2295_v11, %v2276_v14  ;;  %v2322_v56 = vadd.f32 0.05243302, %v2321_v8  ;;  %v2285_v45 = vmul.f32 %v2284_v3, %v2276_v14 }
 0x70b   : > { %v2333_v23 = vadd.f32 0.112945676, %v2332_v20 }
 0x70c   : > { %v2297_v31 = vadd.f32 1.0, %v2296_v57  ;;  %v2323_v21 = vmul.f32 %v2322_v56, %v2316_v52  ;;  %v2286_v12 = vadd.f32 1.1283791, %v2285_v45 }
 0x70d   : > { %v2334_v9 = vmul.f32 %v2333_v23, %v2316_v52 }
 0x70e   : > { %3022 = vrcp.f32 %v2297_v31  ;;  %v2309_v25 = vand.u32 2147483648, %v2297_v31  ;;  %v2324_v29 = vadd.f32 0.18741608, %v2323_v21  ;;  %v2307_v19 = vand.u32 2147483647, %v2297_v31 }
 0x70f   : > { %v2335_v46 = vadd.f32 0.4994258, %v2334_v9  ;;  %vm2303_vm1 = vweird.f32 %v2297_v31  ;;  %v2287_v4 = vmul.f32 %v2286_v12, %v4400_v26 }
 0x710   : > { %v2310_v2 = vor.u32 1.1754944e-38, %v2309_v25  ;;  %v2325_v62 = vmul.f32 %v2324_v29, %v2316_v52  ;;  %vm2308_vm3 = vcmp.eq.f32.partialorder %v2307_v19, 8.507059e+37 }
 0x711   : > { %v2336_v7 = vmul.f32 %v2335_v46, %v2316_v52 }
 0x712   : > { %v2326_v32 = vadd.f32 1.1283791, %v2325_v62 }
 0x713   : > { %v2337_v43 = vadd.f32 1.0, %v2336_v7 }
 0x714   : > { %v3023_v16 = vpop.eup %3022  ;;  %v2327_v26 = vmul.f32 %v2326_v32, %v4408_v49 }
 0x715   : > { %v2299_v18 = vmul.f32 %v3023_v16, %v2297_v31  ;;  %3024 = vrcp.f32 %v2337_v43  ;;  %vm2304_vm0 = vweird.f32 %v3023_v16  ;;  %v2349_v27 = vand.u32 2147483648, %v2337_v43 }
 0x716   : > { %vm2305_vm2 = vmor %vm2303_vm1, %vm2304_vm0  ;;  %v2347_v37 = vand.u32 2147483647, %v2337_v43  ;;  %vm2343_vm5 = vweird.f32 %v2337_v43 }
 0x717   : > { %v2300_v44 = vsub.f32 1.0, %v2299_v18  ;;  %v2350_v52 = vor.u32 1.1754944e-38, %v2349_v27 }
 0x718   : > { %vm2348_vm7 = vcmp.eq.f32.partialorder %v2347_v37, 8.507059e+37 }
 0x719   : > { %v2301_v5 = vmul.f32 %v3023_v16, %v2300_v44 }
 0x71b   : > { %v3025_v6 = vpop.eup %3024  ;;  %v2302_v17 = vadd.f32 %v3023_v16, %v2301_v5 }
 0x71c   : > { %v2339_v50 = vmul.f32 %v3025_v6, %v2337_v43  ;;  %vm2344_vm4 = vweird.f32 %v3025_v6 }
 0x71d   : > { %v2306_v55 = vsel %vm2305_vm2, %v3023_v16, %v2302_v17  ;;  %vm2345_vm6 = vmor %vm2343_vm5, %vm2344_vm4 }
 0x71e   : > { %v2311_v47 = vsel %vm2308_vm3, %v2310_v2, %v2306_v55  ;;  %v2340_v14 = vsub.f32 1.0, %v2339_v50 }
 0x71f   : > { %v2312_v61 = vmul.f32 %v2311_v47, %v2287_v4 }
 0x720   : > { %v2341_v48 = vmul.f32 %v3025_v6, %v2340_v14 }
 0x721   : > { %v2829_v35 = vclamps-f32 %v2312_v61, 1.0 }
 0x722   : > { %v2342_v58 = vadd.f32 %v3025_v6, %v2341_v48 }
 0x723   : > { %v2355_v54 = vadd.f32 1.0, %v2829_v35 }
 0x724   : > { %v2346_v63 = vsel %vm2345_vm6, %v3025_v6, %v2342_v58 }
 0x725   : > { %v2357_v15 = vmul.f32 %v2355_v54, %v2271_v51  ;;  %v2351_v42 = vsel %vm2348_vm7, %v2350_v52, %v2346_v63 }
 0x726   : > { %v2352_v24 = vmul.f32 %v2351_v42, %v2327_v26 }
 0x727   : > { %v2359_v33 = vpack.c.bf16 %v2357_v15, %v2357_v15 }
 0x728   : > { %v2830_v40 = vclamps-f32 %v2352_v24, 1.0 }
 0x729   : > { %2369 = vmatmul.bf16.vlgmr.msrb.gmra.mxu0 %v2359_v33  ;;  %2395 = vmatmul.bf16.vlgmr.msrb.gmra.mxu2 %v2359_v33 }
 0x72a   : > { %v2356_v13 = vadd.f32 1.0, %v2830_v40 }
 0x72c   : > { %v2358_v39 = vmul.f32 %v2356_v13, %v2272_v38 }
 0x72e   : > { %v2360_v10 = vpack.c.bf16 %v2358_v39, %v2358_v39 }
 0x730   : > { %2382 = vmatmul.bf16.vlgmr.msrb.gmra.mxu1 %v2360_v10  ;;  %2408 = vmatmul.bf16.vlgmr.msrb.gmra.mxu3 %v2360_v10 }
 0x7a6   : > { %v2370_v1 = vpop.f32.mrf.mxu0 }
 0x7a7   : > { %v2371_v49 = vadd.f32 %v2370_v1, %v4822_v30 }
 0x7ac   : > { %v2396_v36 = vpop.f32.mrf.mxu2 }
 0x7ad   : > { %v2383_v0 = vpop.f32.mrf.mxu1  ;;  %v2397_v59 = vadd.f32 %v2396_v36, %v4823_v41 }
 0x7ae   : > { %v2384_v53 = vadd.f32 %v2383_v0, %v2371_v49  ;;  %v2372_v22 = vpop.f32.mrf.mxu0 }
 0x7b0   : > { %2413 = vst [vmem:[%s326_s26] sm:$0xff] %v2384_v53 }
 0x7b3   : > { %v2409_v11 = vpop.f32.mrf.mxu3 }
 0x7b4   : > { %v2410_v28 = vadd.f32 %v2409_v11, %v2397_v59  ;;  %v2398_v30 = vpop.f32.mrf.mxu2 }
 0x7b5   : > { %v2385_v34 = vpop.f32.mrf.mxu1 }
 0x7b6   : > { %2414 = vst [vmem:[%s326_s26 + $0x8] sm:$0xff] %v2410_v28 }
 0x7b7   : > { %3189 = shalt.err (!%p3186_p9)
}
 0x7b8   : > { %2916 = dma.vmem_to_hbm [thread:$0]  (%p3365_p13), %s2430_s27, 256, %s2432_s0, %s2416_s11  }
 0x7bb   : > { %v2411_v41 = vpop.f32.mrf.mxu3 }
 0x7bc PF: > { %s2443_s17 = sand.u32 1, %s3226_s28   ;;  %p4830_p10 = scmp.ge.s32.totalorder %s3238_s8, 2 }
 0x7bd   : > { %s2444_s13 = scalar_lea.sflag [#allocation6], %s2443_s17 }
 0x7be   : > { %p2933_p11 = pnand %p4830_p10, %p3370_p4 }
 0x7c0   : > { %p2934_p0 = pneg %p2933_p11 }
 0x7c2   : > { %3221 = dma.done.wait (%p2934_p0), %s2444_s13, 256  }
 0x7c3   : > { %3223 = vsyncadd (%p2934_p0), %s2444_s13, 4294967040  ;;  %p30_p2 = scmp.ge.s32.totalorder %s3345_s9, 4   ;;  %s4831_s28 = smov %s3230_s29 }
 0x7c4   : > { %s4832_s29 = smov %s3234_s30  ;;  %s4833_s30 = smov %s3357_s14 }
 0x7c5   : > { %s4834_s8 = smov %s3345_s9  ;;  %32 = sbr.rel (!%p30_p2) target bundleno = 13 (0xd), region = 101 }
 0x7ca   :  { %2450 = vsyncpa [#allocation5], 1 }
 0x7cb   :  { %2452 = vsyncpa [#allocation5 + $0x1], 1 }
 0x7cc   :  { %2453 = vsyncpa [#allocation8], 1 }
 0x7cd   :  { %2454 = vsyncpa [#allocation11], 1 }
 0x7ce   :  { %2455 = vsyncpa [#allocation6], 1 }
 0x7cf   :  { %2457 = vsyncpa [#allocation6 + $0x1], 1 }

// kernel: tpu_custom_call.1
= control target key start
LH: loop header
LB: loop body
LE: loop exit
PB: predicated region body
PF: predicated region fallthrough
CT: control target
= control target key end

     0   :  { %s3240_s27 = smov [#allocation3]   ;;  %s4453_s0 = inlined_call_operand.hbm [shape: f32[8], index: 0, kind: input, shape index: {}]   ;;  %s4454_s1 = inlined_call_operand.hbm [shape: f32[16,256], index: 1, kind: input, shape index: {}]   ;;  %s4455_s2 = inlined_call_operand.hbm [shape: bf16[256,256], index: 2, kind: input, shape index: {}]   ;;  %s4456_s3 = inlined_call_operand.vmem [shape: f32[1,256], index: 3, kind: input, shape index: {}]   ;;  %s4457_s4 = inlined_call_operand.hbm [shape: bf16[256,256], index: 4, kind: input, shape index: {}]   ;;  %s4458_s5 = inlined_call_operand.vmem [shape: f32[1,256], index: 5, kind: input, shape index: {}]   ;;  %s4459_s6 = inlined_call_operand.hbm [shape: f32[8,256], index: 6, kind: input, shape index: {}]   ;;  %s4460_s7 = inlined_call_operand.hbm [shape: f32[16,256], index: 7, kind: output, shape index: {}]  }
   0x1   :  { %s13_s26 = sshll.u32 %s4453_s0, 4  ;;  %s14_s26 = int_to_ptr.hbm [resolvable:$true] %s13_s26 }
   0x2   :  { %16 = dma.hbm_to_smem %s14_s26, 16, %s3240_s27, [#allocation2] }
   0x3   :  { %3206 = dma.done.wait [#allocation2], 16 }
   0x4   :  { %3207 = vsyncadd [#allocation2], 4294967280 }
   0x5   :  { %19 = sfence }
   0x6   :  { %20 = vsyncpa [#allocation5], 0 }
   0x7   :  { %22 = vsyncpa [#allocation5 + $0x1], 0 }
   0x8   :  { %23 = vsyncpa [#allocation8], 0 }
   0x9   :  { %24 = vsyncpa [#allocation11], 0 }
   0xa   :  { %25 = vsyncpa [#allocation6], 0 }
   0xb   :  { %27 = vsyncpa [#allocation6 + $0x1], 0  ;;  %s3289_s28 = smov 0   ;;  %s3291_s29 = smov 0  }
   0xc   :  { %s3293_s30 = smov 0   ;;  %s3295_s8 = smov 0  }
   0xd LB: > { %s206_s10 = sshll.u32 %s4455_s2, 4  ;;  %s3313_s11 = sadd.s32 4294967295, %s3238_s8   ;;  %s3238_s8 = sphi %s3295_s8, %s4834_s8   ;;  %s3234_s30 = sphi %s3293_s30, %s4833_s30   ;;  %s3230_s29 = sphi %s3291_s29, %s4832_s29   ;;  %s3226_s28 = sphi %s3289_s28, %s4831_s28   ;;  %s207_s10 = int_to_ptr.hbm [resolvable:$true] %s206_s10 }
   0xe   : > { %p2532_p0 = scmp.ge.s32.totalorder %s3238_s8, 1  ;;  %p54_p1 = scmp.eq.s32.totalorder %s3313_s11, 0 }
   0xf   : > { %p195_p2 = scmp.lt.s32.totalorder %s3238_s8, 3  ;;  %s3241_s13 = smov [#allocation7]  }
  0x10   : > { %s208_s14 = sshll.u32 %s3241_s13, 4  ;;  %s223_s17 = sshll.u32 %s4457_s4, 4  ;;  %s209_s14 = int_to_ptr.vmem [resolvable:$true] %s208_s14  ;;  %s224_s17 = int_to_ptr.hbm [resolvable:$true] %s223_s17 }
  0x11   : > { %p3318_p3 = pnand %p2532_p0, %p195_p2  ;;  %s241_s21 = sshll.u32 %s4459_s6, 4  ;;  %s242_s21 = int_to_ptr.hbm [resolvable:$true] %s241_s21 }
  0x12   : > { %s3242_s22 = smov [#allocation9]   ;;  %s3243_s24 = smov 128  }
  0x13   : > { %p2918_p4 = pneg %p3318_p3  ;;  %s225_s23 = sshll.u32 %s3242_s22, 4  ;;  %s226_s23 = int_to_ptr.vmem [resolvable:$true] %s225_s23 }
  0x14   : > { %s3244_s25 = smov 8   ;;  %s3245_s26 = smov [#allocation10]  }
  0x15   : > { %p3330_p6 = pnand %p2918_p4, %p54_p1  ;;  %s243_s27 = sshll.u32 %s3245_s26, 4  ;;  %s244_s27 = int_to_ptr.vmem [resolvable:$true] %s243_s27 }
  0x16   : > { %s2531_s0 = sadd.s32 4294967294, %s3238_s8   ;;  %s3345_s9 = sadd.s32 1, %s3238_s8  }
  0x17   : > { %2921 = dma.hbm_to_vmem [thread:$0]  (!%p3330_p6), %s207_s10, 4096, %s209_s14, [#allocation8], %s3243_s24, %s3243_s24, %s3244_s25  }
  0x18   : > { %2924 = dma.hbm_to_vmem [thread:$0]  (!%p3330_p6), %s224_s17, 4096, %s226_s23, [#allocation8], %s3243_s24, %s3243_s24, %s3244_s25  }
  0x19   : > { %2927 = dma.hbm_to_vmem [thread:$0]  (!%p3330_p6), %s242_s21, 256, %s244_s27, [#allocation11]  }
  0x1a   : > { %s40_s13 = sadd.s32 1, %s3234_s30  ;;  %s37_s10 = ssub.s32 %s3238_s8, %s3345_s9 }
  0x1b   : > { %p47_p7 = scmp.ne.s32.totalorder %s3234_s30, %s3230_s29  ;;  %p38_p8 = scmp.eq.s32.totalorder %s37_s10, 0 }
  0x1c   : > { %p48_p9 = scmp.eq.s32.totalorder %s3238_s8, 0  ;;  %p53_p10 = scmp.ne.s32.totalorder %s3230_s29, %s3226_s28 }
  0x1d   : > { %p182_p11 = scmp.eq.s32.totalorder %s3313_s11, 1  ;;  %p188_p0 = scmp.eq.s32.totalorder %s2531_s0, 1 }
  0x1e   : > { %s3357_s14 = scalar_select %p38_p8, %s3234_s30, %s40_s13  }
  0x1f   : > { %p3361_p12 = por %p54_p1, %p53_p10  ;;  %p3365_p13 = por %p182_p11, %p47_p7 }
  0x20   : > { %p49_p2 = por %p48_p9, %p47_p7  ;;  %s254_s17 = sand.u32 1, %s3234_s30  }
  0x21   : > { %p3370_p4 = por %p188_p0, %p53_p10  ;;  %p2939_p6 = scmp.lt.s32.totalorder %s3238_s8, 2 }
  0x22   : > { %s2537_s19 = sshll.u32 %s254_s17, 4  ;;  %s2836_s20 = sshll.u32 %s3238_s8, 4 }
  0x23   : > { %s263_s23 = scalar_lea.hbm %s4454_s1, %s2836_s20  ;;  %s258_s25 = scalar_lea.vmem [#allocation4], %s2537_s19 }
  0x24   : > { %s265_s24 = sshll.u32 %s263_s23, 4  ;;  %s267_s26 = sshll.u32 %s258_s25, 4  ;;  %s266_s24 = int_to_ptr.hbm [resolvable:$true] %s265_s24  ;;  %s268_s26 = int_to_ptr.vmem [resolvable:$true] %s267_s26 }
  0x25   : > { %p3379_p8 = pnand %p2939_p6, %p49_p2  ;;  %s255_s0 = scalar_lea.sflag [#allocation5], %s254_s17 }
  0x26   : > { %s3132_s13 = sshra.s32 %s266_s24, 4  ;;  %s3139_s19 = scalar_lea.hbm %s4454_s1, 32  ;;  %s3133_s13 = int_to_ptr.hbm [resolvable:$true] %s3132_s13 }
  0x27   : > { %s3134_s10 = scalar_lea.hbm %s3133_s13, 16  ;;  %p3136_p9 = pneg %p3379_p8 }
  0x28   : > { %p3135_p7 = scmp.ne.s32.totalorder %s3133_s13, %s3134_s10  ;;  %p3140_p0 = scmp.lt.s32.totalorder %s3133_s13, %s4454_s1 }
  0x29   : > { %p3141_p2 = scmp.lt.s32.totalorder %s3139_s19, %s3134_s10 }
  0x2a   : > { %p3137_p10 = pnand %p3136_p9, %p3135_p7 }
  0x2b   : > { %p3142_p6 = por %p3141_p2, %p3140_p0 }
  0x2c   : > { %p3138_p11 = pneg %p3137_p10 }
  0x2e   : > { %p3143_p5 = pnand %p3142_p6, %p3138_p11 }
  0x30   : > { %3146 = shalt.err (!%p3143_p5)
}
  0x31   : > { %2931 = dma.hbm_to_vmem [thread:$0]  (!%p3379_p8), %s266_s24, 256, %s268_s26, %s255_s0  }
  0x32   : > { %276 = sbr.rel (%p3318_p3) target bundleno = 1980 (0x7bc), region = 44 }
  0x37   : > { %s3396_s17 = sand.u32 1, %s3230_s29  }
  0x38   : > { %s2541_s25 = sshll.u32 %s3396_s17, 4  ;;  %s279_s20 = scalar_lea.sflag [#allocation5], %s3396_s17 }
  0x39   : > { %s3402_s13 = scalar_lea.vmem [#allocation4], %s2541_s25 }
  0x3a   : > { %3209 = dma.done.wait (%p3361_p12), %s279_s20, 256  }
  0x3b   : > { %3211 = vsyncadd (%p3361_p12), %s279_s20, 4294967040 }
  0x3c   : > { %3213 = dma.done.wait (%p54_p1), [#allocation8], 8192  }
  0x3d   : > { %3215 = vsyncadd (%p54_p1), [#allocation8], 4294959104 }
  0x3e   : > { %3217 = dma.done.wait (%p54_p1), [#allocation11], 256  }
  0x3f   : > { %3219 = vsyncadd (%p54_p1), [#allocation11], 4294967040  ;;  %v2604_v0 = vld [vmem:[#allocation7 + $0x70] sm:$0xf]  ;;  %v2852_v1 = vld [vmem:[#allocation7 + $0x74] sm:$0xf0] }
  0x40   : > { %v2668_v2 = vld [vmem:[#allocation7 + $0xf0] sm:$0xf]  ;;  %v3416_v3 = vor.u32 %v2852_v1, %v2604_v0  ;;  %v2868_v4 = vld [vmem:[#allocation7 + $0xf4] sm:$0xf0]  ;;  %v2851_v5 = vld [vmem:[#allocation7 + $0x74] sm:$0xf] }
  0x41   : > { %v2606_v6 = vld [vmem:[#allocation7 + $0x78] sm:$0xf0]  ;;  %v3418_v7 = vor.u32 %v2868_v4, %v2668_v2  ;;  %v2867_v9 = vld [vmem:[#allocation7 + $0xf4] sm:$0xf]  ;;  %v2596_v11 = vld [vmem:[#allocation7 + $0x60] sm:$0xf] }
  0x42   : > { %4611 = vst [vmem:[#allocation18_spill] sm:$0xff] %v3416_v3  ;;  %v3420_v8 = vor.u32 %v2851_v5, %v2606_v6  ;;  %v2670_v10 = vld [vmem:[#allocation7 + $0xf8] sm:$0xf0]  ;;  %564 = vmatpush.bf16.msra.mxu0 %v3416_v3  ;;  %v2850_v13 = vld [vmem:[#allocation7 + $0x64] sm:$0xf0]  ;;  %s923_s27 = sld [smem:[#allocation3]] }
  0x43   : > { %4612 = vst [vmem:[#allocation19_spill] sm:$0xff] %v3418_v7  ;;  %v3423_v12 = vor.u32 %v2867_v9, %v2670_v10  ;;  %v2660_v14 = vld [vmem:[#allocation7 + $0xe0] sm:$0xf]  ;;  %v2866_v15 = vld [vmem:[#allocation7 + $0xe4] sm:$0xf0]  ;;  %577 = vmatpush.bf16.msra.mxu1 %v3418_v7  ;;  %v3427_v16 = vor.u32 %v2850_v13, %v2596_v11  ;;  %s2806_s0 = sld [smem:[#allocation3 + $0x1]] }
  0x44   : > { %4613 = vst [vmem:[#allocation20_spill] sm:$0xff] %v3420_v8  ;;  %590 = vmatpush.bf16.msra.mxu2 %v3420_v8  ;;  %v3429_v17 = vor.u32 %v2866_v15, %v2660_v14  ;;  %v2849_v18 = vld [vmem:[#allocation7 + $0x64] sm:$0xf]  ;;  %v2598_v19 = vld [vmem:[#allocation7 + $0x68] sm:$0xf0]  ;;  %s4053_s10 = sld [smem:[#allocation3 + $0x2]] }
  0x45   : > { %4614 = vst [vmem:[#allocation21_spill] sm:$0xff] %v3423_v12  ;;  %v2865_v20 = vld [vmem:[#allocation7 + $0xe4] sm:$0xf]  ;;  %603 = vmatpush.bf16.msra.mxu3 %v3423_v12  ;;  %v3432_v21 = vor.u32 %v2849_v18, %v2598_v19  ;;  %v2662_v22 = vld [vmem:[#allocation7 + $0xe8] sm:$0xf0]  ;;  %s4055_s21 = sld [smem:[#allocation3 + $0x4]] }
  0x46   : > { %4615 = vst [vmem:[#allocation22_spill] sm:$0xff] %v3427_v16  ;;  %v2588_v23 = vld [vmem:[#allocation7 + $0x50] sm:$0xf]  ;;  %v2848_v24 = vld [vmem:[#allocation7 + $0x54] sm:$0xf0]  ;;  %v3434_v25 = vor.u32 %v2865_v20, %v2662_v22  ;;  %565 = vmatpush.bf16.msra.mxu0 %v3427_v16  ;;  %s4057_s19 = sld [smem:[#allocation3 + $0x3]] }
  0x47   : > { %4616 = vst [vmem:[#allocation23_spill] sm:$0xff] %v3429_v17  ;;  %v2652_v26 = vld [vmem:[#allocation7 + $0xd0] sm:$0xf]  ;;  %v2864_v27 = vld [vmem:[#allocation7 + $0xd4] sm:$0xf0]  ;;  %v3437_v29 = vor.u32 %v2848_v24, %v2588_v23  ;;  %578 = vmatpush.bf16.msra.mxu1 %v3429_v17  ;;  %s4059_s22 = sld [smem:[#allocation3 + $0x5]] }
  0x48   : > { %4617 = vst [vmem:[#allocation24_spill] sm:$0xff] %v3432_v21  ;;  %v2847_v28 = vld [vmem:[#allocation7 + $0x54] sm:$0xf]  ;;  %v2590_v30 = vld [vmem:[#allocation7 + $0x58] sm:$0xf0]  ;;  %591 = vmatpush.bf16.msra.mxu2 %v3432_v21  ;;  %v3441_v33 = vor.u32 %v2864_v27, %v2652_v26  ;;  %s2825_s23 = sld [smem:[#allocation3 + $0x6]] }
  0x49   : > { %4618 = vst [vmem:[#allocation25_spill] sm:$0xff] %v3434_v25  ;;  %v2863_v31 = vld [vmem:[#allocation7 + $0xd4] sm:$0xf]  ;;  %v2654_v32 = vld [vmem:[#allocation7 + $0xd8] sm:$0xf0]  ;;  %v3443_v34 = vor.u32 %v2847_v28, %v2590_v30  ;;  %604 = vmatpush.bf16.msra.mxu3 %v3434_v25  ;;  %s2826_s20 = sld [smem:[#allocation3 + $0x7]] }
  0x4a   : > { %4619 = vst [vmem:[#allocation26_spill] sm:$0xff] %v3437_v29  ;;  %v2580_v35 = vld [vmem:[#allocation7 + $0x40] sm:$0xf]  ;;  %v2846_v36 = vld [vmem:[#allocation7 + $0x44] sm:$0xf0]  ;;  %v3446_v38 = vor.u32 %v2863_v31, %v2654_v32  ;;  %566 = vmatpush.bf16.msra.mxu0 %v3437_v29  ;;  %s326_s26 = scalar_lea.vmem [#allocation12], %s2541_s25 }
  0x4b   : > { %4620 = vst [vmem:[#allocation27_spill] sm:$0xff] %v3441_v33  ;;  %v2644_v37 = vld [vmem:[#allocation7 + $0xc0] sm:$0xf]  ;;  %v2862_v39 = vld [vmem:[#allocation7 + $0xc4] sm:$0xf0]  ;;  %v3449_v44 = vor.u32 %v2846_v36, %v2580_v35  ;;  %579 = vmatpush.bf16.msra.mxu1 %v3441_v33 }
  0x4c   : > { %4621 = vst [vmem:[#allocation28_spill] sm:$0xff] %v3443_v34  ;;  %v2845_v40 = vld [vmem:[#allocation7 + $0x44] sm:$0xf]  ;;  %v2582_v41 = vld [vmem:[#allocation7 + $0x48] sm:$0xf0]  ;;  %592 = vmatpush.bf16.msra.mxu2 %v3443_v34  ;;  %v3453_v45 = vor.u32 %v2862_v39, %v2644_v37 }
  0x4d   : > { %4622 = vst [vmem:[#allocation29_spill] sm:$0xff] %v3446_v38  ;;  %v2861_v42 = vld [vmem:[#allocation7 + $0xc4] sm:$0xf]  ;;  %v2646_v43 = vld [vmem:[#allocation7 + $0xc8] sm:$0xf0]  ;;  %v3455_v46 = vor.u32 %v2845_v40, %v2582_v41  ;;  %605 = vmatpush.bf16.msra.mxu3 %v3446_v38 }
  0x4e   : > { %4623 = vst [vmem:[#allocation30_spill] sm:$0xff] %v3449_v44  ;;  %v2572_v47 = vld [vmem:[#allocation7 + $0x30] sm:$0xf]  ;;  %v2844_v48 = vld [vmem:[#allocation7 + $0x34] sm:$0xf0]  ;;  %v3458_v50 = vor.u32 %v2861_v42, %v2646_v43  ;;  %567 = vmatpush.bf16.msra.mxu0 %v3449_v44 }
  0x4f   : > { %4624 = vst [vmem:[#allocation31_spill] sm:$0xff] %v3453_v45  ;;  %v2636_v49 = vld [vmem:[#allocation7 + $0xb0] sm:$0xf]  ;;  %v2860_v51 = vld [vmem:[#allocation7 + $0xb4] sm:$0xf0]  ;;  %v3461_v56 = vor.u32 %v2844_v48, %v2572_v47  ;;  %580 = vmatpush.bf16.msra.mxu1 %v3453_v45 }
  0x50   : > { %4625 = vst [vmem:[#allocation32_spill] sm:$0xff] %v3455_v46  ;;  %v2843_v52 = vld [vmem:[#allocation7 + $0x34] sm:$0xf]  ;;  %v2574_v53 = vld [vmem:[#allocation7 + $0x38] sm:$0xf0]  ;;  %593 = vmatpush.bf16.msra.mxu2 %v3455_v46  ;;  %v3465_v57 = vor.u32 %v2860_v51, %v2636_v49 }
  0x51   : > { %4626 = vst [vmem:[#allocation33_spill] sm:$0xff] %v3458_v50  ;;  %v2859_v54 = vld [vmem:[#allocation7 + $0xb4] sm:$0xf]  ;;  %v2638_v55 = vld [vmem:[#allocation7 + $0xb8] sm:$0xf0]  ;;  %v3467_v58 = vor.u32 %v2843_v52, %v2574_v53  ;;  %606 = vmatpush.bf16.msra.mxu3 %v3458_v50 }
  0x52   : > { %4627 = vst [vmem:[#allocation34_spill] sm:$0xff] %v3461_v56  ;;  %v2564_v59 = vld [vmem:[#allocation7 + $0x20] sm:$0xf]  ;;  %v2842_v60 = vld [vmem:[#allocation7 + $0x24] sm:$0xf0]  ;;  %v3470_v62 = vor.u32 %v2859_v54, %v2638_v55  ;;  %568 = vmatpush.bf16.msra.mxu0 %v3461_v56 }
  0x53   : > { %4628 = vst [vmem:[#allocation35_spill] sm:$0xff] %v3465_v57  ;;  %v2628_v61 = vld [vmem:[#allocation7 + $0xa0] sm:$0xf]  ;;  %v2858_v63 = vld [vmem:[#allocation7 + $0xa4] sm:$0xf0]  ;;  %v3473_v5 = vor.u32 %v2842_v60, %v2564_v59  ;;  %581 = vmatpush.bf16.msra.mxu1 %v3465_v57 }
  0x54   : > { %4629 = vst [vmem:[#allocation36_spill] sm:$0xff] %v3467_v58  ;;  %v2841_v0 = vld [vmem:[#allocation7 + $0x24] sm:$0xf]  ;;  %v2566_v1 = vld [vmem:[#allocation7 + $0x28] sm:$0xf0]  ;;  %594 = vmatpush.bf16.msra.mxu2 %v3467_v58  ;;  %v3477_v6 = vor.u32 %v2858_v63, %v2628_v61 }
  0x55   : > { %4630 = vst [vmem:[#allocation37_spill] sm:$0xff] %v3470_v62  ;;  %v2857_v2 = vld [vmem:[#allocation7 + $0xa4] sm:$0xf]  ;;  %v2630_v4 = vld [vmem:[#allocation7 + $0xa8] sm:$0xf0]  ;;  %v3479_v9 = vor.u32 %v2841_v0, %v2566_v1  ;;  %607 = vmatpush.bf16.msra.mxu3 %v3470_v62 }
  0x56   : > { %4631 = vst [vmem:[#allocation38_spill] sm:$0xff] %v3473_v5  ;;  %v2556_v10 = vld [vmem:[#allocation7 + $0x10] sm:$0xf]  ;;  %v2840_v11 = vld [vmem:[#allocation7 + $0x14] sm:$0xf0]  ;;  %v3482_v14 = vor.u32 %v2857_v2, %v2630_v4  ;;  %569 = vmatpush.bf16.msra.mxu0 %v3473_v5 }
  0x57   : > { %4632 = vst [vmem:[#allocation39_spill] sm:$0xff] %v3477_v6  ;;  %v2620_v13 = vld [vmem:[#allocation7 + $0x90] sm:$0xf]  ;;  %v2856_v15 = vld [vmem:[#allocation7 + $0x94] sm:$0xf0]  ;;  %v3485_v23 = vor.u32 %v2840_v11, %v2556_v10  ;;  %582 = vmatpush.bf16.msra.mxu1 %v3477_v6 }
  0x58   : > { %4633 = vst [vmem:[#allocation40_spill] sm:$0xff] %v3479_v9  ;;  %v2839_v18 = vld [vmem:[#allocation7 + $0x14] sm:$0xf]  ;;  %v2558_v19 = vld [vmem:[#allocation7 + $0x18] sm:$0xf0]  ;;  %595 = vmatpush.bf16.msra.mxu2 %v3479_v9  ;;  %v3489_v24 = vor.u32 %v2856_v15, %v2620_v13 }
  0x59   : > { %4634 = vst [vmem:[#allocation41_spill] sm:$0xff] %v3482_v14  ;;  %v2855_v20 = vld [vmem:[#allocation7 + $0x94] sm:$0xf]  ;;  %v2622_v22 = vld [vmem:[#allocation7 + $0x98] sm:$0xf0]  ;;  %v3491_v26 = vor.u32 %v2839_v18, %v2558_v19  ;;  %608 = vmatpush.bf16.msra.mxu3 %v3482_v14 }
  0x5a   : > { %4635 = vst [vmem:[#allocation42_spill] sm:$0xff] %v3485_v23  ;;  %v2548_v27 = vld [vmem:[#allocation7] sm:$0xf]  ;;  %v2838_v28 = vld [vmem:[#allocation7 + $0x4] sm:$0xf0]  ;;  %v3494_v31 = vor.u32 %v2855_v20, %v2622_v22  ;;  %570 = vmatpush.bf16.msra.mxu0 %v3485_v23 }
  0x5b   : > { %4636 = vst [vmem:[#allocation43_spill] sm:$0xff] %v3489_v24  ;;  %v2612_v30 = vld [vmem:[#allocation7 + $0x80] sm:$0xf]  ;;  %v2854_v32 = vld [vmem:[#allocation7 + $0x84] sm:$0xf0]  ;;  %v3497_v40 = vor.u32 %v2838_v28, %v2548_v27  ;;  %583 = vmatpush.bf16.msra.mxu1 %v3489_v24 }
  0x5c   : > { %4637 = vst [vmem:[#allocation44_spill] sm:$0xff] %v3491_v26  ;;  %v2837_v35 = vld [vmem:[#allocation7 + $0x4] sm:$0xf]  ;;  %v2550_v36 = vld [vmem:[#allocation7 + $0x8] sm:$0xf0]  ;;  %596 = vmatpush.bf16.msra.mxu2 %v3491_v26  ;;  %v3502_v42 = vor.u32 %v2854_v32, %v2612_v30 }
  0x5d   : > { %4638 = vst [vmem:[#allocation45_spill] sm:$0xff] %v3494_v31  ;;  %v2853_v37 = vld [vmem:[#allocation7 + $0x84] sm:$0xf]  ;;  %v2614_v39 = vld [vmem:[#allocation7 + $0x88] sm:$0xf0]  ;;  %v3504_v43 = vor.u32 %v2837_v35, %v2550_v36  ;;  %609 = vmatpush.bf16.msra.mxu3 %v3494_v31 }
  0x5e   : > { %4639 = vst [vmem:[#allocation46_spill] sm:$0xff] %v3497_v40  ;;  %v395_v41 = vld [vmem:[%s3402_s13] sm:$0xff]  ;;  %v396_v47 = vld [vmem:[%s3402_s13 + $0x8] sm:$0xff]  ;;  %v3508_v48 = vor.u32 %v2853_v37, %v2614_v39  ;;  %571 = vmatpush.bf16.msra.mxu0 %v3497_v40  ;;  %s2901_s13 = sshll.u32 %s3313_s11, 4  ;;  %s2416_s11 = scalar_lea.sflag [#allocation6], %s3396_s17 }
  0x5f   : > { %4640 = vst [vmem:[#allocation47_spill] sm:$0xff] %v3502_v42  ;;  %v397_v49 = vpack.c.bf16 %v395_v41, %v395_v41  ;;  %v398_v51 = vpack.c.bf16 %v396_v47, %v396_v47  ;;  %584 = vmatpush.bf16.msra.mxu1 %v3502_v42  ;;  %v391_v52 = vld [vmem:[%s4456_s3] sm:$0x3]  ;;  %v2734_v53 = vld [vmem:[#allocation9 + $0x70] sm:$0xf]  ;;  %s2427_s24 = scalar_lea.hbm %s4460_s7, %s2901_s13 }
  0x60   : > { %4641 = vst [vmem:[#allocation48_spill] sm:$0xff] %v3504_v43  ;;  %597 = vmatpush.bf16.msra.mxu2 %v3504_v43  ;;  %v2884_v54 = vld [vmem:[#allocation9 + $0x74] sm:$0xf0]  ;;  %v2883_v55 = vld [vmem:[#allocation9 + $0x74] sm:$0xf]  ;;  %v3521_v63 = vperm.slane %v391_v52, 0 }
  0x61   : > { %4642 = vst [vmem:[#allocation49_spill] sm:$0xff] %v3508_v48  ;;  %610 = vmatpush.bf16.msra.mxu3 %v3508_v48  ;;  %572 = vmatmul.bf16.vlgmr.msra.gmra.mxu0 %v397_v49  ;;  %v3517_v59 = vor.u32 %v2884_v54, %v2734_v53  ;;  %v2736_v60 = vld [vmem:[#allocation9 + $0x78] sm:$0xf0]  ;;  %v2726_v0 = vld [vmem:[#allocation9 + $0x60] sm:$0xf]  ;;  %v3538_v39 = vperm.slane %v391_v52, 1 }
  0x62   : > { %585 = vmatmul.bf16.vlgmr.msra.gmra.mxu1 %v398_v51  ;;  %v3519_v61 = vor.u32 %v2883_v55, %v2736_v60  ;;  %4643 = vst [vmem:[#allocation50_spill] sm:$0xff] %v3521_v63  ;;  %v2882_v1 = vld [vmem:[#allocation9 + $0x64] sm:$0xf0]  ;;  %v2881_v2 = vld [vmem:[#allocation9 + $0x64] sm:$0xf] }
  0x63   : > { %598 = vmatmul.bf16.vlgmr.msra.gmra.mxu2 %v397_v49  ;;  %871 = vmatpush.bf16.msrb.mxu0 %v3517_v59  ;;  %v3525_v4 = vor.u32 %v2882_v1, %v2726_v0  ;;  %v2728_v10 = vld [vmem:[#allocation9 + $0x68] sm:$0xf0]  ;;  %v2798_v15 = vld [vmem:[#allocation9 + $0xf0] sm:$0xf]  ;;  %v2900_v18 = vld [vmem:[#allocation9 + $0xf4] sm:$0xf0] }
  0x64   : > { %611 = vmatmul.bf16.vlgmr.msra.gmra.mxu3 %v398_v51  ;;  %897 = vmatpush.bf16.msrb.mxu2 %v3519_v61  ;;  %v3527_v13 = vor.u32 %v2881_v2, %v2728_v10  ;;  %v2899_v19 = vld [vmem:[#allocation9 + $0xf4] sm:$0xf]  ;;  %v3531_v27 = vor.u32 %v2900_v18, %v2798_v15  ;;  %v2800_v28 = vld [vmem:[#allocation9 + $0xf8] sm:$0xf0]  ;;  %v2718_v32 = vld [vmem:[#allocation9 + $0x50] sm:$0xf] }
  0x65   : > { %4644 = vst [vmem:[#allocation51_spill] sm:$0xff] %v3525_v4  ;;  %v3534_v30 = vor.u32 %v2899_v19, %v2800_v28  ;;  %v2880_v35 = vld [vmem:[#allocation9 + $0x54] sm:$0xf0]  ;;  %v2879_v36 = vld [vmem:[#allocation9 + $0x54] sm:$0xf] }
  0x66   : > { %4645 = vst [vmem:[#allocation52_spill] sm:$0xff] %v3527_v13  ;;  %884 = vmatpush.bf16.msrb.mxu1 %v3531_v27  ;;  %v3541_v41 = vor.u32 %v2880_v35, %v2718_v32  ;;  %v2720_v47 = vld [vmem:[#allocation9 + $0x58] sm:$0xf0]  ;;  %v2790_v51 = vld [vmem:[#allocation9 + $0xe0] sm:$0xf] }
  0x67   : > { %872 = vmatpush.bf16.msrb.mxu0 %v3525_v4  ;;  %4646 = vst [vmem:[#allocation53_spill] sm:$0xff] %v3531_v27  ;;  %910 = vmatpush.bf16.msrb.mxu3 %v3534_v30  ;;  %v3544_v49 = vor.u32 %v2879_v36, %v2720_v47  ;;  %v2898_v53 = vld [vmem:[#allocation9 + $0xe4] sm:$0xf0]  ;;  %v2897_v54 = vld [vmem:[#allocation9 + $0xe4] sm:$0xf] }
  0x68   : > { %898 = vmatpush.bf16.msrb.mxu2 %v3527_v13  ;;  %4647 = vst [vmem:[#allocation54_spill] sm:$0xff] %v3534_v30  ;;  %v3550_v60 = vor.u32 %v2898_v53, %v2790_v51  ;;  %v2792_v52 = vld [vmem:[#allocation9 + $0xe8] sm:$0xf0]  ;;  %v2710_v1 = vld [vmem:[#allocation9 + $0x40] sm:$0xf] }
  0x69   : > { %4648 = vst [vmem:[#allocation55_spill] sm:$0xff] %v3538_v39  ;;  %v3553_v0 = vor.u32 %v2897_v54, %v2792_v52  ;;  %v2878_v2 = vld [vmem:[#allocation9 + $0x44] sm:$0xf0]  ;;  %v2877_v10 = vld [vmem:[#allocation9 + $0x44] sm:$0xf] }
  0x6a   : > { %4649 = vst [vmem:[#allocation56_spill] sm:$0xff] %v3541_v41  ;;  %885 = vmatpush.bf16.msrb.mxu1 %v3550_v60  ;;  %v3558_v18 = vor.u32 %v2878_v2, %v2710_v1  ;;  %v2712_v19 = vld [vmem:[#allocation9 + $0x48] sm:$0xf0]  ;;  %v2782_v35 = vld [vmem:[#allocation9 + $0xd0] sm:$0xf] }
  0x6b   : > { %4650 = vst [vmem:[#allocation57_spill] sm:$0xff] %v3544_v49  ;;  %873 = vmatpush.bf16.msrb.mxu0 %v3541_v41  ;;  %911 = vmatpush.bf16.msrb.mxu3 %v3553_v0  ;;  %v3562_v32 = vor.u32 %v2877_v10, %v2712_v19  ;;  %v2896_v36 = vld [vmem:[#allocation9 + $0xd4] sm:$0xf0]  ;;  %v2895_v47 = vld [vmem:[#allocation9 + $0xd4] sm:$0xf] }
  0x6c   : > { %4651 = vst [vmem:[#allocation58_spill] sm:$0xff] %v3550_v60  ;;  %899 = vmatpush.bf16.msrb.mxu2 %v3544_v49  ;;  %v3567_v54 = vor.u32 %v2896_v36, %v2782_v35  ;;  %v2784_v52 = vld [vmem:[#allocation9 + $0xd8] sm:$0xf0]  ;;  %v2876_v10 = vld [vmem:[#allocation9 + $0x34] sm:$0xf0] }
  0x6d   : > { %4652 = vst [vmem:[#allocation59_spill] sm:$0xff] %v3553_v0  ;;  %v3572_v2 = vor.u32 %v2895_v47, %v2784_v52  ;;  %v2875_v19 = vld [vmem:[#allocation9 + $0x34] sm:$0xf]  ;;  %v2704_v35 = vld [vmem:[#allocation9 + $0x38] sm:$0xf0] }
  0x6e   : > { %4653 = vst [vmem:[#allocation60_spill] sm:$0xff] %v3558_v18  ;;  %886 = vmatpush.bf16.msrb.mxu1 %v3567_v54  ;;  %v2892_v49 = vld [vmem:[#allocation9 + $0xb4] sm:$0xf0] }
  0x6f   : > { %4654 = vst [vmem:[#allocation61_spill] sm:$0xff] %v3562_v32  ;;  %874 = vmatpush.bf16.msrb.mxu0 %v3558_v18  ;;  %912 = vmatpush.bf16.msrb.mxu3 %v3572_v2  ;;  %v2696_v18 = vld [vmem:[#allocation9 + $0x28] sm:$0xf0] }
  0x70   : > { %4655 = vst [vmem:[#allocation62_spill] sm:$0xff] %v3567_v54  ;;  %900 = vmatpush.bf16.msrb.mxu2 %v3562_v32  ;;  %v2776_v54 = vld [vmem:[#allocation9 + $0xc8] sm:$0xf0]  ;;  %v2694_v32 = vld [vmem:[#allocation9 + $0x20] sm:$0xf] }
  0x71   : > { %4656 = vst [vmem:[#allocation63_spill] sm:$0xff] %v3572_v2 }
  0xde   : > { %v573_v11 = vpop.f32.mrf.mxu0 }
  0xdf   : > { %v574_v20 = vadd.f32 %v573_v11, %v3521_v63  ;;  %v586_v22 = vpop.f32.mrf.mxu1 }
  0xe1   : > { %v3536_v37 = vadd.f32 %v586_v22, %v574_v20 }
  0xe3   : > { %v3547_v55 = vmul.f32 0.70710677, %v3536_v37 }
  0xe5   : > { %v620_v11 = vmul.f32 %v3547_v55, %v3547_v55 }
  0xe6   : > { %v599_v15 = vpop.f32.mrf.mxu2  ;;  %v575_v28 = vpop.f32.mrf.mxu0 }
  0xe7   : > { %v600_v20 = vadd.f32 %v599_v15, %v3538_v39  ;;  %v612_v22 = vpop.f32.mrf.mxu3  ;;  %v3564_v51 = vmin.f32 %v620_v11, 16.0  ;;  %v588_v53 = vpop.f32.mrf.mxu1  ;;  %v2702_v15 = vld [vmem:[#allocation9 + $0x30] sm:$0xf]  ;;  %v2894_v39 = vld [vmem:[#allocation9 + $0xc4] sm:$0xf0] }
  0xe8   : > { %v3577_v53 = vor.u32 %v2876_v10, %v2702_v15  ;;  %v2893_v10 = vld [vmem:[#allocation9 + $0xc4] sm:$0xf] }
  0xe9   : > { %v3569_v1 = vadd.f32 %v612_v22, %v600_v20  ;;  %v622_v28 = vmul.f32 2.1237322e-06, %v3564_v51  ;;  %v633_v11 = vmul.f32 3.8918573e-05, %v3564_v51  ;;  %v3583_v20 = vor.u32 %v2875_v19, %v2704_v35  ;;  %v2774_v22 = vld [vmem:[#allocation9 + $0xc0] sm:$0xf] }
  0xea   : > { %4657 = vst [vmem:[#allocation64_spill] sm:$0xff] %v3577_v53  ;;  %875 = vmatpush.bf16.msrb.mxu0 %v3577_v53  ;;  %v3589_v15 = vor.u32 %v2894_v39, %v2774_v22  ;;  %v2873_v53 = vld [vmem:[#allocation9 + $0x24] sm:$0xf] }
  0xeb   : > { %v3580_v36 = vmul.f32 0.70710677, %v3569_v1  ;;  %4658 = vst [vmem:[#allocation65_spill] sm:$0xff] %v3583_v20  ;;  %v623_v47 = vadd.f32 0.00028619796, %v622_v28  ;;  %901 = vmatpush.bf16.msrb.mxu2 %v3583_v20  ;;  %v3593_v28 = vor.u32 %v2893_v10, %v2776_v54  ;;  %v3600_v22 = vor.u32 %v2873_v53, %v2696_v18 }
  0xec   : > { %v634_v52 = vadd.f32 0.001143296, %v633_v11  ;;  %4659 = vst [vmem:[#allocation66_spill] sm:$0xff] %v3589_v15  ;;  %v2874_v11 = vld [vmem:[#allocation9 + $0x24] sm:$0xf0]  ;;  %887 = vmatpush.bf16.msrb.mxu1 %v3589_v15 }
  0xed   : > { %v660_v63 = vmul.f32 %v3580_v36, %v3580_v36  ;;  %v624_v2 = vmul.f32 %v623_v47, %v3564_v51  ;;  %4660 = vst [vmem:[#allocation67_spill] sm:$0xff] %v3593_v28  ;;  %v3598_v39 = vor.u32 %v2874_v11, %v2694_v32  ;;  %v2766_v20 = vld [vmem:[#allocation9 + $0xb0] sm:$0xf]  ;;  %913 = vmatpush.bf16.msrb.mxu3 %v3593_v28  ;;  %v2872_v53 = vld [vmem:[#allocation9 + $0x14] sm:$0xf0] }
  0xee   : > { %v635_v19 = vmul.f32 %v634_v52, %v3564_v51  ;;  %v601_v35 = vpop.f32.mrf.mxu2  ;;  %4662 = vst [vmem:[#allocation69_spill] sm:$0xff] %v3600_v22  ;;  %v3603_v54 = vor.u32 %v2892_v49, %v2766_v20  ;;  %v2891_v52 = vld [vmem:[#allocation9 + $0xb4] sm:$0xf]  ;;  %v2688_v28 = vld [vmem:[#allocation9 + $0x18] sm:$0xf0] }
  0xef   : > { %v3595_v0 = vmin.f32 %v660_v63, 16.0  ;;  %v614_v60 = vpop.f32.mrf.mxu3  ;;  %4661 = vst [vmem:[#allocation68_spill] sm:$0xff] %v3598_v39  ;;  %v625_v47 = vadd.f32 0.0036580483, %v624_v2  ;;  %876 = vmatpush.bf16.msrb.mxu0 %v3598_v39  ;;  %902 = vmatpush.bf16.msrb.mxu2 %v3600_v22  ;;  %v2686_v2 = vld [vmem:[#allocation9 + $0x10] sm:$0xf] }
  0xf0   : > { %v636_v41 = vadd.f32 0.014752088, %v635_v19  ;;  %4663 = vst [vmem:[#allocation70_spill] sm:$0xff] %v3603_v54  ;;  %v2768_v60 = vld [vmem:[#allocation9 + $0xb8] sm:$0xf0]  ;;  %888 = vmatpush.bf16.msrb.mxu1 %v3603_v54  ;;  %v3614_v11 = vor.u32 %v2872_v53, %v2686_v2 }
  0xf1   : > { %v662_v10 = vmul.f32 2.1237322e-06, %v3595_v0  ;;  %v673_v63 = vmul.f32 3.8918573e-05, %v3595_v0  ;;  %v3610_v32 = vor.u32 %v2891_v52, %v2768_v60  ;;  %v2871_v19 = vld [vmem:[#allocation9 + $0x14] sm:$0xf]  ;;  %v626_v49 = vmul.f32 %v625_v47, %v3564_v51 }
  0xf2   : > { %v637_v18 = vmul.f32 %v636_v41, %v3564_v51  ;;  %4665 = vst [vmem:[#allocation72_spill] sm:$0xff] %v3614_v11  ;;  %v3617_v22 = vor.u32 %v2871_v19, %v2688_v28  ;;  %v2758_v41 = vld [vmem:[#allocation9 + $0xa0] sm:$0xf]  ;;  %v2890_v47 = vld [vmem:[#allocation9 + $0xa4] sm:$0xf0] }
  0xf3   : > { %4664 = vst [vmem:[#allocation71_spill] sm:$0xff] %v3610_v32  ;;  %v663_v20 = vadd.f32 0.00028619796, %v662_v10  ;;  %v674_v35 = vadd.f32 0.001143296, %v673_v63  ;;  %914 = vmatpush.bf16.msrb.mxu3 %v3610_v32  ;;  %877 = vmatpush.bf16.msrb.mxu0 %v3614_v11  ;;  %v3624_v2 = vor.u32 %v2890_v47, %v2758_v41 }
  0xf4   : > { %v638_v39 = vadd.f32 0.112945676, %v637_v18  ;;  %4666 = vst [vmem:[#allocation73_spill] sm:$0xff] %v3617_v22  ;;  %v2889_v10 = vld [vmem:[#allocation9 + $0xa4] sm:$0xf]  ;;  %903 = vmatpush.bf16.msrb.mxu2 %v3617_v22 }
  0xf5   : > { %v664_v52 = vmul.f32 %v663_v20, %v3595_v0  ;;  %v675_v60 = vmul.f32 %v674_v35, %v3595_v0  ;;  %v2760_v63 = vld [vmem:[#allocation9 + $0xa8] sm:$0xf0]  ;;  %4667 = vst [vmem:[#allocation74_spill] sm:$0xff] %v3624_v2  ;;  %v2678_v28 = vld [vmem:[#allocation9] sm:$0xf]  ;;  %889 = vmatpush.bf16.msrb.mxu1 %v3624_v2 }
  0xf6   : > { %v639_v54 = vmul.f32 %v638_v39, %v3564_v51  ;;  %v3626_v18 = vor.u32 %v2889_v10, %v2760_v63  ;;  %v2870_v53 = vld [vmem:[#allocation9 + $0x4] sm:$0xf0]  ;;  %v2869_v19 = vld [vmem:[#allocation9 + $0x4] sm:$0xf]  ;;  %v627_v32 = vadd.f32 0.05243302, %v626_v49 }
  0xf7   : > { %v676_v20 = vadd.f32 0.014752088, %v675_v60  ;;  %v3628_v15 = vor.u32 %v2870_v53, %v2678_v28  ;;  %v2680_v35 = vld [vmem:[#allocation9 + $0x8] sm:$0xf0]  ;;  %v665_v30 = vadd.f32 0.0036580483, %v664_v52 }
  0xf8   : > { %4668 = vst [vmem:[#allocation75_spill] sm:$0xff] %v3626_v18  ;;  %v640_v11 = vadd.f32 0.4994258, %v639_v54  ;;  %915 = vmatpush.bf16.msrb.mxu3 %v3626_v18  ;;  %v3632_v39 = vor.u32 %v2869_v19, %v2680_v35  ;;  %v2750_v41 = vld [vmem:[#allocation9 + $0x90] sm:$0xf] }
  0xf9   : > { %4669 = vst [vmem:[#allocation76_spill] sm:$0xff] %v3628_v15  ;;  %v677_v47 = vmul.f32 %v676_v20, %v3595_v0  ;;  %878 = vmatpush.bf16.msrb.mxu0 %v3628_v15  ;;  %v2888_v10 = vld [vmem:[#allocation9 + $0x94] sm:$0xf0]  ;;  %v2887_v63 = vld [vmem:[#allocation9 + $0x94] sm:$0xf]  ;;  %v666_v15 = vmul.f32 %v665_v30, %v3595_v0 }
  0xfa   : > { %4670 = vst [vmem:[#allocation77_spill] sm:$0xff] %v3632_v39  ;;  %v2752_v49 = vld [vmem:[#allocation9 + $0x98] sm:$0xf0]  ;;  %v641_v60 = vmul.f32 %v640_v11, %v3564_v51  ;;  %904 = vmatpush.bf16.msrb.mxu2 %v3632_v39  ;;  %v3638_v54 = vor.u32 %v2888_v10, %v2750_v41  ;;  %v2742_v28 = vld [vmem:[#allocation9 + $0x80] sm:$0xf]  ;;  %v628_v10 = vmul.f32 %v627_v32, %v3564_v51 }
  0xfb   : > { %v3640_v52 = vor.u32 %v2887_v63, %v2752_v49  ;;  %v2886_v53 = vld [vmem:[#allocation9 + $0x84] sm:$0xf0]  ;;  %v2885_v19 = vld [vmem:[#allocation9 + $0x84] sm:$0xf]  ;;  %v678_v35 = vadd.f32 0.112945676, %v677_v47 }
  0xfc   : > { %4671 = vst [vmem:[#allocation78_spill] sm:$0xff] %v3638_v54  ;;  %v2744_v18 = vld [vmem:[#allocation9 + $0x88] sm:$0xf0]  ;;  %v642_v20 = vadd.f32 1.0, %v641_v60  ;;  %890 = vmatpush.bf16.msrb.mxu1 %v3638_v54  ;;  %v3647_v11 = vor.u32 %v2886_v53, %v2742_v28  ;;  %v667_v49 = vadd.f32 0.05243302, %v666_v15 }
  0xfd   : > { %4672 = vst [vmem:[#allocation79_spill] sm:$0xff] %v3640_v52  ;;  %1117 = vmatpush.bf16.msra.mxu0 %v3416_v3  ;;  %916 = vmatpush.bf16.msrb.mxu3 %v3640_v52  ;;  %v3649_v41 = vor.u32 %v2885_v19, %v2744_v18  ;;  %v679_v47 = vmul.f32 %v678_v35, %v3595_v0  ;;  %v629_v30 = vadd.f32 0.18741608, %v628_v10 }
  0xfe   : > { %1143 = vmatpush.bf16.msra.mxu2 %v3420_v8  ;;  %4673 = vst [vmem:[#allocation80_spill] sm:$0xff] %v3647_v11  ;;  %2982 = vrcp.f32 %v642_v20  ;;  %v668_v28 = vmul.f32 %v667_v49, %v3595_v0  ;;  %v654_v35 = vand.u32 2147483648, %v642_v20  ;;  %vm648_vm1 = vweird.f32 %v642_v20 }
  0xff   : > { %4674 = vst [vmem:[#allocation81_spill] sm:$0xff] %v3649_v41  ;;  %v680_v63 = vadd.f32 0.4994258, %v679_v47  ;;  %v630_v15 = vmul.f32 %v629_v30, %v3564_v51 }
 0x100   : > { %891 = vmatpush.bf16.msrb.mxu1 %v3647_v11  ;;  %v669_v10 = vadd.f32 0.18741608, %v668_v28  ;;  %v655_v30 = vor.u32 1.1754944e-38, %v654_v35 }
 0x101   : > { %1118 = vmatpush.bf16.msra.mxu0 %v3427_v16  ;;  %917 = vmatpush.bf16.msrb.mxu3 %v3649_v41  ;;  %v681_v60 = vmul.f32 %v680_v63, %v3595_v0  ;;  %v631_v47 = vadd.f32 1.1283791, %v630_v15 }
 0x102   : > { %1144 = vmatpush.bf16.msra.mxu2 %v3432_v21 }
 0x103   : > { %v682_v32 = vadd.f32 1.0, %v681_v60  ;;  %v652_v60 = vand.u32 2147483647, %v642_v20  ;;  %v632_v15 = vmul.f32 %v631_v47, %v3547_v55 }
 0x104   : > { %1130 = vmatpush.bf16.msra.mxu1 %v3418_v7  ;;  %v2983_v18 = vpop.eup %2982 }
 0x105   : > { %1156 = vmatpush.bf16.msra.mxu3 %v3423_v12  ;;  %1119 = vmatpush.bf16.msra.mxu0 %v3437_v29  ;;  %v644_v53 = vmul.f32 %v2983_v18, %v642_v20  ;;  %2984 = vrcp.f32 %v682_v32  ;;  %vm649_vm0 = vweird.f32 %v2983_v18  ;;  %vm653_vm3 = vcmp.eq.f32.partialorder %v652_v60, 8.507059e+37 }
 0x106   : > { %1145 = vmatpush.bf16.msra.mxu2 %v3443_v34  ;;  %vm650_vm2 = vmor %vm648_vm1, %vm649_vm0  ;;  %vm688_vm5 = vweird.f32 %v682_v32 }
 0x107   : > { %v645_v19 = vsub.f32 1.0, %v644_v53  ;;  %v670_v53 = vmul.f32 %v669_v10, %v3595_v0  ;;  %v692_v0 = vand.u32 2147483647, %v682_v32 }
 0x108   : > { %1131 = vmatpush.bf16.msra.mxu1 %v3429_v17 }
 0x109   : > { %1157 = vmatpush.bf16.msra.mxu3 %v3434_v25  ;;  %1120 = vmatpush.bf16.msra.mxu0 %v3449_v44  ;;  %v646_v63 = vmul.f32 %v2983_v18, %v645_v19  ;;  %v671_v35 = vadd.f32 1.1283791, %v670_v53  ;;  %vm693_vm7 = vcmp.eq.f32.partialorder %v692_v0, 8.507059e+37  ;;  %v4681_v0 = vld [vmem:[#allocation61_spill] sm:$0xff] }
 0x10a   : > { %1146 = vmatpush.bf16.msra.mxu2 %v3455_v46 }
 0x10b   : > { %v2985_v51 = vpop.eup %2984  ;;  %v647_v49 = vadd.f32 %v2983_v18, %v646_v63  ;;  %v672_v60 = vmul.f32 %v671_v35, %v3580_v36  ;;  %v4680_v35 = vld [vmem:[#allocation60_spill] sm:$0xff] }
 0x10c   : > { %1132 = vmatpush.bf16.msra.mxu1 %v3441_v33  ;;  %v684_v28 = vmul.f32 %v2985_v51, %v682_v32  ;;  %v694_v33 = vand.u32 2147483648, %v682_v32  ;;  %vm689_vm4 = vweird.f32 %v2985_v51 }
 0x10d   : > { %1158 = vmatpush.bf16.msra.mxu3 %v3446_v38  ;;  %1121 = vmatpush.bf16.msra.mxu0 %v3461_v56  ;;  %v651_v19 = vsel %vm650_vm2, %v2983_v18, %v647_v49  ;;  %v616_v18 = vmul.f32 0.5, %v3536_v37  ;;  %vm690_vm6 = vmor %vm688_vm5, %vm689_vm4  ;;  %v617_v37 = vmul.f32 0.5, %v3569_v1  ;;  %v4675_v1 = vld [vmem:[#allocation54_spill] sm:$0xff] }
 0x10e   : > { %1147 = vmatpush.bf16.msra.mxu2 %v3467_v58  ;;  %v656_v38 = vsel %vm653_vm3, %v655_v30, %v651_v19  ;;  %v685_v63 = vsub.f32 1.0, %v684_v28  ;;  %v4677_v19 = vld [vmem:[#allocation57_spill] sm:$0xff] }
 0x10f   : > { %v657_v20 = vmul.f32 %v656_v38, %v632_v15  ;;  %v695_v38 = vor.u32 1.1754944e-38, %v694_v33  ;;  %v4676_v15 = vld [vmem:[#allocation56_spill] sm:$0xff] }
 0x110   : > { %1133 = vmatpush.bf16.msra.mxu1 %v3453_v45  ;;  %v686_v58 = vmul.f32 %v2985_v51, %v685_v63  ;;  %v4678_v63 = vld [vmem:[#allocation58_spill] sm:$0xff] }
 0x111   : > { %1159 = vmatpush.bf16.msra.mxu3 %v3458_v50  ;;  %1122 = vmatpush.bf16.msra.mxu0 %v3473_v5  ;;  %v2674_v10 = vclamps-f32 %v657_v20, 1.0  ;;  %v4679_v20 = vld [vmem:[#allocation59_spill] sm:$0xff] }
 0x112   : > { %1148 = vmatpush.bf16.msra.mxu2 %v3479_v9  ;;  %v687_v55 = vadd.f32 %v2985_v51, %v686_v58 }
 0x113   : > { %v700_v47 = vadd.f32 1.0, %v2674_v10  ;;  %v4682_v10 = vld [vmem:[#allocation62_spill] sm:$0xff] }
 0x114   : > { %1134 = vmatpush.bf16.msra.mxu1 %v3465_v57  ;;  %v691_v49 = vsel %vm690_vm6, %v2985_v51, %v687_v55  ;;  %v4683_v55 = vld [vmem:[#allocation63_spill] sm:$0xff] }
 0x115   : > { %1160 = vmatpush.bf16.msra.mxu3 %v3470_v62  ;;  %1123 = vmatpush.bf16.msra.mxu0 %v3485_v23  ;;  %v696_v30 = vsel %vm693_vm7, %v695_v38, %v691_v49  ;;  %v702_v53 = vmul.f32 %v700_v47, %v616_v18  ;;  %v4684_v18 = vld [vmem:[#allocation64_spill] sm:$0xff]  ;;  %v4685_v38 = vld [vmem:[#allocation65_spill] sm:$0xff]  ;;  %v4686_v47 = vld [vmem:[#allocation66_spill] sm:$0xff] }
 0x116   : > { %1149 = vmatpush.bf16.msra.mxu2 %v3491_v26  ;;  %v697_v58 = vmul.f32 %v696_v30, %v672_v60  ;;  %v4687_v60 = vld [vmem:[#allocation67_spill] sm:$0xff]  ;;  %v4688_v49 = vld [vmem:[#allocation68_spill] sm:$0xff]  ;;  %v4689_v30 = vld [vmem:[#allocation69_spill] sm:$0xff] }
 0x117   : > { %v704_v32 = vpack.c.bf16 %v702_v53, %v702_v53  ;;  %v4690_v53 = vld [vmem:[#allocation70_spill] sm:$0xff] }
 0x118   : > { %1135 = vmatpush.bf16.msra.mxu1 %v3477_v6  ;;  %v2675_v33 = vclamps-f32 %v697_v58, 1.0  ;;  %v4691_v58 = vld [vmem:[#allocation71_spill] sm:$0xff] }
 0x119   : > { %1161 = vmatpush.bf16.msra.mxu3 %v3482_v14  ;;  %1124 = vmatpush.bf16.msra.mxu0 %v3497_v40 }
 0x11a   : > { %1150 = vmatpush.bf16.msra.mxu2 %v3504_v43  ;;  %879 = vmatmul.bf16.vlgmr.msrb.gmra.mxu0 %v704_v32  ;;  %v701_v36 = vadd.f32 1.0, %v2675_v33  ;;  %v4693_v33 = vld [vmem:[#allocation75_spill] sm:$0xff] }
 0x11b   : > { %905 = vmatmul.bf16.vlgmr.msrb.gmra.mxu2 %v704_v32  ;;  %v4692_v32 = vld [vmem:[#allocation72_spill] sm:$0xff] }
 0x11c   : > { %1136 = vmatpush.bf16.msra.mxu1 %v3489_v24  ;;  %v703_v51 = vmul.f32 %v701_v36, %v617_v37  ;;  %v4694_v37 = vld [vmem:[#allocation76_spill] sm:$0xff]  ;;  %v392_v36 = vld [vmem:[%s4458_s5] sm:$0x3] }
 0x11d   : > { %1162 = vmatpush.bf16.msra.mxu3 %v3494_v31  ;;  %1259 = vmatpush.bf16.msrb.mxu0 %v3517_v59 }
 0x11e   : > { %1285 = vmatpush.bf16.msrb.mxu2 %v3519_v61  ;;  %v705_v28 = vpack.c.bf16 %v703_v51, %v703_v51 }
 0x120   : > { %1137 = vmatpush.bf16.msra.mxu1 %v3502_v42  ;;  %918 = vmatmul.bf16.vlgmr.msrb.gmra.mxu3 %v705_v28 }
 0x121   : > { %1163 = vmatpush.bf16.msra.mxu3 %v3508_v48  ;;  %1260 = vmatpush.bf16.msrb.mxu0 %v3525_v4 }
 0x122   : > { %1286 = vmatpush.bf16.msrb.mxu2 %v3527_v13  ;;  %892 = vmatmul.bf16.vlgmr.msrb.gmra.mxu1 %v705_v28  ;;  %v3728_v28 = vperm.slane %v392_v36, 0 }
 0x124   : > { %1272 = vmatpush.bf16.msrb.mxu1 %v3531_v27  ;;  %4695 = vst [vmem:[#allocation82_spill] sm:$0xff] %v3728_v28 }
 0x125   : > { %1298 = vmatpush.bf16.msrb.mxu3 %v4675_v1  ;;  %1261 = vmatpush.bf16.msrb.mxu0 %v4676_v15 }
 0x126   : > { %1287 = vmatpush.bf16.msrb.mxu2 %v4677_v19 }
 0x128   : > { %1273 = vmatpush.bf16.msrb.mxu1 %v4678_v63 }
 0x129   : > { %1299 = vmatpush.bf16.msrb.mxu3 %v4679_v20  ;;  %1262 = vmatpush.bf16.msrb.mxu0 %v4680_v35 }
 0x12a   : > { %1288 = vmatpush.bf16.msrb.mxu2 %v4681_v0 }
 0x12c   : > { %1274 = vmatpush.bf16.msrb.mxu1 %v4682_v10 }
 0x12d   : > { %1300 = vmatpush.bf16.msrb.mxu3 %v4683_v55  ;;  %1263 = vmatpush.bf16.msrb.mxu0 %v4684_v18 }
 0x12e   : > { %1289 = vmatpush.bf16.msrb.mxu2 %v4685_v38 }
 0x130   : > { %1275 = vmatpush.bf16.msrb.mxu1 %v4686_v47 }
 0x131   : > { %1301 = vmatpush.bf16.msrb.mxu3 %v4687_v60  ;;  %1264 = vmatpush.bf16.msrb.mxu0 %v4688_v49 }
 0x132   : > { %1290 = vmatpush.bf16.msrb.mxu2 %v4689_v30 }
 0x134   : > { %1276 = vmatpush.bf16.msrb.mxu1 %v4690_v53  ;;  %v3741_v53 = vld [vmem:[#allocation10 + $0x8] sm:$0xff] }
 0x135   : > { %1302 = vmatpush.bf16.msrb.mxu3 %v4691_v58  ;;  %1265 = vmatpush.bf16.msrb.mxu0 %v4692_v32 }
 0x136   : > { %1291 = vmatpush.bf16.msrb.mxu2 %v3617_v22  ;;  %v3736_v22 = vperm.slane %v392_v36, 1 }
 0x138   : > { %1277 = vmatpush.bf16.msrb.mxu1 %v3624_v2  ;;  %v924_v2 = vstv %s923_s27  ;;  %4696 = vst [vmem:[#allocation83_spill] sm:$0xff] %v3736_v22  ;;  %s2429_s27 = sshll.u32 %s326_s26, 4  ;;  %s2430_s27 = int_to_ptr.vmem [resolvable:$true] %s2429_s27 }
 0x139   : > { %1303 = vmatpush.bf16.msrb.mxu3 %v4693_v33  ;;  %1266 = vmatpush.bf16.msrb.mxu0 %v4694_v37  ;;  %v3730_v33 = vld [vmem:[#allocation10] sm:$0xff] }
 0x13a   : > { %1292 = vmatpush.bf16.msrb.mxu2 %v3632_v39 }
 0x13c   : > { %1278 = vmatpush.bf16.msrb.mxu1 %v3638_v54 }
 0x13d   : > { %1304 = vmatpush.bf16.msrb.mxu3 %v3640_v52 }
 0x140   : > { %1279 = vmatpush.bf16.msrb.mxu1 %v3647_v11  ;;  %v927_v11 = vperm.slane %v3730_v33, 0 }
 0x141   : > { %1305 = vmatpush.bf16.msrb.mxu3 %v3649_v41 }
 0x197   : > { %v880_v51 = vpop.f32.mrf.mxu0 }
 0x198   : > { %v881_v39 = vadd.f32 %v880_v51, %v3728_v28 }
 0x19e   : > { %v906_v37 = vpop.f32.mrf.mxu2 }
 0x19f   : > { %v893_v54 = vpop.f32.mrf.mxu1  ;;  %v882_v41 = vpop.f32.mrf.mxu0  ;;  %v907_v30 = vadd.f32 %v906_v37, %v3736_v22 }
 0x1a0   : > { %v3733_v52 = vadd.f32 %v893_v54, %v881_v39  ;;  %v928_v54 = vperm.slane %v3741_v53, 0 }
 0x1a2   : > { %v925_v32 = vmul.f32 %v924_v2, %v3733_v52 }
 0x1a3   : > { %v919_v49 = vpop.f32.mrf.mxu3 }
 0x1a4   : > { %v3739_v58 = vadd.f32 %v927_v11, %v925_v32  ;;  %v3747_v39 = vadd.f32 %v919_v49, %v907_v30 }
 0x1a6   : > { %v3745_v51 = vmul.f32 0.70710677, %v3739_v58  ;;  %v908_v28 = vpop.f32.mrf.mxu2  ;;  %v926_v11 = vmul.f32 %v924_v2, %v3747_v39 }
 0x1a7   : > { %v895_v41 = vpop.f32.mrf.mxu1 }
 0x1a8   : > { %v935_v36 = vmul.f32 %v3745_v51, %v3745_v51  ;;  %v3753_v60 = vadd.f32 %v928_v54, %v926_v11 }
 0x1aa   : > { %v936_v32 = vmin.f32 %v935_v36, 16.0  ;;  %v3756_v22 = vmul.f32 0.70710677, %v3753_v60 }
 0x1ab   : > { %v921_v38 = vpop.f32.mrf.mxu3 }
 0x1ac   : > { %v937_v47 = vmul.f32 2.1237322e-06, %v936_v32  ;;  %v948_v37 = vmul.f32 3.8918573e-05, %v936_v32  ;;  %v975_v30 = vmul.f32 %v3756_v22, %v3756_v22 }
 0x1ae   : > { %v938_v28 = vadd.f32 0.00028619796, %v937_v47  ;;  %v949_v49 = vadd.f32 0.001143296, %v948_v37  ;;  %v976_v55 = vmin.f32 %v975_v30, 16.0 }
 0x1b0   : > { %v939_v41 = vmul.f32 %v938_v28, %v936_v32  ;;  %v950_v18 = vmul.f32 %v949_v49, %v936_v32  ;;  %v977_v2 = vmul.f32 2.1237322e-06, %v976_v55  ;;  %v988_v36 = vmul.f32 3.8918573e-05, %v976_v55 }
 0x1b2   : > { %v940_v10 = vadd.f32 0.0036580483, %v939_v41  ;;  %v951_v0 = vadd.f32 0.014752088, %v950_v18  ;;  %v978_v11 = vadd.f32 0.00028619796, %v977_v2 }
 0x1b3   : > { %v989_v35 = vadd.f32 0.001143296, %v988_v36 }
 0x1b4   : > { %v952_v54 = vmul.f32 %v951_v0, %v936_v32  ;;  %v941_v20 = vmul.f32 %v940_v10, %v936_v32  ;;  %v979_v19 = vmul.f32 %v978_v11, %v976_v55 }
 0x1b5   : > { %v990_v15 = vmul.f32 %v989_v35, %v976_v55 }
 0x1b6   : > { %v953_v63 = vadd.f32 0.112945676, %v952_v54  ;;  %v942_v37 = vadd.f32 0.05243302, %v941_v20  ;;  %v980_v27 = vadd.f32 0.0036580483, %v979_v19 }
 0x1b7   : > { %v991_v47 = vadd.f32 0.014752088, %v990_v15 }
 0x1b8   : > { %v954_v38 = vmul.f32 %v953_v63, %v936_v32  ;;  %v943_v30 = vmul.f32 %v942_v37, %v936_v32  ;;  %v981_v18 = vmul.f32 %v980_v27, %v976_v55 }
 0x1b9   : > { %v992_v13 = vmul.f32 %v991_v47, %v976_v55 }
 0x1ba   : > { %v955_v1 = vadd.f32 0.4994258, %v954_v38  ;;  %v944_v0 = vadd.f32 0.18741608, %v943_v30  ;;  %v982_v2 = vadd.f32 0.05243302, %v981_v18 }
 0x1bb   : > { %v993_v49 = vadd.f32 0.112945676, %v992_v13 }
 0x1bc   : > { %v956_v28 = vmul.f32 %v955_v1, %v936_v32  ;;  %v945_v11 = vmul.f32 %v944_v0, %v936_v32  ;;  %v983_v63 = vmul.f32 %v982_v2, %v976_v55 }
 0x1bd   : > { %v994_v4 = vmul.f32 %v993_v49, %v976_v55 }
 0x1be   : > { %v957_v41 = vadd.f32 1.0, %v956_v28  ;;  %v946_v19 = vadd.f32 1.1283791, %v945_v11  ;;  %v984_v47 = vadd.f32 0.18741608, %v983_v63 }
 0x1bf   : > { %v995_v36 = vadd.f32 0.4994258, %v994_v4 }
 0x1c0   : > { %2986 = vrcp.f32 %v957_v41  ;;  %v969_v38 = vand.u32 2147483648, %v957_v41  ;;  %v967_v13 = vand.u32 2147483647, %v957_v41  ;;  %vm963_vm9 = vweird.f32 %v957_v41 }
 0x1c1   : > { %v996_v10 = vmul.f32 %v995_v36, %v976_v55  ;;  %v947_v4 = vmul.f32 %v946_v19, %v3745_v51  ;;  %v985_v32 = vmul.f32 %v984_v47, %v976_v55 }
 0x1c2   : > { %v970_v37 = vor.u32 1.1754944e-38, %v969_v38  ;;  %vm968_vm11 = vcmp.eq.f32.partialorder %v967_v13, 8.507059e+37 }
 0x1c3   : > { %v997_v15 = vadd.f32 1.0, %v996_v10  ;;  %v986_v36 = vadd.f32 1.1283791, %v985_v32 }
 0x1c5   : > { %2988 = vrcp.f32 %v997_v15  ;;  %v1009_v10 = vand.u32 2147483648, %v997_v15  ;;  %vm1003_vm13 = vweird.f32 %v997_v15 }
 0x1c6   : > { %v2987_v54 = vpop.eup %2986 }
 0x1c7   : > { %v959_v35 = vmul.f32 %v2987_v54, %v957_v41  ;;  %vm964_vm8 = vweird.f32 %v2987_v54  ;;  %v931_v41 = vmul.f32 0.5, %v3739_v58  ;;  %v1010_v51 = vor.u32 1.1754944e-38, %v1009_v10 }
 0x1c8   : > { %vm965_vm10 = vmor %vm963_vm9, %vm964_vm8  ;;  %v932_v58 = vmul.f32 0.5, %v3753_v60  ;;  %v4697_v60 = vld [vmem:[#allocation27_spill] sm:$0xff] }
 0x1c9   : > { %v960_v20 = vsub.f32 1.0, %v959_v35  ;;  %v1007_v35 = vand.u32 2147483647, %v997_v15 }
 0x1cb   : > { %v961_v1 = vmul.f32 %v2987_v54, %v960_v20  ;;  %v2989_v28 = vpop.eup %2988  ;;  %vm1008_vm15 = vcmp.eq.f32.partialorder %v1007_v35, 8.507059e+37 }
 0x1cc   : > { %v999_v18 = vmul.f32 %v2989_v28, %v997_v15  ;;  %vm1004_vm12 = vweird.f32 %v2989_v28 }
 0x1cd   : > { %v962_v27 = vadd.f32 %v2987_v54, %v961_v1  ;;  %vm1005_vm14 = vmor %vm1003_vm13, %vm1004_vm12 }
 0x1ce   : > { %v1000_v2 = vsub.f32 1.0, %v999_v18 }
 0x1cf   : > { %v966_v49 = vsel %vm965_vm10, %v2987_v54, %v962_v27  ;;  %v987_v54 = vmul.f32 %v986_v36, %v3756_v22 }
 0x1d0   : > { %v971_v30 = vsel %vm968_vm11, %v970_v37, %v966_v49  ;;  %v1001_v11 = vmul.f32 %v2989_v28, %v1000_v2  ;;  %v1020_v49 = vstv %s2806_s0  ;;  %v1024_v2 = vperm.slane %v3741_v53, 1  ;;  %s2431_s0 = sshll.u32 %s2427_s24, 4  ;;  %s2432_s0 = int_to_ptr.hbm [resolvable:$true] %s2431_s0 }
 0x1d1   : > { %v972_v0 = vmul.f32 %v971_v30, %v947_v4  ;;  %v4699_v4 = vld [vmem:[#allocation36_spill] sm:$0xff]  ;;  %v1021_v32 = vmul.f32 %v1020_v49, %v3733_v52  ;;  %v1023_v30 = vperm.slane %v3730_v33, 1 }
 0x1d2   : > { %v1002_v20 = vadd.f32 %v2989_v28, %v1001_v11 }
 0x1d3   : > { %v2804_v63 = vclamps-f32 %v972_v0, 1.0  ;;  %v3798_v18 = vadd.f32 %v1023_v30, %v1021_v32  ;;  %v1022_v0 = vmul.f32 %v1020_v49, %v3747_v39 }
 0x1d4   : > { %v1006_v55 = vsel %vm1005_vm14, %v2989_v28, %v1002_v20  ;;  %v4698_v28 = vld [vmem:[#allocation29_spill] sm:$0xff] }
 0x1d5   : > { %v1015_v38 = vadd.f32 1.0, %v2804_v63  ;;  %v1011_v1 = vsel %vm1008_vm15, %v1010_v51, %v1006_v55  ;;  %v3803_v36 = vmul.f32 0.70710677, %v3798_v18  ;;  %v3805_v10 = vadd.f32 %v1024_v2, %v1022_v0  ;;  %v4701_v2 = vld [vmem:[#allocation55_spill] sm:$0xff] }
 0x1d6   : > { %v1012_v13 = vmul.f32 %v1011_v1, %v987_v54 }
 0x1d7   : > { %v1017_v19 = vmul.f32 %v1015_v38, %v931_v41  ;;  %v1031_v11 = vmul.f32 %v3803_v36, %v3803_v36  ;;  %v3810_v35 = vmul.f32 0.70710677, %v3805_v10 }
 0x1d8   : > { %v2805_v27 = vclamps-f32 %v1012_v13, 1.0 }
 0x1d9   : > { %v1115_v47 = vpack.c.bf16 %v1017_v19, %v1017_v19  ;;  %v3812_v52 = vmin.f32 %v1031_v11, 16.0  ;;  %v1071_v33 = vmul.f32 %v3810_v35, %v3810_v35 }
 0x1da   : > { %v1016_v15 = vadd.f32 1.0, %v2805_v27 }
 0x1db   : > { %1125 = vmatmul.bf16.vlgmr.msra.gmra.mxu0 %v1115_v47  ;;  %1151 = vmatmul.bf16.vlgmr.msra.gmra.mxu2 %v1115_v47  ;;  %v1044_v39 = vmul.f32 3.8918573e-05, %v3812_v52  ;;  %v3817_v63 = vmin.f32 %v1071_v33, 16.0  ;;  %v4700_v47 = vld [vmem:[#allocation50_spill] sm:$0xff] }
 0x1dc   : > { %1313 = vmatpush.bf16.msra.mxu0 %v3416_v3  ;;  %1339 = vmatpush.bf16.msra.mxu2 %v3420_v8  ;;  %v1018_v37 = vmul.f32 %v1016_v15, %v932_v58 }
 0x1dd   : > { %v1045_v53 = vadd.f32 0.001143296, %v1044_v39  ;;  %v1084_v41 = vmul.f32 3.8918573e-05, %v3817_v63 }
 0x1de   : > { %v1116_v22 = vpack.c.bf16 %v1018_v37, %v1018_v37 }
 0x1df   : > { %v1046_v20 = vmul.f32 %v1045_v53, %v3812_v52  ;;  %v1085_v38 = vadd.f32 0.001143296, %v1084_v41 }
 0x1e0   : > { %1314 = vmatpush.bf16.msra.mxu0 %v3427_v16  ;;  %1340 = vmatpush.bf16.msra.mxu2 %v3432_v21 }
 0x1e1   : > { %1138 = vmatmul.bf16.vlgmr.msra.gmra.mxu1 %v1116_v22  ;;  %1164 = vmatmul.bf16.vlgmr.msra.gmra.mxu3 %v1116_v22  ;;  %v1047_v54 = vadd.f32 0.014752088, %v1046_v20  ;;  %v1086_v55 = vmul.f32 %v1085_v38, %v3817_v63  ;;  %v1033_v38 = vmul.f32 2.1237322e-06, %v3812_v52 }
 0x1e2   : > { %1326 = vmatpush.bf16.msra.mxu1 %v3418_v7  ;;  %1352 = vmatpush.bf16.msra.mxu3 %v3423_v12 }
 0x1e3   : > { %v1048_v19 = vmul.f32 %v1047_v54, %v3812_v52  ;;  %v1087_v13 = vadd.f32 0.014752088, %v1086_v55 }
 0x1e4   : > { %1315 = vmatpush.bf16.msra.mxu0 %v3437_v29  ;;  %1341 = vmatpush.bf16.msra.mxu2 %v3443_v34 }
 0x1e5   : > { %v1049_v37 = vadd.f32 0.112945676, %v1048_v19  ;;  %v1088_v49 = vmul.f32 %v1087_v13, %v3817_v63 }
 0x1e6   : > { %1327 = vmatpush.bf16.msra.mxu1 %v3429_v17  ;;  %1353 = vmatpush.bf16.msra.mxu3 %v3434_v25 }
 0x1e7   : > { %v1050_v30 = vmul.f32 %v1049_v37, %v3812_v52  ;;  %v1089_v53 = vadd.f32 0.112945676, %v1088_v49  ;;  %v1034_v37 = vadd.f32 0.00028619796, %v1033_v38  ;;  %v1073_v38 = vmul.f32 2.1237322e-06, %v3817_v63 }
 0x1e8   : > { %1316 = vmatpush.bf16.msra.mxu0 %v3449_v44  ;;  %1342 = vmatpush.bf16.msra.mxu2 %v3455_v46 }
 0x1e9   : > { %v1051_v54 = vadd.f32 0.4994258, %v1050_v30 }
 0x1ea   : > { %1328 = vmatpush.bf16.msra.mxu1 %v4697_v60  ;;  %1354 = vmatpush.bf16.msra.mxu3 %v4698_v28 }
 0x1eb   : > { %v1052_v49 = vmul.f32 %v1051_v54, %v3812_v52 }
 0x1ec   : > { %1317 = vmatpush.bf16.msra.mxu0 %v3461_v56  ;;  %1343 = vmatpush.bf16.msra.mxu2 %v4699_v4 }
 0x1ee   : > { %1329 = vmatpush.bf16.msra.mxu1 %v3453_v45  ;;  %1355 = vmatpush.bf16.msra.mxu3 %v3458_v50 }
 0x1f0   : > { %1318 = vmatpush.bf16.msra.mxu0 %v3473_v5  ;;  %1344 = vmatpush.bf16.msra.mxu2 %v3479_v9 }
 0x1f2   : > { %1330 = vmatpush.bf16.msra.mxu1 %v3465_v57  ;;  %1356 = vmatpush.bf16.msra.mxu3 %v3470_v62 }
 0x1f4   : > { %1319 = vmatpush.bf16.msra.mxu0 %v3485_v23  ;;  %1345 = vmatpush.bf16.msra.mxu2 %v3491_v26 }
 0x1f6   : > { %1331 = vmatpush.bf16.msra.mxu1 %v3477_v6  ;;  %1357 = vmatpush.bf16.msra.mxu3 %v3482_v14 }
 0x1f8   : > { %1320 = vmatpush.bf16.msra.mxu0 %v3497_v40  ;;  %1346 = vmatpush.bf16.msra.mxu2 %v3504_v43 }
 0x1fa   : > { %1332 = vmatpush.bf16.msra.mxu1 %v3489_v24  ;;  %1358 = vmatpush.bf16.msra.mxu3 %v3494_v31 }
 0x1fe   : > { %1333 = vmatpush.bf16.msra.mxu1 %v3502_v42  ;;  %1359 = vmatpush.bf16.msra.mxu3 %v3508_v48 }
 0x258   : > { %v1126_v51 = vpop.f32.mrf.mxu0 }
 0x259   : > { %v1127_v27 = vadd.f32 %v1126_v51, %v4700_v47  ;;  %v3855_v47 = vadd.f32 1.0, %v1052_v49 }
 0x25b   : > { %2990 = vrcp.f32 %v3855_v47  ;;  %vm1059_vm3 = vweird.f32 %v3855_v47 }
 0x25e   : > { %v1152_v1 = vpop.f32.mrf.mxu2  ;;  %v1139_v58 = vpop.f32.mrf.mxu1 }
 0x25f   : > { %v3824_v22 = vadd.f32 %v1139_v58, %v1127_v27  ;;  %v1153_v11 = vadd.f32 %v1152_v1, %v4701_v2  ;;  %v1090_v1 = vmul.f32 %v1089_v53, %v3817_v63 }
 0x260   : > { %v1128_v15 = vpop.f32.mrf.mxu0 }
 0x261   : > { %v3828_v32 = vmul.f32 0.70710677, %v3824_v22 }
 0x263   : > { %v1173_v0 = vmul.f32 %v3828_v32, %v3828_v32 }
 0x264   : > { %v1165_v33 = vpop.f32.mrf.mxu3 }
 0x265   : > { %v3834_v41 = vmin.f32 %v1173_v0, 16.0  ;;  %v3836_v20 = vadd.f32 %v1165_v33, %v1153_v11 }
 0x266   : > { %v1154_v39 = vpop.f32.mrf.mxu2  ;;  %v1141_v51 = vpop.f32.mrf.mxu1 }
 0x267   : > { %v1175_v55 = vmul.f32 2.1237322e-06, %v3834_v41  ;;  %v1186_v19 = vmul.f32 3.8918573e-05, %v3834_v41  ;;  %v3842_v13 = vmul.f32 0.70710677, %v3836_v20 }
 0x268   : > { %v1091_v39 = vadd.f32 0.4994258, %v1090_v1 }
 0x269   : > { %v1176_v27 = vadd.f32 0.00028619796, %v1175_v55  ;;  %v1187_v58 = vadd.f32 0.001143296, %v1186_v19  ;;  %v1213_v15 = vmul.f32 %v3842_v13, %v3842_v13  ;;  %v1035_v19 = vmul.f32 %v1034_v37, %v3812_v52 }
 0x26a   : > { %v1074_v37 = vadd.f32 0.00028619796, %v1073_v38 }
 0x26b   : > { %v1177_v0 = vmul.f32 %v1176_v27, %v3834_v41  ;;  %v1188_v30 = vmul.f32 %v1187_v58, %v3834_v41  ;;  %v3850_v11 = vmin.f32 %v1213_v15, 16.0  ;;  %v1036_v48 = vadd.f32 0.0036580483, %v1035_v19 }
 0x26c   : > { %v1167_v33 = vpop.f32.mrf.mxu3 }
 0x26d   : > { %v1189_v51 = vadd.f32 0.014752088, %v1188_v30  ;;  %v1178_v2 = vadd.f32 0.0036580483, %v1177_v0  ;;  %v1215_v53 = vmul.f32 2.1237322e-06, %v3850_v11  ;;  %v1092_v33 = vmul.f32 %v1091_v39, %v3817_v63 }
 0x26e   : > { %v1226_v55 = vmul.f32 3.8918573e-05, %v3850_v11 }
 0x26f   : > { %v1190_v54 = vmul.f32 %v1189_v51, %v3834_v41  ;;  %v1216_v27 = vadd.f32 0.00028619796, %v1215_v53  ;;  %v1179_v1 = vmul.f32 %v1178_v2, %v3834_v41  ;;  %v3865_v53 = vadd.f32 1.0, %v1092_v33 }
 0x270   : > { %v1227_v58 = vadd.f32 0.001143296, %v1226_v55  ;;  %v1037_v2 = vmul.f32 %v1036_v48, %v3812_v52 }
 0x271   : > { %v1191_v15 = vadd.f32 0.112945676, %v1190_v54  ;;  %v1217_v0 = vmul.f32 %v1216_v27, %v3850_v11  ;;  %v1180_v55 = vadd.f32 0.05243302, %v1179_v1  ;;  %v1075_v54 = vmul.f32 %v1074_v37, %v3817_v63 }
 0x272   : > { %v1228_v30 = vmul.f32 %v1227_v58, %v3850_v11  ;;  %v3871_v58 = vpop.eup %2990  ;;  %2992 = vrcp.f32 %v3865_v53  ;;  %vm1099_vm13 = vweird.f32 %v3865_v53 }
 0x273   : > { %v1192_v49 = vmul.f32 %v1191_v15, %v3834_v41  ;;  %v1218_v51 = vadd.f32 0.0036580483, %v1217_v0  ;;  %v1181_v33 = vmul.f32 %v1180_v55, %v3834_v41  ;;  %v1038_v0 = vadd.f32 0.05243302, %v1037_v2 }
 0x274   : > { %v1229_v42 = vadd.f32 0.014752088, %v1228_v30  ;;  %v1055_v48 = vmul.f32 %v3871_v58, %v3855_v47  ;;  %vm1060_vm1 = vweird.f32 %v3871_v58 }
 0x275   : > { %v1193_v31 = vadd.f32 0.4994258, %v1192_v49  ;;  %v1219_v15 = vmul.f32 %v1218_v51, %v3850_v11  ;;  %v1182_v37 = vadd.f32 0.18741608, %v1181_v33  ;;  %vm3904_vm6 = vmor %vm1059_vm3, %vm1060_vm1 }
 0x276   : > { %v1230_v39 = vmul.f32 %v1229_v42, %v3850_v11  ;;  %v1076_v42 = vadd.f32 0.0036580483, %v1075_v54  ;;  %v1056_v55 = vsub.f32 1.0, %v1055_v48 }
 0x277   : > { %v1194_v27 = vmul.f32 %v1193_v31, %v3834_v41  ;;  %v1220_v31 = vadd.f32 0.05243302, %v1219_v15 }
 0x278   : > { %v1231_v19 = vadd.f32 0.112945676, %v1230_v39  ;;  %v1039_v39 = vmul.f32 %v1038_v0, %v3812_v52  ;;  %v1077_v51 = vmul.f32 %v1076_v42, %v3817_v63 }
 0x279   : > { %v1195_v38 = vadd.f32 1.0, %v1194_v27  ;;  %v3882_v27 = vpop.eup %2992  ;;  %v1221_v54 = vmul.f32 %v1220_v31, %v3850_v11 }
 0x27a   : > { %v1232_v1 = vmul.f32 %v1231_v19, %v3850_v11  ;;  %v1183_v19 = vmul.f32 %v1182_v37, %v3834_v41  ;;  %v1040_v15 = vadd.f32 0.18741608, %v1039_v39  ;;  %v1078_v33 = vadd.f32 0.05243302, %v1077_v51 }
 0x27b   : > { %2994 = vrcp.f32 %v1195_v38  ;;  %v1095_v0 = vmul.f32 %v3882_v27, %v3865_v53  ;;  %v1222_v48 = vadd.f32 0.18741608, %v1221_v54  ;;  %v1205_v14 = vand.u32 2147483647, %v1195_v38 }
 0x27c   : > { %v1233_v30 = vadd.f32 0.4994258, %v1232_v1  ;;  %v1057_v1 = vmul.f32 %v3871_v58, %v1056_v55  ;;  %v1041_v31 = vmul.f32 %v1040_v15, %v3812_v52  ;;  %v1065_v41 = vand.u32 2147483648, %v3855_v47 }
 0x27d   : > { %v1079_v37 = vmul.f32 %v1078_v33, %v3817_v63  ;;  %v1096_v55 = vsub.f32 1.0, %v1095_v0  ;;  %vm1201_vm2 = vweird.f32 %v1195_v38  ;;  %v1223_v54 = vmul.f32 %v1222_v48, %v3850_v11 }
 0x27e   : > { %v1234_v49 = vmul.f32 %v1233_v30, %v3850_v11  ;;  %v1207_v30 = vand.u32 2147483648, %v1195_v38  ;;  %v1058_v51 = vadd.f32 %v3871_v58, %v1057_v1  ;;  %vm1206_vm5 = vcmp.eq.f32.partialorder %v1205_v14, 8.507059e+37 }
 0x27f   : > { %v1224_v14 = vadd.f32 1.1283791, %v1223_v54  ;;  %v1042_v48 = vadd.f32 1.1283791, %v1041_v31  ;;  %vm1100_vm10 = vweird.f32 %v3882_v27 }
 0x280   : > { %v3884_v24 = vadd.f32 1.0, %v1234_v49  ;;  %v1184_v49 = vadd.f32 1.1283791, %v1183_v19  ;;  %v1063_v19 = vand.u32 2147483647, %v3855_v47  ;;  %v1062_v11 = vsel %vm3904_vm6, %v3871_v58, %v1058_v51  ;;  %vm1101_vm14 = vmor %vm1099_vm13, %vm1100_vm10 }
 0x281   : > { %v2995_v2 = vpop.eup %2994  ;;  %v1097_v47 = vmul.f32 %v3882_v27, %v1096_v55  ;;  %v1169_v58 = vmul.f32 0.5, %v3824_v22 }
 0x282   : > { %v1197_v43 = vmul.f32 %v2995_v2, %v1195_v38  ;;  %2996 = vrcp.f32 %v3884_v24  ;;  %vm1202_vm0 = vweird.f32 %v2995_v2  ;;  %v1185_v15 = vmul.f32 %v1184_v49, %v3828_v32 }
 0x283   : > { %vm1203_vm4 = vmor %vm1201_vm2, %vm1202_vm0  ;;  %v1080_v38 = vadd.f32 0.18741608, %v1079_v37  ;;  %vm1064_vm8 = vcmp.eq.f32.partialorder %v1063_v19, 8.507059e+37  ;;  %vm1241_vm9 = vweird.f32 %v3884_v24  ;;  %v1098_v54 = vadd.f32 %v3882_v27, %v1097_v47 }
 0x284   : > { %v1198_v42 = vsub.f32 1.0, %v1197_v43  ;;  %v1208_v43 = vor.u32 1.1754944e-38, %v1207_v30  ;;  %v1043_v19 = vmul.f32 %v1042_v48, %v3803_v36  ;;  %v1170_v36 = vmul.f32 0.5, %v3836_v20  ;;  %v4706_v48 = vld [vmem:[#allocation53_spill] sm:$0xff] }
 0x285   : > { %v1081_v37 = vmul.f32 %v1080_v38, %v3817_v63  ;;  %v1105_v63 = vand.u32 2147483648, %v3865_v53  ;;  %v1027_v20 = vmul.f32 0.5, %v3798_v18 }
 0x286   : > { %v1199_v40 = vmul.f32 %v2995_v2, %v1198_v42 }
 0x287   : > { %v1082_v38 = vadd.f32 1.1283791, %v1081_v37  ;;  %v4708_v37 = vld [vmem:[#allocation56_spill] sm:$0xff] }
 0x288   : > { %v2997_v39 = vpop.eup %2996  ;;  %v1200_v6 = vadd.f32 %v2995_v2, %v1199_v40  ;;  %v1066_v40 = vor.u32 1.1754944e-38, %v1065_v41 }
 0x289   : > { %v1237_v52 = vmul.f32 %v2997_v39, %v3884_v24  ;;  %vm1242_vm7 = vweird.f32 %v2997_v39  ;;  %v1083_v47 = vmul.f32 %v1082_v38, %v3810_v35  ;;  %v4709_v35 = vld [vmem:[#allocation57_spill] sm:$0xff]  ;;  %v4720_v38 = vld [vmem:[#allocation68_spill] sm:$0xff] }
 0x28a   : > { %v1204_v42 = vsel %vm1203_vm4, %v2995_v2, %v1200_v6  ;;  %v1247_v6 = vand.u32 2147483648, %v3884_v24  ;;  %v1245_v2 = vand.u32 2147483647, %v3884_v24  ;;  %v1067_v41 = vsel %vm1064_vm8, %v1066_v40, %v1062_v11  ;;  %vm1243_vm11 = vmor %vm1241_vm9, %vm1242_vm7 }
 0x28b   : > { %v1209_v1 = vsel %vm1206_vm5, %v1208_v43, %v1204_v42  ;;  %v1238_v0 = vsub.f32 1.0, %v1237_v52  ;;  %v1225_v52 = vmul.f32 %v1224_v14, %v3842_v13  ;;  %v1103_v24 = vand.u32 2147483647, %v3865_v53 }
 0x28c   : > { %v1210_v30 = vmul.f32 %v1209_v1, %v1185_v15  ;;  %v1248_v55 = vor.u32 1.1754944e-38, %v1247_v6  ;;  %vm1246_vm12 = vcmp.eq.f32.partialorder %v1245_v2, 8.507059e+37  ;;  %v1068_v33 = vmul.f32 %v1067_v41, %v1043_v19 }
 0x28d   : > { %v1239_v32 = vmul.f32 %v2997_v39, %v1238_v0  ;;  %v1102_v13 = vsel %vm1101_vm14, %v3882_v27, %v1098_v54  ;;  %v1106_v1 = vor.u32 1.1754944e-38, %v1105_v63  ;;  %vm1104_vm15 = vcmp.eq.f32.partialorder %v1103_v24, 8.507059e+37  ;;  %v4704_v27 = vld [vmem:[#allocation51_spill] sm:$0xff]  ;;  %v4712_v54 = vld [vmem:[#allocation60_spill] sm:$0xff]  ;;  %v4714_v63 = vld [vmem:[#allocation62_spill] sm:$0xff] }
 0x28e   : > { %v2809_v49 = vclamps-f32 %v1210_v30, 1.0  ;;  %v2807_v11 = vclamps-f32 %v1068_v33, 1.0  ;;  %v4717_v24 = vld [vmem:[#allocation65_spill] sm:$0xff]  ;;  %v4718_v33 = vld [vmem:[#allocation66_spill] sm:$0xff] }
 0x28f   : > { %v1240_v43 = vadd.f32 %v2997_v39, %v1239_v32  ;;  %v1107_v53 = vsel %vm1104_vm15, %v1106_v1, %v1102_v13  ;;  %v4705_v32 = vld [vmem:[#allocation52_spill] sm:$0xff]  ;;  %v4721_v13 = vld [vmem:[#allocation69_spill] sm:$0xff] }
 0x290   : > { %v1253_v51 = vadd.f32 1.0, %v2809_v49  ;;  %v1108_v6 = vmul.f32 %v1107_v53, %v1083_v47  ;;  %v1111_v2 = vadd.f32 1.0, %v2807_v11  ;;  %v4707_v49 = vld [vmem:[#allocation54_spill] sm:$0xff]  ;;  %v4724_v1 = vld [vmem:[#allocation72_spill] sm:$0xff]  ;;  %v4727_v53 = vld [vmem:[#allocation75_spill] sm:$0xff] }
 0x291   : > { %v1244_v31 = vsel %vm1243_vm11, %v2997_v39, %v1240_v43  ;;  %v4728_v11 = vld [vmem:[#allocation76_spill] sm:$0xff]  ;;  %v4729_v47 = vld [vmem:[#allocation77_spill] sm:$0xff] }
 0x292   : > { %v1255_v15 = vmul.f32 %v1253_v51, %v1169_v58  ;;  %v1249_v42 = vsel %vm1246_vm12, %v1248_v55, %v1244_v31  ;;  %v2808_v41 = vclamps-f32 %v1108_v6, 1.0  ;;  %v1113_v43 = vmul.f32 %v1111_v2, %v1027_v20  ;;  %v4710_v58 = vld [vmem:[#allocation58_spill] sm:$0xff]  ;;  %v4711_v51 = vld [vmem:[#allocation59_spill] sm:$0xff]  ;;  %v4733_v2 = vld [vmem:[#allocation81_spill] sm:$0xff] }
 0x293   : > { %v1250_v22 = vmul.f32 %v1249_v42, %v1225_v52  ;;  %v4713_v52 = vld [vmem:[#allocation61_spill] sm:$0xff]  ;;  %v1028_v31 = vmul.f32 0.5, %v3805_v10  ;;  %v4716_v42 = vld [vmem:[#allocation64_spill] sm:$0xff]  ;;  %v4722_v10 = vld [vmem:[#allocation70_spill] sm:$0xff] }
 0x294   : > { %v1257_v40 = vpack.c.bf16 %v1255_v15, %v1255_v15  ;;  %v1112_v55 = vadd.f32 1.0, %v2808_v41  ;;  %v1311_v18 = vpack.c.bf16 %v1113_v43, %v1113_v43  ;;  %v4715_v15 = vld [vmem:[#allocation63_spill] sm:$0xff]  ;;  %v4735_v41 = vld [vmem:[#allocation41_spill] sm:$0xff]  ;;  %v4736_v43 = vld [vmem:[#allocation46_spill] sm:$0xff] }
 0x295   : > { %v2810_v39 = vclamps-f32 %v1250_v22, 1.0  ;;  %v4731_v6 = vld [vmem:[#allocation79_spill] sm:$0xff] }
 0x296   : > { %1267 = vmatmul.bf16.vlgmr.msrb.gmra.mxu0 %v1257_v40  ;;  %1293 = vmatmul.bf16.vlgmr.msrb.gmra.mxu2 %v1257_v40  ;;  %v1114_v19 = vmul.f32 %v1112_v55, %v1028_v31  ;;  %v4719_v40 = vld [vmem:[#allocation67_spill] sm:$0xff]  ;;  %v4737_v55 = vld [vmem:[#allocation48_spill] sm:$0xff]  ;;  %v4739_v31 = vld [vmem:[#allocation45_spill] sm:$0xff] }
 0x297   : > { %v1254_v0 = vadd.f32 1.0, %v2810_v39  ;;  %1455 = vmatpush.bf16.msrb.mxu0 %v3517_v59  ;;  %1481 = vmatpush.bf16.msrb.mxu2 %v3519_v61  ;;  %v4723_v39 = vld [vmem:[#allocation71_spill] sm:$0xff] }
 0x298   : > { %v1312_v22 = vpack.c.bf16 %v1114_v19, %v1114_v19  ;;  %v4734_v20 = vld [vmem:[#allocation39_spill] sm:$0xff] }
 0x299   : > { %v1256_v30 = vmul.f32 %v1254_v0, %v1170_v36  ;;  %v4725_v36 = vld [vmem:[#allocation73_spill] sm:$0xff]  ;;  %v4726_v0 = vld [vmem:[#allocation74_spill] sm:$0xff]  ;;  %v4740_v19 = vld [vmem:[#allocation47_spill] sm:$0xff] }
 0x29b   : > { %v1258_v14 = vpack.c.bf16 %v1256_v30, %v1256_v30  ;;  %1456 = vmatpush.bf16.msrb.mxu0 %v4704_v27  ;;  %1482 = vmatpush.bf16.msrb.mxu2 %v4705_v32  ;;  %v4730_v30 = vld [vmem:[#allocation78_spill] sm:$0xff] }
 0x29d   : > { %1280 = vmatmul.bf16.vlgmr.msrb.gmra.mxu1 %v1258_v14  ;;  %1306 = vmatmul.bf16.vlgmr.msrb.gmra.mxu3 %v1258_v14  ;;  %v4732_v14 = vld [vmem:[#allocation80_spill] sm:$0xff] }
 0x29e   : > { %1468 = vmatpush.bf16.msrb.mxu1 %v4706_v48  ;;  %1494 = vmatpush.bf16.msrb.mxu3 %v4707_v49 }
 0x29f   : > { %1457 = vmatpush.bf16.msrb.mxu0 %v4708_v37  ;;  %1483 = vmatpush.bf16.msrb.mxu2 %v4709_v35 }
 0x2a2   : > { %1469 = vmatpush.bf16.msrb.mxu1 %v4710_v58  ;;  %1495 = vmatpush.bf16.msrb.mxu3 %v4711_v51 }
 0x2a3   : > { %1458 = vmatpush.bf16.msrb.mxu0 %v4712_v54  ;;  %1484 = vmatpush.bf16.msrb.mxu2 %v4713_v52 }
 0x2a6   : > { %1321 = vmatmul.bf16.vlgmr.msra.gmra.mxu0 %v1311_v18  ;;  %1347 = vmatmul.bf16.vlgmr.msra.gmra.mxu2 %v1311_v18  ;;  %v4738_v18 = vld [vmem:[#allocation43_spill] sm:$0xff] }
 0x2a7   : > { %1470 = vmatpush.bf16.msrb.mxu1 %v4714_v63  ;;  %1496 = vmatpush.bf16.msrb.mxu3 %v4715_v15 }
 0x2a8   : > { %1459 = vmatpush.bf16.msrb.mxu0 %v4716_v42  ;;  %1485 = vmatpush.bf16.msrb.mxu2 %v4717_v24 }
 0x2ab   : > { %1471 = vmatpush.bf16.msrb.mxu1 %v4718_v33  ;;  %1497 = vmatpush.bf16.msrb.mxu3 %v4719_v40 }
 0x2ac   : > { %1460 = vmatpush.bf16.msrb.mxu0 %v4720_v38  ;;  %1486 = vmatpush.bf16.msrb.mxu2 %v4721_v13 }
 0x2ad   : > { %1334 = vmatmul.bf16.vlgmr.msra.gmra.mxu1 %v1312_v22  ;;  %1360 = vmatmul.bf16.vlgmr.msra.gmra.mxu3 %v1312_v22  ;;  %v4741_v22 = vld [vmem:[#allocation49_spill] sm:$0xff] }
 0x2af   : > { %1472 = vmatpush.bf16.msrb.mxu1 %v4722_v10  ;;  %1498 = vmatpush.bf16.msrb.mxu3 %v4723_v39 }
 0x2b0   : > { %1461 = vmatpush.bf16.msrb.mxu0 %v4724_v1  ;;  %1487 = vmatpush.bf16.msrb.mxu2 %v4725_v36 }
 0x2b3   : > { %1473 = vmatpush.bf16.msrb.mxu1 %v4726_v0  ;;  %1499 = vmatpush.bf16.msrb.mxu3 %v4727_v53 }
 0x2b4   : > { %1462 = vmatpush.bf16.msrb.mxu0 %v4728_v11  ;;  %1488 = vmatpush.bf16.msrb.mxu2 %v4729_v47 }
 0x2b7   : > { %1474 = vmatpush.bf16.msrb.mxu1 %v4730_v30  ;;  %1500 = vmatpush.bf16.msrb.mxu3 %v4731_v6 }
 0x2b8   : > { %1721 = vmatpush.bf16.msra.mxu0 %v3416_v3  ;;  %1747 = vmatpush.bf16.msra.mxu2 %v3420_v8 }
 0x2bb   : > { %1475 = vmatpush.bf16.msrb.mxu1 %v4732_v14  ;;  %1501 = vmatpush.bf16.msrb.mxu3 %v4733_v2 }
 0x2bc   : > { %1722 = vmatpush.bf16.msra.mxu0 %v3427_v16  ;;  %1748 = vmatpush.bf16.msra.mxu2 %v3432_v21 }
 0x2bf   : > { %1734 = vmatpush.bf16.msra.mxu1 %v3418_v7  ;;  %1760 = vmatpush.bf16.msra.mxu3 %v3423_v12 }
 0x2c0   : > { %1723 = vmatpush.bf16.msra.mxu0 %v3437_v29  ;;  %1749 = vmatpush.bf16.msra.mxu2 %v3443_v34 }
 0x2c3   : > { %1735 = vmatpush.bf16.msra.mxu1 %v3429_v17  ;;  %1761 = vmatpush.bf16.msra.mxu3 %v3434_v25 }
 0x2c4   : > { %1724 = vmatpush.bf16.msra.mxu0 %v3449_v44  ;;  %1750 = vmatpush.bf16.msra.mxu2 %v3455_v46 }
 0x2c7   : > { %1736 = vmatpush.bf16.msra.mxu1 %v4697_v60  ;;  %1762 = vmatpush.bf16.msra.mxu3 %v4698_v28 }
 0x2c8   : > { %1725 = vmatpush.bf16.msra.mxu0 %v3461_v56  ;;  %1751 = vmatpush.bf16.msra.mxu2 %v4699_v4 }
 0x2cb   : > { %1737 = vmatpush.bf16.msra.mxu1 %v3453_v45  ;;  %1763 = vmatpush.bf16.msra.mxu3 %v3458_v50 }
 0x2cc   : > { %1726 = vmatpush.bf16.msra.mxu0 %v3473_v5  ;;  %1752 = vmatpush.bf16.msra.mxu2 %v3479_v9  ;;  %v4743_v5 = vld [vmem:[#allocation83_spill] sm:$0xff] }
 0x2cf   : > { %1738 = vmatpush.bf16.msra.mxu1 %v3465_v57  ;;  %1764 = vmatpush.bf16.msra.mxu3 %v3470_v62 }
 0x2d0   : > { %1727 = vmatpush.bf16.msra.mxu0 %v3485_v23  ;;  %1753 = vmatpush.bf16.msra.mxu2 %v3491_v26  ;;  %v4742_v23 = vld [vmem:[#allocation82_spill] sm:$0xff] }
 0x2d3   : > { %1739 = vmatpush.bf16.msra.mxu1 %v4734_v20  ;;  %1765 = vmatpush.bf16.msra.mxu3 %v4735_v41 }
 0x2d4   : > { %1728 = vmatpush.bf16.msra.mxu0 %v4736_v43  ;;  %1754 = vmatpush.bf16.msra.mxu2 %v4737_v55 }
 0x2d7   : > { %1740 = vmatpush.bf16.msra.mxu1 %v4738_v18  ;;  %1766 = vmatpush.bf16.msra.mxu3 %v4739_v31 }
 0x2db   : > { %1741 = vmatpush.bf16.msra.mxu1 %v4740_v19  ;;  %1767 = vmatpush.bf16.msra.mxu3 %v4741_v22  ;;  %v4745_v19 = vld [vmem:[#allocation50_spill] sm:$0xff] }
 0x313   : > { %v1268_v62 = vpop.f32.mrf.mxu0 }
 0x314   : > { %v1269_v57 = vadd.f32 %v1268_v62, %v4742_v23 }
 0x319   : > { %v1294_v26 = vpop.f32.mrf.mxu2 }
 0x31a   : > { %v1281_v9 = vpop.f32.mrf.mxu1  ;;  %v1295_v43 = vadd.f32 %v1294_v26, %v4743_v5  ;;  %v4746_v26 = vld [vmem:[#allocation55_spill] sm:$0xff] }
 0x31b   : > { %v3996_v20 = vadd.f32 %v1281_v9, %v1269_v57  ;;  %v1270_v41 = vpop.f32.mrf.mxu0 }
 0x320   : > { %v1307_v50 = vpop.f32.mrf.mxu3 }
 0x321   : > { %v3999_v55 = vadd.f32 %v1307_v50, %v1295_v43  ;;  %v1296_v18 = vpop.f32.mrf.mxu2 }
 0x322   : > { %v1283_v45 = vpop.f32.mrf.mxu1 }
 0x323   : > { %4744 = vst [vmem:[#allocation51_spill] sm:$0xff] %v3999_v55  ;;  %v1322_v31 = vpop.f32.mrf.mxu0 }
 0x324   : > { %v1323_v56 = vadd.f32 %v1322_v31, %v4745_v19 }
 0x328   : > { %v1309_v4 = vpop.f32.mrf.mxu3 }
 0x329   : > { %v1348_v22 = vpop.f32.mrf.mxu2 }
 0x32a   : > { %v1335_v28 = vpop.f32.mrf.mxu1  ;;  %v1349_v50 = vadd.f32 %v1348_v22, %v4746_v26 }
 0x32b   : > { %v4002_v60 = vadd.f32 %v1335_v28, %v1323_v56  ;;  %v1324_v62 = vpop.f32.mrf.mxu0 }
 0x32d   : > { %v4005_v57 = vmul.f32 0.70710677, %v4002_v60 }
 0x32f   : > { %v1369_v9 = vmul.f32 %v4005_v57, %v4005_v57 }
 0x330   : > { %v1361_v41 = vpop.f32.mrf.mxu3 }
 0x331   : > { %v1370_v43 = vmin.f32 %v1369_v9, 16.0  ;;  %v4010_v45 = vadd.f32 %v1361_v41, %v1349_v50  ;;  %v1350_v4 = vpop.f32.mrf.mxu2 }
 0x332   : > { %v1337_v18 = vpop.f32.mrf.mxu1 }
 0x333   : > { %v1371_v31 = vmul.f32 2.1237322e-06, %v1370_v43  ;;  %v1382_v19 = vmul.f32 3.8918573e-05, %v1370_v43  ;;  %v4013_v56 = vmul.f32 0.70710677, %v4010_v45 }
 0x335   : > { %v1372_v28 = vadd.f32 0.00028619796, %v1371_v31  ;;  %v1383_v62 = vadd.f32 0.001143296, %v1382_v19  ;;  %v1409_v46 = vmul.f32 %v4013_v56, %v4013_v56 }
 0x337   : > { %v1373_v44 = vmul.f32 %v1372_v28, %v1370_v43  ;;  %v1384_v25 = vmul.f32 %v1383_v62, %v1370_v43  ;;  %v1410_v17 = vmin.f32 %v1409_v46, 16.0 }
 0x338   : > { %v1363_v22 = vpop.f32.mrf.mxu3 }
 0x339   : > { %v1385_v26 = vadd.f32 0.014752088, %v1384_v25  ;;  %v1374_v9 = vadd.f32 0.0036580483, %v1373_v44  ;;  %v1411_v50 = vmul.f32 2.1237322e-06, %v1410_v17 }
 0x33a   : > { %v1422_v41 = vmul.f32 3.8918573e-05, %v1410_v17 }
 0x33b   : > { %v1386_v4 = vmul.f32 %v1385_v26, %v1370_v43  ;;  %v1412_v18 = vadd.f32 0.00028619796, %v1411_v50  ;;  %v1375_v12 = vmul.f32 %v1374_v9, %v1370_v43 }
 0x33c   : > { %v1423_v34 = vadd.f32 0.001143296, %v1422_v41 }
 0x33d   : > { %v1387_v29 = vadd.f32 0.112945676, %v1386_v4  ;;  %v1413_v7 = vmul.f32 %v1412_v18, %v1410_v17  ;;  %v1376_v3 = vadd.f32 0.05243302, %v1375_v12 }
 0x33e   : > { %v1424_v21 = vmul.f32 %v1423_v34, %v1410_v17 }
 0x33f   : > { %v1388_v31 = vmul.f32 %v1387_v29, %v1370_v43  ;;  %v1414_v8 = vadd.f32 0.0036580483, %v1413_v7  ;;  %v1377_v44 = vmul.f32 %v1376_v3, %v1370_v43 }
 0x340   : > { %v1425_v19 = vadd.f32 0.014752088, %v1424_v21 }
 0x341   : > { %v1389_v16 = vadd.f32 0.4994258, %v1388_v31  ;;  %v1415_v25 = vmul.f32 %v1414_v8, %v1410_v17  ;;  %v1378_v41 = vadd.f32 0.18741608, %v1377_v44 }
 0x342   : > { %v1426_v28 = vmul.f32 %v1425_v19, %v1410_v17 }
 0x343   : > { %v1390_v62 = vmul.f32 %v1389_v16, %v1370_v43  ;;  %v1416_v50 = vadd.f32 0.05243302, %v1415_v25  ;;  %v1379_v29 = vmul.f32 %v1378_v41, %v1370_v43 }
 0x344   : > { %v1427_v46 = vadd.f32 0.112945676, %v1426_v28 }
 0x345   : > { %v1391_v22 = vadd.f32 1.0, %v1390_v62  ;;  %v1417_v34 = vmul.f32 %v1416_v50, %v1410_v17  ;;  %v1380_v16 = vadd.f32 1.1283791, %v1379_v29 }
 0x346   : > { %v1428_v55 = vmul.f32 %v1427_v46, %v1410_v17 }
 0x347   : > { %2998 = vrcp.f32 %v1391_v22  ;;  %v1403_v12 = vand.u32 2147483648, %v1391_v22  ;;  %v1418_v31 = vadd.f32 0.18741608, %v1417_v34  ;;  %v1401_v8 = vand.u32 2147483647, %v1391_v22 }
 0x348   : > { %v1429_v26 = vadd.f32 0.4994258, %v1428_v55  ;;  %vm1397_vm1 = vweird.f32 %v1391_v22  ;;  %v1381_v25 = vmul.f32 %v1380_v16, %v4005_v57 }
 0x349   : > { %v1404_v55 = vor.u32 1.1754944e-38, %v1403_v12  ;;  %v1419_v62 = vmul.f32 %v1418_v31, %v1410_v17  ;;  %vm1402_vm3 = vcmp.eq.f32.partialorder %v1401_v8, 8.507059e+37 }
 0x34a   : > { %v1430_v4 = vmul.f32 %v1429_v26, %v1410_v17 }
 0x34c   : > { %v1431_v9 = vadd.f32 1.0, %v1430_v4  ;;  %v1420_v4 = vadd.f32 1.1283791, %v1419_v62 }
 0x34d   : > { %v2999_v18 = vpop.eup %2998 }
 0x34e   : > { %v1393_v21 = vmul.f32 %v2999_v18, %v1391_v22  ;;  %3000 = vrcp.f32 %v1431_v9  ;;  %vm1398_vm0 = vweird.f32 %v2999_v18  ;;  %v1443_v41 = vand.u32 2147483648, %v1431_v9 }
 0x34f   : > { %vm1399_vm2 = vmor %vm1397_vm1, %vm1398_vm0  ;;  %v1441_v29 = vand.u32 2147483647, %v1431_v9  ;;  %vm1437_vm5 = vweird.f32 %v1431_v9  ;;  %v1365_v22 = vmul.f32 0.5, %v4002_v60  ;;  %v1421_v57 = vmul.f32 %v1420_v4, %v4013_v56 }
 0x350   : > { %v1394_v7 = vsub.f32 1.0, %v1393_v21  ;;  %v1444_v17 = vor.u32 1.1754944e-38, %v1443_v41  ;;  %v1508_v56 = vstv %s4053_s10  ;;  %v1516_v4 = vstv %s4057_s19  ;;  %s3176_s10 = sshra.s32 %s2432_s0, 4  ;;  %s3177_s10 = int_to_ptr.hbm [resolvable:$true] %s3176_s10 }
 0x351   : > { %vm1442_vm7 = vcmp.eq.f32.partialorder %v1441_v29, 8.507059e+37  ;;  %p3183_p12 = scmp.lt.s32.totalorder %s3177_s10, %s4460_s7 }
 0x352   : > { %v1395_v19 = vmul.f32 %v2999_v18, %v1394_v7 }
 0x354   : > { %v3001_v3 = vpop.eup %3000  ;;  %v1396_v28 = vadd.f32 %v2999_v18, %v1395_v19 }
 0x355   : > { %v1433_v46 = vmul.f32 %v3001_v3, %v1431_v9  ;;  %vm1438_vm4 = vweird.f32 %v3001_v3 }
 0x356   : > { %v1400_v44 = vsel %vm1399_vm2, %v2999_v18, %v1396_v28  ;;  %vm1439_vm6 = vmor %vm1437_vm5, %vm1438_vm4 }
 0x357   : > { %v1405_v43 = vsel %vm1402_vm3, %v1404_v55, %v1400_v44  ;;  %v1434_v26 = vsub.f32 1.0, %v1433_v46  ;;  %v1366_v55 = vmul.f32 0.5, %v4010_v45  ;;  %v3026_v46 = vld [vmem:[#allocation10] sm:$0xff] }
 0x358   : > { %v1406_v50 = vmul.f32 %v1405_v43, %v1381_v25  ;;  %v1511_v25 = vperm.slane %v3026_v46, 2 }
 0x359   : > { %v1435_v34 = vmul.f32 %v3001_v3, %v1434_v26  ;;  %v1509_v26 = vmul.f32 %v1508_v56, %v3996_v20 }
 0x35a   : > { %v2811_v21 = vclamps-f32 %v1406_v50, 1.0  ;;  %v1617_v50 = vperm.slane %v3026_v46, 4 }
 0x35b   : > { %v1436_v7 = vadd.f32 %v3001_v3, %v1435_v34  ;;  %v1622_v34 = vstv %s4059_s22  ;;  %s3182_s22 = scalar_lea.hbm %s4460_s7, 32 }
 0x35c   : > { %v1449_v12 = vadd.f32 1.0, %v2811_v21 }
 0x35d   : > { %v1440_v18 = vsel %vm1439_vm6, %v3001_v3, %v1436_v7  ;;  %v1614_v3 = vstv %s4055_s21  ;;  %v1519_v7 = vperm.slane %v3026_v46, 3  ;;  %s3178_s21 = scalar_lea.hbm %s3177_s10, 16 }
 0x35e   : > { %v1451_v31 = vmul.f32 %v1449_v12, %v1365_v22  ;;  %v1445_v16 = vsel %vm1442_vm7, %v1444_v17, %v1440_v18  ;;  %v1615_v29 = vmul.f32 %v1614_v3, %v3996_v20  ;;  %v1625_v22 = vperm.slane %v3026_v46, 5  ;;  %v4747_v46 = vld [vmem:[#allocation51_spill] sm:$0xff]  ;;  %p3179_p1 = scmp.ne.s32.totalorder %s3177_s10, %s3178_s21  ;;  %p3184_p8 = scmp.lt.s32.totalorder %s3182_s22, %s3178_s21 }
 0x35f   : > { %v1446_v19 = vmul.f32 %v1445_v16, %v1421_v57  ;;  %v1513_v18 = vadd.f32 %v1511_v25, %v1509_v26 }
 0x360   : > { %v1453_v8 = vpack.c.bf16 %v1451_v31, %v1451_v31  ;;  %v1619_v31 = vadd.f32 %v1617_v50, %v1615_v29  ;;  %p3180_p3 = pnand %p3179_p1, %p3365_p13  ;;  %p3185_p7 = por %p3184_p8, %p3183_p12 }
 0x361   : > { %v2812_v28 = vclamps-f32 %v1446_v19, 1.0 }
 0x362   : > { %1463 = vmatmul.bf16.vlgmr.msrb.gmra.mxu0 %v1453_v8  ;;  %1489 = vmatmul.bf16.vlgmr.msrb.gmra.mxu2 %v1453_v8  ;;  %p3181_p5 = pneg %p3180_p3 }
 0x363   : > { %v1450_v62 = vadd.f32 1.0, %v2812_v28  ;;  %1863 = vmatpush.bf16.msrb.mxu0 %v3517_v59  ;;  %1889 = vmatpush.bf16.msrb.mxu2 %v3519_v61  ;;  %v3027_v28 = vld [vmem:[#allocation10 + $0x8] sm:$0xff] }
 0x364   : > { %v1520_v25 = vperm.slane %v3027_v28, 3  ;;  %v1626_v26 = vperm.slane %v3027_v28, 5  ;;  %p3186_p9 = pnand %p3185_p7, %p3181_p5 }
 0x365   : > { %v1452_v60 = vmul.f32 %v1450_v62, %v1366_v55  ;;  %v1512_v55 = vperm.slane %v3027_v28, 2 }
 0x367   : > { %v1454_v9 = vpack.c.bf16 %v1452_v60, %v1452_v60  ;;  %1864 = vmatpush.bf16.msrb.mxu0 %v4704_v27  ;;  %1890 = vmatpush.bf16.msrb.mxu2 %v4705_v32  ;;  %v1618_v60 = vperm.slane %v3027_v28, 4 }
 0x369   : > { %1476 = vmatmul.bf16.vlgmr.msrb.gmra.mxu1 %v1454_v9  ;;  %1502 = vmatmul.bf16.vlgmr.msrb.gmra.mxu3 %v1454_v9 }
 0x36a   : > { %1876 = vmatpush.bf16.msrb.mxu1 %v4706_v48  ;;  %1902 = vmatpush.bf16.msrb.mxu3 %v4707_v49 }
 0x36b   : > { %1865 = vmatpush.bf16.msrb.mxu0 %v4708_v37  ;;  %1891 = vmatpush.bf16.msrb.mxu2 %v4709_v35 }
 0x36e   : > { %1877 = vmatpush.bf16.msrb.mxu1 %v4710_v58  ;;  %1903 = vmatpush.bf16.msrb.mxu3 %v4711_v51 }
 0x36f   : > { %1866 = vmatpush.bf16.msrb.mxu0 %v4712_v54  ;;  %1892 = vmatpush.bf16.msrb.mxu2 %v4713_v52 }
 0x372   : > { %1878 = vmatpush.bf16.msrb.mxu1 %v4714_v63  ;;  %1904 = vmatpush.bf16.msrb.mxu3 %v4715_v15 }
 0x373   : > { %1867 = vmatpush.bf16.msrb.mxu0 %v4716_v42  ;;  %1893 = vmatpush.bf16.msrb.mxu2 %v4717_v24 }
 0x376   : > { %1879 = vmatpush.bf16.msrb.mxu1 %v4718_v33  ;;  %1905 = vmatpush.bf16.msrb.mxu3 %v4719_v40 }
 0x377   : > { %1868 = vmatpush.bf16.msrb.mxu0 %v4720_v38  ;;  %1894 = vmatpush.bf16.msrb.mxu2 %v4721_v13 }
 0x37a   : > { %1880 = vmatpush.bf16.msrb.mxu1 %v4722_v10  ;;  %1906 = vmatpush.bf16.msrb.mxu3 %v4723_v39 }
 0x37b   : > { %1869 = vmatpush.bf16.msrb.mxu0 %v4724_v1  ;;  %1895 = vmatpush.bf16.msrb.mxu2 %v4725_v36 }
 0x37e   : > { %1881 = vmatpush.bf16.msrb.mxu1 %v4726_v0  ;;  %1907 = vmatpush.bf16.msrb.mxu3 %v4727_v53 }
 0x37f   : > { %1870 = vmatpush.bf16.msrb.mxu0 %v4728_v11  ;;  %1896 = vmatpush.bf16.msrb.mxu2 %v4729_v47 }
 0x382   : > { %1882 = vmatpush.bf16.msrb.mxu1 %v4730_v30  ;;  %1908 = vmatpush.bf16.msrb.mxu3 %v4731_v6 }
 0x386   : > { %1883 = vmatpush.bf16.msrb.mxu1 %v4732_v14  ;;  %1909 = vmatpush.bf16.msrb.mxu3 %v4733_v2 }
 0x3df   : > { %v1464_v45 = vpop.f32.mrf.mxu0 }
 0x3e0   : > { %v1465_v44 = vadd.f32 %v1464_v45, %v4742_v23  ;;  %v4777_v23 = vld [vmem:[#allocation45_spill] sm:$0xff] }
 0x3e5   : > { %v1490_v43 = vpop.f32.mrf.mxu2 }
 0x3e6   : > { %v1477_v41 = vpop.f32.mrf.mxu1  ;;  %v1491_v8 = vadd.f32 %v1490_v43, %v4743_v5 }
 0x3e7   : > { %v1478_v21 = vadd.f32 %v1477_v41, %v1465_v44  ;;  %v1466_v12 = vpop.f32.mrf.mxu0  ;;  %v1510_v41 = vmul.f32 %v1508_v56, %v4747_v46 }
 0x3e9   : > { %v1517_v17 = vmul.f32 %v1516_v4, %v1478_v21  ;;  %v1623_v57 = vmul.f32 %v1622_v34, %v1478_v21  ;;  %v1616_v21 = vmul.f32 %v1614_v3, %v4747_v46  ;;  %v1514_v12 = vadd.f32 %v1512_v55, %v1510_v41 }
 0x3eb   : > { %v1521_v16 = vadd.f32 %v1519_v7, %v1517_v17  ;;  %v1627_v19 = vadd.f32 %v1625_v22, %v1623_v57  ;;  %v1620_v17 = vadd.f32 %v1618_v60, %v1616_v21 }
 0x3ec   : > { %v1503_v62 = vpop.f32.mrf.mxu3 }
 0x3ed   : > { %v4069_v9 = vadd.f32 %v1521_v16, %v1513_v18  ;;  %v4071_v45 = vadd.f32 %v1627_v19, %v1619_v31  ;;  %v1504_v20 = vadd.f32 %v1503_v62, %v1491_v8  ;;  %v1492_v44 = vpop.f32.mrf.mxu2 }
 0x3ee   : > { %v1479_v50 = vpop.f32.mrf.mxu1 }
 0x3ef   : > { %v4076_v29 = vmul.f32 0.70710677, %v4069_v9  ;;  %v1518_v43 = vmul.f32 %v1516_v4, %v1504_v20  ;;  %v1624_v7 = vmul.f32 %v1622_v34, %v1504_v20 }
 0x3f1   : > { %v1529_v22 = vmul.f32 %v4076_v29, %v4076_v29  ;;  %v1522_v57 = vadd.f32 %v1520_v25, %v1518_v43  ;;  %v1628_v18 = vadd.f32 %v1626_v26, %v1624_v7 }
 0x3f3   : > { %v1530_v31 = vmin.f32 %v1529_v22, 16.0  ;;  %v4080_v16 = vadd.f32 %v1522_v57, %v1514_v12  ;;  %v4082_v56 = vadd.f32 %v1628_v18, %v1620_v17 }
 0x3f4   : > { %v1505_v3 = vpop.f32.mrf.mxu3 }
 0x3f5   : > { %v1531_v19 = vmul.f32 2.1237322e-06, %v1530_v31  ;;  %v1542_v8 = vmul.f32 3.8918573e-05, %v1530_v31  ;;  %v4085_v28 = vmul.f32 0.70710677, %v4080_v16 }
 0x3f7   : > { %v1532_v4 = vadd.f32 0.00028619796, %v1531_v19  ;;  %v1543_v34 = vadd.f32 0.001143296, %v1542_v8  ;;  %v1569_v62 = vmul.f32 %v4085_v28, %v4085_v28 }
 0x3f9   : > { %v1533_v55 = vmul.f32 %v1532_v4, %v1530_v31  ;;  %v1544_v60 = vmul.f32 %v1543_v34, %v1530_v31  ;;  %v1570_v20 = vmin.f32 %v1569_v62, 16.0 }
 0x3fb   : > { %v1545_v44 = vadd.f32 0.014752088, %v1544_v60  ;;  %v1534_v46 = vadd.f32 0.0036580483, %v1533_v55  ;;  %v1571_v41 = vmul.f32 2.1237322e-06, %v1570_v20 }
 0x3fc   : > { %v1582_v21 = vmul.f32 3.8918573e-05, %v1570_v20 }
 0x3fd   : > { %v1546_v25 = vmul.f32 %v1545_v44, %v1530_v31  ;;  %v1572_v26 = vadd.f32 0.00028619796, %v1571_v41  ;;  %v1535_v7 = vmul.f32 %v1534_v46, %v1530_v31 }
 0x3fe   : > { %v1583_v50 = vadd.f32 0.001143296, %v1582_v21 }
 0x3ff   : > { %v1547_v43 = vadd.f32 0.112945676, %v1546_v25  ;;  %v1573_v22 = vmul.f32 %v1572_v26, %v1570_v20  ;;  %v1536_v19 = vadd.f32 0.05243302, %v1535_v7 }
 0x400   : > { %v1584_v12 = vmul.f32 %v1583_v50, %v1570_v20 }
 0x401   : > { %v1548_v17 = vmul.f32 %v1547_v43, %v1530_v31  ;;  %v1574_v18 = vadd.f32 0.0036580483, %v1573_v22  ;;  %v1537_v55 = vmul.f32 %v1536_v19, %v1530_v31 }
 0x402   : > { %v1585_v57 = vadd.f32 0.014752088, %v1584_v12 }
 0x403   : > { %v1549_v3 = vadd.f32 0.4994258, %v1548_v17  ;;  %v1575_v62 = vmul.f32 %v1574_v18, %v1570_v20  ;;  %v1538_v21 = vadd.f32 0.18741608, %v1537_v55 }
 0x404   : > { %v1586_v8 = vmul.f32 %v1585_v57, %v1570_v20 }
 0x405   : > { %v1550_v4 = vmul.f32 %v1549_v3, %v1530_v31  ;;  %v1576_v44 = vadd.f32 0.05243302, %v1575_v62  ;;  %v1539_v43 = vmul.f32 %v1538_v21, %v1530_v31 }
 0x406   : > { %v1587_v34 = vadd.f32 0.112945676, %v1586_v8 }
 0x407   : > { %v1551_v60 = vadd.f32 1.0, %v1550_v4  ;;  %v1577_v26 = vmul.f32 %v1576_v44, %v1570_v20  ;;  %v1540_v57 = vadd.f32 1.1283791, %v1539_v43 }
 0x408   : > { %v1588_v5 = vmul.f32 %v1587_v34, %v1570_v20 }
 0x409   : > { %3002 = vrcp.f32 %v1551_v60  ;;  %v1578_v7 = vadd.f32 0.18741608, %v1577_v26  ;;  %v1563_v17 = vand.u32 2147483648, %v1551_v60  ;;  %v1561_v18 = vand.u32 2147483647, %v1551_v60 }
 0x40a   : > { %v1589_v41 = vadd.f32 0.4994258, %v1588_v5  ;;  %vm1557_vm9 = vweird.f32 %v1551_v60  ;;  %v1541_v34 = vmul.f32 %v1540_v57, %v4076_v29 }
 0x40b   : > { %v1579_v4 = vmul.f32 %v1578_v7, %v1570_v20  ;;  %v1564_v5 = vor.u32 1.1754944e-38, %v1563_v17  ;;  %vm1562_vm11 = vcmp.eq.f32.partialorder %v1561_v18, 8.507059e+37 }
 0x40c   : > { %v1590_v25 = vmul.f32 %v1589_v41, %v1570_v20 }
 0x40d   : > { %v1580_v21 = vadd.f32 1.1283791, %v1579_v4  ;;  %v4748_v4 = vld [vmem:[#allocation18_spill] sm:$0xff] }
 0x40e   : > { %v1591_v50 = vadd.f32 1.0, %v1590_v25 }
 0x40f   : > { %v3003_v46 = vpop.eup %3002  ;;  %v1581_v29 = vmul.f32 %v1580_v21, %v4085_v28  ;;  %v4751_v28 = vld [vmem:[#allocation24_spill] sm:$0xff]  ;;  %v4756_v21 = vld [vmem:[#allocation23_spill] sm:$0xff] }
 0x410   : > { %v1553_v12 = vmul.f32 %v3003_v46, %v1551_v60  ;;  %3004 = vrcp.f32 %v1591_v50  ;;  %vm1558_vm8 = vweird.f32 %v3003_v46  ;;  %v1603_v25 = vand.u32 2147483648, %v1591_v50 }
 0x411   : > { %vm1559_vm10 = vmor %vm1557_vm9, %vm1558_vm8  ;;  %v1525_v60 = vmul.f32 0.5, %v4069_v9  ;;  %vm1597_vm13 = vweird.f32 %v1591_v50  ;;  %v1526_v9 = vmul.f32 0.5, %v4080_v16  ;;  %v4757_v16 = vld [vmem:[#allocation25_spill] sm:$0xff] }
 0x412   : > { %v1554_v22 = vsub.f32 1.0, %v1553_v12  ;;  %v1601_v12 = vand.u32 2147483647, %v1591_v50  ;;  %v1604_v7 = vor.u32 1.1754944e-38, %v1603_v25  ;;  %v4758_v25 = vld [vmem:[#allocation30_spill] sm:$0xff] }
 0x414   : > { %v1555_v3 = vmul.f32 %v3003_v46, %v1554_v22  ;;  %vm1602_vm15 = vcmp.eq.f32.partialorder %v1601_v12, 8.507059e+37  ;;  %v4761_v12 = vld [vmem:[#allocation29_spill] sm:$0xff] }
 0x416   : > { %v1556_v19 = vadd.f32 %v3003_v46, %v1555_v3  ;;  %v3005_v8 = vpop.eup %3004 }
 0x417   : > { %v1593_v31 = vmul.f32 %v3005_v8, %v1591_v50  ;;  %vm1598_vm12 = vweird.f32 %v3005_v8 }
 0x418   : > { %v1560_v62 = vsel %vm1559_vm10, %v3003_v46, %v1556_v19  ;;  %vm1599_vm14 = vmor %vm1597_vm13, %vm1598_vm12 }
 0x419   : > { %v1565_v55 = vsel %vm1562_vm11, %v1564_v5, %v1560_v62  ;;  %v1594_v41 = vsub.f32 1.0, %v1593_v31  ;;  %v4749_v5 = vld [vmem:[#allocation20_spill] sm:$0xff]  ;;  %v4750_v62 = vld [vmem:[#allocation22_spill] sm:$0xff]  ;;  %v4752_v31 = vld [vmem:[#allocation19_spill] sm:$0xff] }
 0x41a   : > { %v1566_v44 = vmul.f32 %v1565_v55, %v1541_v34  ;;  %v4753_v55 = vld [vmem:[#allocation21_spill] sm:$0xff] }
 0x41b   : > { %v1595_v43 = vmul.f32 %v3005_v8, %v1594_v41  ;;  %v4755_v41 = vld [vmem:[#allocation28_spill] sm:$0xff] }
 0x41c   : > { %v2815_v26 = vclamps-f32 %v1566_v44, 1.0  ;;  %v4754_v44 = vld [vmem:[#allocation26_spill] sm:$0xff] }
 0x41d   : > { %v1596_v20 = vadd.f32 %v3005_v8, %v1595_v43  ;;  %v4760_v43 = vld [vmem:[#allocation27_spill] sm:$0xff] }
 0x41e   : > { %v1609_v22 = vadd.f32 1.0, %v2815_v26  ;;  %v4759_v26 = vld [vmem:[#allocation32_spill] sm:$0xff] }
 0x41f   : > { %v1600_v17 = vsel %vm1599_vm14, %v3005_v8, %v1596_v20  ;;  %v4764_v20 = vld [vmem:[#allocation31_spill] sm:$0xff] }
 0x420   : > { %v1611_v46 = vmul.f32 %v1609_v22, %v1525_v60  ;;  %v1605_v57 = vsel %vm1602_vm15, %v1604_v7, %v1600_v17  ;;  %v4762_v60 = vld [vmem:[#allocation34_spill] sm:$0xff]  ;;  %v4763_v22 = vld [vmem:[#allocation36_spill] sm:$0xff]  ;;  %v4765_v7 = vld [vmem:[#allocation33_spill] sm:$0xff] }
 0x421   : > { %v1606_v18 = vmul.f32 %v1605_v57, %v1581_v29  ;;  %v4766_v29 = vld [vmem:[#allocation38_spill] sm:$0xff]  ;;  %v4768_v17 = vld [vmem:[#allocation35_spill] sm:$0xff]  ;;  %v4769_v57 = vld [vmem:[#allocation37_spill] sm:$0xff] }
 0x422   : > { %v1719_v3 = vpack.c.bf16 %v1611_v46, %v1611_v46  ;;  %v4767_v46 = vld [vmem:[#allocation40_spill] sm:$0xff] }
 0x423   : > { %v2816_v19 = vclamps-f32 %v1606_v18, 1.0  ;;  %v4771_v18 = vld [vmem:[#allocation44_spill] sm:$0xff] }
 0x424   : > { %1729 = vmatmul.bf16.vlgmr.msra.gmra.mxu0 %v1719_v3  ;;  %1755 = vmatmul.bf16.vlgmr.msra.gmra.mxu2 %v1719_v3  ;;  %v4770_v3 = vld [vmem:[#allocation42_spill] sm:$0xff] }
 0x425   : > { %1917 = vmatpush.bf16.msra.mxu0 %v4748_v4  ;;  %1943 = vmatpush.bf16.msra.mxu2 %v4749_v5  ;;  %v1610_v50 = vadd.f32 1.0, %v2816_v19  ;;  %v4772_v19 = vld [vmem:[#allocation39_spill] sm:$0xff] }
 0x427   : > { %v1612_v34 = vmul.f32 %v1610_v50, %v1526_v9  ;;  %v4773_v9 = vld [vmem:[#allocation41_spill] sm:$0xff]  ;;  %v4774_v50 = vld [vmem:[#allocation46_spill] sm:$0xff] }
 0x429   : > { %1918 = vmatpush.bf16.msra.mxu0 %v4750_v62  ;;  %1944 = vmatpush.bf16.msra.mxu2 %v4751_v28  ;;  %v1720_v8 = vpack.c.bf16 %v1612_v34, %v1612_v34  ;;  %v4775_v34 = vld [vmem:[#allocation48_spill] sm:$0xff] }
 0x42b   : > { %1742 = vmatmul.bf16.vlgmr.msra.gmra.mxu1 %v1720_v8  ;;  %1768 = vmatmul.bf16.vlgmr.msra.gmra.mxu3 %v1720_v8  ;;  %v4776_v8 = vld [vmem:[#allocation43_spill] sm:$0xff] }
 0x42c   : > { %1930 = vmatpush.bf16.msra.mxu1 %v4752_v31  ;;  %1956 = vmatpush.bf16.msra.mxu3 %v4753_v55 }
 0x42d   : > { %1919 = vmatpush.bf16.msra.mxu0 %v4754_v44  ;;  %1945 = vmatpush.bf16.msra.mxu2 %v4755_v41 }
 0x430   : > { %1931 = vmatpush.bf16.msra.mxu1 %v4756_v21  ;;  %1957 = vmatpush.bf16.msra.mxu3 %v4757_v16 }
 0x431   : > { %1920 = vmatpush.bf16.msra.mxu0 %v4758_v25  ;;  %1946 = vmatpush.bf16.msra.mxu2 %v4759_v26 }
 0x434   : > { %1932 = vmatpush.bf16.msra.mxu1 %v4760_v43  ;;  %1958 = vmatpush.bf16.msra.mxu3 %v4761_v12 }
 0x435   : > { %1921 = vmatpush.bf16.msra.mxu0 %v4762_v60  ;;  %1947 = vmatpush.bf16.msra.mxu2 %v4763_v22  ;;  %v4780_v60 = vld [vmem:[#allocation50_spill] sm:$0xff] }
 0x438   : > { %1933 = vmatpush.bf16.msra.mxu1 %v4764_v20  ;;  %1959 = vmatpush.bf16.msra.mxu3 %v4765_v7 }
 0x439   : > { %1922 = vmatpush.bf16.msra.mxu0 %v4766_v29  ;;  %1948 = vmatpush.bf16.msra.mxu2 %v4767_v46  ;;  %v4778_v46 = vld [vmem:[#allocation47_spill] sm:$0xff] }
 0x43c   : > { %1934 = vmatpush.bf16.msra.mxu1 %v4768_v17  ;;  %1960 = vmatpush.bf16.msra.mxu3 %v4769_v57  ;;  %v4779_v17 = vld [vmem:[#allocation49_spill] sm:$0xff] }
 0x43d   : > { %1923 = vmatpush.bf16.msra.mxu0 %v4770_v3  ;;  %1949 = vmatpush.bf16.msra.mxu2 %v4771_v18  ;;  %v4126_v3 = vmul.f32 0.70710677, %v4071_v45 }
 0x440   : > { %1935 = vmatpush.bf16.msra.mxu1 %v4772_v19  ;;  %1961 = vmatpush.bf16.msra.mxu3 %v4773_v9  ;;  %v1635_v19 = vmul.f32 %v4126_v3, %v4126_v3  ;;  %v4131_v9 = vmul.f32 0.70710677, %v4082_v56 }
 0x441   : > { %1924 = vmatpush.bf16.msra.mxu0 %v4774_v50  ;;  %1950 = vmatpush.bf16.msra.mxu2 %v4775_v34 }
 0x442   : > { %v4133_v50 = vmin.f32 %v1635_v19, 16.0 }
 0x444   : > { %1936 = vmatpush.bf16.msra.mxu1 %v4776_v8  ;;  %1962 = vmatpush.bf16.msra.mxu3 %v4777_v23  ;;  %v1675_v8 = vmul.f32 %v4131_v9, %v4131_v9  ;;  %v1648_v23 = vmul.f32 3.8918573e-05, %v4133_v50 }
 0x446   : > { %v4138_v34 = vmin.f32 %v1675_v8, 16.0 }
 0x448   : > { %1937 = vmatpush.bf16.msra.mxu1 %v4778_v46  ;;  %1963 = vmatpush.bf16.msra.mxu3 %v4779_v17  ;;  %v1649_v46 = vadd.f32 0.001143296, %v1648_v23  ;;  %v1688_v17 = vmul.f32 3.8918573e-05, %v4138_v34 }
 0x44a   : > { %v1650_v18 = vmul.f32 %v1649_v46, %v4133_v50  ;;  %v1689_v57 = vadd.f32 0.001143296, %v1688_v17 }
 0x44c   : > { %v1651_v7 = vadd.f32 0.014752088, %v1650_v18  ;;  %v1690_v20 = vmul.f32 %v1689_v57, %v4138_v34  ;;  %v4781_v57 = vld [vmem:[#allocation55_spill] sm:$0xff] }
 0x44e   : > { %v1652_v19 = vmul.f32 %v1651_v7, %v4133_v50  ;;  %v1691_v43 = vadd.f32 0.014752088, %v1690_v20 }
 0x450   : > { %v1653_v23 = vadd.f32 0.112945676, %v1652_v19  ;;  %v1692_v46 = vmul.f32 %v1691_v43, %v4138_v34 }
 0x452   : > { %v1654_v7 = vmul.f32 %v1653_v23, %v4133_v50 }
 0x454   : > { %v1655_v41 = vadd.f32 0.4994258, %v1654_v7 }
 0x4a1   : > { %v1730_v29 = vpop.f32.mrf.mxu0 }
 0x4a2   : > { %v1731_v12 = vadd.f32 %v1730_v29, %v4780_v60 }
 0x4a7   : > { %v1756_v22 = vpop.f32.mrf.mxu2 }
 0x4a8   : > { %v1743_v26 = vpop.f32.mrf.mxu1  ;;  %v1757_v18 = vadd.f32 %v1756_v22, %v4781_v57  ;;  %v1656_v57 = vmul.f32 %v1655_v41, %v4133_v50 }
 0x4a9   : > { %v1732_v25 = vpop.f32.mrf.mxu0  ;;  %v4145_v8 = vadd.f32 %v1743_v26, %v1731_v12  ;;  %v1693_v26 = vadd.f32 0.112945676, %v1692_v46  ;;  %v1637_v12 = vmul.f32 2.1237322e-06, %v4133_v50  ;;  %v1677_v46 = vmul.f32 2.1237322e-06, %v4138_v34 }
 0x4ab   : > { %v4148_v16 = vmul.f32 0.70710677, %v4145_v8  ;;  %v1678_v14 = vadd.f32 0.00028619796, %v1677_v46 }
 0x4ad   : > { %v1777_v17 = vmul.f32 %v4148_v16, %v4148_v16  ;;  %v1679_v6 = vmul.f32 %v1678_v14, %v4138_v34 }
 0x4ae   : > { %v1769_v21 = vpop.f32.mrf.mxu3 }
 0x4af   : > { %v1758_v29 = vpop.f32.mrf.mxu2  ;;  %v4155_v20 = vmin.f32 %v1777_v17, 16.0  ;;  %v4157_v25 = vadd.f32 %v1769_v21, %v1757_v18  ;;  %v1638_v17 = vadd.f32 0.00028619796, %v1637_v12 }
 0x4b0   : > { %v1745_v19 = vpop.f32.mrf.mxu1  ;;  %v1694_v29 = vmul.f32 %v1693_v26, %v4138_v34 }
 0x4b1   : > { %v1779_v60 = vmul.f32 2.1237322e-06, %v4155_v20  ;;  %v1790_v43 = vmul.f32 3.8918573e-05, %v4155_v20  ;;  %v4163_v44 = vmul.f32 0.70710677, %v4157_v25  ;;  %v1639_v2 = vmul.f32 %v1638_v17, %v4133_v50 }
 0x4b3   : > { %v1780_v22 = vadd.f32 0.00028619796, %v1779_v60  ;;  %v1791_v23 = vadd.f32 0.001143296, %v1790_v43  ;;  %v1817_v21 = vmul.f32 %v4163_v44, %v4163_v44  ;;  %v1695_v60 = vadd.f32 0.4994258, %v1694_v29 }
 0x4b5   : > { %v1781_v18 = vmul.f32 %v1780_v22, %v4155_v20  ;;  %v1792_v19 = vmul.f32 %v1791_v23, %v4155_v20  ;;  %v4172_v7 = vmin.f32 %v1817_v21, 16.0  ;;  %v4178_v22 = vadd.f32 1.0, %v1656_v57 }
 0x4b6   : > { %v1771_v55 = vpop.f32.mrf.mxu3 }
 0x4b7   : > { %v1793_v31 = vadd.f32 0.014752088, %v1792_v19  ;;  %v1782_v43 = vadd.f32 0.0036580483, %v1781_v18  ;;  %v1819_v26 = vmul.f32 2.1237322e-06, %v4172_v7  ;;  %v1696_v18 = vmul.f32 %v1695_v60, %v4138_v34 }
 0x4b8   : > { %v1830_v12 = vmul.f32 3.8918573e-05, %v4172_v7  ;;  %v1640_v19 = vadd.f32 0.0036580483, %v1639_v2  ;;  %3006 = vrcp.f32 %v4178_v22  ;;  %vm1663_vm4 = vweird.f32 %v4178_v22 }
 0x4b9   : > { %v1794_v28 = vmul.f32 %v1793_v31, %v4155_v20  ;;  %v1820_v23 = vadd.f32 0.00028619796, %v1819_v26  ;;  %v1783_v21 = vmul.f32 %v1782_v43, %v4155_v20  ;;  %v4188_v43 = vadd.f32 1.0, %v1696_v18 }
 0x4ba   : > { %v1831_v62 = vadd.f32 0.001143296, %v1830_v12  ;;  %v1641_v12 = vmul.f32 %v1640_v19, %v4133_v50 }
 0x4bb   : > { %v1795_v41 = vadd.f32 0.112945676, %v1794_v28  ;;  %v1821_v55 = vmul.f32 %v1820_v23, %v4172_v7  ;;  %v1784_v26 = vadd.f32 0.05243302, %v1783_v21  ;;  %3008 = vrcp.f32 %v4188_v43 }
 0x4bc   : > { %v1832_v29 = vmul.f32 %v1831_v62, %v4172_v7  ;;  %v1680_v62 = vadd.f32 0.0036580483, %v1679_v6  ;;  %v1642_v21 = vadd.f32 0.05243302, %v1641_v12  ;;  %vm1703_vm13 = vweird.f32 %v4188_v43 }
 0x4bd   : > { %v1796_v17 = vmul.f32 %v1795_v41, %v4155_v20  ;;  %v1822_v46 = vadd.f32 0.0036580483, %v1821_v55 }
 0x4be   : > { %v1833_v31 = vadd.f32 0.014752088, %v1832_v29  ;;  %v4192_v23 = vpop.eup %3006  ;;  %v1785_v29 = vmul.f32 %v1784_v26, %v4155_v20  ;;  %v1681_v18 = vmul.f32 %v1680_v62, %v4138_v34 }
 0x4bf   : > { %v1797_v57 = vadd.f32 0.4994258, %v1796_v17  ;;  %v1823_v41 = vmul.f32 %v1822_v46, %v4172_v7  ;;  %v1659_v6 = vmul.f32 %v4192_v23, %v4178_v22  ;;  %v1643_v46 = vmul.f32 %v1642_v21, %v4133_v50 }
 0x4c0   : > { %v1834_v28 = vmul.f32 %v1833_v31, %v4172_v7  ;;  %v1786_v31 = vadd.f32 0.18741608, %v1785_v29  ;;  %vm1664_vm1 = vweird.f32 %v4192_v23 }
 0x4c1   : > { %v1798_v60 = vmul.f32 %v1797_v57, %v4155_v20  ;;  %v1824_v17 = vadd.f32 0.05243302, %v1823_v41  ;;  %v4203_v26 = vpop.eup %3008  ;;  %v1644_v41 = vadd.f32 0.18741608, %v1643_v46  ;;  %vm4224_vm6 = vmor %vm1663_vm4, %vm1664_vm1 }
 0x4c2   : > { %v1835_v2 = vadd.f32 0.112945676, %v1834_v28  ;;  %v1682_v28 = vadd.f32 0.05243302, %v1681_v18  ;;  %v1699_v18 = vmul.f32 %v4203_v26, %v4188_v43  ;;  %vm1704_vm10 = vweird.f32 %v4203_v26 }
 0x4c3   : > { %v1799_v14 = vadd.f32 1.0, %v1798_v60  ;;  %v1825_v62 = vmul.f32 %v1824_v17, %v4172_v7  ;;  %vm1705_vm14 = vmor %vm1703_vm13, %vm1704_vm10 }
 0x4c4   : > { %v1836_v55 = vmul.f32 %v1835_v2, %v4172_v7  ;;  %v1660_v2 = vsub.f32 1.0, %v1659_v6  ;;  %v1683_v29 = vmul.f32 %v1682_v28, %v4138_v34  ;;  %v1700_v28 = vsub.f32 1.0, %v1699_v18 }
 0x4c5   : > { %3010 = vrcp.f32 %v1799_v14  ;;  %v1826_v5 = vadd.f32 0.18741608, %v1825_v62  ;;  %v1809_v17 = vand.u32 2147483647, %v1799_v14  ;;  %vm1805_vm2 = vweird.f32 %v1799_v14 }
 0x4c6   : > { %v1837_v19 = vadd.f32 0.4994258, %v1836_v55  ;;  %v1787_v55 = vmul.f32 %v1786_v31, %v4155_v20  ;;  %v1661_v21 = vmul.f32 %v4192_v23, %v1660_v2  ;;  %v1645_v20 = vmul.f32 %v1644_v41, %v4133_v50 }
 0x4c7   : > { %v1684_v31 = vadd.f32 0.18741608, %v1683_v29  ;;  %v1827_v11 = vmul.f32 %v1826_v5, %v4172_v7  ;;  %vm1810_vm5 = vcmp.eq.f32.partialorder %v1809_v17, 8.507059e+37  ;;  %v1669_v41 = vand.u32 2147483648, %v4178_v22 }
 0x4c8   : > { %v1838_v57 = vmul.f32 %v1837_v19, %v4172_v7  ;;  %v1788_v6 = vadd.f32 1.1283791, %v1787_v55  ;;  %v1667_v5 = vand.u32 2147483647, %v4178_v22 }
 0x4ca   : > { %v4205_v60 = vadd.f32 1.0, %v1838_v57  ;;  %v1811_v57 = vand.u32 2147483648, %v1799_v14  ;;  %v1789_v55 = vmul.f32 %v1788_v6, %v4148_v16  ;;  %v1701_v16 = vmul.f32 %v4203_v26, %v1700_v28 }
 0x4cb   : > { %v3011_v12 = vpop.eup %3010  ;;  %v1685_v6 = vmul.f32 %v1684_v31, %v4138_v34  ;;  %vm1668_vm9 = vcmp.eq.f32.partialorder %v1667_v5, 8.507059e+37  ;;  %v1774_v5 = vmul.f32 0.5, %v4157_v25  ;;  %v1631_v25 = vmul.f32 0.5, %v4071_v45 }
 0x4cc   : > { %v1801_v30 = vmul.f32 %v3011_v12, %v1799_v14  ;;  %3012 = vrcp.f32 %v4205_v60  ;;  %vm1806_vm0 = vweird.f32 %v3011_v12  ;;  %v1812_v2 = vor.u32 1.1754944e-38, %v1811_v57 }
 0x4cd   : > { %vm1807_vm3 = vmor %vm1805_vm2, %vm1806_vm0  ;;  %v1849_v18 = vand.u32 2147483647, %v4205_v60  ;;  %v1646_v57 = vadd.f32 1.1283791, %v1645_v20  ;;  %vm1845_vm8 = vweird.f32 %v4205_v60  ;;  %v1702_v34 = vadd.f32 %v4203_v26, %v1701_v16 }
 0x4ce   : > { %v1802_v19 = vsub.f32 1.0, %v1801_v30  ;;  %v1662_v30 = vadd.f32 %v4192_v23, %v1661_v21 }
 0x4cf   : > { %vm1850_vm12 = vcmp.eq.f32.partialorder %v1849_v18, 8.507059e+37  ;;  %v1647_v20 = vmul.f32 %v1646_v57, %v4126_v3  ;;  %v1706_v14 = vsel %vm1705_vm14, %v4203_v26, %v1702_v34  ;;  %v4792_v34 = vld [vmem:[#allocation80_spill] sm:$0xff] }
 0x4d0   : > { %v1803_v4 = vmul.f32 %v3011_v12, %v1802_v19  ;;  %v1851_v19 = vand.u32 2147483648, %v4205_v60 }
 0x4d2   : > { %v3013_v46 = vpop.eup %3012  ;;  %v1804_v47 = vadd.f32 %v3011_v12, %v1803_v4 }
 0x4d3   : > { %v1841_v62 = vmul.f32 %v3013_v46, %v4205_v60  ;;  %vm1846_vm7 = vweird.f32 %v3013_v46  ;;  %v1709_v60 = vand.u32 2147483648, %v4188_v43 }
 0x4d4   : > { %v1808_v50 = vsel %vm1807_vm3, %v3011_v12, %v1804_v47  ;;  %v1666_v47 = vsel %vm4224_vm6, %v4192_v23, %v1662_v30  ;;  %v1828_v12 = vadd.f32 1.1283791, %v1827_v11  ;;  %v1773_v23 = vmul.f32 0.5, %v4145_v8  ;;  %vm1847_vm11 = vmor %vm1845_vm8, %vm1846_vm7 }
 0x4d5   : > { %v1813_v29 = vsel %vm1810_vm5, %v1812_v2, %v1808_v50  ;;  %v1842_v4 = vsub.f32 1.0, %v1841_v62  ;;  %v1670_v2 = vor.u32 1.1754944e-38, %v1669_v41  ;;  %v1852_v11 = vor.u32 1.1754944e-38, %v1851_v19 }
 0x4d6   : > { %v1814_v7 = vmul.f32 %v1813_v29, %v1789_v55  ;;  %v1829_v62 = vmul.f32 %v1828_v12, %v4163_v44  ;;  %v1707_v8 = vand.u32 2147483647, %v4188_v43  ;;  %v1686_v44 = vadd.f32 1.1283791, %v1685_v6 }
 0x4d7   : > { %v1843_v21 = vmul.f32 %v3013_v46, %v1842_v4  ;;  %v1671_v28 = vsel %vm1668_vm9, %v1670_v2, %v1666_v47  ;;  %v1710_v3 = vor.u32 1.1754944e-38, %v1709_v60  ;;  %v1632_v6 = vmul.f32 0.5, %v4082_v56  ;;  %v4784_v56 = vld [vmem:[#allocation76_spill] sm:$0xff]  ;;  %v4796_v60 = vld [vmem:[#allocation26_spill] sm:$0xff] }
 0x4d8   : > { %v2821_v17 = vclamps-f32 %v1814_v7, 1.0  ;;  %v1672_v4 = vmul.f32 %v1671_v28, %v1647_v20  ;;  %vm1708_vm15 = vcmp.eq.f32.partialorder %v1707_v8, 8.507059e+37  ;;  %v1687_v47 = vmul.f32 %v1686_v44, %v4131_v9  ;;  %v4789_v28 = vld [vmem:[#allocation79_spill] sm:$0xff]  ;;  %v4793_v20 = vld [vmem:[#allocation81_spill] sm:$0xff]  ;;  %v4801_v44 = vld [vmem:[#allocation32_spill] sm:$0xff] }
 0x4d9   : > { %v1844_v22 = vadd.f32 %v3013_v46, %v1843_v21  ;;  %v1711_v19 = vsel %vm1708_vm15, %v1710_v3, %v1706_v14  ;;  %v4798_v8 = vld [vmem:[#allocation23_spill] sm:$0xff]  ;;  %v4803_v14 = vld [vmem:[#allocation29_spill] sm:$0xff]  ;;  %v4804_v3 = vld [vmem:[#allocation34_spill] sm:$0xff] }
 0x4da   : > { %v1857_v30 = vadd.f32 1.0, %v2821_v17  ;;  %v2819_v43 = vclamps-f32 %v1672_v4, 1.0  ;;  %v1712_v21 = vmul.f32 %v1711_v19, %v1687_v47  ;;  %v4800_v4 = vld [vmem:[#allocation30_spill] sm:$0xff]  ;;  %v4809_v47 = vld [vmem:[#allocation40_spill] sm:$0xff] }
 0x4db   : > { %v1848_v55 = vsel %vm1847_vm11, %v3013_v46, %v1844_v22  ;;  %v4785_v22 = vld [vmem:[#allocation77_spill] sm:$0xff]  ;;  %v4808_v19 = vld [vmem:[#allocation38_spill] sm:$0xff] }
 0x4dc   : > { %v1859_v31 = vmul.f32 %v1857_v30, %v1773_v23  ;;  %v1853_v50 = vsel %vm1850_vm12, %v1852_v11, %v1848_v55  ;;  %v1715_v26 = vadd.f32 1.0, %v2819_v43  ;;  %v2820_v18 = vclamps-f32 %v1712_v21, 1.0  ;;  %v4786_v23 = vld [vmem:[#allocation18_spill] sm:$0xff]  ;;  %v4787_v30 = vld [vmem:[#allocation20_spill] sm:$0xff]  ;;  %v4807_v43 = vld [vmem:[#allocation33_spill] sm:$0xff] }
 0x4dd   : > { %v1854_v41 = vmul.f32 %v1853_v50, %v1829_v62  ;;  %v4788_v11 = vld [vmem:[#allocation78_spill] sm:$0xff]  ;;  %v4791_v55 = vld [vmem:[#allocation24_spill] sm:$0xff]  ;;  %v4795_v50 = vld [vmem:[#allocation21_spill] sm:$0xff] }
 0x4de   : > { %v1861_v29 = vpack.c.bf16 %v1859_v31, %v1859_v31  ;;  %v1717_v9 = vmul.f32 %v1715_v26, %v1631_v25  ;;  %v1716_v57 = vadd.f32 1.0, %v2820_v18  ;;  %v4790_v62 = vld [vmem:[#allocation22_spill] sm:$0xff]  ;;  %v4794_v31 = vld [vmem:[#allocation19_spill] sm:$0xff]  ;;  %v4813_v26 = vld [vmem:[#allocation44_spill] sm:$0xff] }
 0x4df   : > { %v2822_v46 = vclamps-f32 %v1854_v41, 1.0  ;;  %v4797_v41 = vld [vmem:[#allocation28_spill] sm:$0xff]  ;;  %v4812_v21 = vld [vmem:[#allocation42_spill] sm:$0xff]  ;;  %v4814_v25 = vld [vmem:[#allocation39_spill] sm:$0xff] }
 0x4e0   : > { %1871 = vmatmul.bf16.vlgmr.msrb.gmra.mxu0 %v1861_v29  ;;  %1897 = vmatmul.bf16.vlgmr.msrb.gmra.mxu2 %v1861_v29  ;;  %v1915_v45 = vpack.c.bf16 %v1717_v9, %v1717_v9  ;;  %v1718_v17 = vmul.f32 %v1716_v57, %v1632_v6  ;;  %v4799_v29 = vld [vmem:[#allocation25_spill] sm:$0xff]  ;;  %v4816_v9 = vld [vmem:[#allocation46_spill] sm:$0xff]  ;;  %v4817_v57 = vld [vmem:[#allocation48_spill] sm:$0xff] }
 0x4e1   : > { %v1858_v7 = vadd.f32 1.0, %v2822_v46  ;;  %2059 = vmatpush.bf16.msrb.mxu0 %v3517_v59  ;;  %2085 = vmatpush.bf16.msrb.mxu2 %v3519_v61  ;;  %v4802_v46 = vld [vmem:[#allocation27_spill] sm:$0xff]  ;;  %v4815_v18 = vld [vmem:[#allocation41_spill] sm:$0xff] }
 0x4e2   : > { %v1916_v2 = vpack.c.bf16 %v1718_v17, %v1718_v17  ;;  %v4819_v6 = vld [vmem:[#allocation45_spill] sm:$0xff]  ;;  %v4820_v17 = vld [vmem:[#allocation47_spill] sm:$0xff] }
 0x4e3   : > { %v1860_v16 = vmul.f32 %v1858_v7, %v1774_v5  ;;  %v4805_v5 = vld [vmem:[#allocation36_spill] sm:$0xff]  ;;  %v4806_v7 = vld [vmem:[#allocation31_spill] sm:$0xff] }
 0x4e5   : > { %v1862_v12 = vpack.c.bf16 %v1860_v16, %v1860_v16  ;;  %2060 = vmatpush.bf16.msrb.mxu0 %v4704_v27  ;;  %2086 = vmatpush.bf16.msrb.mxu2 %v4705_v32  ;;  %v4810_v16 = vld [vmem:[#allocation35_spill] sm:$0xff] }
 0x4e7   : > { %1884 = vmatmul.bf16.vlgmr.msrb.gmra.mxu1 %v1862_v12  ;;  %1910 = vmatmul.bf16.vlgmr.msrb.gmra.mxu3 %v1862_v12  ;;  %v4811_v12 = vld [vmem:[#allocation37_spill] sm:$0xff] }
 0x4e8   : > { %2072 = vmatpush.bf16.msrb.mxu1 %v4706_v48  ;;  %2098 = vmatpush.bf16.msrb.mxu3 %v4707_v49 }
 0x4e9   : > { %2061 = vmatpush.bf16.msrb.mxu0 %v4708_v37  ;;  %2087 = vmatpush.bf16.msrb.mxu2 %v4709_v35 }
 0x4ec   : > { %2073 = vmatpush.bf16.msrb.mxu1 %v4710_v58  ;;  %2099 = vmatpush.bf16.msrb.mxu3 %v4711_v51 }
 0x4ed   : > { %2062 = vmatpush.bf16.msrb.mxu0 %v4712_v54  ;;  %2088 = vmatpush.bf16.msrb.mxu2 %v4713_v52 }
 0x4f0   : > { %1925 = vmatmul.bf16.vlgmr.msra.gmra.mxu0 %v1915_v45  ;;  %1951 = vmatmul.bf16.vlgmr.msra.gmra.mxu2 %v1915_v45  ;;  %v4818_v45 = vld [vmem:[#allocation43_spill] sm:$0xff] }
 0x4f1   : > { %2074 = vmatpush.bf16.msrb.mxu1 %v4714_v63  ;;  %2100 = vmatpush.bf16.msrb.mxu3 %v4715_v15 }
 0x4f2   : > { %2063 = vmatpush.bf16.msrb.mxu0 %v4716_v42  ;;  %2089 = vmatpush.bf16.msrb.mxu2 %v4717_v24 }
 0x4f5   : > { %2075 = vmatpush.bf16.msrb.mxu1 %v4718_v33  ;;  %2101 = vmatpush.bf16.msrb.mxu3 %v4719_v40 }
 0x4f6   : > { %2064 = vmatpush.bf16.msrb.mxu0 %v4720_v38  ;;  %2090 = vmatpush.bf16.msrb.mxu2 %v4721_v13 }
 0x4f7   : > { %1938 = vmatmul.bf16.vlgmr.msra.gmra.mxu1 %v1916_v2  ;;  %1964 = vmatmul.bf16.vlgmr.msra.gmra.mxu3 %v1916_v2  ;;  %v4821_v2 = vld [vmem:[#allocation49_spill] sm:$0xff] }
 0x4f9   : > { %2076 = vmatpush.bf16.msrb.mxu1 %v4722_v10  ;;  %2102 = vmatpush.bf16.msrb.mxu3 %v4723_v39 }
 0x4fa   : > { %2065 = vmatpush.bf16.msrb.mxu0 %v4724_v1  ;;  %2091 = vmatpush.bf16.msrb.mxu2 %v4725_v36 }
 0x4fd   : > { %2077 = vmatpush.bf16.msrb.mxu1 %v4726_v0  ;;  %2103 = vmatpush.bf16.msrb.mxu3 %v4727_v53 }
 0x4fe   : > { %2066 = vmatpush.bf16.msrb.mxu0 %v4784_v56  ;;  %2092 = vmatpush.bf16.msrb.mxu2 %v4785_v22 }
 0x501   : > { %2078 = vmatpush.bf16.msrb.mxu1 %v4788_v11  ;;  %2104 = vmatpush.bf16.msrb.mxu3 %v4789_v28 }
 0x502   : > { %2219 = vmatpush.bf16.msra.mxu0 %v4786_v23  ;;  %2245 = vmatpush.bf16.msra.mxu2 %v4787_v30  ;;  %v4822_v30 = vld [vmem:[#allocation82_spill] sm:$0xff] }
 0x505   : > { %2079 = vmatpush.bf16.msrb.mxu1 %v4792_v34  ;;  %2105 = vmatpush.bf16.msrb.mxu3 %v4793_v20 }
 0x506   : > { %2220 = vmatpush.bf16.msra.mxu0 %v4790_v62  ;;  %2246 = vmatpush.bf16.msra.mxu2 %v4791_v55 }
 0x509   : > { %2232 = vmatpush.bf16.msra.mxu1 %v4794_v31  ;;  %2258 = vmatpush.bf16.msra.mxu3 %v4795_v50 }
 0x50a   : > { %2221 = vmatpush.bf16.msra.mxu0 %v4796_v60  ;;  %2247 = vmatpush.bf16.msra.mxu2 %v4797_v41  ;;  %v4823_v41 = vld [vmem:[#allocation83_spill] sm:$0xff] }
 0x50d   : > { %2233 = vmatpush.bf16.msra.mxu1 %v4798_v8  ;;  %2259 = vmatpush.bf16.msra.mxu3 %v4799_v29 }
 0x50e   : > { %2222 = vmatpush.bf16.msra.mxu0 %v4800_v4  ;;  %2248 = vmatpush.bf16.msra.mxu2 %v4801_v44 }
 0x511   : > { %2234 = vmatpush.bf16.msra.mxu1 %v4802_v46  ;;  %2260 = vmatpush.bf16.msra.mxu3 %v4803_v14 }
 0x512   : > { %2223 = vmatpush.bf16.msra.mxu0 %v4804_v3  ;;  %2249 = vmatpush.bf16.msra.mxu2 %v4805_v5  ;;  %v4825_v5 = vld [vmem:[#allocation50_spill] sm:$0xff] }
 0x515   : > { %2235 = vmatpush.bf16.msra.mxu1 %v4806_v7  ;;  %2261 = vmatpush.bf16.msra.mxu3 %v4807_v43 }
 0x516   : > { %2224 = vmatpush.bf16.msra.mxu0 %v4808_v19  ;;  %2250 = vmatpush.bf16.msra.mxu2 %v4809_v47 }
 0x519   : > { %2236 = vmatpush.bf16.msra.mxu1 %v4810_v16  ;;  %2262 = vmatpush.bf16.msra.mxu3 %v4811_v12 }
 0x51a   : > { %2225 = vmatpush.bf16.msra.mxu0 %v4812_v21  ;;  %2251 = vmatpush.bf16.msra.mxu2 %v4813_v26  ;;  %v4826_v26 = vld [vmem:[#allocation55_spill] sm:$0xff] }
 0x51d   : > { %2237 = vmatpush.bf16.msra.mxu1 %v4814_v25  ;;  %2263 = vmatpush.bf16.msra.mxu3 %v4815_v18 }
 0x51e   : > { %2226 = vmatpush.bf16.msra.mxu0 %v4816_v9  ;;  %2252 = vmatpush.bf16.msra.mxu2 %v4817_v57 }
 0x521   : > { %2238 = vmatpush.bf16.msra.mxu1 %v4818_v45  ;;  %2264 = vmatpush.bf16.msra.mxu3 %v4819_v6 }
 0x525   : > { %2239 = vmatpush.bf16.msra.mxu1 %v4820_v17  ;;  %2265 = vmatpush.bf16.msra.mxu3 %v4821_v2 }
 0x55d   : > { %v1872_v23 = vpop.f32.mrf.mxu0 }
 0x55e   : > { %v1873_v62 = vadd.f32 %v1872_v23, %v4822_v30 }
 0x563   : > { %v1898_v55 = vpop.f32.mrf.mxu2 }
 0x564   : > { %v1885_v31 = vpop.f32.mrf.mxu1  ;;  %v1899_v8 = vadd.f32 %v1898_v55, %v4823_v41 }
 0x565   : > { %v4317_v50 = vadd.f32 %v1885_v31, %v1873_v62  ;;  %v1874_v60 = vpop.f32.mrf.mxu0 }
 0x56a   : > { %v1911_v29 = vpop.f32.mrf.mxu3 }
 0x56b   : > { %v4320_v4 = vadd.f32 %v1911_v29, %v1899_v8  ;;  %v1900_v44 = vpop.f32.mrf.mxu2 }
 0x56c   : > { %v1887_v46 = vpop.f32.mrf.mxu1 }
 0x56d   : > { %4824 = vst [vmem:[#allocation52_spill] sm:$0xff] %v4320_v4  ;;  %v1926_v14 = vpop.f32.mrf.mxu0 }
 0x56e   : > { %v1927_v7 = vadd.f32 %v1926_v14, %v4825_v5 }
 0x572   : > { %v1913_v3 = vpop.f32.mrf.mxu3 }
 0x573   : > { %v1952_v43 = vpop.f32.mrf.mxu2 }
 0x574   : > { %v1939_v19 = vpop.f32.mrf.mxu1  ;;  %v1953_v25 = vadd.f32 %v1952_v43, %v4826_v26 }
 0x575   : > { %v4323_v47 = vadd.f32 %v1939_v19, %v1927_v7  ;;  %v1928_v16 = vpop.f32.mrf.mxu0 }
 0x577   : > { %v4326_v12 = vmul.f32 0.70710677, %v4323_v47 }
 0x579   : > { %v1973_v21 = vmul.f32 %v4326_v12, %v4326_v12 }
 0x57a   : > { %v1965_v18 = vpop.f32.mrf.mxu3 }
 0x57b   : > { %v1974_v9 = vmin.f32 %v1973_v21, 16.0  ;;  %v4331_v57 = vadd.f32 %v1965_v18, %v1953_v25  ;;  %v1954_v45 = vpop.f32.mrf.mxu2 }
 0x57c   : > { %v1941_v6 = vpop.f32.mrf.mxu1 }
 0x57d   : > { %v1975_v17 = vmul.f32 2.1237322e-06, %v1974_v9  ;;  %v1986_v2 = vmul.f32 3.8918573e-05, %v1974_v9  ;;  %v4334_v23 = vmul.f32 0.70710677, %v4331_v57 }
 0x57f   : > { %v1976_v62 = vadd.f32 0.00028619796, %v1975_v17  ;;  %v1987_v55 = vadd.f32 0.001143296, %v1986_v2  ;;  %v2013_v31 = vmul.f32 %v4334_v23, %v4334_v23 }
 0x581   : > { %v1977_v60 = vmul.f32 %v1976_v62, %v1974_v9  ;;  %v1988_v8 = vmul.f32 %v1987_v55, %v1974_v9  ;;  %v2014_v29 = vmin.f32 %v2013_v31, 16.0 }
 0x582   : > { %v1967_v44 = vpop.f32.mrf.mxu3 }
 0x583   : > { %v1989_v46 = vadd.f32 0.014752088, %v1988_v8  ;;  %v1978_v14 = vadd.f32 0.0036580483, %v1977_v60  ;;  %v2015_v3 = vmul.f32 2.1237322e-06, %v2014_v29 }
 0x584   : > { %v2026_v7 = vmul.f32 3.8918573e-05, %v2014_v29 }
 0x585   : > { %v1990_v43 = vmul.f32 %v1989_v46, %v1974_v9  ;;  %v2016_v19 = vadd.f32 0.00028619796, %v2015_v3  ;;  %v1979_v25 = vmul.f32 %v1978_v14, %v1974_v9 }
 0x586   : > { %v2027_v16 = vadd.f32 0.001143296, %v2026_v7 }
 0x587   : > { %v1991_v21 = vadd.f32 0.112945676, %v1990_v43  ;;  %v2017_v18 = vmul.f32 %v2016_v19, %v2014_v29  ;;  %v1980_v5 = vadd.f32 0.05243302, %v1979_v25 }
 0x588   : > { %v2028_v45 = vmul.f32 %v2027_v16, %v2014_v29 }
 0x589   : > { %v1992_v6 = vmul.f32 %v1991_v21, %v1974_v9  ;;  %v2018_v26 = vadd.f32 0.0036580483, %v2017_v18  ;;  %v1981_v60 = vmul.f32 %v1980_v5, %v1974_v9 }
 0x58a   : > { %v2029_v17 = vadd.f32 0.014752088, %v2028_v45 }
 0x58b   : > { %v1993_v2 = vadd.f32 0.4994258, %v1992_v6  ;;  %v2019_v8 = vmul.f32 %v2018_v26, %v2014_v29  ;;  %v1982_v7 = vadd.f32 0.18741608, %v1981_v60 }
 0x58c   : > { %v2030_v62 = vmul.f32 %v2029_v17, %v2014_v29 }
 0x58d   : > { %v1994_v55 = vmul.f32 %v1993_v2, %v1974_v9  ;;  %v2020_v3 = vadd.f32 0.05243302, %v2019_v8  ;;  %v1983_v21 = vmul.f32 %v1982_v7, %v1974_v9 }
 0x58e   : > { %v2031_v31 = vadd.f32 0.112945676, %v2030_v62 }
 0x58f   : > { %v1995_v44 = vadd.f32 1.0, %v1994_v55  ;;  %v2021_v16 = vmul.f32 %v2020_v3, %v2014_v29  ;;  %v1984_v17 = vadd.f32 1.1283791, %v1983_v21 }
 0x590   : > { %v2032_v4 = vmul.f32 %v2031_v31, %v2014_v29 }
 0x591   : > { %3014 = vrcp.f32 %v1995_v44  ;;  %v2007_v25 = vand.u32 2147483648, %v1995_v44  ;;  %v2022_v6 = vadd.f32 0.18741608, %v2021_v16  ;;  %v2005_v26 = vand.u32 2147483647, %v1995_v44 }
 0x592   : > { %v2033_v46 = vadd.f32 0.4994258, %v2032_v4  ;;  %vm2001_vm1 = vweird.f32 %v1995_v44  ;;  %v1985_v8 = vmul.f32 %v1984_v17, %v4326_v12 }
 0x593   : > { %v2008_v4 = vor.u32 1.1754944e-38, %v2007_v25  ;;  %v2023_v55 = vmul.f32 %v2022_v6, %v2014_v29  ;;  %vm2006_vm3 = vcmp.eq.f32.partialorder %v2005_v26, 8.507059e+37 }
 0x594   : > { %v2034_v43 = vmul.f32 %v2033_v46, %v2014_v29 }
 0x596   : > { %v2035_v14 = vadd.f32 1.0, %v2034_v43  ;;  %v2024_v43 = vadd.f32 1.1283791, %v2023_v55 }
 0x597   : > { %v3015_v19 = vpop.eup %3014 }
 0x598   : > { %v1997_v45 = vmul.f32 %v3015_v19, %v1995_v44  ;;  %3016 = vrcp.f32 %v2035_v14  ;;  %vm2002_vm0 = vweird.f32 %v3015_v19  ;;  %v2047_v7 = vand.u32 2147483648, %v2035_v14 }
 0x599   : > { %vm2003_vm2 = vmor %vm2001_vm1, %vm2002_vm0  ;;  %v2045_v21 = vand.u32 2147483647, %v2035_v14  ;;  %vm2041_vm5 = vweird.f32 %v2035_v14  ;;  %v1969_v44 = vmul.f32 0.5, %v4323_v47  ;;  %v2025_v12 = vmul.f32 %v2024_v43, %v4334_v23 }
 0x59a   : > { %v1998_v18 = vsub.f32 1.0, %v1997_v45  ;;  %v2048_v29 = vor.u32 1.1754944e-38, %v2047_v7 }
 0x59b   : > { %vm2046_vm7 = vcmp.eq.f32.partialorder %v2045_v21, 8.507059e+37 }
 0x59c   : > { %v1999_v2 = vmul.f32 %v3015_v19, %v1998_v18 }
 0x59e   : > { %v3017_v5 = vpop.eup %3016  ;;  %v2000_v62 = vadd.f32 %v3015_v19, %v1999_v2 }
 0x59f   : > { %v2037_v31 = vmul.f32 %v3017_v5, %v2035_v14  ;;  %vm2042_vm4 = vweird.f32 %v3017_v5 }
 0x5a0   : > { %v2004_v60 = vsel %vm2003_vm2, %v3015_v19, %v2000_v62  ;;  %vm2043_vm6 = vmor %vm2041_vm5, %vm2042_vm4 }
 0x5a1   : > { %v2009_v9 = vsel %vm2006_vm3, %v2008_v4, %v2004_v60  ;;  %v2038_v46 = vsub.f32 1.0, %v2037_v31  ;;  %v1970_v4 = vmul.f32 0.5, %v4331_v57 }
 0x5a2   : > { %v2010_v3 = vmul.f32 %v2009_v9, %v1985_v8 }
 0x5a3   : > { %v2039_v16 = vmul.f32 %v3017_v5, %v2038_v46 }
 0x5a4   : > { %v2823_v45 = vclamps-f32 %v2010_v3, 1.0 }
 0x5a5   : > { %v2040_v18 = vadd.f32 %v3017_v5, %v2039_v16 }
 0x5a6   : > { %v2053_v25 = vadd.f32 1.0, %v2823_v45 }
 0x5a7   : > { %v2044_v19 = vsel %vm2043_vm6, %v3017_v5, %v2040_v18 }
 0x5a8   : > { %v2055_v6 = vmul.f32 %v2053_v25, %v1969_v44  ;;  %v2049_v17 = vsel %vm2046_vm7, %v2048_v29, %v2044_v19 }
 0x5a9   : > { %v2050_v2 = vmul.f32 %v2049_v17, %v2025_v12 }
 0x5aa   : > { %v2057_v26 = vpack.c.bf16 %v2055_v6, %v2055_v6 }
 0x5ab   : > { %v2824_v62 = vclamps-f32 %v2050_v2, 1.0 }
 0x5ac   : > { %2067 = vmatmul.bf16.vlgmr.msrb.gmra.mxu0 %v2057_v26  ;;  %2093 = vmatmul.bf16.vlgmr.msrb.gmra.mxu2 %v2057_v26 }
 0x5ad   : > { %v2054_v55 = vadd.f32 1.0, %v2824_v62  ;;  %2361 = vmatpush.bf16.msrb.mxu0 %v3517_v59  ;;  %2387 = vmatpush.bf16.msrb.mxu2 %v3519_v61  ;;  %v2112_v61 = vstv %s2825_s23 }
 0x5af   : > { %v2056_v47 = vmul.f32 %v2054_v55, %v1970_v4 }
 0x5b1   : > { %v2058_v14 = vpack.c.bf16 %v2056_v47, %v2056_v47  ;;  %2362 = vmatpush.bf16.msrb.mxu0 %v4704_v27  ;;  %2388 = vmatpush.bf16.msrb.mxu2 %v4705_v32 }
 0x5b3   : > { %2080 = vmatmul.bf16.vlgmr.msrb.gmra.mxu1 %v2058_v14  ;;  %2106 = vmatmul.bf16.vlgmr.msrb.gmra.mxu3 %v2058_v14 }
 0x5b4   : > { %2374 = vmatpush.bf16.msrb.mxu1 %v4706_v48  ;;  %2400 = vmatpush.bf16.msrb.mxu3 %v4707_v49  ;;  %v2120_v49 = vstv %s2826_s20 }
 0x5b5   : > { %2363 = vmatpush.bf16.msrb.mxu0 %v4708_v37  ;;  %2389 = vmatpush.bf16.msrb.mxu2 %v4709_v35  ;;  %v2113_v37 = vmul.f32 %v2112_v61, %v4317_v50  ;;  %v3028_v35 = vld [vmem:[#allocation10] sm:$0xff] }
 0x5b8   : > { %2375 = vmatpush.bf16.msrb.mxu1 %v4710_v58  ;;  %2401 = vmatpush.bf16.msrb.mxu3 %v4711_v51  ;;  %v2115_v58 = vperm.slane %v3028_v35, 6 }
 0x5b9   : > { %2364 = vmatpush.bf16.msrb.mxu0 %v4712_v54  ;;  %2390 = vmatpush.bf16.msrb.mxu2 %v4713_v52  ;;  %v2123_v54 = vperm.slane %v3028_v35, 7 }
 0x5bc   : > { %2376 = vmatpush.bf16.msrb.mxu1 %v4714_v63  ;;  %2402 = vmatpush.bf16.msrb.mxu3 %v4715_v15  ;;  %v2117_v15 = vadd.f32 %v2115_v58, %v2113_v37 }
 0x5bd   : > { %2365 = vmatpush.bf16.msrb.mxu0 %v4716_v42  ;;  %2391 = vmatpush.bf16.msrb.mxu2 %v4717_v24 }
 0x5c0   : > { %2377 = vmatpush.bf16.msrb.mxu1 %v4718_v33  ;;  %2403 = vmatpush.bf16.msrb.mxu3 %v4719_v40  ;;  %v3029_v33 = vld [vmem:[#allocation10 + $0x8] sm:$0xff] }
 0x5c1   : > { %2366 = vmatpush.bf16.msrb.mxu0 %v4720_v38  ;;  %2392 = vmatpush.bf16.msrb.mxu2 %v4721_v13  ;;  %v2116_v40 = vperm.slane %v3029_v33, 6  ;;  %v4827_v13 = vld [vmem:[#allocation52_spill] sm:$0xff] }
 0x5c4   : > { %2378 = vmatpush.bf16.msrb.mxu1 %v4722_v10  ;;  %2404 = vmatpush.bf16.msrb.mxu3 %v4723_v39  ;;  %v2114_v10 = vmul.f32 %v2112_v61, %v4827_v13 }
 0x5c5   : > { %2367 = vmatpush.bf16.msrb.mxu0 %v4724_v1  ;;  %2393 = vmatpush.bf16.msrb.mxu2 %v4725_v36  ;;  %v2124_v36 = vperm.slane %v3029_v33, 7 }
 0x5c8   : > { %2379 = vmatpush.bf16.msrb.mxu1 %v4726_v0  ;;  %2405 = vmatpush.bf16.msrb.mxu3 %v4727_v53 }
 0x5c9   : > { %2368 = vmatpush.bf16.msrb.mxu0 %v4784_v56  ;;  %2394 = vmatpush.bf16.msrb.mxu2 %v4785_v22 }
 0x5cc   : > { %2380 = vmatpush.bf16.msrb.mxu1 %v4788_v11  ;;  %2406 = vmatpush.bf16.msrb.mxu3 %v4789_v28  ;;  %v2118_v11 = vadd.f32 %v2116_v40, %v2114_v10 }
 0x5d0   : > { %2381 = vmatpush.bf16.msrb.mxu1 %v4792_v34  ;;  %2407 = vmatpush.bf16.msrb.mxu3 %v4793_v20 }
 0x629   : > { %v2068_v59 = vpop.f32.mrf.mxu0 }
 0x62a   : > { %v2069_v27 = vadd.f32 %v2068_v59, %v4822_v30 }
 0x62f   : > { %v2094_v32 = vpop.f32.mrf.mxu2 }
 0x630   : > { %v2081_v48 = vpop.f32.mrf.mxu1  ;;  %v2095_v24 = vadd.f32 %v2094_v32, %v4823_v41 }
 0x631   : > { %v2082_v51 = vadd.f32 %v2081_v48, %v2069_v27  ;;  %v2070_v52 = vpop.f32.mrf.mxu0 }
 0x633   : > { %v2121_v63 = vmul.f32 %v2120_v49, %v2082_v51 }
 0x635   : > { %v2125_v42 = vadd.f32 %v2123_v54, %v2121_v63 }
 0x636   : > { %v2107_v38 = vpop.f32.mrf.mxu3 }
 0x637   : > { %v4378_v39 = vadd.f32 %v2125_v42, %v2117_v15  ;;  %v2108_v1 = vadd.f32 %v2107_v38, %v2095_v24  ;;  %v2096_v0 = vpop.f32.mrf.mxu2 }
 0x638   : > { %v2083_v53 = vpop.f32.mrf.mxu1 }
 0x639   : > { %v4381_v56 = vmul.f32 0.70710677, %v4378_v39  ;;  %v2122_v22 = vmul.f32 %v2120_v49, %v2108_v1 }
 0x63b   : > { %v2133_v28 = vmul.f32 %v4381_v56, %v4381_v56  ;;  %v2126_v34 = vadd.f32 %v2124_v36, %v2122_v22 }
 0x63d   : > { %v2134_v20 = vmin.f32 %v2133_v28, 16.0  ;;  %v4385_v50 = vadd.f32 %v2126_v34, %v2118_v11 }
 0x63e   : > { %v2109_v57 = vpop.f32.mrf.mxu3 }
 0x63f   : > { %v2135_v23 = vmul.f32 2.1237322e-06, %v2134_v20  ;;  %v4388_v5 = vmul.f32 0.70710677, %v4385_v50  ;;  %v2146_v31 = vmul.f32 3.8918573e-05, %v2134_v20 }
 0x641   : > { %v2136_v8 = vadd.f32 0.00028619796, %v2135_v23  ;;  %v2173_v60 = vmul.f32 %v4388_v5, %v4388_v5  ;;  %v2147_v9 = vadd.f32 0.001143296, %v2146_v31 }
 0x643   : > { %v2137_v46 = vmul.f32 %v2136_v8, %v2134_v20  ;;  %v2174_v3 = vmin.f32 %v2173_v60, 16.0  ;;  %v2148_v7 = vmul.f32 %v2147_v9, %v2134_v20 }
 0x645   : > { %v2175_v43 = vmul.f32 2.1237322e-06, %v2174_v3  ;;  %v2186_v16 = vmul.f32 3.8918573e-05, %v2174_v3  ;;  %v2138_v21 = vadd.f32 0.0036580483, %v2137_v46 }
 0x646   : > { %v2149_v45 = vadd.f32 0.014752088, %v2148_v7 }
 0x647   : > { %v2176_v18 = vadd.f32 0.00028619796, %v2175_v43  ;;  %v2187_v44 = vadd.f32 0.001143296, %v2186_v16  ;;  %v2139_v19 = vmul.f32 %v2138_v21, %v2134_v20 }
 0x648   : > { %v2150_v25 = vmul.f32 %v2149_v45, %v2134_v20 }
 0x649   : > { %v2177_v29 = vmul.f32 %v2176_v18, %v2174_v3  ;;  %v2188_v12 = vmul.f32 %v2187_v44, %v2174_v3  ;;  %v2140_v4 = vadd.f32 0.05243302, %v2139_v19  ;;  %v2130_v44 = vmul.f32 0.5, %v4385_v50  ;;  %v4828_v19 = vld [vmem:[#allocation50_spill] sm:$0xff] }
 0x64a   : > { %v2151_v6 = vadd.f32 0.112945676, %v2150_v25 }
 0x64b   : > { %v2178_v17 = vadd.f32 0.0036580483, %v2177_v29  ;;  %v2189_v2 = vadd.f32 0.014752088, %v2188_v12  ;;  %v2141_v27 = vmul.f32 %v2140_v4, %v2134_v20  ;;  %v4829_v4 = vld [vmem:[#allocation55_spill] sm:$0xff] }
 0x64c   : > { %v2152_v26 = vmul.f32 %v2151_v6, %v2134_v20 }
 0x64d   : > { %v2190_v62 = vmul.f32 %v2189_v2, %v2174_v3  ;;  %v2179_v47 = vmul.f32 %v2178_v17, %v2174_v3  ;;  %v2142_v35 = vadd.f32 0.18741608, %v2141_v27 }
 0x64e   : > { %v2153_v55 = vadd.f32 0.4994258, %v2152_v26 }
 0x64f   : > { %v2191_v14 = vadd.f32 0.112945676, %v2190_v62  ;;  %v2180_v48 = vadd.f32 0.05243302, %v2179_v47  ;;  %v2143_v52 = vmul.f32 %v2142_v35, %v2134_v20 }
 0x650   : > { %v2154_v59 = vmul.f32 %v2153_v55, %v2134_v20 }
 0x651   : > { %v2192_v61 = vmul.f32 %v2191_v14, %v2174_v3  ;;  %v2181_v58 = vmul.f32 %v2180_v48, %v2174_v3  ;;  %v2144_v24 = vadd.f32 1.1283791, %v2143_v52 }
 0x652   : > { %v2155_v32 = vadd.f32 1.0, %v2154_v59 }
 0x653   : > { %v2193_v49 = vadd.f32 0.4994258, %v2192_v61  ;;  %v2182_v63 = vadd.f32 0.18741608, %v2181_v58  ;;  %v2145_v0 = vmul.f32 %v2144_v24, %v4381_v56 }
 0x654   : > { %3018 = vrcp.f32 %v2155_v32  ;;  %v2167_v33 = vand.u32 2147483648, %v2155_v32  ;;  %v2165_v10 = vand.u32 2147483647, %v2155_v32  ;;  %vm2161_vm9 = vweird.f32 %v2155_v32 }
 0x655   : > { %v2194_v37 = vmul.f32 %v2193_v49, %v2174_v3  ;;  %v2183_v38 = vmul.f32 %v2182_v63, %v2174_v3  ;;  %v2129_v3 = vmul.f32 0.5, %v4378_v39 }
 0x656   : > { %v2168_v53 = vor.u32 1.1754944e-38, %v2167_v33  ;;  %vm2166_vm11 = vcmp.eq.f32.partialorder %v2165_v10, 8.507059e+37 }
 0x657   : > { %v2195_v51 = vadd.f32 1.0, %v2194_v37  ;;  %v2184_v11 = vadd.f32 1.1283791, %v2183_v38 }
 0x659   : > { %3020 = vrcp.f32 %v2195_v51  ;;  %v2207_v34 = vand.u32 2147483648, %v2195_v51  ;;  %v2205_v23 = vand.u32 2147483647, %v2195_v51  ;;  %vm2201_vm13 = vweird.f32 %v2195_v51 }
 0x65a   : > { %v3019_v54 = vpop.eup %3018  ;;  %v2185_v46 = vmul.f32 %v2184_v11, %v4388_v5 }
 0x65b   : > { %v2157_v15 = vmul.f32 %v3019_v54, %v2155_v32  ;;  %vm2162_vm8 = vweird.f32 %v3019_v54  ;;  %v2208_v9 = vor.u32 1.1754944e-38, %v2207_v34  ;;  %vm2206_vm15 = vcmp.eq.f32.partialorder %v2205_v23, 8.507059e+37 }
 0x65c   : > { %vm2163_vm10 = vmor %vm2161_vm9, %vm2162_vm8 }
 0x65d   : > { %v2158_v42 = vsub.f32 1.0, %v2157_v15 }
 0x65f   : > { %v3021_v40 = vpop.eup %3020  ;;  %v2159_v13 = vmul.f32 %v3019_v54, %v2158_v42 }
 0x660   : > { %v2197_v1 = vmul.f32 %v3021_v40, %v2195_v51  ;;  %vm2202_vm12 = vweird.f32 %v3021_v40 }
 0x661   : > { %v2160_v36 = vadd.f32 %v3019_v54, %v2159_v13  ;;  %vm2203_vm14 = vmor %vm2201_vm13, %vm2202_vm12 }
 0x662   : > { %v2198_v22 = vsub.f32 1.0, %v2197_v1 }
 0x663   : > { %v2164_v28 = vsel %vm2163_vm10, %v3019_v54, %v2160_v36 }
 0x664   : > { %v2169_v20 = vsel %vm2166_vm11, %v2168_v53, %v2164_v28  ;;  %v2199_v57 = vmul.f32 %v3021_v40, %v2198_v22 }
 0x665   : > { %v2170_v31 = vmul.f32 %v2169_v20, %v2145_v0 }
 0x666   : > { %v2200_v8 = vadd.f32 %v3021_v40, %v2199_v57 }
 0x667   : > { %v2827_v60 = vclamps-f32 %v2170_v31, 1.0 }
 0x668   : > { %v2204_v56 = vsel %vm2203_vm14, %v3021_v40, %v2200_v8 }
 0x669   : > { %v2213_v7 = vadd.f32 1.0, %v2827_v60  ;;  %v2209_v43 = vsel %vm2206_vm15, %v2208_v9, %v2204_v56 }
 0x66a   : > { %v2210_v16 = vmul.f32 %v2209_v43, %v2185_v46 }
 0x66b   : > { %v2215_v21 = vmul.f32 %v2213_v7, %v2129_v3 }
 0x66c   : > { %v2828_v45 = vclamps-f32 %v2210_v16, 1.0 }
 0x66d   : > { %v2217_v18 = vpack.c.bf16 %v2215_v21, %v2215_v21 }
 0x66e   : > { %v2214_v25 = vadd.f32 1.0, %v2828_v45 }
 0x66f   : > { %2227 = vmatmul.bf16.vlgmr.msra.gmra.mxu0 %v2217_v18  ;;  %2253 = vmatmul.bf16.vlgmr.msra.gmra.mxu2 %v2217_v18 }
 0x670   : > { %v2216_v29 = vmul.f32 %v2214_v25, %v2130_v44 }
 0x672   : > { %v2218_v12 = vpack.c.bf16 %v2216_v29, %v2216_v29 }
 0x674   : > { %2240 = vmatmul.bf16.vlgmr.msra.gmra.mxu1 %v2218_v12  ;;  %2266 = vmatmul.bf16.vlgmr.msra.gmra.mxu3 %v2218_v12 }
 0x6ec   : > { %v2228_v5 = vpop.f32.mrf.mxu0 }
 0x6ed   : > { %v2229_v6 = vadd.f32 %v2228_v5, %v4828_v19 }
 0x6f1   : > { %v2241_v17 = vpop.f32.mrf.mxu1 }
 0x6f2   : > { %v4397_v39 = vadd.f32 %v2241_v17, %v2229_v6  ;;  %v2254_v2 = vpop.f32.mrf.mxu2 }
 0x6f3   : > { %v2255_v55 = vadd.f32 %v2254_v2, %v4829_v4 }
 0x6f4   : > { %v4400_v26 = vmul.f32 0.70710677, %v4397_v39  ;;  %v2230_v62 = vpop.f32.mrf.mxu0 }
 0x6f6   : > { %v2275_v50 = vmul.f32 %v4400_v26, %v4400_v26 }
 0x6f7   : > { %v2267_v47 = vpop.f32.mrf.mxu3 }
 0x6f8   : > { %v2276_v14 = vmin.f32 %v2275_v50, 16.0  ;;  %v4405_v59 = vadd.f32 %v2267_v47, %v2255_v55 }
 0x6f9   : > { %v2243_v61 = vpop.f32.mrf.mxu1 }
 0x6fa   : > { %v2277_v27 = vmul.f32 2.1237322e-06, %v2276_v14  ;;  %v2288_v32 = vmul.f32 3.8918573e-05, %v2276_v14  ;;  %v2256_v48 = vpop.f32.mrf.mxu2  ;;  %v4408_v49 = vmul.f32 0.70710677, %v4405_v59 }
 0x6fc   : > { %v2278_v37 = vadd.f32 0.00028619796, %v2277_v27  ;;  %v2289_v35 = vadd.f32 0.001143296, %v2288_v32  ;;  %v2315_v58 = vmul.f32 %v4408_v49, %v4408_v49 }
 0x6fe   : > { %v2279_v51 = vmul.f32 %v2278_v37, %v2276_v14  ;;  %v2290_v54 = vmul.f32 %v2289_v35, %v2276_v14  ;;  %v2316_v52 = vmin.f32 %v2315_v58, 16.0 }
 0x6ff   : > { %v2269_v63 = vpop.f32.mrf.mxu3 }
 0x700   : > { %v2291_v15 = vadd.f32 0.014752088, %v2290_v54  ;;  %v2280_v42 = vadd.f32 0.0036580483, %v2279_v51  ;;  %v2317_v24 = vmul.f32 2.1237322e-06, %v2316_v52 }
 0x701   : > { %v2328_v33 = vmul.f32 3.8918573e-05, %v2316_v52  ;;  %v2271_v51 = vmul.f32 0.5, %v4397_v39 }
 0x702   : > { %v2292_v40 = vmul.f32 %v2291_v15, %v2276_v14  ;;  %v2318_v38 = vadd.f32 0.00028619796, %v2317_v24  ;;  %v2281_v1 = vmul.f32 %v2280_v42, %v2276_v14 }
 0x703   : > { %v2329_v13 = vadd.f32 0.001143296, %v2328_v33 }
 0x704   : > { %v2293_v10 = vadd.f32 0.112945676, %v2292_v40  ;;  %v2319_v36 = vmul.f32 %v2318_v38, %v2316_v52  ;;  %v2282_v34 = vadd.f32 0.05243302, %v2281_v1  ;;  %v2272_v38 = vmul.f32 0.5, %v4405_v59 }
 0x705   : > { %v2330_v0 = vmul.f32 %v2329_v13, %v2316_v52 }
 0x706   : > { %v2294_v53 = vmul.f32 %v2293_v10, %v2276_v14  ;;  %v2320_v28 = vadd.f32 0.0036580483, %v2319_v36  ;;  %v2283_v60 = vmul.f32 %v2282_v34, %v2276_v14 }
 0x707   : > { %v2331_v22 = vadd.f32 0.014752088, %v2330_v0 }
 0x708   : > { %v2295_v11 = vadd.f32 0.4994258, %v2294_v53  ;;  %v2321_v8 = vmul.f32 %v2320_v28, %v2316_v52  ;;  %v2284_v3 = vadd.f32 0.18741608, %v2283_v60 }
 0x709   : > { %v2332_v20 = vmul.f32 %v2331_v22, %v2316_v52 }
 0x70a   : > { %v2296_v57 = vmul.f32 %v2295_v11, %v2276_v14  ;;  %v2322_v56 = vadd.f32 0.05243302, %v2321_v8  ;;  %v2285_v45 = vmul.f32 %v2284_v3, %v2276_v14 }
 0x70b   : > { %v2333_v23 = vadd.f32 0.112945676, %v2332_v20 }
 0x70c   : > { %v2297_v31 = vadd.f32 1.0, %v2296_v57  ;;  %v2323_v21 = vmul.f32 %v2322_v56, %v2316_v52  ;;  %v2286_v12 = vadd.f32 1.1283791, %v2285_v45 }
 0x70d   : > { %v2334_v9 = vmul.f32 %v2333_v23, %v2316_v52 }
 0x70e   : > { %3022 = vrcp.f32 %v2297_v31  ;;  %v2309_v25 = vand.u32 2147483648, %v2297_v31  ;;  %v2324_v29 = vadd.f32 0.18741608, %v2323_v21  ;;  %v2307_v19 = vand.u32 2147483647, %v2297_v31 }
 0x70f   : > { %v2335_v46 = vadd.f32 0.4994258, %v2334_v9  ;;  %vm2303_vm1 = vweird.f32 %v2297_v31  ;;  %v2287_v4 = vmul.f32 %v2286_v12, %v4400_v26 }
 0x710   : > { %v2310_v2 = vor.u32 1.1754944e-38, %v2309_v25  ;;  %v2325_v62 = vmul.f32 %v2324_v29, %v2316_v52  ;;  %vm2308_vm3 = vcmp.eq.f32.partialorder %v2307_v19, 8.507059e+37 }
 0x711   : > { %v2336_v7 = vmul.f32 %v2335_v46, %v2316_v52 }
 0x712   : > { %v2326_v32 = vadd.f32 1.1283791, %v2325_v62 }
 0x713   : > { %v2337_v43 = vadd.f32 1.0, %v2336_v7 }
 0x714   : > { %v3023_v16 = vpop.eup %3022  ;;  %v2327_v26 = vmul.f32 %v2326_v32, %v4408_v49 }
 0x715   : > { %v2299_v18 = vmul.f32 %v3023_v16, %v2297_v31  ;;  %3024 = vrcp.f32 %v2337_v43  ;;  %vm2304_vm0 = vweird.f32 %v3023_v16  ;;  %v2349_v27 = vand.u32 2147483648, %v2337_v43 }
 0x716   : > { %vm2305_vm2 = vmor %vm2303_vm1, %vm2304_vm0  ;;  %v2347_v37 = vand.u32 2147483647, %v2337_v43  ;;  %vm2343_vm5 = vweird.f32 %v2337_v43 }
 0x717   : > { %v2300_v44 = vsub.f32 1.0, %v2299_v18  ;;  %v2350_v52 = vor.u32 1.1754944e-38, %v2349_v27 }
 0x718   : > { %vm2348_vm7 = vcmp.eq.f32.partialorder %v2347_v37, 8.507059e+37 }
 0x719   : > { %v2301_v5 = vmul.f32 %v3023_v16, %v2300_v44 }
 0x71b   : > { %v3025_v6 = vpop.eup %3024  ;;  %v2302_v17 = vadd.f32 %v3023_v16, %v2301_v5 }
 0x71c   : > { %v2339_v50 = vmul.f32 %v3025_v6, %v2337_v43  ;;  %vm2344_vm4 = vweird.f32 %v3025_v6 }
 0x71d   : > { %v2306_v55 = vsel %vm2305_vm2, %v3023_v16, %v2302_v17  ;;  %vm2345_vm6 = vmor %vm2343_vm5, %vm2344_vm4 }
 0x71e   : > { %v2311_v47 = vsel %vm2308_vm3, %v2310_v2, %v2306_v55  ;;  %v2340_v14 = vsub.f32 1.0, %v2339_v50 }
 0x71f   : > { %v2312_v61 = vmul.f32 %v2311_v47, %v2287_v4 }
 0x720   : > { %v2341_v48 = vmul.f32 %v3025_v6, %v2340_v14 }
 0x721   : > { %v2829_v35 = vclamps-f32 %v2312_v61, 1.0 }
 0x722   : > { %v2342_v58 = vadd.f32 %v3025_v6, %v2341_v48 }
 0x723   : > { %v2355_v54 = vadd.f32 1.0, %v2829_v35 }
 0x724   : > { %v2346_v63 = vsel %vm2345_vm6, %v3025_v6, %v2342_v58 }
 0x725   : > { %v2357_v15 = vmul.f32 %v2355_v54, %v2271_v51  ;;  %v2351_v42 = vsel %vm2348_vm7, %v2350_v52, %v2346_v63 }
 0x726   : > { %v2352_v24 = vmul.f32 %v2351_v42, %v2327_v26 }
 0x727   : > { %v2359_v33 = vpack.c.bf16 %v2357_v15, %v2357_v15 }
 0x728   : > { %v2830_v40 = vclamps-f32 %v2352_v24, 1.0 }
 0x729   : > { %2369 = vmatmul.bf16.vlgmr.msrb.gmra.mxu0 %v2359_v33  ;;  %2395 = vmatmul.bf16.vlgmr.msrb.gmra.mxu2 %v2359_v33 }
 0x72a   : > { %v2356_v13 = vadd.f32 1.0, %v2830_v40 }
 0x72c   : > { %v2358_v39 = vmul.f32 %v2356_v13, %v2272_v38 }
 0x72e   : > { %v2360_v10 = vpack.c.bf16 %v2358_v39, %v2358_v39 }
 0x730   : > { %2382 = vmatmul.bf16.vlgmr.msrb.gmra.mxu1 %v2360_v10  ;;  %2408 = vmatmul.bf16.vlgmr.msrb.gmra.mxu3 %v2360_v10 }
 0x7a6   : > { %v2370_v1 = vpop.f32.mrf.mxu0 }
 0x7a7   : > { %v2371_v49 = vadd.f32 %v2370_v1, %v4822_v30 }
 0x7ac   : > { %v2396_v36 = vpop.f32.mrf.mxu2 }
 0x7ad   : > { %v2383_v0 = vpop.f32.mrf.mxu1  ;;  %v2397_v59 = vadd.f32 %v2396_v36, %v4823_v41 }
 0x7ae   : > { %v2384_v53 = vadd.f32 %v2383_v0, %v2371_v49  ;;  %v2372_v22 = vpop.f32.mrf.mxu0 }
 0x7b0   : > { %2413 = vst [vmem:[%s326_s26] sm:$0xff] %v2384_v53 }
 0x7b3   : > { %v2409_v11 = vpop.f32.mrf.mxu3 }
 0x7b4   : > { %v2410_v28 = vadd.f32 %v2409_v11, %v2397_v59  ;;  %v2398_v30 = vpop.f32.mrf.mxu2 }
 0x7b5   : > { %v2385_v34 = vpop.f32.mrf.mxu1 }
 0x7b6   : > { %2414 = vst [vmem:[%s326_s26 + $0x8] sm:$0xff] %v2410_v28 }
 0x7b7   : > { %3189 = shalt.err (!%p3186_p9)
}
 0x7b8   : > { %2916 = dma.vmem_to_hbm [thread:$0]  (%p3365_p13), %s2430_s27, 256, %s2432_s0, %s2416_s11  }
 0x7bb   : > { %v2411_v41 = vpop.f32.mrf.mxu3 }
 0x7bc PF: > { %s2443_s17 = sand.u32 1, %s3226_s28   ;;  %p4830_p10 = scmp.ge.s32.totalorder %s3238_s8, 2 }
 0x7bd   : > { %s2444_s13 = scalar_lea.sflag [#allocation6], %s2443_s17 }
 0x7be   : > { %p2933_p11 = pnand %p4830_p10, %p3370_p4 }
 0x7c0   : > { %p2934_p0 = pneg %p2933_p11 }
 0x7c2   : > { %3221 = dma.done.wait (%p2934_p0), %s2444_s13, 256  }
 0x7c3   : > { %3223 = vsyncadd (%p2934_p0), %s2444_s13, 4294967040  ;;  %p30_p2 = scmp.ge.s32.totalorder %s3345_s9, 4   ;;  %s4831_s28 = smov %s3230_s29 }
 0x7c4   : > { %s4832_s29 = smov %s3234_s30  ;;  %s4833_s30 = smov %s3357_s14 }
 0x7c5   : > { %s4834_s8 = smov %s3345_s9  ;;  %32 = sbr.rel (!%p30_p2) target bundleno = 13 (0xd), region = 101 }
 0x7ca   :  { %2450 = vsyncpa [#allocation5], 1 }
 0x7cb   :  { %2452 = vsyncpa [#allocation5 + $0x1], 1 }
 0x7cc   :  { %2453 = vsyncpa [#allocation8], 1 }
 0x7cd   :  { %2454 = vsyncpa [#allocation11], 1 }
 0x7ce   :  { %2455 = vsyncpa [#allocation6], 1 }
 0x7cf   :  { %2457 = vsyncpa [#allocation6 + $0x1], 1 }

</bundles_post_ra>
